<compile_context>
chip_gen: v6e
topology: v6e:2x2x1
jax: 0.10.0
libtpu: 0.0.40
codegen_flags: <defaults>
</compile_context>

<pallas_src>
import jax
import jax.numpy as jnp
from jax.experimental import pallas as pl
from jax.experimental.pallas import tpu as pltpu


# ----------------------------- Pallas kernels ------------------------------ #

def _relu6(x):
    return jnp.clip(x, 0.0, 6.0)


def _make_stage_kernel(has_stem, ho, wo, n_blocks):
    """Fused kernel for one resolution stage.

    Ref layout: (x_ref, [stem_w, stem_b,] {dw_w, dw_b, pw_w, pw_b} * n_blocks,
                 o_ref, pad_ref)
      has_stem:  x_ref is (1, ho*wo, K) bf16 im2col patches of the raw image.
      otherwise: x_ref is (4, 1, ho+1, wo+1, Cin) bf16 even/odd parity planes of the
                 ZeroPad2d((0,1,0,1))-padded previous-stage map (stride-2 depthwise).
    pad_ref is a (1, ho+2, wo+2, C_mid) f32 VMEM scratch holding the zero-padded
    intermediate activation; it is the only place intra-stage activations live.
    """
    hw = ho * wo

    def kernel(*refs):
        pos = 0
        x_ref = refs[pos]; pos += 1
        if has_stem:
            stem_w_ref, stem_b_ref = refs[pos], refs[pos + 1]; pos += 2
        block_refs = []
        for _ in range(n_blocks):
            block_refs.append(refs[pos:pos + 4]); pos += 4
        o_ref = refs[pos]
        pad_ref = refs[pos + 1]

        # Zero the padded scratch (halo must be zero; interior is overwritten below).
        pad_ref[...] = jnp.zeros_like(pad_ref)

        def store_padded(y):
            # y: (hw, c_mid) f32 -> interior [1:ho+1, 1:wo+1] of the padded VMEM map.
            for h in range(ho):
                pad_ref[0, 1 + h, 1:wo + 1, :] = y[h * wo:(h + 1) * wo, :]

        def dw_pw(tap_fn, dw_w_ref, dw_b_ref, pw_w_ref, pw_b_ref):
            dww = dw_w_ref[...]                              # (9, c) f32, BN folded
            c = dww.shape[1]
            acc = None
            for kh in range(3):                              # unrolled 9-tap FMA (VPU)
                for kw in range(3):
                    tap = tap_fn(kh, kw)                     # (1, ho, wo, c)
                    k = kh * 3 + kw
                    term = tap.astype(jnp.float32) * dww[k:k + 1, :]
                    acc = term if acc is None else acc + term
            dw = _relu6(acc + dw_b_ref[...])                 # depthwise BN bias + ReLU6
            lhs = dw.reshape(hw, c).astype(jnp.bfloat16)     # stays in VMEM/vregs
            y = jnp.dot(lhs, pw_w_ref[...], preferred_element_type=jnp.float32)
            return _relu6(y + pw_b_ref[...])                 # (hw, cout) f32

        def tap_s1(kh, kw):                                  # stride-1: padded scratch
            return pad_ref[:, kh:kh + ho, kw:kw + wo, :]

        if has_stem:
            # Stem 3x3/s2 conv as im2col matmul + folded-BN bias + ReLU6.
            y = jnp.dot(x_ref[0], stem_w_ref[...], preferred_element_type=jnp.float32)
            y = _relu6(y + stem_b_ref[...])                  # (hw, c0)
            store_padded(y)
            remaining = block_refs
        else:
            def tap_s2(kh, kw):                              # stride-2: parity planes
                p = (kh % 2) * 2 + (kw % 2)
                return x_ref[p, :, kh // 2:kh // 2 + ho, kw // 2:kw // 2 + wo, :]
            y = dw_pw(tap_s2, *block_refs[0])
            remaining = block_refs[1:]
            if remaining:
                store_padded(y)

        for bi, bp in enumerate(remaining):                  # stride-1 blocks
            y = dw_pw(tap_s1, *bp)
            if bi + 1 < len(remaining):
                store_padded(y)

        o_ref[0] = y.astype(o_ref.dtype)

    return kernel


# ------------------------------ stage wrapper ------------------------------- #

def fused_stage(x_in, blocks, *, stem, ho, wo):
    """Run one fused stage as a single pallas_call.  Returns (N, ho*wo, cout) bf16."""
    hw = ho * wo
    cout = blocks[-1]["pw_w"].shape[1]
    n_blocks = len(blocks)

    # Channel count of the in-VMEM padded intermediate map.
    if stem is not None:
        c_mid = blocks[0]["dw_w"].shape[1]
        readers = blocks
    elif n_blocks > 1:
        c_mid = blocks[1]["dw_w"].shape[1]
        readers = blocks[1:]
    else:
        c_mid = blocks[0]["pw_w"].shape[1]
        readers = []
    for blk in readers:
        assert blk["dw_w"].shape[1] == c_mid, "stage blocks must share depthwise width"

    operands = []
    in_specs = []
    if stem is not None:
        n = x_in.shape[0]                                    # (n, hw, K) bf16 patches
        k_pad = x_in.shape[2]
        operands.append(x_in)
        in_specs.append(pl.BlockSpec((1, hw, k_pad), lambda i: (i, 0, 0)))
        operands += [stem["w"], stem["b"]]
        in_specs += [pl.BlockSpec(stem["w"].shape, lambda i: (0, 0)),
                     pl.BlockSpec(stem["b"].shape, lambda i: (0, 0))]
    else:
        _, n, hh, wh, c_in = x_in.shape                      # (4, n, hh, wh, cin) bf16
        operands.append(x_in)
        in_specs.append(pl.BlockSpec((4, 1, hh, wh, c_in), lambda i: (0, i, 0, 0, 0)))

    for blk in blocks:
        operands += [blk["dw_w"], blk["dw_b"], blk["pw_w"], blk["pw_b"]]
        in_specs += [pl.BlockSpec(blk["dw_w"].shape, lambda i: (0, 0)),
                     pl.BlockSpec(blk["dw_b"].shape, lambda i: (0, 0)),
                     pl.BlockSpec(blk["pw_w"].shape, lambda i: (0, 0)),
                     pl.BlockSpec(blk["pw_b"].shape, lambda i: (0, 0))]

    out = pl.pallas_call(
        _make_stage_kernel(stem is not None, ho, wo, n_blocks),
        out_shape=jax.ShapeDtypeStruct((n, hw, cout), jnp.bfloat16),
        grid=(n,),
        in_specs=in_specs,
        out_specs=pl.BlockSpec((1, hw, cout), lambda i: (i, 0, 0)),
        scratch_shapes=[pltpu.VMEM((1, ho + 2, wo + 2, c_mid), jnp.float32)],
        compiler_params=pltpu.CompilerParams(dimension_semantics=("parallel",)),
    )(*operands)
    return out


def to_parity_planes(x_nhwc):
    """ZeroPad2d((0,1,0,1)) + even/odd parity-plane split for a stride-2 depthwise.
    (One extra never-read zero row/col keeps the split even.)  Returns (4, N, H/2+1, W/2+1, C)."""
    n, h, w, c = x_nhwc.shape
    assert h % 2 == 0 and w % 2 == 0, "stride-2 stage requires even spatial dims"
    hh, wh = h // 2 + 1, w // 2 + 1
    xp = jnp.pad(x_nhwc, ((0, 0), (0, 2), (0, 2), (0, 0)))
    xr = xp.reshape(n, hh, 2, wh, 2, c).transpose(2, 4, 0, 1, 3, 5)
    return xr.reshape(4, n, hh, wh, c)


# ----------------------------- parameter setup ------------------------------ #

_DW_CFG = [(64, 1), (128, 2), (128, 1), (256, 2), (256, 1), (512, 2),
           (512, 1), (512, 1), (512, 1), (512, 1), (512, 1), (1024, 2), (1024, 1)]


def make_params(key, in_ch=3, depth_multiplier=0.25, min_depth=4):
    depth = lambda d: max(int(d * depth_multiplier), min_depth)
    eps = 1e-5

    def bn_fold(c):
        gamma = jnp.ones((c,), jnp.float32)
        beta = jnp.zeros((c,), jnp.float32)
        mean = jnp.zeros((c,), jnp.float32)
        var = jnp.ones((c,), jnp.float32)
        scale = gamma * jax.lax.rsqrt(var + eps)
        return scale, beta - mean * scale

    def xavier(k, shape, fan_in, fan_out):
        bound = (6.0 / (fan_in + fan_out)) ** 0.5
        return jax.random.uniform(k, shape, jnp.float32, -bound, bound)

    keys = jax.random.split(key, 1 + 2 * len(_DW_CFG))
    ki = 0

    # Stem: 3x3/s2 conv, BN scale folded, im2col K padded 27 -> 32 (multiple of 8).
    c0 = depth(32)
    k_raw = 9 * in_ch
    k_pad = ((k_raw + 7) // 8) * 8
    w_stem = xavier(keys[ki], (3, 3, in_ch, c0), in_ch * 9, c0 * 9); ki += 1
    s0, b0 = bn_fold(c0)
    w_flat = (w_stem * s0).reshape(k_raw, c0)
    w_flat = jnp.pad(w_flat, ((0, k_pad - k_raw), (0, 0)))
    stem = dict(w=w_flat.astype(jnp.bfloat16), b=b0.reshape(1, c0))

    # Depthwise-separable blocks; BN scale folded into dw and pw weights.
    # TODO(synk): loading real PyTorch weights (cout, cin, kh, kw) would need a transpose.
    blocks = []
    cin = c0
    for d, stride in _DW_CFG:
        cout = depth(d)
        dw_w = xavier(keys[ki], (3, 3, cin), 9, cin * 9); ki += 1     # torch (cin,1,3,3)
        dws, dwb = bn_fold(cin)
        pw_w = xavier(keys[ki], (cin, cout), cin, cout); ki += 1      # torch (cout,cin,1,1)
        pws, pwb = bn_fold(cout)
        blocks.append(dict(
            dw_w=(dw_w * dws).reshape(9, cin),                # f32 (VPU path)
            dw_b=dwb.reshape(1, cin),
            pw_w=(pw_w * pws).astype(jnp.bfloat16),           # bf16 (MXU path)
            pw_b=pwb.reshape(1, cout),
            stride=stride))
        cin = cout

    # Group into stages: stage 0 = stem + leading stride-1 blocks; each later stage
    # starts at a stride-2 block and runs through the following stride-1 blocks.
    stages = [[]]
    for blk in blocks:
        if blk["stride"] == 2:
            stages.append([])
        stages[-1].append(blk)

    return dict(stem=stem, stages=stages)


# --------------------------------- forward ---------------------------------- #

def mobilenet_forward(x_nchw, params):
    """Equivalent of MobileNet(include_top=False).forward; input/output NCHW, f32."""
    x = jnp.transpose(x_nchw, (0, 2, 3, 1)).astype(jnp.float32)       # NCHW -> NHWC
    n, h, w, cin = x.shape
    ho, wo = h // 2, w // 2

    # Stem im2col (ZeroPad2d((0,1,0,1)), stride 2); raw image, Cin=3, runs once.
    xp = jnp.pad(x, ((0, 0), (0, 1), (0, 1), (0, 0)))
    taps = [xp[:, kh:kh + 2 * ho - 1:2, kw:kw + 2 * wo - 1:2, :]
            for kh in range(3) for kw in range(3)]
    k_raw = 9 * cin
    k_pad = params["stem"]["w"].shape[0]
    if k_pad > k_raw:
        taps.append(jnp.zeros((n, ho, wo, k_pad - k_raw), x.dtype))
    patches = jnp.concatenate(taps, axis=-1).reshape(n, ho * wo, k_pad)
    patches = patches.astype(jnp.bfloat16)

    y = None
    for si, stage_blocks in enumerate(params["stages"]):
        if si == 0:
            y = fused_stage(patches, stage_blocks, stem=params["stem"], ho=ho, wo=wo)
        else:
            c_prev = y.shape[-1]
            planes = to_parity_planes(y.reshape(n, ho, wo, c_prev))
            ho, wo = ho // 2, wo // 2
            y = fused_stage(planes, stage_blocks, stem=None, ho=ho, wo=wo)

    c_fin = y.shape[-1]
    out = y.reshape(n, ho, wo, c_fin)
    return jnp.transpose(out, (0, 3, 1, 2)).astype(jnp.float32)       # NHWC -> NCHW


# --------------------------------- main ------------------------------------- #

if __name__ == "__main__":
    key = jax.random.PRNGKey(0)
    pkey, xkey = jax.random.split(key)

    # Small config: depth_multiplier=0.25 -> channels 8,16,32,64,128,256
    params = make_params(pkey, in_ch=3, depth_multiplier=0.25, min_depth=4)

    x = jax.random.normal(xkey, (2, 3, 32, 32), dtype=jnp.float32)    # NCHW, like PyTorch

    fwd = jax.jit(lambda inp: mobilenet_forward(inp, params))
    out = jax.block_until_ready(fwd(x))

    assert out.shape == (2, 256, 1, 1), out.shape
    assert out.dtype == jnp.float32
    assert bool(jnp.all(jnp.isfinite(out)))
    print("KERNEL_OK")
</pallas_src>

<mosaic_0001>
module attributes {stable_mosaic.version = 11 : i64} {
  func.func @kernel(%arg0: i32, %arg1: memref<1x256x32xbf16, #tpu.memory_space<vmem>>, %arg2: memref<32x8xbf16, #tpu.memory_space<vmem>>, %arg3: memref<1x8xf32, #tpu.memory_space<vmem>>, %arg4: memref<9x8xf32, #tpu.memory_space<vmem>>, %arg5: memref<1x8xf32, #tpu.memory_space<vmem>>, %arg6: memref<8x16xbf16, #tpu.memory_space<vmem>>, %arg7: memref<1x16xf32, #tpu.memory_space<vmem>>, %arg8: memref<1x256x16xbf16, #tpu.memory_space<vmem>>, %arg9: memref<1x18x18x8xf32, #tpu.memory_space<vmem>>) attributes {dimension_semantics = [#tpu.dimension_semantics<parallel>], iteration_bounds = array<i64: 2>, scalar_prefetch = 0 : i64, scratch_operands = 1 : i64, tpu.core_type = #tpu.core_type<tc>, window_params = [{transform_indices = @transform_0, window_bounds = array<i64: 1, 256, 32>}, {pipeline_mode = #tpu.pipeline_mode<synchronous>, transform_indices = @transform_1, window_bounds = array<i64: 32, 8>}, {pipeline_mode = #tpu.pipeline_mode<synchronous>, transform_indices = @transform_2, window_bounds = array<i64: 1, 8>}, {pipeline_mode = #tpu.pipeline_mode<synchronous>, transform_indices = @transform_3, window_bounds = array<i64: 9, 8>}, {pipeline_mode = #tpu.pipeline_mode<synchronous>, transform_indices = @transform_4, window_bounds = array<i64: 1, 8>}, {pipeline_mode = #tpu.pipeline_mode<synchronous>, transform_indices = @transform_5, window_bounds = array<i64: 8, 16>}, {pipeline_mode = #tpu.pipeline_mode<synchronous>, transform_indices = @transform_6, window_bounds = array<i64: 1, 16>}, {transform_indices = @transform_7, window_bounds = array<i64: 1, 256, 16>}]} {
    %cst = arith.constant 0.000000e+00 : f32
    %0 = vector.broadcast %cst : f32 to vector<1x18x18x8xf32>
    %c0 = arith.constant 0 : index
    %c0_0 = arith.constant 0 : index
    %c0_1 = arith.constant 0 : index
    %c0_2 = arith.constant 0 : index
    %1 = vector.load %arg9[%c0, %c0_0, %c0_1, %c0_2] : memref<1x18x18x8xf32, #tpu.memory_space<vmem>>, vector<1x18x18x8xf32>
    tpu.vector_store %arg9[%c0, %c0_0, %c0_1, %c0_2], %0 {strides = array<i32>} : memref<1x18x18x8xf32, #tpu.memory_space<vmem>>, vector<1x18x18x8xf32>,
    %c0_3 = arith.constant 0 : index
    %c0_4 = arith.constant 0 : index
    %c0_5 = arith.constant 0 : index
    %2 = vector.load %arg1[%c0_3, %c0_4, %c0_5] : memref<1x256x32xbf16, #tpu.memory_space<vmem>>, vector<1x256x32xbf16>
    %3 = vector.shape_cast %2 : vector<1x256x32xbf16> to vector<256x32xbf16>
    %c0_6 = arith.constant 0 : index
    %c0_7 = arith.constant 0 : index
    %4 = vector.load %arg2[%c0_6, %c0_7] : memref<32x8xbf16, #tpu.memory_space<vmem>>, vector<32x8xbf16>
    %cst_8 = arith.constant dense<0.000000e+00> : vector<256x8xf32>
    %5 = tpu.matmul %3, %4, %cst_8 {dimension_numbers = #tpu.dot_dimension_numbers<[1], [0], [0], [1], [0, 0, 1, 1], [], []>} : vector<256x32xbf16>, vector<32x8xbf16>, vector<256x8xf32> -> vector<256x8xf32>
    %c0_9 = arith.constant 0 : index
    %c0_10 = arith.constant 0 : index
    %6 = vector.load %arg3[%c0_9, %c0_10] : memref<1x8xf32, #tpu.memory_space<vmem>>, vector<1x8xf32>
    %7 = vector.broadcast %6 : vector<1x8xf32> to vector<256x8xf32>
    %8 = arith.addf %5, %7 : vector<256x8xf32>
    %cst_11 = arith.constant 0.000000e+00 : f32
    %cst_12 = arith.constant 6.000000e+00 : f32
    %9 = vector.broadcast %cst_11 : f32 to vector<256x8xf32>
    %10 = arith.maximumf %9, %8 : vector<256x8xf32>
    %11 = vector.broadcast %cst_12 : f32 to vector<256x8xf32>
    %12 = arith.minimumf %11, %10 : vector<256x8xf32>
    %13 = vector.extract_strided_slice %12 {offsets = [0, 0], sizes = [16, 8], strides = [1, 1]} : vector<256x8xf32> to vector<16x8xf32>
    %c0_13 = arith.constant 0 : index
    %c1 = arith.constant 1 : index
    %c1_14 = arith.constant 1 : index
    %c0_15 = arith.constant 0 : index
    %14 = vector.load %arg9[%c0_13, %c1, %c1_14, %c0_15] : memref<1x18x18x8xf32, #tpu.memory_space<vmem>>, vector<1x1x16x8xf32>
    %15 = vector.shape_cast %14 : vector<1x1x16x8xf32> to vector<16x8xf32>
    %16 = vector.shape_cast %13 : vector<16x8xf32> to vector<1x1x16x8xf32>
    tpu.vector_store %arg9[%c0_13, %c1, %c1_14, %c0_15], %16 {strides = array<i32>} : memref<1x18x18x8xf32, #tpu.memory_space<vmem>>, vector<1x1x16x8xf32>,
    %17 = vector.extract_strided_slice %12 {offsets = [16, 0], sizes = [16, 8], strides = [1, 1]} : vector<256x8xf32> to vector<16x8xf32>
    %c0_16 = arith.constant 0 : index
    %c2 = arith.constant 2 : index
    %c1_17 = arith.constant 1 : index
    %c0_18 = arith.constant 0 : index
    %18 = vector.load %arg9[%c0_16, %c2, %c1_17, %c0_18] : memref<1x18x18x8xf32, #tpu.memory_space<vmem>>, vector<1x1x16x8xf32>
    %19 = vector.shape_cast %18 : vector<1x1x16x8xf32> to vector<16x8xf32>
    %20 = vector.shape_cast %17 : vector<16x8xf32> to vector<1x1x16x8xf32>
    tpu.vector_store %arg9[%c0_16, %c2, %c1_17, %c0_18], %20 {strides = array<i32>} : memref<1x18x18x8xf32, #tpu.memory_space<vmem>>, vector<1x1x16x8xf32>,
    %21 = vector.extract_strided_slice %12 {offsets = [32, 0], sizes = [16, 8], strides = [1, 1]} : vector<256x8xf32> to vector<16x8xf32>
    %c0_19 = arith.constant 0 : index
    %c3 = arith.constant 3 : index
    %c1_20 = arith.constant 1 : index
    %c0_21 = arith.constant 0 : index
    %22 = vector.load %arg9[%c0_19, %c3, %c1_20, %c0_21] : memref<1x18x18x8xf32, #tpu.memory_space<vmem>>, vector<1x1x16x8xf32>
    %23 = vector.shape_cast %22 : vector<1x1x16x8xf32> to vector<16x8xf32>
    %24 = vector.shape_cast %21 : vector<16x8xf32> to vector<1x1x16x8xf32>
    tpu.vector_store %arg9[%c0_19, %c3, %c1_20, %c0_21], %24 {strides = array<i32>} : memref<1x18x18x8xf32, #tpu.memory_space<vmem>>, vector<1x1x16x8xf32>,
    %25 = vector.extract_strided_slice %12 {offsets = [48, 0], sizes = [16, 8], strides = [1, 1]} : vector<256x8xf32> to vector<16x8xf32>
    %c0_22 = arith.constant 0 : index
    %c4 = arith.constant 4 : index
    %c1_23 = arith.constant 1 : index
    %c0_24 = arith.constant 0 : index
    %26 = vector.load %arg9[%c0_22, %c4, %c1_23, %c0_24] : memref<1x18x18x8xf32, #tpu.memory_space<vmem>>, vector<1x1x16x8xf32>
    %27 = vector.shape_cast %26 : vector<1x1x16x8xf32> to vector<16x8xf32>
    %28 = vector.shape_cast %25 : vector<16x8xf32> to vector<1x1x16x8xf32>
    tpu.vector_store %arg9[%c0_22, %c4, %c1_23, %c0_24], %28 {strides = array<i32>} : memref<1x18x18x8xf32, #tpu.memory_space<vmem>>, vector<1x1x16x8xf32>,
    %29 = vector.extract_strided_slice %12 {offsets = [64, 0], sizes = [16, 8], strides = [1, 1]} : vector<256x8xf32> to vector<16x8xf32>
    %c0_25 = arith.constant 0 : index
    %c5 = arith.constant 5 : index
    %c1_26 = arith.constant 1 : index
    %c0_27 = arith.constant 0 : index
    %30 = vector.load %arg9[%c0_25, %c5, %c1_26, %c0_27] : memref<1x18x18x8xf32, #tpu.memory_space<vmem>>, vector<1x1x16x8xf32>
    %31 = vector.shape_cast %30 : vector<1x1x16x8xf32> to vector<16x8xf32>
    %32 = vector.shape_cast %29 : vector<16x8xf32> to vector<1x1x16x8xf32>
    tpu.vector_store %arg9[%c0_25, %c5, %c1_26, %c0_27], %32 {strides = array<i32>} : memref<1x18x18x8xf32, #tpu.memory_space<vmem>>, vector<1x1x16x8xf32>,
    %33 = vector.extract_strided_slice %12 {offsets = [80, 0], sizes = [16, 8], strides = [1, 1]} : vector<256x8xf32> to vector<16x8xf32>
    %c0_28 = arith.constant 0 : index
    %c6 = arith.constant 6 : index
    %c1_29 = arith.constant 1 : index
    %c0_30 = arith.constant 0 : index
    %34 = vector.load %arg9[%c0_28, %c6, %c1_29, %c0_30] : memref<1x18x18x8xf32, #tpu.memory_space<vmem>>, vector<1x1x16x8xf32>
    %35 = vector.shape_cast %34 : vector<1x1x16x8xf32> to vector<16x8xf32>
    %36 = vector.shape_cast %33 : vector<16x8xf32> to vector<1x1x16x8xf32>
    tpu.vector_store %arg9[%c0_28, %c6, %c1_29, %c0_30], %36 {strides = array<i32>} : memref<1x18x18x8xf32, #tpu.memory_space<vmem>>, vector<1x1x16x8xf32>,
    %37 = vector.extract_strided_slice %12 {offsets = [96, 0], sizes = [16, 8], strides = [1, 1]} : vector<256x8xf32> to vector<16x8xf32>
    %c0_31 = arith.constant 0 : index
    %c7 = arith.constant 7 : index
    %c1_32 = arith.constant 1 : index
    %c0_33 = arith.constant 0 : index
    %38 = vector.load %arg9[%c0_31, %c7, %c1_32, %c0_33] : memref<1x18x18x8xf32, #tpu.memory_space<vmem>>, vector<1x1x16x8xf32>
    %39 = vector.shape_cast %38 : vector<1x1x16x8xf32> to vector<16x8xf32>
    %40 = vector.shape_cast %37 : vector<16x8xf32> to vector<1x1x16x8xf32>
    tpu.vector_store %arg9[%c0_31, %c7, %c1_32, %c0_33], %40 {strides = array<i32>} : memref<1x18x18x8xf32, #tpu.memory_space<vmem>>, vector<1x1x16x8xf32>,
    %41 = vector.extract_strided_slice %12 {offsets = [112, 0], sizes = [16, 8], strides = [1, 1]} : vector<256x8xf32> to vector<16x8xf32>
    %c0_34 = arith.constant 0 : index
    %c8 = arith.constant 8 : index
    %c1_35 = arith.constant 1 : index
    %c0_36 = arith.constant 0 : index
    %42 = vector.load %arg9[%c0_34, %c8, %c1_35, %c0_36] : memref<1x18x18x8xf32, #tpu.memory_space<vmem>>, vector<1x1x16x8xf32>
    %43 = vector.shape_cast %42 : vector<1x1x16x8xf32> to vector<16x8xf32>
    %44 = vector.shape_cast %41 : vector<16x8xf32> to vector<1x1x16x8xf32>
    tpu.vector_store %arg9[%c0_34, %c8, %c1_35, %c0_36], %44 {strides = array<i32>} : memref<1x18x18x8xf32, #tpu.memory_space<vmem>>, vector<1x1x16x8xf32>,
    %45 = vector.extract_strided_slice %12 {offsets = [128, 0], sizes = [16, 8], strides = [1, 1]} : vector<256x8xf32> to vector<16x8xf32>
    %c0_37 = arith.constant 0 : index
    %c9 = arith.constant 9 : index
    %c1_38 = arith.constant 1 : index
    %c0_39 = arith.constant 0 : index
    %46 = vector.load %arg9[%c0_37, %c9, %c1_38, %c0_39] : memref<1x18x18x8xf32, #tpu.memory_space<vmem>>, vector<1x1x16x8xf32>
    %47 = vector.shape_cast %46 : vector<1x1x16x8xf32> to vector<16x8xf32>
    %48 = vector.shape_cast %45 : vector<16x8xf32> to vector<1x1x16x8xf32>
    tpu.vector_store %arg9[%c0_37, %c9, %c1_38, %c0_39], %48 {strides = array<i32>} : memref<1x18x18x8xf32, #tpu.memory_space<vmem>>, vector<1x1x16x8xf32>,
    %49 = vector.extract_strided_slice %12 {offsets = [144, 0], sizes = [16, 8], strides = [1, 1]} : vector<256x8xf32> to vector<16x8xf32>
    %c0_40 = arith.constant 0 : index
    %c10 = arith.constant 10 : index
    %c1_41 = arith.constant 1 : index
    %c0_42 = arith.constant 0 : index
    %50 = vector.load %arg9[%c0_40, %c10, %c1_41, %c0_42] : memref<1x18x18x8xf32, #tpu.memory_space<vmem>>, vector<1x1x16x8xf32>
    %51 = vector.shape_cast %50 : vector<1x1x16x8xf32> to vector<16x8xf32>
    %52 = vector.shape_cast %49 : vector<16x8xf32> to vector<1x1x16x8xf32>
    tpu.vector_store %arg9[%c0_40, %c10, %c1_41, %c0_42], %52 {strides = array<i32>} : memref<1x18x18x8xf32, #tpu.memory_space<vmem>>, vector<1x1x16x8xf32>,
    %53 = vector.extract_strided_slice %12 {offsets = [160, 0], sizes = [16, 8], strides = [1, 1]} : vector<256x8xf32> to vector<16x8xf32>
    %c0_43 = arith.constant 0 : index
    %c11 = arith.constant 11 : index
    %c1_44 = arith.constant 1 : index
    %c0_45 = arith.constant 0 : index
    %54 = vector.load %arg9[%c0_43, %c11, %c1_44, %c0_45] : memref<1x18x18x8xf32, #tpu.memory_space<vmem>>, vector<1x1x16x8xf32>
    %55 = vector.shape_cast %54 : vector<1x1x16x8xf32> to vector<16x8xf32>
    %56 = vector.shape_cast %53 : vector<16x8xf32> to vector<1x1x16x8xf32>
    tpu.vector_store %arg9[%c0_43, %c11, %c1_44, %c0_45], %56 {strides = array<i32>} : memref<1x18x18x8xf32, #tpu.memory_space<vmem>>, vector<1x1x16x8xf32>,
    %57 = vector.extract_strided_slice %12 {offsets = [176, 0], sizes = [16, 8], strides = [1, 1]} : vector<256x8xf32> to vector<16x8xf32>
    %c0_46 = arith.constant 0 : index
    %c12 = arith.constant 12 : index
    %c1_47 = arith.constant 1 : index
    %c0_48 = arith.constant 0 : index
    %58 = vector.load %arg9[%c0_46, %c12, %c1_47, %c0_48] : memref<1x18x18x8xf32, #tpu.memory_space<vmem>>, vector<1x1x16x8xf32>
    %59 = vector.shape_cast %58 : vector<1x1x16x8xf32> to vector<16x8xf32>
    %60 = vector.shape_cast %57 : vector<16x8xf32> to vector<1x1x16x8xf32>
    tpu.vector_store %arg9[%c0_46, %c12, %c1_47, %c0_48], %60 {strides = array<i32>} : memref<1x18x18x8xf32, #tpu.memory_space<vmem>>, vector<1x1x16x8xf32>,
    %61 = vector.extract_strided_slice %12 {offsets = [192, 0], sizes = [16, 8], strides = [1, 1]} : vector<256x8xf32> to vector<16x8xf32>
    %c0_49 = arith.constant 0 : index
    %c13 = arith.constant 13 : index
    %c1_50 = arith.constant 1 : index
    %c0_51 = arith.constant 0 : index
    %62 = vector.load %arg9[%c0_49, %c13, %c1_50, %c0_51] : memref<1x18x18x8xf32, #tpu.memory_space<vmem>>, vector<1x1x16x8xf32>
    %63 = vector.shape_cast %62 : vector<1x1x16x8xf32> to vector<16x8xf32>
    %64 = vector.shape_cast %61 : vector<16x8xf32> to vector<1x1x16x8xf32>
    tpu.vector_store %arg9[%c0_49, %c13, %c1_50, %c0_51], %64 {strides = array<i32>} : memref<1x18x18x8xf32, #tpu.memory_space<vmem>>, vector<1x1x16x8xf32>,
    %65 = vector.extract_strided_slice %12 {offsets = [208, 0], sizes = [16, 8], strides = [1, 1]} : vector<256x8xf32> to vector<16x8xf32>
    %c0_52 = arith.constant 0 : index
    %c14 = arith.constant 14 : index
    %c1_53 = arith.constant 1 : index
    %c0_54 = arith.constant 0 : index
    %66 = vector.load %arg9[%c0_52, %c14, %c1_53, %c0_54] : memref<1x18x18x8xf32, #tpu.memory_space<vmem>>, vector<1x1x16x8xf32>
    %67 = vector.shape_cast %66 : vector<1x1x16x8xf32> to vector<16x8xf32>
    %68 = vector.shape_cast %65 : vector<16x8xf32> to vector<1x1x16x8xf32>
    tpu.vector_store %arg9[%c0_52, %c14, %c1_53, %c0_54], %68 {strides = array<i32>} : memref<1x18x18x8xf32, #tpu.memory_space<vmem>>, vector<1x1x16x8xf32>,
    %69 = vector.extract_strided_slice %12 {offsets = [224, 0], sizes = [16, 8], strides = [1, 1]} : vector<256x8xf32> to vector<16x8xf32>
    %c0_55 = arith.constant 0 : index
    %c15 = arith.constant 15 : index
    %c1_56 = arith.constant 1 : index
    %c0_57 = arith.constant 0 : index
    %70 = vector.load %arg9[%c0_55, %c15, %c1_56, %c0_57] : memref<1x18x18x8xf32, #tpu.memory_space<vmem>>, vector<1x1x16x8xf32>
    %71 = vector.shape_cast %70 : vector<1x1x16x8xf32> to vector<16x8xf32>
    %72 = vector.shape_cast %69 : vector<16x8xf32> to vector<1x1x16x8xf32>
    tpu.vector_store %arg9[%c0_55, %c15, %c1_56, %c0_57], %72 {strides = array<i32>} : memref<1x18x18x8xf32, #tpu.memory_space<vmem>>, vector<1x1x16x8xf32>,
    %73 = vector.extract_strided_slice %12 {offsets = [240, 0], sizes = [16, 8], strides = [1, 1]} : vector<256x8xf32> to vector<16x8xf32>
    %c0_58 = arith.constant 0 : index
    %c16 = arith.constant 16 : index
    %c1_59 = arith.constant 1 : index
    %c0_60 = arith.constant 0 : index
    %74 = vector.load %arg9[%c0_58, %c16, %c1_59, %c0_60] : memref<1x18x18x8xf32, #tpu.memory_space<vmem>>, vector<1x1x16x8xf32>
    %75 = vector.shape_cast %74 : vector<1x1x16x8xf32> to vector<16x8xf32>
    %76 = vector.shape_cast %73 : vector<16x8xf32> to vector<1x1x16x8xf32>
    tpu.vector_store %arg9[%c0_58, %c16, %c1_59, %c0_60], %76 {strides = array<i32>} : memref<1x18x18x8xf32, #tpu.memory_space<vmem>>, vector<1x1x16x8xf32>,
    %c0_61 = arith.constant 0 : index
    %c0_62 = arith.constant 0 : index
    %77 = vector.load %arg4[%c0_61, %c0_62] : memref<9x8xf32, #tpu.memory_space<vmem>>, vector<9x8xf32>
    %c0_63 = arith.constant 0 : index
    %c0_64 = arith.constant 0 : index
    %c0_65 = arith.constant 0 : index
    %c0_66 = arith.constant 0 : index
    %78 = vector.load %arg9[%c0_63, %c0_64, %c0_65, %c0_66] : memref<1x18x18x8xf32, #tpu.memory_space<vmem>>, vector<1x16x16x8xf32>
    %79 = vector.extract_strided_slice %77 {offsets = [0, 0], sizes = [1, 8], strides = [1, 1]} : vector<9x8xf32> to vector<1x8xf32>
    %80 = vector.shape_cast %79 : vector<1x8xf32> to vector<1x1x1x8xf32>
    %81 = vector.broadcast %80 : vector<1x1x1x8xf32> to vector<1x16x16x8xf32>
    %82 = arith.mulf %78, %81 : vector<1x16x16x8xf32>
    %c0_67 = arith.constant 0 : index
    %c0_68 = arith.constant 0 : index
    %c1_69 = arith.constant 1 : index
    %c0_70 = arith.constant 0 : index
    %83 = vector.load %arg9[%c0_67, %c0_68, %c1_69, %c0_70] : memref<1x18x18x8xf32, #tpu.memory_space<vmem>>, vector<1x16x16x8xf32>
    %84 = vector.extract_strided_slice %77 {offsets = [1, 0], sizes = [1, 8], strides = [1, 1]} : vector<9x8xf32> to vector<1x8xf32>
    %85 = vector.shape_cast %84 : vector<1x8xf32> to vector<1x1x1x8xf32>
    %86 = vector.broadcast %85 : vector<1x1x1x8xf32> to vector<1x16x16x8xf32>
    %87 = arith.mulf %83, %86 : vector<1x16x16x8xf32>
    %88 = arith.addf %82, %87 : vector<1x16x16x8xf32>
    %c0_71 = arith.constant 0 : index
    %c0_72 = arith.constant 0 : index
    %c2_73 = arith.constant 2 : index
    %c0_74 = arith.constant 0 : index
    %89 = vector.load %arg9[%c0_71, %c0_72, %c2_73, %c0_74] : memref<1x18x18x8xf32, #tpu.memory_space<vmem>>, vector<1x16x16x8xf32>
    %90 = vector.extract_strided_slice %77 {offsets = [2, 0], sizes = [1, 8], strides = [1, 1]} : vector<9x8xf32> to vector<1x8xf32>
    %91 = vector.shape_cast %90 : vector<1x8xf32> to vector<1x1x1x8xf32>
    %92 = vector.broadcast %91 : vector<1x1x1x8xf32> to vector<1x16x16x8xf32>
    %93 = arith.mulf %89, %92 : vector<1x16x16x8xf32>
    %94 = arith.addf %88, %93 : vector<1x16x16x8xf32>
    %c0_75 = arith.constant 0 : index
    %c1_76 = arith.constant 1 : index
    %c0_77 = arith.constant 0 : index
    %c0_78 = arith.constant 0 : index
    %95 = vector.load %arg9[%c0_75, %c1_76, %c0_77, %c0_78] : memref<1x18x18x8xf32, #tpu.memory_space<vmem>>, vector<1x16x16x8xf32>
    %96 = vector.extract_strided_slice %77 {offsets = [3, 0], sizes = [1, 8], strides = [1, 1]} : vector<9x8xf32> to vector<1x8xf32>
    %97 = vector.shape_cast %96 : vector<1x8xf32> to vector<1x1x1x8xf32>
    %98 = vector.broadcast %97 : vector<1x1x1x8xf32> to vector<1x16x16x8xf32>
    %99 = arith.mulf %95, %98 : vector<1x16x16x8xf32>
    %100 = arith.addf %94, %99 : vector<1x16x16x8xf32>
    %c0_79 = arith.constant 0 : index
    %c1_80 = arith.constant 1 : index
    %c1_81 = arith.constant 1 : index
    %c0_82 = arith.constant 0 : index
    %101 = vector.load %arg9[%c0_79, %c1_80, %c1_81, %c0_82] : memref<1x18x18x8xf32, #tpu.memory_space<vmem>>, vector<1x16x16x8xf32>
    %102 = vector.extract_strided_slice %77 {offsets = [4, 0], sizes = [1, 8], strides = [1, 1]} : vector<9x8xf32> to vector<1x8xf32>
    %103 = vector.shape_cast %102 : vector<1x8xf32> to vector<1x1x1x8xf32>
    %104 = vector.broadcast %103 : vector<1x1x1x8xf32> to vector<1x16x16x8xf32>
    %105 = arith.mulf %101, %104 : vector<1x16x16x8xf32>
    %106 = arith.addf %100, %105 : vector<1x16x16x8xf32>
    %c0_83 = arith.constant 0 : index
    %c1_84 = arith.constant 1 : index
    %c2_85 = arith.constant 2 : index
    %c0_86 = arith.constant 0 : index
    %107 = vector.load %arg9[%c0_83, %c1_84, %c2_85, %c0_86] : memref<1x18x18x8xf32, #tpu.memory_space<vmem>>, vector<1x16x16x8xf32>
    %108 = vector.extract_strided_slice %77 {offsets = [5, 0], sizes = [1, 8], strides = [1, 1]} : vector<9x8xf32> to vector<1x8xf32>
    %109 = vector.shape_cast %108 : vector<1x8xf32> to vector<1x1x1x8xf32>
    %110 = vector.broadcast %109 : vector<1x1x1x8xf32> to vector<1x16x16x8xf32>
    %111 = arith.mulf %107, %110 : vector<1x16x16x8xf32>
    %112 = arith.addf %106, %111 : vector<1x16x16x8xf32>
    %c0_87 = arith.constant 0 : index
    %c2_88 = arith.constant 2 : index
    %c0_89 = arith.constant 0 : index
    %c0_90 = arith.constant 0 : index
    %113 = vector.load %arg9[%c0_87, %c2_88, %c0_89, %c0_90] : memref<1x18x18x8xf32, #tpu.memory_space<vmem>>, vector<1x16x16x8xf32>
    %114 = vector.extract_strided_slice %77 {offsets = [6, 0], sizes = [1, 8], strides = [1, 1]} : vector<9x8xf32> to vector<1x8xf32>
    %115 = vector.shape_cast %114 : vector<1x8xf32> to vector<1x1x1x8xf32>
    %116 = vector.broadcast %115 : vector<1x1x1x8xf32> to vector<1x16x16x8xf32>
    %117 = arith.mulf %113, %116 : vector<1x16x16x8xf32>
    %118 = arith.addf %112, %117 : vector<1x16x16x8xf32>
    %c0_91 = arith.constant 0 : index
    %c2_92 = arith.constant 2 : index
    %c1_93 = arith.constant 1 : index
    %c0_94 = arith.constant 0 : index
    %119 = vector.load %arg9[%c0_91, %c2_92, %c1_93, %c0_94] : memref<1x18x18x8xf32, #tpu.memory_space<vmem>>, vector<1x16x16x8xf32>
    %120 = vector.extract_strided_slice %77 {offsets = [7, 0], sizes = [1, 8], strides = [1, 1]} : vector<9x8xf32> to vector<1x8xf32>
    %121 = vector.shape_cast %120 : vector<1x8xf32> to vector<1x1x1x8xf32>
    %122 = vector.broadcast %121 : vector<1x1x1x8xf32> to vector<1x16x16x8xf32>
    %123 = arith.mulf %119, %122 : vector<1x16x16x8xf32>
    %124 = arith.addf %118, %123 : vector<1x16x16x8xf32>
    %c0_95 = arith.constant 0 : index
    %c2_96 = arith.constant 2 : index
    %c2_97 = arith.constant 2 : index
    %c0_98 = arith.constant 0 : index
    %125 = vector.load %arg9[%c0_95, %c2_96, %c2_97, %c0_98] : memref<1x18x18x8xf32, #tpu.memory_space<vmem>>, vector<1x16x16x8xf32>
    %126 = vector.extract_strided_slice %77 {offsets = [8, 0], sizes = [1, 8], strides = [1, 1]} : vector<9x8xf32> to vector<1x8xf32>
    %127 = vector.shape_cast %126 : vector<1x8xf32> to vector<1x1x1x8xf32>
    %128 = vector.broadcast %127 : vector<1x1x1x8xf32> to vector<1x16x16x8xf32>
    %129 = arith.mulf %125, %128 : vector<1x16x16x8xf32>
    %130 = arith.addf %124, %129 : vector<1x16x16x8xf32>
    %c0_99 = arith.constant 0 : index
    %c0_100 = arith.constant 0 : index
    %131 = vector.load %arg5[%c0_99, %c0_100] : memref<1x8xf32, #tpu.memory_space<vmem>>, vector<1x8xf32>
    %132 = vector.shape_cast %131 : vector<1x8xf32> to vector<1x1x1x8xf32>
    %133 = vector.broadcast %132 : vector<1x1x1x8xf32> to vector<1x16x16x8xf32>
    %134 = arith.addf %130, %133 : vector<1x16x16x8xf32>
    %cst_101 = arith.constant 0.000000e+00 : f32
    %cst_102 = arith.constant 6.000000e+00 : f32
    %135 = vector.broadcast %cst_101 : f32 to vector<1x16x16x8xf32>
    %136 = arith.maximumf %135, %134 : vector<1x16x16x8xf32>
    %137 = vector.broadcast %cst_102 : f32 to vector<1x16x16x8xf32>
    %138 = arith.minimumf %137, %136 : vector<1x16x16x8xf32>
    %139 = vector.shape_cast %138 : vector<1x16x16x8xf32> to vector<256x8xf32>
    %140 = arith.truncf %139 : vector<256x8xf32> to vector<256x8xbf16>
    %c0_103 = arith.constant 0 : index
    %c0_104 = arith.constant 0 : index
    %141 = vector.load %arg6[%c0_103, %c0_104] : memref<8x16xbf16, #tpu.memory_space<vmem>>, vector<8x16xbf16>
    %cst_105 = arith.constant dense<0.000000e+00> : vector<256x16xf32>
    %142 = tpu.matmul %140, %141, %cst_105 {dimension_numbers = #tpu.dot_dimension_numbers<[1], [0], [0], [1], [0, 0, 1, 1], [], []>} : vector<256x8xbf16>, vector<8x16xbf16>, vector<256x16xf32> -> vector<256x16xf32>
    %c0_106 = arith.constant 0 : index
    %c0_107 = arith.constant 0 : index
    %143 = vector.load %arg7[%c0_106, %c0_107] : memref<1x16xf32, #tpu.memory_space<vmem>>, vector<1x16xf32>
    %144 = vector.broadcast %143 : vector<1x16xf32> to vector<256x16xf32>
    %145 = arith.addf %142, %144 : vector<256x16xf32>
    %cst_108 = arith.constant 0.000000e+00 : f32
    %cst_109 = arith.constant 6.000000e+00 : f32
    %146 = vector.broadcast %cst_108 : f32 to vector<256x16xf32>
    %147 = arith.maximumf %146, %145 : vector<256x16xf32>
    %148 = vector.broadcast %cst_109 : f32 to vector<256x16xf32>
    %149 = arith.minimumf %148, %147 : vector<256x16xf32>
    %150 = arith.truncf %149 : vector<256x16xf32> to vector<256x16xbf16>
    %c0_110 = arith.constant 0 : index
    %c0_111 = arith.constant 0 : index
    %c0_112 = arith.constant 0 : index
    %151 = vector.load %arg8[%c0_110, %c0_111, %c0_112] : memref<1x256x16xbf16, #tpu.memory_space<vmem>>, vector<1x256x16xbf16>
    %152 = vector.shape_cast %151 : vector<1x256x16xbf16> to vector<256x16xbf16>
    %153 = vector.shape_cast %150 : vector<256x16xbf16> to vector<1x256x16xbf16>
    tpu.vector_store %arg8[%c0_110, %c0_111, %c0_112], %153 {strides = array<i32>} : memref<1x256x16xbf16, #tpu.memory_space<vmem>>, vector<1x256x16xbf16>,
    return
  }
  func.func @transform_0(%arg0: i32) -> (i32, i32, i32) {
    %c0_i32 = arith.constant 0 : i32
    %c0_i32_0 = arith.constant 0 : i32
    %c0_i32_1 = arith.constant 0 : i32
    return %arg0, %c0_i32, %c0_i32_0 : i32, i32, i32
  }
  func.func @transform_1(%arg0: i32) -> (i32, i32) {
    %c0_i32 = arith.constant 0 : i32
    %c0_i32_0 = arith.constant 0 : i32
    %c0_i32_1 = arith.constant 0 : i32
    return %c0_i32, %c0_i32_0 : i32, i32
  }
  func.func @transform_2(%arg0: i32) -> (i32, i32) {
    %c0_i32 = arith.constant 0 : i32
    %c0_i32_0 = arith.constant 0 : i32
    %c0_i32_1 = arith.constant 0 : i32
    return %c0_i32, %c0_i32_0 : i32, i32
  }
  func.func @transform_3(%arg0: i32) -> (i32, i32) {
    %c0_i32 = arith.constant 0 : i32
    %c0_i32_0 = arith.constant 0 : i32
    %c0_i32_1 = arith.constant 0 : i32
    return %c0_i32, %c0_i32_0 : i32, i32
  }
  func.func @transform_4(%arg0: i32) -> (i32, i32) {
    %c0_i32 = arith.constant 0 : i32
    %c0_i32_0 = arith.constant 0 : i32
    %c0_i32_1 = arith.constant 0 : i32
    return %c0_i32, %c0_i32_0 : i32, i32
  }
  func.func @transform_5(%arg0: i32) -> (i32, i32) {
    %c0_i32 = arith.constant 0 : i32
    %c0_i32_0 = arith.constant 0 : i32
    %c0_i32_1 = arith.constant 0 : i32
    return %c0_i32, %c0_i32_0 : i32, i32
  }
  func.func @transform_6(%arg0: i32) -> (i32, i32) {
    %c0_i32 = arith.constant 0 : i32
    %c0_i32_0 = arith.constant 0 : i32
    %c0_i32_1 = arith.constant 0 : i32
    return %c0_i32, %c0_i32_0 : i32, i32
  }
  func.func @transform_7(%arg0: i32) -> (i32, i32, i32) {
    %c0_i32 = arith.constant 0 : i32
    %c0_i32_0 = arith.constant 0 : i32
    %c0_i32_1 = arith.constant 0 : i32
    return %arg0, %c0_i32, %c0_i32_0 : i32, i32, i32
  }
}

module attributes {stable_mosaic.version = 11 : i64} {
  func.func @kernel(%arg0: i32, %arg1: memref<4x1x9x9x16xbf16, #tpu.memory_space<vmem>>, %arg2: memref<9x16xf32, #tpu.memory_space<vmem>>, %arg3: memref<1x16xf32, #tpu.memory_space<vmem>>, %arg4: memref<16x32xbf16, #tpu.memory_space<vmem>>, %arg5: memref<1x32xf32, #tpu.memory_space<vmem>>, %arg6: memref<9x32xf32, #tpu.memory_space<vmem>>, %arg7: memref<1x32xf32, #tpu.memory_space<vmem>>, %arg8: memref<32x32xbf16, #tpu.memory_space<vmem>>, %arg9: memref<1x32xf32, #tpu.memory_space<vmem>>, %arg10: memref<1x64x32xbf16, #tpu.memory_space<vmem>>, %arg11: memref<1x10x10x32xf32, #tpu.memory_space<vmem>>) attributes {dimension_semantics = [#tpu.dimension_semantics<parallel>], iteration_bounds = array<i64: 2>, scalar_prefetch = 0 : i64, scratch_operands = 1 : i64, tpu.core_type = #tpu.core_type<tc>, window_params = [{transform_indices = @transform_0, window_bounds = array<i64: 4, 1, 9, 9, 16>}, {pipeline_mode = #tpu.pipeline_mode<synchronous>, transform_indices = @transform_1, window_bounds = array<i64: 9, 16>}, {pipeline_mode = #tpu.pipeline_mode<synchronous>, transform_indices = @transform_2, window_bounds = array<i64: 1, 16>}, {pipeline_mode = #tpu.pipeline_mode<synchronous>, transform_indices = @transform_3, window_bounds = array<i64: 16, 32>}, {pipeline_mode = #tpu.pipeline_mode<synchronous>, transform_indices = @transform_4, window_bounds = array<i64: 1, 32>}, {pipeline_mode = #tpu.pipeline_mode<synchronous>, transform_indices = @transform_5, window_bounds = array<i64: 9, 32>}, {pipeline_mode = #tpu.pipeline_mode<synchronous>, transform_indices = @transform_6, window_bounds = array<i64: 1, 32>}, {pipeline_mode = #tpu.pipeline_mode<synchronous>, transform_indices = @transform_7, window_bounds = array<i64: 32, 32>}, {pipeline_mode = #tpu.pipeline_mode<synchronous>, transform_indices = @transform_8, window_bounds = array<i64: 1, 32>}, {transform_indices = @transform_9, window_bounds = array<i64: 1, 64, 32>}]} {
    %cst = arith.constant 0.000000e+00 : f32
    %0 = vector.broadcast %cst : f32 to vector<1x10x10x32xf32>
    %c0 = arith.constant 0 : index
    %c0_0 = arith.constant 0 : index
    %c0_1 = arith.constant 0 : index
    %c0_2 = arith.constant 0 : index
    %1 = vector.load %arg11[%c0, %c0_0, %c0_1, %c0_2] : memref<1x10x10x32xf32, #tpu.memory_space<vmem>>, vector<1x10x10x32xf32>
    tpu.vector_store %arg11[%c0, %c0_0, %c0_1, %c0_2], %0 {strides = array<i32>} : memref<1x10x10x32xf32, #tpu.memory_space<vmem>>, vector<1x10x10x32xf32>,
    %c0_3 = arith.constant 0 : index
    %c0_4 = arith.constant 0 : index
    %2 = vector.load %arg2[%c0_3, %c0_4] : memref<9x16xf32, #tpu.memory_space<vmem>>, vector<9x16xf32>
    %c0_5 = arith.constant 0 : index
    %c0_6 = arith.constant 0 : index
    %c0_7 = arith.constant 0 : index
    %c0_8 = arith.constant 0 : index
    %c0_9 = arith.constant 0 : index
    %3 = vector.load %arg1[%c0_5, %c0_6, %c0_7, %c0_8, %c0_9] : memref<4x1x9x9x16xbf16, #tpu.memory_space<vmem>>, vector<1x1x8x8x16xbf16>
    %4 = vector.shape_cast %3 : vector<1x1x8x8x16xbf16> to vector<1x8x8x16xbf16>
    %5 = arith.extf %4 : vector<1x8x8x16xbf16> to vector<1x8x8x16xf32>
    %6 = vector.extract_strided_slice %2 {offsets = [0, 0], sizes = [1, 16], strides = [1, 1]} : vector<9x16xf32> to vector<1x16xf32>
    %7 = vector.shape_cast %6 : vector<1x16xf32> to vector<1x1x1x16xf32>
    %8 = vector.broadcast %7 : vector<1x1x1x16xf32> to vector<1x8x8x16xf32>
    %9 = arith.mulf %5, %8 : vector<1x8x8x16xf32>
    %c1 = arith.constant 1 : index
    %c0_10 = arith.constant 0 : index
    %c0_11 = arith.constant 0 : index
    %c0_12 = arith.constant 0 : index
    %c0_13 = arith.constant 0 : index
    %10 = vector.load %arg1[%c1, %c0_10, %c0_11, %c0_12, %c0_13] : memref<4x1x9x9x16xbf16, #tpu.memory_space<vmem>>, vector<1x1x8x8x16xbf16>
    %11 = vector.shape_cast %10 : vector<1x1x8x8x16xbf16> to vector<1x8x8x16xbf16>
    %12 = arith.extf %11 : vector<1x8x8x16xbf16> to vector<1x8x8x16xf32>
    %13 = vector.extract_strided_slice %2 {offsets = [1, 0], sizes = [1, 16], strides = [1, 1]} : vector<9x16xf32> to vector<1x16xf32>
    %14 = vector.shape_cast %13 : vector<1x16xf32> to vector<1x1x1x16xf32>
    %15 = vector.broadcast %14 : vector<1x1x1x16xf32> to vector<1x8x8x16xf32>
    %16 = arith.mulf %12, %15 : vector<1x8x8x16xf32>
    %17 = arith.addf %9, %16 : vector<1x8x8x16xf32>
    %c0_14 = arith.constant 0 : index
    %c0_15 = arith.constant 0 : index
    %c0_16 = arith.constant 0 : index
    %c1_17 = arith.constant 1 : index
    %c0_18 = arith.constant 0 : index
    %18 = vector.load %arg1[%c0_14, %c0_15, %c0_16, %c1_17, %c0_18] : memref<4x1x9x9x16xbf16, #tpu.memory_space<vmem>>, vector<1x1x8x8x16xbf16>
    %19 = vector.shape_cast %18 : vector<1x1x8x8x16xbf16> to vector<1x8x8x16xbf16>
    %20 = arith.extf %19 : vector<1x8x8x16xbf16> to vector<1x8x8x16xf32>
    %21 = vector.extract_strided_slice %2 {offsets = [2, 0], sizes = [1, 16], strides = [1, 1]} : vector<9x16xf32> to vector<1x16xf32>
    %22 = vector.shape_cast %21 : vector<1x16xf32> to vector<1x1x1x16xf32>
    %23 = vector.broadcast %22 : vector<1x1x1x16xf32> to vector<1x8x8x16xf32>
    %24 = arith.mulf %20, %23 : vector<1x8x8x16xf32>
    %25 = arith.addf %17, %24 : vector<1x8x8x16xf32>
    %c2 = arith.constant 2 : index
    %c0_19 = arith.constant 0 : index
    %c0_20 = arith.constant 0 : index
    %c0_21 = arith.constant 0 : index
    %c0_22 = arith.constant 0 : index
    %26 = vector.load %arg1[%c2, %c0_19, %c0_20, %c0_21, %c0_22] : memref<4x1x9x9x16xbf16, #tpu.memory_space<vmem>>, vector<1x1x8x8x16xbf16>
    %27 = vector.shape_cast %26 : vector<1x1x8x8x16xbf16> to vector<1x8x8x16xbf16>
    %28 = arith.extf %27 : vector<1x8x8x16xbf16> to vector<1x8x8x16xf32>
    %29 = vector.extract_strided_slice %2 {offsets = [3, 0], sizes = [1, 16], strides = [1, 1]} : vector<9x16xf32> to vector<1x16xf32>
    %30 = vector.shape_cast %29 : vector<1x16xf32> to vector<1x1x1x16xf32>
    %31 = vector.broadcast %30 : vector<1x1x1x16xf32> to vector<1x8x8x16xf32>
    %32 = arith.mulf %28, %31 : vector<1x8x8x16xf32>
    %33 = arith.addf %25, %32 : vector<1x8x8x16xf32>
    %c3 = arith.constant 3 : index
    %c0_23 = arith.constant 0 : index
    %c0_24 = arith.constant 0 : index
    %c0_25 = arith.constant 0 : index
    %c0_26 = arith.constant 0 : index
    %34 = vector.load %arg1[%c3, %c0_23, %c0_24, %c0_25, %c0_26] : memref<4x1x9x9x16xbf16, #tpu.memory_space<vmem>>, vector<1x1x8x8x16xbf16>
    %35 = vector.shape_cast %34 : vector<1x1x8x8x16xbf16> to vector<1x8x8x16xbf16>
    %36 = arith.extf %35 : vector<1x8x8x16xbf16> to vector<1x8x8x16xf32>
    %37 = vector.extract_strided_slice %2 {offsets = [4, 0], sizes = [1, 16], strides = [1, 1]} : vector<9x16xf32> to vector<1x16xf32>
    %38 = vector.shape_cast %37 : vector<1x16xf32> to vector<1x1x1x16xf32>
    %39 = vector.broadcast %38 : vector<1x1x1x16xf32> to vector<1x8x8x16xf32>
    %40 = arith.mulf %36, %39 : vector<1x8x8x16xf32>
    %41 = arith.addf %33, %40 : vector<1x8x8x16xf32>
    %c2_27 = arith.constant 2 : index
    %c0_28 = arith.constant 0 : index
    %c0_29 = arith.constant 0 : index
    %c1_30 = arith.constant 1 : index
    %c0_31 = arith.constant 0 : index
    %42 = vector.load %arg1[%c2_27, %c0_28, %c0_29, %c1_30, %c0_31] : memref<4x1x9x9x16xbf16, #tpu.memory_space<vmem>>, vector<1x1x8x8x16xbf16>
    %43 = vector.shape_cast %42 : vector<1x1x8x8x16xbf16> to vector<1x8x8x16xbf16>
    %44 = arith.extf %43 : vector<1x8x8x16xbf16> to vector<1x8x8x16xf32>
    %45 = vector.extract_strided_slice %2 {offsets = [5, 0], sizes = [1, 16], strides = [1, 1]} : vector<9x16xf32> to vector<1x16xf32>
    %46 = vector.shape_cast %45 : vector<1x16xf32> to vector<1x1x1x16xf32>
    %47 = vector.broadcast %46 : vector<1x1x1x16xf32> to vector<1x8x8x16xf32>
    %48 = arith.mulf %44, %47 : vector<1x8x8x16xf32>
    %49 = arith.addf %41, %48 : vector<1x8x8x16xf32>
    %c0_32 = arith.constant 0 : index
    %c0_33 = arith.constant 0 : index
    %c1_34 = arith.constant 1 : index
    %c0_35 = arith.constant 0 : index
    %c0_36 = arith.constant 0 : index
    %50 = vector.load %arg1[%c0_32, %c0_33, %c1_34, %c0_35, %c0_36] : memref<4x1x9x9x16xbf16, #tpu.memory_space<vmem>>, vector<1x1x8x8x16xbf16>
    %51 = vector.shape_cast %50 : vector<1x1x8x8x16xbf16> to vector<1x8x8x16xbf16>
    %52 = arith.extf %51 : vector<1x8x8x16xbf16> to vector<1x8x8x16xf32>
    %53 = vector.extract_strided_slice %2 {offsets = [6, 0], sizes = [1, 16], strides = [1, 1]} : vector<9x16xf32> to vector<1x16xf32>
    %54 = vector.shape_cast %53 : vector<1x16xf32> to vector<1x1x1x16xf32>
    %55 = vector.broadcast %54 : vector<1x1x1x16xf32> to vector<1x8x8x16xf32>
    %56 = arith.mulf %52, %55 : vector<1x8x8x16xf32>
    %57 = arith.addf %49, %56 : vector<1x8x8x16xf32>
    %c1_37 = arith.constant 1 : index
    %c0_38 = arith.constant 0 : index
    %c1_39 = arith.constant 1 : index
    %c0_40 = arith.constant 0 : index
    %c0_41 = arith.constant 0 : index
    %58 = vector.load %arg1[%c1_37, %c0_38, %c1_39, %c0_40, %c0_41] : memref<4x1x9x9x16xbf16, #tpu.memory_space<vmem>>, vector<1x1x8x8x16xbf16>
    %59 = vector.shape_cast %58 : vector<1x1x8x8x16xbf16> to vector<1x8x8x16xbf16>
    %60 = arith.extf %59 : vector<1x8x8x16xbf16> to vector<1x8x8x16xf32>
    %61 = vector.extract_strided_slice %2 {offsets = [7, 0], sizes = [1, 16], strides = [1, 1]} : vector<9x16xf32> to vector<1x16xf32>
    %62 = vector.shape_cast %61 : vector<1x16xf32> to vector<1x1x1x16xf32>
    %63 = vector.broadcast %62 : vector<1x1x1x16xf32> to vector<1x8x8x16xf32>
    %64 = arith.mulf %60, %63 : vector<1x8x8x16xf32>
    %65 = arith.addf %57, %64 : vector<1x8x8x16xf32>
    %c0_42 = arith.constant 0 : index
    %c0_43 = arith.constant 0 : index
    %c1_44 = arith.constant 1 : index
    %c1_45 = arith.constant 1 : index
    %c0_46 = arith.constant 0 : index
    %66 = vector.load %arg1[%c0_42, %c0_43, %c1_44, %c1_45, %c0_46] : memref<4x1x9x9x16xbf16, #tpu.memory_space<vmem>>, vector<1x1x8x8x16xbf16>
    %67 = vector.shape_cast %66 : vector<1x1x8x8x16xbf16> to vector<1x8x8x16xbf16>
    %68 = arith.extf %67 : vector<1x8x8x16xbf16> to vector<1x8x8x16xf32>
    %69 = vector.extract_strided_slice %2 {offsets = [8, 0], sizes = [1, 16], strides = [1, 1]} : vector<9x16xf32> to vector<1x16xf32>
    %70 = vector.shape_cast %69 : vector<1x16xf32> to vector<1x1x1x16xf32>
    %71 = vector.broadcast %70 : vector<1x1x1x16xf32> to vector<1x8x8x16xf32>
    %72 = arith.mulf %68, %71 : vector<1x8x8x16xf32>
    %73 = arith.addf %65, %72 : vector<1x8x8x16xf32>
    %c0_47 = arith.constant 0 : index
    %c0_48 = arith.constant 0 : index
    %74 = vector.load %arg3[%c0_47, %c0_48] : memref<1x16xf32, #tpu.memory_space<vmem>>, vector<1x16xf32>
    %75 = vector.shape_cast %74 : vector<1x16xf32> to vector<1x1x1x16xf32>
    %76 = vector.broadcast %75 : vector<1x1x1x16xf32> to vector<1x8x8x16xf32>
    %77 = arith.addf %73, %76 : vector<1x8x8x16xf32>
    %cst_49 = arith.constant 0.000000e+00 : f32
    %cst_50 = arith.constant 6.000000e+00 : f32
    %78 = vector.broadcast %cst_49 : f32 to vector<1x8x8x16xf32>
    %79 = arith.maximumf %78, %77 : vector<1x8x8x16xf32>
    %80 = vector.broadcast %cst_50 : f32 to vector<1x8x8x16xf32>
    %81 = arith.minimumf %80, %79 : vector<1x8x8x16xf32>
    %82 = vector.shape_cast %81 : vector<1x8x8x16xf32> to vector<64x16xf32>
    %83 = arith.truncf %82 : vector<64x16xf32> to vector<64x16xbf16>
    %c0_51 = arith.constant 0 : index
    %c0_52 = arith.constant 0 : index
    %84 = vector.load %arg4[%c0_51, %c0_52] : memref<16x32xbf16, #tpu.memory_space<vmem>>, vector<16x32xbf16>
    %cst_53 = arith.constant dense<0.000000e+00> : vector<64x32xf32>
    %85 = tpu.matmul %83, %84, %cst_53 {dimension_numbers = #tpu.dot_dimension_numbers<[1], [0], [0], [1], [0, 0, 1, 1], [], []>} : vector<64x16xbf16>, vector<16x32xbf16>, vector<64x32xf32> -> vector<64x32xf32>
    %c0_54 = arith.constant 0 : index
    %c0_55 = arith.constant 0 : index
    %86 = vector.load %arg5[%c0_54, %c0_55] : memref<1x32xf32, #tpu.memory_space<vmem>>, vector<1x32xf32>
    %87 = vector.broadcast %86 : vector<1x32xf32> to vector<64x32xf32>
    %88 = arith.addf %85, %87 : vector<64x32xf32>
    %cst_56 = arith.constant 0.000000e+00 : f32
    %cst_57 = arith.constant 6.000000e+00 : f32
    %89 = vector.broadcast %cst_56 : f32 to vector<64x32xf32>
    %90 = arith.maximumf %89, %88 : vector<64x32xf32>
    %91 = vector.broadcast %cst_57 : f32 to vector<64x32xf32>
    %92 = arith.minimumf %91, %90 : vector<64x32xf32>
    %93 = vector.extract_strided_slice %92 {offsets = [0, 0], sizes = [8, 32], strides = [1, 1]} : vector<64x32xf32> to vector<8x32xf32>
    %c0_58 = arith.constant 0 : index
    %c1_59 = arith.constant 1 : index
    %c1_60 = arith.constant 1 : index
    %c0_61 = arith.constant 0 : index
    %94 = vector.load %arg11[%c0_58, %c1_59, %c1_60, %c0_61] : memref<1x10x10x32xf32, #tpu.memory_space<vmem>>, vector<1x1x8x32xf32>
    %95 = vector.shape_cast %94 : vector<1x1x8x32xf32> to vector<8x32xf32>
    %96 = vector.shape_cast %93 : vector<8x32xf32> to vector<1x1x8x32xf32>
    tpu.vector_store %arg11[%c0_58, %c1_59, %c1_60, %c0_61], %96 {strides = array<i32>} : memref<1x10x10x32xf32, #tpu.memory_space<vmem>>, vector<1x1x8x32xf32>,
    %97 = vector.extract_strided_slice %92 {offsets = [8, 0], sizes = [8, 32], strides = [1, 1]} : vector<64x32xf32> to vector<8x32xf32>
    %c0_62 = arith.constant 0 : index
    %c2_63 = arith.constant 2 : index
    %c1_64 = arith.constant 1 : index
    %c0_65 = arith.constant 0 : index
    %98 = vector.load %arg11[%c0_62, %c2_63, %c1_64, %c0_65] : memref<1x10x10x32xf32, #tpu.memory_space<vmem>>, vector<1x1x8x32xf32>
    %99 = vector.shape_cast %98 : vector<1x1x8x32xf32> to vector<8x32xf32>
    %100 = vector.shape_cast %97 : vector<8x32xf32> to vector<1x1x8x32xf32>
    tpu.vector_store %arg11[%c0_62, %c2_63, %c1_64, %c0_65], %100 {strides = array<i32>} : memref<1x10x10x32xf32, #tpu.memory_space<vmem>>, vector<1x1x8x32xf32>,
    %101 = vector.extract_strided_slice %92 {offsets = [16, 0], sizes = [8, 32], strides = [1, 1]} : vector<64x32xf32> to vector<8x32xf32>
    %c0_66 = arith.constant 0 : index
    %c3_67 = arith.constant 3 : index
    %c1_68 = arith.constant 1 : index
    %c0_69 = arith.constant 0 : index
    %102 = vector.load %arg11[%c0_66, %c3_67, %c1_68, %c0_69] : memref<1x10x10x32xf32, #tpu.memory_space<vmem>>, vector<1x1x8x32xf32>
    %103 = vector.shape_cast %102 : vector<1x1x8x32xf32> to vector<8x32xf32>
    %104 = vector.shape_cast %101 : vector<8x32xf32> to vector<1x1x8x32xf32>
    tpu.vector_store %arg11[%c0_66, %c3_67, %c1_68, %c0_69], %104 {strides = array<i32>} : memref<1x10x10x32xf32, #tpu.memory_space<vmem>>, vector<1x1x8x32xf32>,
    %105 = vector.extract_strided_slice %92 {offsets = [24, 0], sizes = [8, 32], strides = [1, 1]} : vector<64x32xf32> to vector<8x32xf32>
    %c0_70 = arith.constant 0 : index
    %c4 = arith.constant 4 : index
    %c1_71 = arith.constant 1 : index
    %c0_72 = arith.constant 0 : index
    %106 = vector.load %arg11[%c0_70, %c4, %c1_71, %c0_72] : memref<1x10x10x32xf32, #tpu.memory_space<vmem>>, vector<1x1x8x32xf32>
    %107 = vector.shape_cast %106 : vector<1x1x8x32xf32> to vector<8x32xf32>
    %108 = vector.shape_cast %105 : vector<8x32xf32> to vector<1x1x8x32xf32>
    tpu.vector_store %arg11[%c0_70, %c4, %c1_71, %c0_72], %108 {strides = array<i32>} : memref<1x10x10x32xf32, #tpu.memory_space<vmem>>, vector<1x1x8x32xf32>,
    %109 = vector.extract_strided_slice %92 {offsets = [32, 0], sizes = [8, 32], strides = [1, 1]} : vector<64x32xf32> to vector<8x32xf32>
    %c0_73 = arith.constant 0 : index
    %c5 = arith.constant 5 : index
    %c1_74 = arith.constant 1 : index
    %c0_75 = arith.constant 0 : index
    %110 = vector.load %arg11[%c0_73, %c5, %c1_74, %c0_75] : memref<1x10x10x32xf32, #tpu.memory_space<vmem>>, vector<1x1x8x32xf32>
    %111 = vector.shape_cast %110 : vector<1x1x8x32xf32> to vector<8x32xf32>
    %112 = vector.shape_cast %109 : vector<8x32xf32> to vector<1x1x8x32xf32>
    tpu.vector_store %arg11[%c0_73, %c5, %c1_74, %c0_75], %112 {strides = array<i32>} : memref<1x10x10x32xf32, #tpu.memory_space<vmem>>, vector<1x1x8x32xf32>,
    %113 = vector.extract_strided_slice %92 {offsets = [40, 0], sizes = [8, 32], strides = [1, 1]} : vector<64x32xf32> to vector<8x32xf32>
    %c0_76 = arith.constant 0 : index
    %c6 = arith.constant 6 : index
    %c1_77 = arith.constant 1 : index
    %c0_78 = arith.constant 0 : index
    %114 = vector.load %arg11[%c0_76, %c6, %c1_77, %c0_78] : memref<1x10x10x32xf32, #tpu.memory_space<vmem>>, vector<1x1x8x32xf32>
    %115 = vector.shape_cast %114 : vector<1x1x8x32xf32> to vector<8x32xf32>
    %116 = vector.shape_cast %113 : vector<8x32xf32> to vector<1x1x8x32xf32>
    tpu.vector_store %arg11[%c0_76, %c6, %c1_77, %c0_78], %116 {strides = array<i32>} : memref<1x10x10x32xf32, #tpu.memory_space<vmem>>, vector<1x1x8x32xf32>,
    %117 = vector.extract_strided_slice %92 {offsets = [48, 0], sizes = [8, 32], strides = [1, 1]} : vector<64x32xf32> to vector<8x32xf32>
    %c0_79 = arith.constant 0 : index
    %c7 = arith.constant 7 : index
    %c1_80 = arith.constant 1 : index
    %c0_81 = arith.constant 0 : index
    %118 = vector.load %arg11[%c0_79, %c7, %c1_80, %c0_81] : memref<1x10x10x32xf32, #tpu.memory_space<vmem>>, vector<1x1x8x32xf32>
    %119 = vector.shape_cast %118 : vector<1x1x8x32xf32> to vector<8x32xf32>
    %120 = vector.shape_cast %117 : vector<8x32xf32> to vector<1x1x8x32xf32>
    tpu.vector_store %arg11[%c0_79, %c7, %c1_80, %c0_81], %120 {strides = array<i32>} : memref<1x10x10x32xf32, #tpu.memory_space<vmem>>, vector<1x1x8x32xf32>,
    %121 = vector.extract_strided_slice %92 {offsets = [56, 0], sizes = [8, 32], strides = [1, 1]} : vector<64x32xf32> to vector<8x32xf32>
    %c0_82 = arith.constant 0 : index
    %c8 = arith.constant 8 : index
    %c1_83 = arith.constant 1 : index
    %c0_84 = arith.constant 0 : index
    %122 = vector.load %arg11[%c0_82, %c8, %c1_83, %c0_84] : memref<1x10x10x32xf32, #tpu.memory_space<vmem>>, vector<1x1x8x32xf32>
    %123 = vector.shape_cast %122 : vector<1x1x8x32xf32> to vector<8x32xf32>
    %124 = vector.shape_cast %121 : vector<8x32xf32> to vector<1x1x8x32xf32>
    tpu.vector_store %arg11[%c0_82, %c8, %c1_83, %c0_84], %124 {strides = array<i32>} : memref<1x10x10x32xf32, #tpu.memory_space<vmem>>, vector<1x1x8x32xf32>,
    %c0_85 = arith.constant 0 : index
    %c0_86 = arith.constant 0 : index
    %125 = vector.load %arg6[%c0_85, %c0_86] : memref<9x32xf32, #tpu.memory_space<vmem>>, vector<9x32xf32>
    %c0_87 = arith.constant 0 : index
    %c0_88 = arith.constant 0 : index
    %c0_89 = arith.constant 0 : index
    %c0_90 = arith.constant 0 : index
    %126 = vector.load %arg11[%c0_87, %c0_88, %c0_89, %c0_90] : memref<1x10x10x32xf32, #tpu.memory_space<vmem>>, vector<1x8x8x32xf32>
    %127 = vector.extract_strided_slice %125 {offsets = [0, 0], sizes = [1, 32], strides = [1, 1]} : vector<9x32xf32> to vector<1x32xf32>
    %128 = vector.shape_cast %127 : vector<1x32xf32> to vector<1x1x1x32xf32>
    %129 = vector.broadcast %128 : vector<1x1x1x32xf32> to vector<1x8x8x32xf32>
    %130 = arith.mulf %126, %129 : vector<1x8x8x32xf32>
    %c0_91 = arith.constant 0 : index
    %c0_92 = arith.constant 0 : index
    %c1_93 = arith.constant 1 : index
    %c0_94 = arith.constant 0 : index
    %131 = vector.load %arg11[%c0_91, %c0_92, %c1_93, %c0_94] : memref<1x10x10x32xf32, #tpu.memory_space<vmem>>, vector<1x8x8x32xf32>
    %132 = vector.extract_strided_slice %125 {offsets = [1, 0], sizes = [1, 32], strides = [1, 1]} : vector<9x32xf32> to vector<1x32xf32>
    %133 = vector.shape_cast %132 : vector<1x32xf32> to vector<1x1x1x32xf32>
    %134 = vector.broadcast %133 : vector<1x1x1x32xf32> to vector<1x8x8x32xf32>
    %135 = arith.mulf %131, %134 : vector<1x8x8x32xf32>
    %136 = arith.addf %130, %135 : vector<1x8x8x32xf32>
    %c0_95 = arith.constant 0 : index
    %c0_96 = arith.constant 0 : index
    %c2_97 = arith.constant 2 : index
    %c0_98 = arith.constant 0 : index
    %137 = vector.load %arg11[%c0_95, %c0_96, %c2_97, %c0_98] : memref<1x10x10x32xf32, #tpu.memory_space<vmem>>, vector<1x8x8x32xf32>
    %138 = vector.extract_strided_slice %125 {offsets = [2, 0], sizes = [1, 32], strides = [1, 1]} : vector<9x32xf32> to vector<1x32xf32>
    %139 = vector.shape_cast %138 : vector<1x32xf32> to vector<1x1x1x32xf32>
    %140 = vector.broadcast %139 : vector<1x1x1x32xf32> to vector<1x8x8x32xf32>
    %141 = arith.mulf %137, %140 : vector<1x8x8x32xf32>
    %142 = arith.addf %136, %141 : vector<1x8x8x32xf32>
    %c0_99 = arith.constant 0 : index
    %c1_100 = arith.constant 1 : index
    %c0_101 = arith.constant 0 : index
    %c0_102 = arith.constant 0 : index
    %143 = vector.load %arg11[%c0_99, %c1_100, %c0_101, %c0_102] : memref<1x10x10x32xf32, #tpu.memory_space<vmem>>, vector<1x8x8x32xf32>
    %144 = vector.extract_strided_slice %125 {offsets = [3, 0], sizes = [1, 32], strides = [1, 1]} : vector<9x32xf32> to vector<1x32xf32>
    %145 = vector.shape_cast %144 : vector<1x32xf32> to vector<1x1x1x32xf32>
    %146 = vector.broadcast %145 : vector<1x1x1x32xf32> to vector<1x8x8x32xf32>
    %147 = arith.mulf %143, %146 : vector<1x8x8x32xf32>
    %148 = arith.addf %142, %147 : vector<1x8x8x32xf32>
    %c0_103 = arith.constant 0 : index
    %c1_104 = arith.constant 1 : index
    %c1_105 = arith.constant 1 : index
    %c0_106 = arith.constant 0 : index
    %149 = vector.load %arg11[%c0_103, %c1_104, %c1_105, %c0_106] : memref<1x10x10x32xf32, #tpu.memory_space<vmem>>, vector<1x8x8x32xf32>
    %150 = vector.extract_strided_slice %125 {offsets = [4, 0], sizes = [1, 32], strides = [1, 1]} : vector<9x32xf32> to vector<1x32xf32>
    %151 = vector.shape_cast %150 : vector<1x32xf32> to vector<1x1x1x32xf32>
    %152 = vector.broadcast %151 : vector<1x1x1x32xf32> to vector<1x8x8x32xf32>
    %153 = arith.mulf %149, %152 : vector<1x8x8x32xf32>
    %154 = arith.addf %148, %153 : vector<1x8x8x32xf32>
    %c0_107 = arith.constant 0 : index
    %c1_108 = arith.constant 1 : index
    %c2_109 = arith.constant 2 : index
    %c0_110 = arith.constant 0 : index
    %155 = vector.load %arg11[%c0_107, %c1_108, %c2_109, %c0_110] : memref<1x10x10x32xf32, #tpu.memory_space<vmem>>, vector<1x8x8x32xf32>
    %156 = vector.extract_strided_slice %125 {offsets = [5, 0], sizes = [1, 32], strides = [1, 1]} : vector<9x32xf32> to vector<1x32xf32>
    %157 = vector.shape_cast %156 : vector<1x32xf32> to vector<1x1x1x32xf32>
    %158 = vector.broadcast %157 : vector<1x1x1x32xf32> to vector<1x8x8x32xf32>
    %159 = arith.mulf %155, %158 : vector<1x8x8x32xf32>
    %160 = arith.addf %154, %159 : vector<1x8x8x32xf32>
    %c0_111 = arith.constant 0 : index
    %c2_112 = arith.constant 2 : index
    %c0_113 = arith.constant 0 : index
    %c0_114 = arith.constant 0 : index
    %161 = vector.load %arg11[%c0_111, %c2_112, %c0_113, %c0_114] : memref<1x10x10x32xf32, #tpu.memory_space<vmem>>, vector<1x8x8x32xf32>
    %162 = vector.extract_strided_slice %125 {offsets = [6, 0], sizes = [1, 32], strides = [1, 1]} : vector<9x32xf32> to vector<1x32xf32>
    %163 = vector.shape_cast %162 : vector<1x32xf32> to vector<1x1x1x32xf32>
    %164 = vector.broadcast %163 : vector<1x1x1x32xf32> to vector<1x8x8x32xf32>
    %165 = arith.mulf %161, %164 : vector<1x8x8x32xf32>
    %166 = arith.addf %160, %165 : vector<1x8x8x32xf32>
    %c0_115 = arith.constant 0 : index
    %c2_116 = arith.constant 2 : index
    %c1_117 = arith.constant 1 : index
    %c0_118 = arith.constant 0 : index
    %167 = vector.load %arg11[%c0_115, %c2_116, %c1_117, %c0_118] : memref<1x10x10x32xf32, #tpu.memory_space<vmem>>, vector<1x8x8x32xf32>
    %168 = vector.extract_strided_slice %125 {offsets = [7, 0], sizes = [1, 32], strides = [1, 1]} : vector<9x32xf32> to vector<1x32xf32>
    %169 = vector.shape_cast %168 : vector<1x32xf32> to vector<1x1x1x32xf32>
    %170 = vector.broadcast %169 : vector<1x1x1x32xf32> to vector<1x8x8x32xf32>
    %171 = arith.mulf %167, %170 : vector<1x8x8x32xf32>
    %172 = arith.addf %166, %171 : vector<1x8x8x32xf32>
    %c0_119 = arith.constant 0 : index
    %c2_120 = arith.constant 2 : index
    %c2_121 = arith.constant 2 : index
    %c0_122 = arith.constant 0 : index
    %173 = vector.load %arg11[%c0_119, %c2_120, %c2_121, %c0_122] : memref<1x10x10x32xf32, #tpu.memory_space<vmem>>, vector<1x8x8x32xf32>
    %174 = vector.extract_strided_slice %125 {offsets = [8, 0], sizes = [1, 32], strides = [1, 1]} : vector<9x32xf32> to vector<1x32xf32>
    %175 = vector.shape_cast %174 : vector<1x32xf32> to vector<1x1x1x32xf32>
    %176 = vector.broadcast %175 : vector<1x1x1x32xf32> to vector<1x8x8x32xf32>
    %177 = arith.mulf %173, %176 : vector<1x8x8x32xf32>
    %178 = arith.addf %172, %177 : vector<1x8x8x32xf32>
    %c0_123 = arith.constant 0 : index
    %c0_124 = arith.constant 0 : index
    %179 = vector.load %arg7[%c0_123, %c0_124] : memref<1x32xf32, #tpu.memory_space<vmem>>, vector<1x32xf32>
    %180 = vector.shape_cast %179 : vector<1x32xf32> to vector<1x1x1x32xf32>
    %181 = vector.broadcast %180 : vector<1x1x1x32xf32> to vector<1x8x8x32xf32>
    %182 = arith.addf %178, %181 : vector<1x8x8x32xf32>
    %cst_125 = arith.constant 0.000000e+00 : f32
    %cst_126 = arith.constant 6.000000e+00 : f32
    %183 = vector.broadcast %cst_125 : f32 to vector<1x8x8x32xf32>
    %184 = arith.maximumf %183, %182 : vector<1x8x8x32xf32>
    %185 = vector.broadcast %cst_126 : f32 to vector<1x8x8x32xf32>
    %186 = arith.minimumf %185, %184 : vector<1x8x8x32xf32>
    %187 = vector.shape_cast %186 : vector<1x8x8x32xf32> to vector<64x32xf32>
    %188 = arith.truncf %187 : vector<64x32xf32> to vector<64x32xbf16>
    %c0_127 = arith.constant 0 : index
    %c0_128 = arith.constant 0 : index
    %189 = vector.load %arg8[%c0_127, %c0_128] : memref<32x32xbf16, #tpu.memory_space<vmem>>, vector<32x32xbf16>
    %cst_129 = arith.constant dense<0.000000e+00> : vector<64x32xf32>
    %190 = tpu.matmul %188, %189, %cst_129 {dimension_numbers = #tpu.dot_dimension_numbers<[1], [0], [0], [1], [0, 0, 1, 1], [], []>} : vector<64x32xbf16>, vector<32x32xbf16>, vector<64x32xf32> -> vector<64x32xf32>
    %c0_130 = arith.constant 0 : index
    %c0_131 = arith.constant 0 : index
    %191 = vector.load %arg9[%c0_130, %c0_131] : memref<1x32xf32, #tpu.memory_space<vmem>>, vector<1x32xf32>
    %192 = vector.broadcast %191 : vector<1x32xf32> to vector<64x32xf32>
    %193 = arith.addf %190, %192 : vector<64x32xf32>
    %cst_132 = arith.constant 0.000000e+00 : f32
    %cst_133 = arith.constant 6.000000e+00 : f32
    %194 = vector.broadcast %cst_132 : f32 to vector<64x32xf32>
    %195 = arith.maximumf %194, %193 : vector<64x32xf32>
    %196 = vector.broadcast %cst_133 : f32 to vector<64x32xf32>
    %197 = arith.minimumf %196, %195 : vector<64x32xf32>
    %198 = arith.truncf %197 : vector<64x32xf32> to vector<64x32xbf16>
    %c0_134 = arith.constant 0 : index
    %c0_135 = arith.constant 0 : index
    %c0_136 = arith.constant 0 : index
    %199 = vector.load %arg10[%c0_134, %c0_135, %c0_136] : memref<1x64x32xbf16, #tpu.memory_space<vmem>>, vector<1x64x32xbf16>
    %200 = vector.shape_cast %199 : vector<1x64x32xbf16> to vector<64x32xbf16>
    %201 = vector.shape_cast %198 : vector<64x32xbf16> to vector<1x64x32xbf16>
    tpu.vector_store %arg10[%c0_134, %c0_135, %c0_136], %201 {strides = array<i32>} : memref<1x64x32xbf16, #tpu.memory_space<vmem>>, vector<1x64x32xbf16>,
    return
  }
  func.func @transform_0(%arg0: i32) -> (i32, i32, i32, i32, i32) {
    %c0_i32 = arith.constant 0 : i32
    %c0_i32_0 = arith.constant 0 : i32
    %c0_i32_1 = arith.constant 0 : i32
    %c0_i32_2 = arith.constant 0 : i32
    %c0_i32_3 = arith.constant 0 : i32
    return %c0_i32, %arg0, %c0_i32_0, %c0_i32_1, %c0_i32_2 : i32, i32, i32, i32, i32
  }
  func.func @transform_1(%arg0: i32) -> (i32, i32) {
    %c0_i32 = arith.constant 0 : i32
    %c0_i32_0 = arith.constant 0 : i32
    %c0_i32_1 = arith.constant 0 : i32
    return %c0_i32, %c0_i32_0 : i32, i32
  }
  func.func @transform_2(%arg0: i32) -> (i32, i32) {
    %c0_i32 = arith.constant 0 : i32
    %c0_i32_0 = arith.constant 0 : i32
    %c0_i32_1 = arith.constant 0 : i32
    return %c0_i32, %c0_i32_0 : i32, i32
  }
  func.func @transform_3(%arg0: i32) -> (i32, i32) {
    %c0_i32 = arith.constant 0 : i32
    %c0_i32_0 = arith.constant 0 : i32
    %c0_i32_1 = arith.constant 0 : i32
    return %c0_i32, %c0_i32_0 : i32, i32
  }
  func.func @transform_4(%arg0: i32) -> (i32, i32) {
    %c0_i32 = arith.constant 0 : i32
    %c0_i32_0 = arith.constant 0 : i32
    %c0_i32_1 = arith.constant 0 : i32
    return %c0_i32, %c0_i32_0 : i32, i32
  }
  func.func @transform_5(%arg0: i32) -> (i32, i32) {
    %c0_i32 = arith.constant 0 : i32
    %c0_i32_0 = arith.constant 0 : i32
    %c0_i32_1 = arith.constant 0 : i32
    return %c0_i32, %c0_i32_0 : i32, i32
  }
  func.func @transform_6(%arg0: i32) -> (i32, i32) {
    %c0_i32 = arith.constant 0 : i32
    %c0_i32_0 = arith.constant 0 : i32
    %c0_i32_1 = arith.constant 0 : i32
    return %c0_i32, %c0_i32_0 : i32, i32
  }
  func.func @transform_7(%arg0: i32) -> (i32, i32) {
    %c0_i32 = arith.constant 0 : i32
    %c0_i32_0 = arith.constant 0 : i32
    %c0_i32_1 = arith.constant 0 : i32
    return %c0_i32, %c0_i32_0 : i32, i32
  }
  func.func @transform_8(%arg0: i32) -> (i32, i32) {
    %c0_i32 = arith.constant 0 : i32
    %c0_i32_0 = arith.constant 0 : i32
    %c0_i32_1 = arith.constant 0 : i32
    return %c0_i32, %c0_i32_0 : i32, i32
  }
  func.func @transform_9(%arg0: i32) -> (i32, i32, i32) {
    %c0_i32 = arith.constant 0 : i32
    %c0_i32_0 = arith.constant 0 : i32
    %c0_i32_1 = arith.constant 0 : i32
    return %arg0, %c0_i32, %c0_i32_0 : i32, i32, i32
  }
}

module attributes {stable_mosaic.version = 11 : i64} {
  func.func @kernel(%arg0: i32, %arg1: memref<4x1x5x5x32xbf16, #tpu.memory_space<vmem>>, %arg2: memref<9x32xf32, #tpu.memory_space<vmem>>, %arg3: memref<1x32xf32, #tpu.memory_space<vmem>>, %arg4: memref<32x64xbf16, #tpu.memory_space<vmem>>, %arg5: memref<1x64xf32, #tpu.memory_space<vmem>>, %arg6: memref<9x64xf32, #tpu.memory_space<vmem>>, %arg7: memref<1x64xf32, #tpu.memory_space<vmem>>, %arg8: memref<64x64xbf16, #tpu.memory_space<vmem>>, %arg9: memref<1x64xf32, #tpu.memory_space<vmem>>, %arg10: memref<1x16x64xbf16, #tpu.memory_space<vmem>>, %arg11: memref<1x6x6x64xf32, #tpu.memory_space<vmem>>) attributes {dimension_semantics = [#tpu.dimension_semantics<parallel>], iteration_bounds = array<i64: 2>, scalar_prefetch = 0 : i64, scratch_operands = 1 : i64, tpu.core_type = #tpu.core_type<tc>, window_params = [{transform_indices = @transform_0, window_bounds = array<i64: 4, 1, 5, 5, 32>}, {pipeline_mode = #tpu.pipeline_mode<synchronous>, transform_indices = @transform_1, window_bounds = array<i64: 9, 32>}, {pipeline_mode = #tpu.pipeline_mode<synchronous>, transform_indices = @transform_2, window_bounds = array<i64: 1, 32>}, {pipeline_mode = #tpu.pipeline_mode<synchronous>, transform_indices = @transform_3, window_bounds = array<i64: 32, 64>}, {pipeline_mode = #tpu.pipeline_mode<synchronous>, transform_indices = @transform_4, window_bounds = array<i64: 1, 64>}, {pipeline_mode = #tpu.pipeline_mode<synchronous>, transform_indices = @transform_5, window_bounds = array<i64: 9, 64>}, {pipeline_mode = #tpu.pipeline_mode<synchronous>, transform_indices = @transform_6, window_bounds = array<i64: 1, 64>}, {pipeline_mode = #tpu.pipeline_mode<synchronous>, transform_indices = @transform_7, window_bounds = array<i64: 64, 64>}, {pipeline_mode = #tpu.pipeline_mode<synchronous>, transform_indices = @transform_8, window_bounds = array<i64: 1, 64>}, {transform_indices = @transform_9, window_bounds = array<i64: 1, 16, 64>}]} {
    %cst = arith.constant 0.000000e+00 : f32
    %0 = vector.broadcast %cst : f32 to vector<1x6x6x64xf32>
    %c0 = arith.constant 0 : index
    %c0_0 = arith.constant 0 : index
    %c0_1 = arith.constant 0 : index
    %c0_2 = arith.constant 0 : index
    %1 = vector.load %arg11[%c0, %c0_0, %c0_1, %c0_2] : memref<1x6x6x64xf32, #tpu.memory_space<vmem>>, vector<1x6x6x64xf32>
    tpu.vector_store %arg11[%c0, %c0_0, %c0_1, %c0_2], %0 {strides = array<i32>} : memref<1x6x6x64xf32, #tpu.memory_space<vmem>>, vector<1x6x6x64xf32>,
    %c0_3 = arith.constant 0 : index
    %c0_4 = arith.constant 0 : index
    %2 = vector.load %arg2[%c0_3, %c0_4] : memref<9x32xf32, #tpu.memory_space<vmem>>, vector<9x32xf32>
    %c0_5 = arith.constant 0 : index
    %c0_6 = arith.constant 0 : index
    %c0_7 = arith.constant 0 : index
    %c0_8 = arith.constant 0 : index
    %c0_9 = arith.constant 0 : index
    %3 = vector.load %arg1[%c0_5, %c0_6, %c0_7, %c0_8, %c0_9] : memref<4x1x5x5x32xbf16, #tpu.memory_space<vmem>>, vector<1x1x4x4x32xbf16>
    %4 = vector.shape_cast %3 : vector<1x1x4x4x32xbf16> to vector<1x4x4x32xbf16>
    %5 = arith.extf %4 : vector<1x4x4x32xbf16> to vector<1x4x4x32xf32>
    %6 = vector.extract_strided_slice %2 {offsets = [0, 0], sizes = [1, 32], strides = [1, 1]} : vector<9x32xf32> to vector<1x32xf32>
    %7 = vector.shape_cast %6 : vector<1x32xf32> to vector<1x1x1x32xf32>
    %8 = vector.broadcast %7 : vector<1x1x1x32xf32> to vector<1x4x4x32xf32>
    %9 = arith.mulf %5, %8 : vector<1x4x4x32xf32>
    %c1 = arith.constant 1 : index
    %c0_10 = arith.constant 0 : index
    %c0_11 = arith.constant 0 : index
    %c0_12 = arith.constant 0 : index
    %c0_13 = arith.constant 0 : index
    %10 = vector.load %arg1[%c1, %c0_10, %c0_11, %c0_12, %c0_13] : memref<4x1x5x5x32xbf16, #tpu.memory_space<vmem>>, vector<1x1x4x4x32xbf16>
    %11 = vector.shape_cast %10 : vector<1x1x4x4x32xbf16> to vector<1x4x4x32xbf16>
    %12 = arith.extf %11 : vector<1x4x4x32xbf16> to vector<1x4x4x32xf32>
    %13 = vector.extract_strided_slice %2 {offsets = [1, 0], sizes = [1, 32], strides = [1, 1]} : vector<9x32xf32> to vector<1x32xf32>
    %14 = vector.shape_cast %13 : vector<1x32xf32> to vector<1x1x1x32xf32>
    %15 = vector.broadcast %14 : vector<1x1x1x32xf32> to vector<1x4x4x32xf32>
    %16 = arith.mulf %12, %15 : vector<1x4x4x32xf32>
    %17 = arith.addf %9, %16 : vector<1x4x4x32xf32>
    %c0_14 = arith.constant 0 : index
    %c0_15 = arith.constant 0 : index
    %c0_16 = arith.constant 0 : index
    %c1_17 = arith.constant 1 : index
    %c0_18 = arith.constant 0 : index
    %18 = vector.load %arg1[%c0_14, %c0_15, %c0_16, %c1_17, %c0_18] : memref<4x1x5x5x32xbf16, #tpu.memory_space<vmem>>, vector<1x1x4x4x32xbf16>
    %19 = vector.shape_cast %18 : vector<1x1x4x4x32xbf16> to vector<1x4x4x32xbf16>
    %20 = arith.extf %19 : vector<1x4x4x32xbf16> to vector<1x4x4x32xf32>
    %21 = vector.extract_strided_slice %2 {offsets = [2, 0], sizes = [1, 32], strides = [1, 1]} : vector<9x32xf32> to vector<1x32xf32>
    %22 = vector.shape_cast %21 : vector<1x32xf32> to vector<1x1x1x32xf32>
    %23 = vector.broadcast %22 : vector<1x1x1x32xf32> to vector<1x4x4x32xf32>
    %24 = arith.mulf %20, %23 : vector<1x4x4x32xf32>
    %25 = arith.addf %17, %24 : vector<1x4x4x32xf32>
    %c2 = arith.constant 2 : index
    %c0_19 = arith.constant 0 : index
    %c0_20 = arith.constant 0 : index
    %c0_21 = arith.constant 0 : index
    %c0_22 = arith.constant 0 : index
    %26 = vector.load %arg1[%c2, %c0_19, %c0_20, %c0_21, %c0_22] : memref<4x1x5x5x32xbf16, #tpu.memory_space<vmem>>, vector<1x1x4x4x32xbf16>
    %27 = vector.shape_cast %26 : vector<1x1x4x4x32xbf16> to vector<1x4x4x32xbf16>
    %28 = arith.extf %27 : vector<1x4x4x32xbf16> to vector<1x4x4x32xf32>
    %29 = vector.extract_strided_slice %2 {offsets = [3, 0], sizes = [1, 32], strides = [1, 1]} : vector<9x32xf32> to vector<1x32xf32>
    %30 = vector.shape_cast %29 : vector<1x32xf32> to vector<1x1x1x32xf32>
    %31 = vector.broadcast %30 : vector<1x1x1x32xf32> to vector<1x4x4x32xf32>
    %32 = arith.mulf %28, %31 : vector<1x4x4x32xf32>
    %33 = arith.addf %25, %32 : vector<1x4x4x32xf32>
    %c3 = arith.constant 3 : index
    %c0_23 = arith.constant 0 : index
    %c0_24 = arith.constant 0 : index
    %c0_25 = arith.constant 0 : index
    %c0_26 = arith.constant 0 : index
    %34 = vector.load %arg1[%c3, %c0_23, %c0_24, %c0_25, %c0_26] : memref<4x1x5x5x32xbf16, #tpu.memory_space<vmem>>, vector<1x1x4x4x32xbf16>
    %35 = vector.shape_cast %34 : vector<1x1x4x4x32xbf16> to vector<1x4x4x32xbf16>
    %36 = arith.extf %35 : vector<1x4x4x32xbf16> to vector<1x4x4x32xf32>
    %37 = vector.extract_strided_slice %2 {offsets = [4, 0], sizes = [1, 32], strides = [1, 1]} : vector<9x32xf32> to vector<1x32xf32>
    %38 = vector.shape_cast %37 : vector<1x32xf32> to vector<1x1x1x32xf32>
    %39 = vector.broadcast %38 : vector<1x1x1x32xf32> to vector<1x4x4x32xf32>
    %40 = arith.mulf %36, %39 : vector<1x4x4x32xf32>
    %41 = arith.addf %33, %40 : vector<1x4x4x32xf32>
    %c2_27 = arith.constant 2 : index
    %c0_28 = arith.constant 0 : index
    %c0_29 = arith.constant 0 : index
    %c1_30 = arith.constant 1 : index
    %c0_31 = arith.constant 0 : index
    %42 = vector.load %arg1[%c2_27, %c0_28, %c0_29, %c1_30, %c0_31] : memref<4x1x5x5x32xbf16, #tpu.memory_space<vmem>>, vector<1x1x4x4x32xbf16>
    %43 = vector.shape_cast %42 : vector<1x1x4x4x32xbf16> to vector<1x4x4x32xbf16>
    %44 = arith.extf %43 : vector<1x4x4x32xbf16> to vector<1x4x4x32xf32>
    %45 = vector.extract_strided_slice %2 {offsets = [5, 0], sizes = [1, 32], strides = [1, 1]} : vector<9x32xf32> to vector<1x32xf32>
    %46 = vector.shape_cast %45 : vector<1x32xf32> to vector<1x1x1x32xf32>
    %47 = vector.broadcast %46 : vector<1x1x1x32xf32> to vector<1x4x4x32xf32>
    %48 = arith.mulf %44, %47 : vector<1x4x4x32xf32>
    %49 = arith.addf %41, %48 : vector<1x4x4x32xf32>
    %c0_32 = arith.constant 0 : index
    %c0_33 = arith.constant 0 : index
    %c1_34 = arith.constant 1 : index
    %c0_35 = arith.constant 0 : index
    %c0_36 = arith.constant 0 : index
    %50 = vector.load %arg1[%c0_32, %c0_33, %c1_34, %c0_35, %c0_36] : memref<4x1x5x5x32xbf16, #tpu.memory_space<vmem>>, vector<1x1x4x4x32xbf16>
    %51 = vector.shape_cast %50 : vector<1x1x4x4x32xbf16> to vector<1x4x4x32xbf16>
    %52 = arith.extf %51 : vector<1x4x4x32xbf16> to vector<1x4x4x32xf32>
    %53 = vector.extract_strided_slice %2 {offsets = [6, 0], sizes = [1, 32], strides = [1, 1]} : vector<9x32xf32> to vector<1x32xf32>
    %54 = vector.shape_cast %53 : vector<1x32xf32> to vector<1x1x1x32xf32>
    %55 = vector.broadcast %54 : vector<1x1x1x32xf32> to vector<1x4x4x32xf32>
    %56 = arith.mulf %52, %55 : vector<1x4x4x32xf32>
    %57 = arith.addf %49, %56 : vector<1x4x4x32xf32>
    %c1_37 = arith.constant 1 : index
    %c0_38 = arith.constant 0 : index
    %c1_39 = arith.constant 1 : index
    %c0_40 = arith.constant 0 : index
    %c0_41 = arith.constant 0 : index
    %58 = vector.load %arg1[%c1_37, %c0_38, %c1_39, %c0_40, %c0_41] : memref<4x1x5x5x32xbf16, #tpu.memory_space<vmem>>, vector<1x1x4x4x32xbf16>
    %59 = vector.shape_cast %58 : vector<1x1x4x4x32xbf16> to vector<1x4x4x32xbf16>
    %60 = arith.extf %59 : vector<1x4x4x32xbf16> to vector<1x4x4x32xf32>
    %61 = vector.extract_strided_slice %2 {offsets = [7, 0], sizes = [1, 32], strides = [1, 1]} : vector<9x32xf32> to vector<1x32xf32>
    %62 = vector.shape_cast %61 : vector<1x32xf32> to vector<1x1x1x32xf32>
    %63 = vector.broadcast %62 : vector<1x1x1x32xf32> to vector<1x4x4x32xf32>
    %64 = arith.mulf %60, %63 : vector<1x4x4x32xf32>
    %65 = arith.addf %57, %64 : vector<1x4x4x32xf32>
    %c0_42 = arith.constant 0 : index
    %c0_43 = arith.constant 0 : index
    %c1_44 = arith.constant 1 : index
    %c1_45 = arith.constant 1 : index
    %c0_46 = arith.constant 0 : index
    %66 = vector.load %arg1[%c0_42, %c0_43, %c1_44, %c1_45, %c0_46] : memref<4x1x5x5x32xbf16, #tpu.memory_space<vmem>>, vector<1x1x4x4x32xbf16>
    %67 = vector.shape_cast %66 : vector<1x1x4x4x32xbf16> to vector<1x4x4x32xbf16>
    %68 = arith.extf %67 : vector<1x4x4x32xbf16> to vector<1x4x4x32xf32>
    %69 = vector.extract_strided_slice %2 {offsets = [8, 0], sizes = [1, 32], strides = [1, 1]} : vector<9x32xf32> to vector<1x32xf32>
    %70 = vector.shape_cast %69 : vector<1x32xf32> to vector<1x1x1x32xf32>
    %71 = vector.broadcast %70 : vector<1x1x1x32xf32> to vector<1x4x4x32xf32>
    %72 = arith.mulf %68, %71 : vector<1x4x4x32xf32>
    %73 = arith.addf %65, %72 : vector<1x4x4x32xf32>
    %c0_47 = arith.constant 0 : index
    %c0_48 = arith.constant 0 : index
    %74 = vector.load %arg3[%c0_47, %c0_48] : memref<1x32xf32, #tpu.memory_space<vmem>>, vector<1x32xf32>
    %75 = vector.shape_cast %74 : vector<1x32xf32> to vector<1x1x1x32xf32>
    %76 = vector.broadcast %75 : vector<1x1x1x32xf32> to vector<1x4x4x32xf32>
    %77 = arith.addf %73, %76 : vector<1x4x4x32xf32>
    %cst_49 = arith.constant 0.000000e+00 : f32
    %cst_50 = arith.constant 6.000000e+00 : f32
    %78 = vector.broadcast %cst_49 : f32 to vector<1x4x4x32xf32>
    %79 = arith.maximumf %78, %77 : vector<1x4x4x32xf32>
    %80 = vector.broadcast %cst_50 : f32 to vector<1x4x4x32xf32>
    %81 = arith.minimumf %80, %79 : vector<1x4x4x32xf32>
    %82 = vector.shape_cast %81 : vector<1x4x4x32xf32> to vector<16x32xf32>
    %83 = arith.truncf %82 : vector<16x32xf32> to vector<16x32xbf16>
    %c0_51 = arith.constant 0 : index
    %c0_52 = arith.constant 0 : index
    %84 = vector.load %arg4[%c0_51, %c0_52] : memref<32x64xbf16, #tpu.memory_space<vmem>>, vector<32x64xbf16>
    %cst_53 = arith.constant dense<0.000000e+00> : vector<16x64xf32>
    %85 = tpu.matmul %83, %84, %cst_53 {dimension_numbers = #tpu.dot_dimension_numbers<[1], [0], [0], [1], [0, 0, 1, 1], [], []>} : vector<16x32xbf16>, vector<32x64xbf16>, vector<16x64xf32> -> vector<16x64xf32>
    %c0_54 = arith.constant 0 : index
    %c0_55 = arith.constant 0 : index
    %86 = vector.load %arg5[%c0_54, %c0_55] : memref<1x64xf32, #tpu.memory_space<vmem>>, vector<1x64xf32>
    %87 = vector.broadcast %86 : vector<1x64xf32> to vector<16x64xf32>
    %88 = arith.addf %85, %87 : vector<16x64xf32>
    %cst_56 = arith.constant 0.000000e+00 : f32
    %cst_57 = arith.constant 6.000000e+00 : f32
    %89 = vector.broadcast %cst_56 : f32 to vector<16x64xf32>
    %90 = arith.maximumf %89, %88 : vector<16x64xf32>
    %91 = vector.broadcast %cst_57 : f32 to vector<16x64xf32>
    %92 = arith.minimumf %91, %90 : vector<16x64xf32>
    %93 = vector.extract_strided_slice %92 {offsets = [0, 0], sizes = [4, 64], strides = [1, 1]} : vector<16x64xf32> to vector<4x64xf32>
    %c0_58 = arith.constant 0 : index
    %c1_59 = arith.constant 1 : index
    %c1_60 = arith.constant 1 : index
    %c0_61 = arith.constant 0 : index
    %94 = vector.load %arg11[%c0_58, %c1_59, %c1_60, %c0_61] : memref<1x6x6x64xf32, #tpu.memory_space<vmem>>, vector<1x1x4x64xf32>
    %95 = vector.shape_cast %94 : vector<1x1x4x64xf32> to vector<4x64xf32>
    %96 = vector.shape_cast %93 : vector<4x64xf32> to vector<1x1x4x64xf32>
    tpu.vector_store %arg11[%c0_58, %c1_59, %c1_60, %c0_61], %96 {strides = array<i32>} : memref<1x6x6x64xf32, #tpu.memory_space<vmem>>, vector<1x1x4x64xf32>,
    %97 = vector.extract_strided_slice %92 {offsets = [4, 0], sizes = [4, 64], strides = [1, 1]} : vector<16x64xf32> to vector<4x64xf32>
    %c0_62 = arith.constant 0 : index
    %c2_63 = arith.constant 2 : index
    %c1_64 = arith.constant 1 : index
    %c0_65 = arith.constant 0 : index
    %98 = vector.load %arg11[%c0_62, %c2_63, %c1_64, %c0_65] : memref<1x6x6x64xf32, #tpu.memory_space<vmem>>, vector<1x1x4x64xf32>
    %99 = vector.shape_cast %98 : vector<1x1x4x64xf32> to vector<4x64xf32>
    %100 = vector.shape_cast %97 : vector<4x64xf32> to vector<1x1x4x64xf32>
    tpu.vector_store %arg11[%c0_62, %c2_63, %c1_64, %c0_65], %100 {strides = array<i32>} : memref<1x6x6x64xf32, #tpu.memory_space<vmem>>, vector<1x1x4x64xf32>,
    %101 = vector.extract_strided_slice %92 {offsets = [8, 0], sizes = [4, 64], strides = [1, 1]} : vector<16x64xf32> to vector<4x64xf32>
    %c0_66 = arith.constant 0 : index
    %c3_67 = arith.constant 3 : index
    %c1_68 = arith.constant 1 : index
    %c0_69 = arith.constant 0 : index
    %102 = vector.load %arg11[%c0_66, %c3_67, %c1_68, %c0_69] : memref<1x6x6x64xf32, #tpu.memory_space<vmem>>, vector<1x1x4x64xf32>
    %103 = vector.shape_cast %102 : vector<1x1x4x64xf32> to vector<4x64xf32>
    %104 = vector.shape_cast %101 : vector<4x64xf32> to vector<1x1x4x64xf32>
    tpu.vector_store %arg11[%c0_66, %c3_67, %c1_68, %c0_69], %104 {strides = array<i32>} : memref<1x6x6x64xf32, #tpu.memory_space<vmem>>, vector<1x1x4x64xf32>,
    %105 = vector.extract_strided_slice %92 {offsets = [12, 0], sizes = [4, 64], strides = [1, 1]} : vector<16x64xf32> to vector<4x64xf32>
    %c0_70 = arith.constant 0 : index
    %c4 = arith.constant 4 : index
    %c1_71 = arith.constant 1 : index
    %c0_72 = arith.constant 0 : index
    %106 = vector.load %arg11[%c0_70, %c4, %c1_71, %c0_72] : memref<1x6x6x64xf32, #tpu.memory_space<vmem>>, vector<1x1x4x64xf32>
    %107 = vector.shape_cast %106 : vector<1x1x4x64xf32> to vector<4x64xf32>
    %108 = vector.shape_cast %105 : vector<4x64xf32> to vector<1x1x4x64xf32>
    tpu.vector_store %arg11[%c0_70, %c4, %c1_71, %c0_72], %108 {strides = array<i32>} : memref<1x6x6x64xf32, #tpu.memory_space<vmem>>, vector<1x1x4x64xf32>,
    %c0_73 = arith.constant 0 : index
    %c0_74 = arith.constant 0 : index
    %109 = vector.load %arg6[%c0_73, %c0_74] : memref<9x64xf32, #tpu.memory_space<vmem>>, vector<9x64xf32>
    %c0_75 = arith.constant 0 : index
    %c0_76 = arith.constant 0 : index
    %c0_77 = arith.constant 0 : index
    %c0_78 = arith.constant 0 : index
    %110 = vector.load %arg11[%c0_75, %c0_76, %c0_77, %c0_78] : memref<1x6x6x64xf32, #tpu.memory_space<vmem>>, vector<1x4x4x64xf32>
    %111 = vector.extract_strided_slice %109 {offsets = [0, 0], sizes = [1, 64], strides = [1, 1]} : vector<9x64xf32> to vector<1x64xf32>
    %112 = vector.shape_cast %111 : vector<1x64xf32> to vector<1x1x1x64xf32>
    %113 = vector.broadcast %112 : vector<1x1x1x64xf32> to vector<1x4x4x64xf32>
    %114 = arith.mulf %110, %113 : vector<1x4x4x64xf32>
    %c0_79 = arith.constant 0 : index
    %c0_80 = arith.constant 0 : index
    %c1_81 = arith.constant 1 : index
    %c0_82 = arith.constant 0 : index
    %115 = vector.load %arg11[%c0_79, %c0_80, %c1_81, %c0_82] : memref<1x6x6x64xf32, #tpu.memory_space<vmem>>, vector<1x4x4x64xf32>
    %116 = vector.extract_strided_slice %109 {offsets = [1, 0], sizes = [1, 64], strides = [1, 1]} : vector<9x64xf32> to vector<1x64xf32>
    %117 = vector.shape_cast %116 : vector<1x64xf32> to vector<1x1x1x64xf32>
    %118 = vector.broadcast %117 : vector<1x1x1x64xf32> to vector<1x4x4x64xf32>
    %119 = arith.mulf %115, %118 : vector<1x4x4x64xf32>
    %120 = arith.addf %114, %119 : vector<1x4x4x64xf32>
    %c0_83 = arith.constant 0 : index
    %c0_84 = arith.constant 0 : index
    %c2_85 = arith.constant 2 : index
    %c0_86 = arith.constant 0 : index
    %121 = vector.load %arg11[%c0_83, %c0_84, %c2_85, %c0_86] : memref<1x6x6x64xf32, #tpu.memory_space<vmem>>, vector<1x4x4x64xf32>
    %122 = vector.extract_strided_slice %109 {offsets = [2, 0], sizes = [1, 64], strides = [1, 1]} : vector<9x64xf32> to vector<1x64xf32>
    %123 = vector.shape_cast %122 : vector<1x64xf32> to vector<1x1x1x64xf32>
    %124 = vector.broadcast %123 : vector<1x1x1x64xf32> to vector<1x4x4x64xf32>
    %125 = arith.mulf %121, %124 : vector<1x4x4x64xf32>
    %126 = arith.addf %120, %125 : vector<1x4x4x64xf32>
    %c0_87 = arith.constant 0 : index
    %c1_88 = arith.constant 1 : index
    %c0_89 = arith.constant 0 : index
    %c0_90 = arith.constant 0 : index
    %127 = vector.load %arg11[%c0_87, %c1_88, %c0_89, %c0_90] : memref<1x6x6x64xf32, #tpu.memory_space<vmem>>, vector<1x4x4x64xf32>
    %128 = vector.extract_strided_slice %109 {offsets = [3, 0], sizes = [1, 64], strides = [1, 1]} : vector<9x64xf32> to vector<1x64xf32>
    %129 = vector.shape_cast %128 : vector<1x64xf32> to vector<1x1x1x64xf32>
    %130 = vector.broadcast %129 : vector<1x1x1x64xf32> to vector<1x4x4x64xf32>
    %131 = arith.mulf %127, %130 : vector<1x4x4x64xf32>
    %132 = arith.addf %126, %131 : vector<1x4x4x64xf32>
    %c0_91 = arith.constant 0 : index
    %c1_92 = arith.constant 1 : index
    %c1_93 = arith.constant 1 : index
    %c0_94 = arith.constant 0 : index
    %133 = vector.load %arg11[%c0_91, %c1_92, %c1_93, %c0_94] : memref<1x6x6x64xf32, #tpu.memory_space<vmem>>, vector<1x4x4x64xf32>
    %134 = vector.extract_strided_slice %109 {offsets = [4, 0], sizes = [1, 64], strides = [1, 1]} : vector<9x64xf32> to vector<1x64xf32>
    %135 = vector.shape_cast %134 : vector<1x64xf32> to vector<1x1x1x64xf32>
    %136 = vector.broadcast %135 : vector<1x1x1x64xf32> to vector<1x4x4x64xf32>
    %137 = arith.mulf %133, %136 : vector<1x4x4x64xf32>
    %138 = arith.addf %132, %137 : vector<1x4x4x64xf32>
    %c0_95 = arith.constant 0 : index
    %c1_96 = arith.constant 1 : index
    %c2_97 = arith.constant 2 : index
    %c0_98 = arith.constant 0 : index
    %139 = vector.load %arg11[%c0_95, %c1_96, %c2_97, %c0_98] : memref<1x6x6x64xf32, #tpu.memory_space<vmem>>, vector<1x4x4x64xf32>
    %140 = vector.extract_strided_slice %109 {offsets = [5, 0], sizes = [1, 64], strides = [1, 1]} : vector<9x64xf32> to vector<1x64xf32>
    %141 = vector.shape_cast %140 : vector<1x64xf32> to vector<1x1x1x64xf32>
    %142 = vector.broadcast %141 : vector<1x1x1x64xf32> to vector<1x4x4x64xf32>
    %143 = arith.mulf %139, %142 : vector<1x4x4x64xf32>
    %144 = arith.addf %138, %143 : vector<1x4x4x64xf32>
    %c0_99 = arith.constant 0 : index
    %c2_100 = arith.constant 2 : index
    %c0_101 = arith.constant 0 : index
    %c0_102 = arith.constant 0 : index
    %145 = vector.load %arg11[%c0_99, %c2_100, %c0_101, %c0_102] : memref<1x6x6x64xf32, #tpu.memory_space<vmem>>, vector<1x4x4x64xf32>
    %146 = vector.extract_strided_slice %109 {offsets = [6, 0], sizes = [1, 64], strides = [1, 1]} : vector<9x64xf32> to vector<1x64xf32>
    %147 = vector.shape_cast %146 : vector<1x64xf32> to vector<1x1x1x64xf32>
    %148 = vector.broadcast %147 : vector<1x1x1x64xf32> to vector<1x4x4x64xf32>
    %149 = arith.mulf %145, %148 : vector<1x4x4x64xf32>
    %150 = arith.addf %144, %149 : vector<1x4x4x64xf32>
    %c0_103 = arith.constant 0 : index
    %c2_104 = arith.constant 2 : index
    %c1_105 = arith.constant 1 : index
    %c0_106 = arith.constant 0 : index
    %151 = vector.load %arg11[%c0_103, %c2_104, %c1_105, %c0_106] : memref<1x6x6x64xf32, #tpu.memory_space<vmem>>, vector<1x4x4x64xf32>
    %152 = vector.extract_strided_slice %109 {offsets = [7, 0], sizes = [1, 64], strides = [1, 1]} : vector<9x64xf32> to vector<1x64xf32>
    %153 = vector.shape_cast %152 : vector<1x64xf32> to vector<1x1x1x64xf32>
    %154 = vector.broadcast %153 : vector<1x1x1x64xf32> to vector<1x4x4x64xf32>
    %155 = arith.mulf %151, %154 : vector<1x4x4x64xf32>
    %156 = arith.addf %150, %155 : vector<1x4x4x64xf32>
    %c0_107 = arith.constant 0 : index
    %c2_108 = arith.constant 2 : index
    %c2_109 = arith.constant 2 : index
    %c0_110 = arith.constant 0 : index
    %157 = vector.load %arg11[%c0_107, %c2_108, %c2_109, %c0_110] : memref<1x6x6x64xf32, #tpu.memory_space<vmem>>, vector<1x4x4x64xf32>
    %158 = vector.extract_strided_slice %109 {offsets = [8, 0], sizes = [1, 64], strides = [1, 1]} : vector<9x64xf32> to vector<1x64xf32>
    %159 = vector.shape_cast %158 : vector<1x64xf32> to vector<1x1x1x64xf32>
    %160 = vector.broadcast %159 : vector<1x1x1x64xf32> to vector<1x4x4x64xf32>
    %161 = arith.mulf %157, %160 : vector<1x4x4x64xf32>
    %162 = arith.addf %156, %161 : vector<1x4x4x64xf32>
    %c0_111 = arith.constant 0 : index
    %c0_112 = arith.constant 0 : index
    %163 = vector.load %arg7[%c0_111, %c0_112] : memref<1x64xf32, #tpu.memory_space<vmem>>, vector<1x64xf32>
    %164 = vector.shape_cast %163 : vector<1x64xf32> to vector<1x1x1x64xf32>
    %165 = vector.broadcast %164 : vector<1x1x1x64xf32> to vector<1x4x4x64xf32>
    %166 = arith.addf %162, %165 : vector<1x4x4x64xf32>
    %cst_113 = arith.constant 0.000000e+00 : f32
    %cst_114 = arith.constant 6.000000e+00 : f32
    %167 = vector.broadcast %cst_113 : f32 to vector<1x4x4x64xf32>
    %168 = arith.maximumf %167, %166 : vector<1x4x4x64xf32>
    %169 = vector.broadcast %cst_114 : f32 to vector<1x4x4x64xf32>
    %170 = arith.minimumf %169, %168 : vector<1x4x4x64xf32>
    %171 = vector.shape_cast %170 : vector<1x4x4x64xf32> to vector<16x64xf32>
    %172 = arith.truncf %171 : vector<16x64xf32> to vector<16x64xbf16>
    %c0_115 = arith.constant 0 : index
    %c0_116 = arith.constant 0 : index
    %173 = vector.load %arg8[%c0_115, %c0_116] : memref<64x64xbf16, #tpu.memory_space<vmem>>, vector<64x64xbf16>
    %cst_117 = arith.constant dense<0.000000e+00> : vector<16x64xf32>
    %174 = tpu.matmul %172, %173, %cst_117 {dimension_numbers = #tpu.dot_dimension_numbers<[1], [0], [0], [1], [0, 0, 1, 1], [], []>} : vector<16x64xbf16>, vector<64x64xbf16>, vector<16x64xf32> -> vector<16x64xf32>
    %c0_118 = arith.constant 0 : index
    %c0_119 = arith.constant 0 : index
    %175 = vector.load %arg9[%c0_118, %c0_119] : memref<1x64xf32, #tpu.memory_space<vmem>>, vector<1x64xf32>
    %176 = vector.broadcast %175 : vector<1x64xf32> to vector<16x64xf32>
    %177 = arith.addf %174, %176 : vector<16x64xf32>
    %cst_120 = arith.constant 0.000000e+00 : f32
    %cst_121 = arith.constant 6.000000e+00 : f32
    %178 = vector.broadcast %cst_120 : f32 to vector<16x64xf32>
    %179 = arith.maximumf %178, %177 : vector<16x64xf32>
    %180 = vector.broadcast %cst_121 : f32 to vector<16x64xf32>
    %181 = arith.minimumf %180, %179 : vector<16x64xf32>
    %182 = arith.truncf %181 : vector<16x64xf32> to vector<16x64xbf16>
    %c0_122 = arith.constant 0 : index
    %c0_123 = arith.constant 0 : index
    %c0_124 = arith.constant 0 : index
    %183 = vector.load %arg10[%c0_122, %c0_123, %c0_124] : memref<1x16x64xbf16, #tpu.memory_space<vmem>>, vector<1x16x64xbf16>
    %184 = vector.shape_cast %183 : vector<1x16x64xbf16> to vector<16x64xbf16>
    %185 = vector.shape_cast %182 : vector<16x64xbf16> to vector<1x16x64xbf16>
    tpu.vector_store %arg10[%c0_122, %c0_123, %c0_124], %185 {strides = array<i32>} : memref<1x16x64xbf16, #tpu.memory_space<vmem>>, vector<1x16x64xbf16>,
    return
  }
  func.func @transform_0(%arg0: i32) -> (i32, i32, i32, i32, i32) {
    %c0_i32 = arith.constant 0 : i32
    %c0_i32_0 = arith.constant 0 : i32
    %c0_i32_1 = arith.constant 0 : i32
    %c0_i32_2 = arith.constant 0 : i32
    %c0_i32_3 = arith.constant 0 : i32
    return %c0_i32, %arg0, %c0_i32_0, %c0_i32_1, %c0_i32_2 : i32, i32, i32, i32, i32
  }
  func.func @transform_1(%arg0: i32) -> (i32, i32) {
    %c0_i32 = arith.constant 0 : i32
    %c0_i32_0 = arith.constant 0 : i32
    %c0_i32_1 = arith.constant 0 : i32
    return %c0_i32, %c0_i32_0 : i32, i32
  }
  func.func @transform_2(%arg0: i32) -> (i32, i32) {
    %c0_i32 = arith.constant 0 : i32
    %c0_i32_0 = arith.constant 0 : i32
    %c0_i32_1 = arith.constant 0 : i32
    return %c0_i32, %c0_i32_0 : i32, i32
  }
  func.func @transform_3(%arg0: i32) -> (i32, i32) {
    %c0_i32 = arith.constant 0 : i32
    %c0_i32_0 = arith.constant 0 : i32
    %c0_i32_1 = arith.constant 0 : i32
    return %c0_i32, %c0_i32_0 : i32, i32
  }
  func.func @transform_4(%arg0: i32) -> (i32, i32) {
    %c0_i32 = arith.constant 0 : i32
    %c0_i32_0 = arith.constant 0 : i32
    %c0_i32_1 = arith.constant 0 : i32
    return %c0_i32, %c0_i32_0 : i32, i32
  }
  func.func @transform_5(%arg0: i32) -> (i32, i32) {
    %c0_i32 = arith.constant 0 : i32
    %c0_i32_0 = arith.constant 0 : i32
    %c0_i32_1 = arith.constant 0 : i32
    return %c0_i32, %c0_i32_0 : i32, i32
  }
  func.func @transform_6(%arg0: i32) -> (i32, i32) {
    %c0_i32 = arith.constant 0 : i32
    %c0_i32_0 = arith.constant 0 : i32
    %c0_i32_1 = arith.constant 0 : i32
    return %c0_i32, %c0_i32_0 : i32, i32
  }
  func.func @transform_7(%arg0: i32) -> (i32, i32) {
    %c0_i32 = arith.constant 0 : i32
    %c0_i32_0 = arith.constant 0 : i32
    %c0_i32_1 = arith.constant 0 : i32
    return %c0_i32, %c0_i32_0 : i32, i32
  }
  func.func @transform_8(%arg0: i32) -> (i32, i32) {
    %c0_i32 = arith.constant 0 : i32
    %c0_i32_0 = arith.constant 0 : i32
    %c0_i32_1 = arith.constant 0 : i32
    return %c0_i32, %c0_i32_0 : i32, i32
  }
  func.func @transform_9(%arg0: i32) -> (i32, i32, i32) {
    %c0_i32 = arith.constant 0 : i32
    %c0_i32_0 = arith.constant 0 : i32
    %c0_i32_1 = arith.constant 0 : i32
    return %arg0, %c0_i32, %c0_i32_0 : i32, i32, i32
  }
}

module attributes {stable_mosaic.version = 11 : i64} {
  func.func @kernel(%arg0: i32, %arg1: memref<4x1x3x3x64xbf16, #tpu.memory_space<vmem>>, %arg2: memref<9x64xf32, #tpu.memory_space<vmem>>, %arg3: memref<1x64xf32, #tpu.memory_space<vmem>>, %arg4: memref<64x128xbf16, #tpu.memory_space<vmem>>, %arg5: memref<1x128xf32, #tpu.memory_space<vmem>>, %arg6: memref<9x128xf32, #tpu.memory_space<vmem>>, %arg7: memref<1x128xf32, #tpu.memory_space<vmem>>, %arg8: memref<128x128xbf16, #tpu.memory_space<vmem>>, %arg9: memref<1x128xf32, #tpu.memory_space<vmem>>, %arg10: memref<9x128xf32, #tpu.memory_space<vmem>>, %arg11: memref<1x128xf32, #tpu.memory_space<vmem>>, %arg12: memref<128x128xbf16, #tpu.memory_space<vmem>>, %arg13: memref<1x128xf32, #tpu.memory_space<vmem>>, %arg14: memref<9x128xf32, #tpu.memory_space<vmem>>, %arg15: memref<1x128xf32, #tpu.memory_space<vmem>>, %arg16: memref<128x128xbf16, #tpu.memory_space<vmem>>, %arg17: memref<1x128xf32, #tpu.memory_space<vmem>>, %arg18: memref<9x128xf32, #tpu.memory_space<vmem>>, %arg19: memref<1x128xf32, #tpu.memory_space<vmem>>, %arg20: memref<128x128xbf16, #tpu.memory_space<vmem>>, %arg21: memref<1x128xf32, #tpu.memory_space<vmem>>, %arg22: memref<9x128xf32, #tpu.memory_space<vmem>>, %arg23: memref<1x128xf32, #tpu.memory_space<vmem>>, %arg24: memref<128x128xbf16, #tpu.memory_space<vmem>>, %arg25: memref<1x128xf32, #tpu.memory_space<vmem>>, %arg26: memref<1x4x128xbf16, #tpu.memory_space<vmem>>, %arg27: memref<1x4x4x128xf32, #tpu.memory_space<vmem>>) attributes {dimension_semantics = [#tpu.dimension_semantics<parallel>], iteration_bounds = array<i64: 2>, scalar_prefetch = 0 : i64, scratch_operands = 1 : i64, tpu.core_type = #tpu.core_type<tc>, window_params = [{transform_indices = @transform_0, window_bounds = array<i64: 4, 1, 3, 3, 64>}, {pipeline_mode = #tpu.pipeline_mode<synchronous>, transform_indices = @transform_1, window_bounds = array<i64: 9, 64>}, {pipeline_mode = #tpu.pipeline_mode<synchronous>, transform_indices = @transform_2, window_bounds = array<i64: 1, 64>}, {pipeline_mode = #tpu.pipeline_mode<synchronous>, transform_indices = @transform_3, window_bounds = array<i64: 64, 128>}, {pipeline_mode = #tpu.pipeline_mode<synchronous>, transform_indices = @transform_4, window_bounds = array<i64: 1, 128>}, {pipeline_mode = #tpu.pipeline_mode<synchronous>, transform_indices = @transform_5, window_bounds = array<i64: 9, 128>}, {pipeline_mode = #tpu.pipeline_mode<synchronous>, transform_indices = @transform_6, window_bounds = array<i64: 1, 128>}, {pipeline_mode = #tpu.pipeline_mode<synchronous>, transform_indices = @transform_7, window_bounds = array<i64: 128, 128>}, {pipeline_mode = #tpu.pipeline_mode<synchronous>, transform_indices = @transform_8, window_bounds = array<i64: 1, 128>}, {pipeline_mode = #tpu.pipeline_mode<synchronous>, transform_indices = @transform_9, window_bounds = array<i64: 9, 128>}, {pipeline_mode = #tpu.pipeline_mode<synchronous>, transform_indices = @transform_10, window_bounds = array<i64: 1, 128>}, {pipeline_mode = #tpu.pipeline_mode<synchronous>, transform_indices = @transform_11, window_bounds = array<i64: 128, 128>}, {pipeline_mode = #tpu.pipeline_mode<synchronous>, transform_indices = @transform_12, window_bounds = array<i64: 1, 128>}, {pipeline_mode = #tpu.pipeline_mode<synchronous>, transform_indices = @transform_13, window_bounds = array<i64: 9, 128>}, {pipeline_mode = #tpu.pipeline_mode<synchronous>, transform_indices = @transform_14, window_bounds = array<i64: 1, 128>}, {pipeline_mode = #tpu.pipeline_mode<synchronous>, transform_indices = @transform_15, window_bounds = array<i64: 128, 128>}, {pipeline_mode = #tpu.pipeline_mode<synchronous>, transform_indices = @transform_16, window_bounds = array<i64: 1, 128>}, {pipeline_mode = #tpu.pipeline_mode<synchronous>, transform_indices = @transform_17, window_bounds = array<i64: 9, 128>}, {pipeline_mode = #tpu.pipeline_mode<synchronous>, transform_indices = @transform_18, window_bounds = array<i64: 1, 128>}, {pipeline_mode = #tpu.pipeline_mode<synchronous>, transform_indices = @transform_19, window_bounds = array<i64: 128, 128>}, {pipeline_mode = #tpu.pipeline_mode<synchronous>, transform_indices = @transform_20, window_bounds = array<i64: 1, 128>}, {pipeline_mode = #tpu.pipeline_mode<synchronous>, transform_indices = @transform_21, window_bounds = array<i64: 9, 128>}, {pipeline_mode = #tpu.pipeline_mode<synchronous>, transform_indices = @transform_22, window_bounds = array<i64: 1, 128>}, {pipeline_mode = #tpu.pipeline_mode<synchronous>, transform_indices = @transform_23, window_bounds = array<i64: 128, 128>}, {pipeline_mode = #tpu.pipeline_mode<synchronous>, transform_indices = @transform_24, window_bounds = array<i64: 1, 128>}, {transform_indices = @transform_25, window_bounds = array<i64: 1, 4, 128>}]} {
    %cst = arith.constant 0.000000e+00 : f32
    %0 = vector.broadcast %cst : f32 to vector<1x4x4x128xf32>
    %c0 = arith.constant 0 : index
    %c0_0 = arith.constant 0 : index
    %c0_1 = arith.constant 0 : index
    %c0_2 = arith.constant 0 : index
    %1 = vector.load %arg27[%c0, %c0_0, %c0_1, %c0_2] : memref<1x4x4x128xf32, #tpu.memory_space<vmem>>, vector<1x4x4x128xf32>
    tpu.vector_store %arg27[%c0, %c0_0, %c0_1, %c0_2], %0 {strides = array<i32>} : memref<1x4x4x128xf32, #tpu.memory_space<vmem>>, vector<1x4x4x128xf32>,
    %c0_3 = arith.constant 0 : index
    %c0_4 = arith.constant 0 : index
    %2 = vector.load %arg2[%c0_3, %c0_4] : memref<9x64xf32, #tpu.memory_space<vmem>>, vector<9x64xf32>
    %c0_5 = arith.constant 0 : index
    %c0_6 = arith.constant 0 : index
    %c0_7 = arith.constant 0 : index
    %c0_8 = arith.constant 0 : index
    %c0_9 = arith.constant 0 : index
    %3 = vector.load %arg1[%c0_5, %c0_6, %c0_7, %c0_8, %c0_9] : memref<4x1x3x3x64xbf16, #tpu.memory_space<vmem>>, vector<1x1x2x2x64xbf16>
    %4 = vector.shape_cast %3 : vector<1x1x2x2x64xbf16> to vector<1x2x2x64xbf16>
    %5 = arith.extf %4 : vector<1x2x2x64xbf16> to vector<1x2x2x64xf32>
    %6 = vector.extract_strided_slice %2 {offsets = [0, 0], sizes = [1, 64], strides = [1, 1]} : vector<9x64xf32> to vector<1x64xf32>
    %7 = vector.shape_cast %6 : vector<1x64xf32> to vector<1x1x1x64xf32>
    %8 = vector.broadcast %7 : vector<1x1x1x64xf32> to vector<1x2x2x64xf32>
    %9 = arith.mulf %5, %8 : vector<1x2x2x64xf32>
    %c1 = arith.constant 1 : index
    %c0_10 = arith.constant 0 : index
    %c0_11 = arith.constant 0 : index
    %c0_12 = arith.constant 0 : index
    %c0_13 = arith.constant 0 : index
    %10 = vector.load %arg1[%c1, %c0_10, %c0_11, %c0_12, %c0_13] : memref<4x1x3x3x64xbf16, #tpu.memory_space<vmem>>, vector<1x1x2x2x64xbf16>
    %11 = vector.shape_cast %10 : vector<1x1x2x2x64xbf16> to vector<1x2x2x64xbf16>
    %12 = arith.extf %11 : vector<1x2x2x64xbf16> to vector<1x2x2x64xf32>
    %13 = vector.extract_strided_slice %2 {offsets = [1, 0], sizes = [1, 64], strides = [1, 1]} : vector<9x64xf32> to vector<1x64xf32>
    %14 = vector.shape_cast %13 : vector<1x64xf32> to vector<1x1x1x64xf32>
    %15 = vector.broadcast %14 : vector<1x1x1x64xf32> to vector<1x2x2x64xf32>
    %16 = arith.mulf %12, %15 : vector<1x2x2x64xf32>
    %17 = arith.addf %9, %16 : vector<1x2x2x64xf32>
    %c0_14 = arith.constant 0 : index
    %c0_15 = arith.constant 0 : index
    %c0_16 = arith.constant 0 : index
    %c1_17 = arith.constant 1 : index
    %c0_18 = arith.constant 0 : index
    %18 = vector.load %arg1[%c0_14, %c0_15, %c0_16, %c1_17, %c0_18] : memref<4x1x3x3x64xbf16, #tpu.memory_space<vmem>>, vector<1x1x2x2x64xbf16>
    %19 = vector.shape_cast %18 : vector<1x1x2x2x64xbf16> to vector<1x2x2x64xbf16>
    %20 = arith.extf %19 : vector<1x2x2x64xbf16> to vector<1x2x2x64xf32>
    %21 = vector.extract_strided_slice %2 {offsets = [2, 0], sizes = [1, 64], strides = [1, 1]} : vector<9x64xf32> to vector<1x64xf32>
    %22 = vector.shape_cast %21 : vector<1x64xf32> to vector<1x1x1x64xf32>
    %23 = vector.broadcast %22 : vector<1x1x1x64xf32> to vector<1x2x2x64xf32>
    %24 = arith.mulf %20, %23 : vector<1x2x2x64xf32>
    %25 = arith.addf %17, %24 : vector<1x2x2x64xf32>
    %c2 = arith.constant 2 : index
    %c0_19 = arith.constant 0 : index
    %c0_20 = arith.constant 0 : index
    %c0_21 = arith.constant 0 : index
    %c0_22 = arith.constant 0 : index
    %26 = vector.load %arg1[%c2, %c0_19, %c0_20, %c0_21, %c0_22] : memref<4x1x3x3x64xbf16, #tpu.memory_space<vmem>>, vector<1x1x2x2x64xbf16>
    %27 = vector.shape_cast %26 : vector<1x1x2x2x64xbf16> to vector<1x2x2x64xbf16>
    %28 = arith.extf %27 : vector<1x2x2x64xbf16> to vector<1x2x2x64xf32>
    %29 = vector.extract_strided_slice %2 {offsets = [3, 0], sizes = [1, 64], strides = [1, 1]} : vector<9x64xf32> to vector<1x64xf32>
    %30 = vector.shape_cast %29 : vector<1x64xf32> to vector<1x1x1x64xf32>
    %31 = vector.broadcast %30 : vector<1x1x1x64xf32> to vector<1x2x2x64xf32>
    %32 = arith.mulf %28, %31 : vector<1x2x2x64xf32>
    %33 = arith.addf %25, %32 : vector<1x2x2x64xf32>
    %c3 = arith.constant 3 : index
    %c0_23 = arith.constant 0 : index
    %c0_24 = arith.constant 0 : index
    %c0_25 = arith.constant 0 : index
    %c0_26 = arith.constant 0 : index
    %34 = vector.load %arg1[%c3, %c0_23, %c0_24, %c0_25, %c0_26] : memref<4x1x3x3x64xbf16, #tpu.memory_space<vmem>>, vector<1x1x2x2x64xbf16>
    %35 = vector.shape_cast %34 : vector<1x1x2x2x64xbf16> to vector<1x2x2x64xbf16>
    %36 = arith.extf %35 : vector<1x2x2x64xbf16> to vector<1x2x2x64xf32>
    %37 = vector.extract_strided_slice %2 {offsets = [4, 0], sizes = [1, 64], strides = [1, 1]} : vector<9x64xf32> to vector<1x64xf32>
    %38 = vector.shape_cast %37 : vector<1x64xf32> to vector<1x1x1x64xf32>
    %39 = vector.broadcast %38 : vector<1x1x1x64xf32> to vector<1x2x2x64xf32>
    %40 = arith.mulf %36, %39 : vector<1x2x2x64xf32>
    %41 = arith.addf %33, %40 : vector<1x2x2x64xf32>
    %c2_27 = arith.constant 2 : index
    %c0_28 = arith.constant 0 : index
    %c0_29 = arith.constant 0 : index
    %c1_30 = arith.constant 1 : index
    %c0_31 = arith.constant 0 : index
    %42 = vector.load %arg1[%c2_27, %c0_28, %c0_29, %c1_30, %c0_31] : memref<4x1x3x3x64xbf16, #tpu.memory_space<vmem>>, vector<1x1x2x2x64xbf16>
    %43 = vector.shape_cast %42 : vector<1x1x2x2x64xbf16> to vector<1x2x2x64xbf16>
    %44 = arith.extf %43 : vector<1x2x2x64xbf16> to vector<1x2x2x64xf32>
    %45 = vector.extract_strided_slice %2 {offsets = [5, 0], sizes = [1, 64], strides = [1, 1]} : vector<9x64xf32> to vector<1x64xf32>
    %46 = vector.shape_cast %45 : vector<1x64xf32> to vector<1x1x1x64xf32>
    %47 = vector.broadcast %46 : vector<1x1x1x64xf32> to vector<1x2x2x64xf32>
    %48 = arith.mulf %44, %47 : vector<1x2x2x64xf32>
    %49 = arith.addf %41, %48 : vector<1x2x2x64xf32>
    %c0_32 = arith.constant 0 : index
    %c0_33 = arith.constant 0 : index
    %c1_34 = arith.constant 1 : index
    %c0_35 = arith.constant 0 : index
    %c0_36 = arith.constant 0 : index
    %50 = vector.load %arg1[%c0_32, %c0_33, %c1_34, %c0_35, %c0_36] : memref<4x1x3x3x64xbf16, #tpu.memory_space<vmem>>, vector<1x1x2x2x64xbf16>
    %51 = vector.shape_cast %50 : vector<1x1x2x2x64xbf16> to vector<1x2x2x64xbf16>
    %52 = arith.extf %51 : vector<1x2x2x64xbf16> to vector<1x2x2x64xf32>
    %53 = vector.extract_strided_slice %2 {offsets = [6, 0], sizes = [1, 64], strides = [1, 1]} : vector<9x64xf32> to vector<1x64xf32>
    %54 = vector.shape_cast %53 : vector<1x64xf32> to vector<1x1x1x64xf32>
    %55 = vector.broadcast %54 : vector<1x1x1x64xf32> to vector<1x2x2x64xf32>
    %56 = arith.mulf %52, %55 : vector<1x2x2x64xf32>
    %57 = arith.addf %49, %56 : vector<1x2x2x64xf32>
    %c1_37 = arith.constant 1 : index
    %c0_38 = arith.constant 0 : index
    %c1_39 = arith.constant 1 : index
    %c0_40 = arith.constant 0 : index
    %c0_41 = arith.constant 0 : index
    %58 = vector.load %arg1[%c1_37, %c0_38, %c1_39, %c0_40, %c0_41] : memref<4x1x3x3x64xbf16, #tpu.memory_space<vmem>>, vector<1x1x2x2x64xbf16>
    %59 = vector.shape_cast %58 : vector<1x1x2x2x64xbf16> to vector<1x2x2x64xbf16>
    %60 = arith.extf %59 : vector<1x2x2x64xbf16> to vector<1x2x2x64xf32>
    %61 = vector.extract_strided_slice %2 {offsets = [7, 0], sizes = [1, 64], strides = [1, 1]} : vector<9x64xf32> to vector<1x64xf32>
    %62 = vector.shape_cast %61 : vector<1x64xf32> to vector<1x1x1x64xf32>
    %63 = vector.broadcast %62 : vector<1x1x1x64xf32> to vector<1x2x2x64xf32>
    %64 = arith.mulf %60, %63 : vector<1x2x2x64xf32>
    %65 = arith.addf %57, %64 : vector<1x2x2x64xf32>
    %c0_42 = arith.constant 0 : index
    %c0_43 = arith.constant 0 : index
    %c1_44 = arith.constant 1 : index
    %c1_45 = arith.constant 1 : index
    %c0_46 = arith.constant 0 : index
    %66 = vector.load %arg1[%c0_42, %c0_43, %c1_44, %c1_45, %c0_46] : memref<4x1x3x3x64xbf16, #tpu.memory_space<vmem>>, vector<1x1x2x2x64xbf16>
    %67 = vector.shape_cast %66 : vector<1x1x2x2x64xbf16> to vector<1x2x2x64xbf16>
    %68 = arith.extf %67 : vector<1x2x2x64xbf16> to vector<1x2x2x64xf32>
    %69 = vector.extract_strided_slice %2 {offsets = [8, 0], sizes = [1, 64], strides = [1, 1]} : vector<9x64xf32> to vector<1x64xf32>
    %70 = vector.shape_cast %69 : vector<1x64xf32> to vector<1x1x1x64xf32>
    %71 = vector.broadcast %70 : vector<1x1x1x64xf32> to vector<1x2x2x64xf32>
    %72 = arith.mulf %68, %71 : vector<1x2x2x64xf32>
    %73 = arith.addf %65, %72 : vector<1x2x2x64xf32>
    %c0_47 = arith.constant 0 : index
    %c0_48 = arith.constant 0 : index
    %74 = vector.load %arg3[%c0_47, %c0_48] : memref<1x64xf32, #tpu.memory_space<vmem>>, vector<1x64xf32>
    %75 = vector.shape_cast %74 : vector<1x64xf32> to vector<1x1x1x64xf32>
    %76 = vector.broadcast %75 : vector<1x1x1x64xf32> to vector<1x2x2x64xf32>
    %77 = arith.addf %73, %76 : vector<1x2x2x64xf32>
    %cst_49 = arith.constant 0.000000e+00 : f32
    %cst_50 = arith.constant 6.000000e+00 : f32
    %78 = vector.broadcast %cst_49 : f32 to vector<1x2x2x64xf32>
    %79 = arith.maximumf %78, %77 : vector<1x2x2x64xf32>
    %80 = vector.broadcast %cst_50 : f32 to vector<1x2x2x64xf32>
    %81 = arith.minimumf %80, %79 : vector<1x2x2x64xf32>
    %82 = vector.shape_cast %81 : vector<1x2x2x64xf32> to vector<4x64xf32>
    %83 = arith.truncf %82 : vector<4x64xf32> to vector<4x64xbf16>
    %c0_51 = arith.constant 0 : index
    %c0_52 = arith.constant 0 : index
    %84 = vector.load %arg4[%c0_51, %c0_52] : memref<64x128xbf16, #tpu.memory_space<vmem>>, vector<64x128xbf16>
    %cst_53 = arith.constant dense<0.000000e+00> : vector<4x128xf32>
    %85 = tpu.matmul %83, %84, %cst_53 {dimension_numbers = #tpu.dot_dimension_numbers<[1], [0], [0], [1], [0, 0, 1, 1], [], []>} : vector<4x64xbf16>, vector<64x128xbf16>, vector<4x128xf32> -> vector<4x128xf32>
    %c0_54 = arith.constant 0 : index
    %c0_55 = arith.constant 0 : index
    %86 = vector.load %arg5[%c0_54, %c0_55] : memref<1x128xf32, #tpu.memory_space<vmem>>, vector<1x128xf32>
    %87 = vector.broadcast %86 : vector<1x128xf32> to vector<4x128xf32>
    %88 = arith.addf %85, %87 : vector<4x128xf32>
    %cst_56 = arith.constant 0.000000e+00 : f32
    %cst_57 = arith.constant 6.000000e+00 : f32
    %89 = vector.broadcast %cst_56 : f32 to vector<4x128xf32>
    %90 = arith.maximumf %89, %88 : vector<4x128xf32>
    %91 = vector.broadcast %cst_57 : f32 to vector<4x128xf32>
    %92 = arith.minimumf %91, %90 : vector<4x128xf32>
    %93 = vector.extract_strided_slice %92 {offsets = [0, 0], sizes = [2, 128], strides = [1, 1]} : vector<4x128xf32> to vector<2x128xf32>
    %c0_58 = arith.constant 0 : index
    %c1_59 = arith.constant 1 : index
    %c1_60 = arith.constant 1 : index
    %c0_61 = arith.constant 0 : index
    %94 = vector.load %arg27[%c0_58, %c1_59, %c1_60, %c0_61] : memref<1x4x4x128xf32, #tpu.memory_space<vmem>>, vector<1x1x2x128xf32>
    %95 = vector.shape_cast %94 : vector<1x1x2x128xf32> to vector<2x128xf32>
    %96 = vector.shape_cast %93 : vector<2x128xf32> to vector<1x1x2x128xf32>
    tpu.vector_store %arg27[%c0_58, %c1_59, %c1_60, %c0_61], %96 {strides = array<i32>} : memref<1x4x4x128xf32, #tpu.memory_space<vmem>>, vector<1x1x2x128xf32>,
    %97 = vector.extract_strided_slice %92 {offsets = [2, 0], sizes = [2, 128], strides = [1, 1]} : vector<4x128xf32> to vector<2x128xf32>
    %c0_62 = arith.constant 0 : index
    %c2_63 = arith.constant 2 : index
    %c1_64 = arith.constant 1 : index
    %c0_65 = arith.constant 0 : index
    %98 = vector.load %arg27[%c0_62, %c2_63, %c1_64, %c0_65] : memref<1x4x4x128xf32, #tpu.memory_space<vmem>>, vector<1x1x2x128xf32>
    %99 = vector.shape_cast %98 : vector<1x1x2x128xf32> to vector<2x128xf32>
    %100 = vector.shape_cast %97 : vector<2x128xf32> to vector<1x1x2x128xf32>
    tpu.vector_store %arg27[%c0_62, %c2_63, %c1_64, %c0_65], %100 {strides = array<i32>} : memref<1x4x4x128xf32, #tpu.memory_space<vmem>>, vector<1x1x2x128xf32>,
    %c0_66 = arith.constant 0 : index
    %c0_67 = arith.constant 0 : index
    %101 = vector.load %arg6[%c0_66, %c0_67] : memref<9x128xf32, #tpu.memory_space<vmem>>, vector<9x128xf32>
    %c0_68 = arith.constant 0 : index
    %c0_69 = arith.constant 0 : index
    %c0_70 = arith.constant 0 : index
    %c0_71 = arith.constant 0 : index
    %102 = vector.load %arg27[%c0_68, %c0_69, %c0_70, %c0_71] : memref<1x4x4x128xf32, #tpu.memory_space<vmem>>, vector<1x2x2x128xf32>
    %103 = vector.extract_strided_slice %101 {offsets = [0, 0], sizes = [1, 128], strides = [1, 1]} : vector<9x128xf32> to vector<1x128xf32>
    %104 = vector.shape_cast %103 : vector<1x128xf32> to vector<1x1x1x128xf32>
    %105 = vector.broadcast %104 : vector<1x1x1x128xf32> to vector<1x2x2x128xf32>
    %106 = arith.mulf %102, %105 : vector<1x2x2x128xf32>
    %c0_72 = arith.constant 0 : index
    %c0_73 = arith.constant 0 : index
    %c1_74 = arith.constant 1 : index
    %c0_75 = arith.constant 0 : index
    %107 = vector.load %arg27[%c0_72, %c0_73, %c1_74, %c0_75] : memref<1x4x4x128xf32, #tpu.memory_space<vmem>>, vector<1x2x2x128xf32>
    %108 = vector.extract_strided_slice %101 {offsets = [1, 0], sizes = [1, 128], strides = [1, 1]} : vector<9x128xf32> to vector<1x128xf32>
    %109 = vector.shape_cast %108 : vector<1x128xf32> to vector<1x1x1x128xf32>
    %110 = vector.broadcast %109 : vector<1x1x1x128xf32> to vector<1x2x2x128xf32>
    %111 = arith.mulf %107, %110 : vector<1x2x2x128xf32>
    %112 = arith.addf %106, %111 : vector<1x2x2x128xf32>
    %c0_76 = arith.constant 0 : index
    %c0_77 = arith.constant 0 : index
    %c2_78 = arith.constant 2 : index
    %c0_79 = arith.constant 0 : index
    %113 = vector.load %arg27[%c0_76, %c0_77, %c2_78, %c0_79] : memref<1x4x4x128xf32, #tpu.memory_space<vmem>>, vector<1x2x2x128xf32>
    %114 = vector.extract_strided_slice %101 {offsets = [2, 0], sizes = [1, 128], strides = [1, 1]} : vector<9x128xf32> to vector<1x128xf32>
    %115 = vector.shape_cast %114 : vector<1x128xf32> to vector<1x1x1x128xf32>
    %116 = vector.broadcast %115 : vector<1x1x1x128xf32> to vector<1x2x2x128xf32>
    %117 = arith.mulf %113, %116 : vector<1x2x2x128xf32>
    %118 = arith.addf %112, %117 : vector<1x2x2x128xf32>
    %c0_80 = arith.constant 0 : index
    %c1_81 = arith.constant 1 : index
    %c0_82 = arith.constant 0 : index
    %c0_83 = arith.constant 0 : index
    %119 = vector.load %arg27[%c0_80, %c1_81, %c0_82, %c0_83] : memref<1x4x4x128xf32, #tpu.memory_space<vmem>>, vector<1x2x2x128xf32>
    %120 = vector.extract_strided_slice %101 {offsets = [3, 0], sizes = [1, 128], strides = [1, 1]} : vector<9x128xf32> to vector<1x128xf32>
    %121 = vector.shape_cast %120 : vector<1x128xf32> to vector<1x1x1x128xf32>
    %122 = vector.broadcast %121 : vector<1x1x1x128xf32> to vector<1x2x2x128xf32>
    %123 = arith.mulf %119, %122 : vector<1x2x2x128xf32>
    %124 = arith.addf %118, %123 : vector<1x2x2x128xf32>
    %c0_84 = arith.constant 0 : index
    %c1_85 = arith.constant 1 : index
    %c1_86 = arith.constant 1 : index
    %c0_87 = arith.constant 0 : index
    %125 = vector.load %arg27[%c0_84, %c1_85, %c1_86, %c0_87] : memref<1x4x4x128xf32, #tpu.memory_space<vmem>>, vector<1x2x2x128xf32>
    %126 = vector.extract_strided_slice %101 {offsets = [4, 0], sizes = [1, 128], strides = [1, 1]} : vector<9x128xf32> to vector<1x128xf32>
    %127 = vector.shape_cast %126 : vector<1x128xf32> to vector<1x1x1x128xf32>
    %128 = vector.broadcast %127 : vector<1x1x1x128xf32> to vector<1x2x2x128xf32>
    %129 = arith.mulf %125, %128 : vector<1x2x2x128xf32>
    %130 = arith.addf %124, %129 : vector<1x2x2x128xf32>
    %c0_88 = arith.constant 0 : index
    %c1_89 = arith.constant 1 : index
    %c2_90 = arith.constant 2 : index
    %c0_91 = arith.constant 0 : index
    %131 = vector.load %arg27[%c0_88, %c1_89, %c2_90, %c0_91] : memref<1x4x4x128xf32, #tpu.memory_space<vmem>>, vector<1x2x2x128xf32>
    %132 = vector.extract_strided_slice %101 {offsets = [5, 0], sizes = [1, 128], strides = [1, 1]} : vector<9x128xf32> to vector<1x128xf32>
    %133 = vector.shape_cast %132 : vector<1x128xf32> to vector<1x1x1x128xf32>
    %134 = vector.broadcast %133 : vector<1x1x1x128xf32> to vector<1x2x2x128xf32>
    %135 = arith.mulf %131, %134 : vector<1x2x2x128xf32>
    %136 = arith.addf %130, %135 : vector<1x2x2x128xf32>
    %c0_92 = arith.constant 0 : index
    %c2_93 = arith.constant 2 : index
    %c0_94 = arith.constant 0 : index
    %c0_95 = arith.constant 0 : index
    %137 = vector.load %arg27[%c0_92, %c2_93, %c0_94, %c0_95] : memref<1x4x4x128xf32, #tpu.memory_space<vmem>>, vector<1x2x2x128xf32>
    %138 = vector.extract_strided_slice %101 {offsets = [6, 0], sizes = [1, 128], strides = [1, 1]} : vector<9x128xf32> to vector<1x128xf32>
    %139 = vector.shape_cast %138 : vector<1x128xf32> to vector<1x1x1x128xf32>
    %140 = vector.broadcast %139 : vector<1x1x1x128xf32> to vector<1x2x2x128xf32>
    %141 = arith.mulf %137, %140 : vector<1x2x2x128xf32>
    %142 = arith.addf %136, %141 : vector<1x2x2x128xf32>
    %c0_96 = arith.constant 0 : index
    %c2_97 = arith.constant 2 : index
    %c1_98 = arith.constant 1 : index
    %c0_99 = arith.constant 0 : index
    %143 = vector.load %arg27[%c0_96, %c2_97, %c1_98, %c0_99] : memref<1x4x4x128xf32, #tpu.memory_space<vmem>>, vector<1x2x2x128xf32>
    %144 = vector.extract_strided_slice %101 {offsets = [7, 0], sizes = [1, 128], strides = [1, 1]} : vector<9x128xf32> to vector<1x128xf32>
    %145 = vector.shape_cast %144 : vector<1x128xf32> to vector<1x1x1x128xf32>
    %146 = vector.broadcast %145 : vector<1x1x1x128xf32> to vector<1x2x2x128xf32>
    %147 = arith.mulf %143, %146 : vector<1x2x2x128xf32>
    %148 = arith.addf %142, %147 : vector<1x2x2x128xf32>
    %c0_100 = arith.constant 0 : index
    %c2_101 = arith.constant 2 : index
    %c2_102 = arith.constant 2 : index
    %c0_103 = arith.constant 0 : index
    %149 = vector.load %arg27[%c0_100, %c2_101, %c2_102, %c0_103] : memref<1x4x4x128xf32, #tpu.memory_space<vmem>>, vector<1x2x2x128xf32>
    %150 = vector.extract_strided_slice %101 {offsets = [8, 0], sizes = [1, 128], strides = [1, 1]} : vector<9x128xf32> to vector<1x128xf32>
    %151 = vector.shape_cast %150 : vector<1x128xf32> to vector<1x1x1x128xf32>
    %152 = vector.broadcast %151 : vector<1x1x1x128xf32> to vector<1x2x2x128xf32>
    %153 = arith.mulf %149, %152 : vector<1x2x2x128xf32>
    %154 = arith.addf %148, %153 : vector<1x2x2x128xf32>
    %c0_104 = arith.constant 0 : index
    %c0_105 = arith.constant 0 : index
    %155 = vector.load %arg7[%c0_104, %c0_105] : memref<1x128xf32, #tpu.memory_space<vmem>>, vector<1x128xf32>
    %156 = vector.shape_cast %155 : vector<1x128xf32> to vector<1x1x1x128xf32>
    %157 = vector.broadcast %156 : vector<1x1x1x128xf32> to vector<1x2x2x128xf32>
    %158 = arith.addf %154, %157 : vector<1x2x2x128xf32>
    %cst_106 = arith.constant 0.000000e+00 : f32
    %cst_107 = arith.constant 6.000000e+00 : f32
    %159 = vector.broadcast %cst_106 : f32 to vector<1x2x2x128xf32>
    %160 = arith.maximumf %159, %158 : vector<1x2x2x128xf32>
    %161 = vector.broadcast %cst_107 : f32 to vector<1x2x2x128xf32>
    %162 = arith.minimumf %161, %160 : vector<1x2x2x128xf32>
    %163 = vector.shape_cast %162 : vector<1x2x2x128xf32> to vector<4x128xf32>
    %164 = arith.truncf %163 : vector<4x128xf32> to vector<4x128xbf16>
    %c0_108 = arith.constant 0 : index
    %c0_109 = arith.constant 0 : index
    %165 = vector.load %arg8[%c0_108, %c0_109] : memref<128x128xbf16, #tpu.memory_space<vmem>>, vector<128x128xbf16>
    %cst_110 = arith.constant dense<0.000000e+00> : vector<4x128xf32>
    %166 = tpu.matmul %164, %165, %cst_110 {dimension_numbers = #tpu.dot_dimension_numbers<[1], [0], [0], [1], [0, 0, 1, 1], [], []>} : vector<4x128xbf16>, vector<128x128xbf16>, vector<4x128xf32> -> vector<4x128xf32>
    %c0_111 = arith.constant 0 : index
    %c0_112 = arith.constant 0 : index
    %167 = vector.load %arg9[%c0_111, %c0_112] : memref<1x128xf32, #tpu.memory_space<vmem>>, vector<1x128xf32>
    %168 = vector.broadcast %167 : vector<1x128xf32> to vector<4x128xf32>
    %169 = arith.addf %166, %168 : vector<4x128xf32>
    %cst_113 = arith.constant 0.000000e+00 : f32
    %cst_114 = arith.constant 6.000000e+00 : f32
    %170 = vector.broadcast %cst_113 : f32 to vector<4x128xf32>
    %171 = arith.maximumf %170, %169 : vector<4x128xf32>
    %172 = vector.broadcast %cst_114 : f32 to vector<4x128xf32>
    %173 = arith.minimumf %172, %171 : vector<4x128xf32>
    %174 = vector.extract_strided_slice %173 {offsets = [0, 0], sizes = [2, 128], strides = [1, 1]} : vector<4x128xf32> to vector<2x128xf32>
    %c0_115 = arith.constant 0 : index
    %c1_116 = arith.constant 1 : index
    %c1_117 = arith.constant 1 : index
    %c0_118 = arith.constant 0 : index
    %175 = vector.load %arg27[%c0_115, %c1_116, %c1_117, %c0_118] : memref<1x4x4x128xf32, #tpu.memory_space<vmem>>, vector<1x1x2x128xf32>
    %176 = vector.shape_cast %175 : vector<1x1x2x128xf32> to vector<2x128xf32>
    %177 = vector.shape_cast %174 : vector<2x128xf32> to vector<1x1x2x128xf32>
    tpu.vector_store %arg27[%c0_115, %c1_116, %c1_117, %c0_118], %177 {strides = array<i32>} : memref<1x4x4x128xf32, #tpu.memory_space<vmem>>, vector<1x1x2x128xf32>,
    %178 = vector.extract_strided_slice %173 {offsets = [2, 0], sizes = [2, 128], strides = [1, 1]} : vector<4x128xf32> to vector<2x128xf32>
    %c0_119 = arith.constant 0 : index
    %c2_120 = arith.constant 2 : index
    %c1_121 = arith.constant 1 : index
    %c0_122 = arith.constant 0 : index
    %179 = vector.load %arg27[%c0_119, %c2_120, %c1_121, %c0_122] : memref<1x4x4x128xf32, #tpu.memory_space<vmem>>, vector<1x1x2x128xf32>
    %180 = vector.shape_cast %179 : vector<1x1x2x128xf32> to vector<2x128xf32>
    %181 = vector.shape_cast %178 : vector<2x128xf32> to vector<1x1x2x128xf32>
    tpu.vector_store %arg27[%c0_119, %c2_120, %c1_121, %c0_122], %181 {strides = array<i32>} : memref<1x4x4x128xf32, #tpu.memory_space<vmem>>, vector<1x1x2x128xf32>,
    %c0_123 = arith.constant 0 : index
    %c0_124 = arith.constant 0 : index
    %182 = vector.load %arg10[%c0_123, %c0_124] : memref<9x128xf32, #tpu.memory_space<vmem>>, vector<9x128xf32>
    %c0_125 = arith.constant 0 : index
    %c0_126 = arith.constant 0 : index
    %c0_127 = arith.constant 0 : index
    %c0_128 = arith.constant 0 : index
    %183 = vector.load %arg27[%c0_125, %c0_126, %c0_127, %c0_128] : memref<1x4x4x128xf32, #tpu.memory_space<vmem>>, vector<1x2x2x128xf32>
    %184 = vector.extract_strided_slice %182 {offsets = [0, 0], sizes = [1, 128], strides = [1, 1]} : vector<9x128xf32> to vector<1x128xf32>
    %185 = vector.shape_cast %184 : vector<1x128xf32> to vector<1x1x1x128xf32>
    %186 = vector.broadcast %185 : vector<1x1x1x128xf32> to vector<1x2x2x128xf32>
    %187 = arith.mulf %183, %186 : vector<1x2x2x128xf32>
    %c0_129 = arith.constant 0 : index
    %c0_130 = arith.constant 0 : index
    %c1_131 = arith.constant 1 : index
    %c0_132 = arith.constant 0 : index
    %188 = vector.load %arg27[%c0_129, %c0_130, %c1_131, %c0_132] : memref<1x4x4x128xf32, #tpu.memory_space<vmem>>, vector<1x2x2x128xf32>
    %189 = vector.extract_strided_slice %182 {offsets = [1, 0], sizes = [1, 128], strides = [1, 1]} : vector<9x128xf32> to vector<1x128xf32>
    %190 = vector.shape_cast %189 : vector<1x128xf32> to vector<1x1x1x128xf32>
    %191 = vector.broadcast %190 : vector<1x1x1x128xf32> to vector<1x2x2x128xf32>
    %192 = arith.mulf %188, %191 : vector<1x2x2x128xf32>
    %193 = arith.addf %187, %192 : vector<1x2x2x128xf32>
    %c0_133 = arith.constant 0 : index
    %c0_134 = arith.constant 0 : index
    %c2_135 = arith.constant 2 : index
    %c0_136 = arith.constant 0 : index
    %194 = vector.load %arg27[%c0_133, %c0_134, %c2_135, %c0_136] : memref<1x4x4x128xf32, #tpu.memory_space<vmem>>, vector<1x2x2x128xf32>
    %195 = vector.extract_strided_slice %182 {offsets = [2, 0], sizes = [1, 128], strides = [1, 1]} : vector<9x128xf32> to vector<1x128xf32>
    %196 = vector.shape_cast %195 : vector<1x128xf32> to vector<1x1x1x128xf32>
    %197 = vector.broadcast %196 : vector<1x1x1x128xf32> to vector<1x2x2x128xf32>
    %198 = arith.mulf %194, %197 : vector<1x2x2x128xf32>
    %199 = arith.addf %193, %198 : vector<1x2x2x128xf32>
    %c0_137 = arith.constant 0 : index
    %c1_138 = arith.constant 1 : index
    %c0_139 = arith.constant 0 : index
    %c0_140 = arith.constant 0 : index
    %200 = vector.load %arg27[%c0_137, %c1_138, %c0_139, %c0_140] : memref<1x4x4x128xf32, #tpu.memory_space<vmem>>, vector<1x2x2x128xf32>
    %201 = vector.extract_strided_slice %182 {offsets = [3, 0], sizes = [1, 128], strides = [1, 1]} : vector<9x128xf32> to vector<1x128xf32>
    %202 = vector.shape_cast %201 : vector<1x128xf32> to vector<1x1x1x128xf32>
    %203 = vector.broadcast %202 : vector<1x1x1x128xf32> to vector<1x2x2x128xf32>
    %204 = arith.mulf %200, %203 : vector<1x2x2x128xf32>
    %205 = arith.addf %199, %204 : vector<1x2x2x128xf32>
    %c0_141 = arith.constant 0 : index
    %c1_142 = arith.constant 1 : index
    %c1_143 = arith.constant 1 : index
    %c0_144 = arith.constant 0 : index
    %206 = vector.load %arg27[%c0_141, %c1_142, %c1_143, %c0_144] : memref<1x4x4x128xf32, #tpu.memory_space<vmem>>, vector<1x2x2x128xf32>
    %207 = vector.extract_strided_slice %182 {offsets = [4, 0], sizes = [1, 128], strides = [1, 1]} : vector<9x128xf32> to vector<1x128xf32>
    %208 = vector.shape_cast %207 : vector<1x128xf32> to vector<1x1x1x128xf32>
    %209 = vector.broadcast %208 : vector<1x1x1x128xf32> to vector<1x2x2x128xf32>
    %210 = arith.mulf %206, %209 : vector<1x2x2x128xf32>
    %211 = arith.addf %205, %210 : vector<1x2x2x128xf32>
    %c0_145 = arith.constant 0 : index
    %c1_146 = arith.constant 1 : index
    %c2_147 = arith.constant 2 : index
    %c0_148 = arith.constant 0 : index
    %212 = vector.load %arg27[%c0_145, %c1_146, %c2_147, %c0_148] : memref<1x4x4x128xf32, #tpu.memory_space<vmem>>, vector<1x2x2x128xf32>
    %213 = vector.extract_strided_slice %182 {offsets = [5, 0], sizes = [1, 128], strides = [1, 1]} : vector<9x128xf32> to vector<1x128xf32>
    %214 = vector.shape_cast %213 : vector<1x128xf32> to vector<1x1x1x128xf32>
    %215 = vector.broadcast %214 : vector<1x1x1x128xf32> to vector<1x2x2x128xf32>
    %216 = arith.mulf %212, %215 : vector<1x2x2x128xf32>
    %217 = arith.addf %211, %216 : vector<1x2x2x128xf32>
    %c0_149 = arith.constant 0 : index
    %c2_150 = arith.constant 2 : index
    %c0_151 = arith.constant 0 : index
    %c0_152 = arith.constant 0 : index
    %218 = vector.load %arg27[%c0_149, %c2_150, %c0_151, %c0_152] : memref<1x4x4x128xf32, #tpu.memory_space<vmem>>, vector<1x2x2x128xf32>
    %219 = vector.extract_strided_slice %182 {offsets = [6, 0], sizes = [1, 128], strides = [1, 1]} : vector<9x128xf32> to vector<1x128xf32>
    %220 = vector.shape_cast %219 : vector<1x128xf32> to vector<1x1x1x128xf32>
    %221 = vector.broadcast %220 : vector<1x1x1x128xf32> to vector<1x2x2x128xf32>
    %222 = arith.mulf %218, %221 : vector<1x2x2x128xf32>
    %223 = arith.addf %217, %222 : vector<1x2x2x128xf32>
    %c0_153 = arith.constant 0 : index
    %c2_154 = arith.constant 2 : index
    %c1_155 = arith.constant 1 : index
    %c0_156 = arith.constant 0 : index
    %224 = vector.load %arg27[%c0_153, %c2_154, %c1_155, %c0_156] : memref<1x4x4x128xf32, #tpu.memory_space<vmem>>, vector<1x2x2x128xf32>
    %225 = vector.extract_strided_slice %182 {offsets = [7, 0], sizes = [1, 128], strides = [1, 1]} : vector<9x128xf32> to vector<1x128xf32>
    %226 = vector.shape_cast %225 : vector<1x128xf32> to vector<1x1x1x128xf32>
    %227 = vector.broadcast %226 : vector<1x1x1x128xf32> to vector<1x2x2x128xf32>
    %228 = arith.mulf %224, %227 : vector<1x2x2x128xf32>
    %229 = arith.addf %223, %228 : vector<1x2x2x128xf32>
    %c0_157 = arith.constant 0 : index
    %c2_158 = arith.constant 2 : index
    %c2_159 = arith.constant 2 : index
    %c0_160 = arith.constant 0 : index
    %230 = vector.load %arg27[%c0_157, %c2_158, %c2_159, %c0_160] : memref<1x4x4x128xf32, #tpu.memory_space<vmem>>, vector<1x2x2x128xf32>
    %231 = vector.extract_strided_slice %182 {offsets = [8, 0], sizes = [1, 128], strides = [1, 1]} : vector<9x128xf32> to vector<1x128xf32>
    %232 = vector.shape_cast %231 : vector<1x128xf32> to vector<1x1x1x128xf32>
    %233 = vector.broadcast %232 : vector<1x1x1x128xf32> to vector<1x2x2x128xf32>
    %234 = arith.mulf %230, %233 : vector<1x2x2x128xf32>
    %235 = arith.addf %229, %234 : vector<1x2x2x128xf32>
    %c0_161 = arith.constant 0 : index
    %c0_162 = arith.constant 0 : index
    %236 = vector.load %arg11[%c0_161, %c0_162] : memref<1x128xf32, #tpu.memory_space<vmem>>, vector<1x128xf32>
    %237 = vector.shape_cast %236 : vector<1x128xf32> to vector<1x1x1x128xf32>
    %238 = vector.broadcast %237 : vector<1x1x1x128xf32> to vector<1x2x2x128xf32>
    %239 = arith.addf %235, %238 : vector<1x2x2x128xf32>
    %cst_163 = arith.constant 0.000000e+00 : f32
    %cst_164 = arith.constant 6.000000e+00 : f32
    %240 = vector.broadcast %cst_163 : f32 to vector<1x2x2x128xf32>
    %241 = arith.maximumf %240, %239 : vector<1x2x2x128xf32>
    %242 = vector.broadcast %cst_164 : f32 to vector<1x2x2x128xf32>
    %243 = arith.minimumf %242, %241 : vector<1x2x2x128xf32>
    %244 = vector.shape_cast %243 : vector<1x2x2x128xf32> to vector<4x128xf32>
    %245 = arith.truncf %244 : vector<4x128xf32> to vector<4x128xbf16>
    %c0_165 = arith.constant 0 : index
    %c0_166 = arith.constant 0 : index
    %246 = vector.load %arg12[%c0_165, %c0_166] : memref<128x128xbf16, #tpu.memory_space<vmem>>, vector<128x128xbf16>
    %cst_167 = arith.constant dense<0.000000e+00> : vector<4x128xf32>
    %247 = tpu.matmul %245, %246, %cst_167 {dimension_numbers = #tpu.dot_dimension_numbers<[1], [0], [0], [1], [0, 0, 1, 1], [], []>} : vector<4x128xbf16>, vector<128x128xbf16>, vector<4x128xf32> -> vector<4x128xf32>
    %c0_168 = arith.constant 0 : index
    %c0_169 = arith.constant 0 : index
    %248 = vector.load %arg13[%c0_168, %c0_169] : memref<1x128xf32, #tpu.memory_space<vmem>>, vector<1x128xf32>
    %249 = vector.broadcast %248 : vector<1x128xf32> to vector<4x128xf32>
    %250 = arith.addf %247, %249 : vector<4x128xf32>
    %cst_170 = arith.constant 0.000000e+00 : f32
    %cst_171 = arith.constant 6.000000e+00 : f32
    %251 = vector.broadcast %cst_170 : f32 to vector<4x128xf32>
    %252 = arith.maximumf %251, %250 : vector<4x128xf32>
    %253 = vector.broadcast %cst_171 : f32 to vector<4x128xf32>
    %254 = arith.minimumf %253, %252 : vector<4x128xf32>
    %255 = vector.extract_strided_slice %254 {offsets = [0, 0], sizes = [2, 128], strides = [1, 1]} : vector<4x128xf32> to vector<2x128xf32>
    %c0_172 = arith.constant 0 : index
    %c1_173 = arith.constant 1 : index
    %c1_174 = arith.constant 1 : index
    %c0_175 = arith.constant 0 : index
    %256 = vector.load %arg27[%c0_172, %c1_173, %c1_174, %c0_175] : memref<1x4x4x128xf32, #tpu.memory_space<vmem>>, vector<1x1x2x128xf32>
    %257 = vector.shape_cast %256 : vector<1x1x2x128xf32> to vector<2x128xf32>
    %258 = vector.shape_cast %255 : vector<2x128xf32> to vector<1x1x2x128xf32>
    tpu.vector_store %arg27[%c0_172, %c1_173, %c1_174, %c0_175], %258 {strides = array<i32>} : memref<1x4x4x128xf32, #tpu.memory_space<vmem>>, vector<1x1x2x128xf32>,
    %259 = vector.extract_strided_slice %254 {offsets = [2, 0], sizes = [2, 128], strides = [1, 1]} : vector<4x128xf32> to vector<2x128xf32>
    %c0_176 = arith.constant 0 : index
    %c2_177 = arith.constant 2 : index
    %c1_178 = arith.constant 1 : index
    %c0_179 = arith.constant 0 : index
    %260 = vector.load %arg27[%c0_176, %c2_177, %c1_178, %c0_179] : memref<1x4x4x128xf32, #tpu.memory_space<vmem>>, vector<1x1x2x128xf32>
    %261 = vector.shape_cast %260 : vector<1x1x2x128xf32> to vector<2x128xf32>
    %262 = vector.shape_cast %259 : vector<2x128xf32> to vector<1x1x2x128xf32>
    tpu.vector_store %arg27[%c0_176, %c2_177, %c1_178, %c0_179], %262 {strides = array<i32>} : memref<1x4x4x128xf32, #tpu.memory_space<vmem>>, vector<1x1x2x128xf32>,
    %c0_180 = arith.constant 0 : index
    %c0_181 = arith.constant 0 : index
    %263 = vector.load %arg14[%c0_180, %c0_181] : memref<9x128xf32, #tpu.memory_space<vmem>>, vector<9x128xf32>
    %c0_182 = arith.constant 0 : index
    %c0_183 = arith.constant 0 : index
    %c0_184 = arith.constant 0 : index
    %c0_185 = arith.constant 0 : index
    %264 = vector.load %arg27[%c0_182, %c0_183, %c0_184, %c0_185] : memref<1x4x4x128xf32, #tpu.memory_space<vmem>>, vector<1x2x2x128xf32>
    %265 = vector.extract_strided_slice %263 {offsets = [0, 0], sizes = [1, 128], strides = [1, 1]} : vector<9x128xf32> to vector<1x128xf32>
    %266 = vector.shape_cast %265 : vector<1x128xf32> to vector<1x1x1x128xf32>
    %267 = vector.broadcast %266 : vector<1x1x1x128xf32> to vector<1x2x2x128xf32>
    %268 = arith.mulf %264, %267 : vector<1x2x2x128xf32>
    %c0_186 = arith.constant 0 : index
    %c0_187 = arith.constant 0 : index
    %c1_188 = arith.constant 1 : index
    %c0_189 = arith.constant 0 : index
    %269 = vector.load %arg27[%c0_186, %c0_187, %c1_188, %c0_189] : memref<1x4x4x128xf32, #tpu.memory_space<vmem>>, vector<1x2x2x128xf32>
    %270 = vector.extract_strided_slice %263 {offsets = [1, 0], sizes = [1, 128], strides = [1, 1]} : vector<9x128xf32> to vector<1x128xf32>
    %271 = vector.shape_cast %270 : vector<1x128xf32> to vector<1x1x1x128xf32>
    %272 = vector.broadcast %271 : vector<1x1x1x128xf32> to vector<1x2x2x128xf32>
    %273 = arith.mulf %269, %272 : vector<1x2x2x128xf32>
    %274 = arith.addf %268, %273 : vector<1x2x2x128xf32>
    %c0_190 = arith.constant 0 : index
    %c0_191 = arith.constant 0 : index
    %c2_192 = arith.constant 2 : index
    %c0_193 = arith.constant 0 : index
    %275 = vector.load %arg27[%c0_190, %c0_191, %c2_192, %c0_193] : memref<1x4x4x128xf32, #tpu.memory_space<vmem>>, vector<1x2x2x128xf32>
    %276 = vector.extract_strided_slice %263 {offsets = [2, 0], sizes = [1, 128], strides = [1, 1]} : vector<9x128xf32> to vector<1x128xf32>
    %277 = vector.shape_cast %276 : vector<1x128xf32> to vector<1x1x1x128xf32>
    %278 = vector.broadcast %277 : vector<1x1x1x128xf32> to vector<1x2x2x128xf32>
    %279 = arith.mulf %275, %278 : vector<1x2x2x128xf32>
    %280 = arith.addf %274, %279 : vector<1x2x2x128xf32>
    %c0_194 = arith.constant 0 : index
    %c1_195 = arith.constant 1 : index
    %c0_196 = arith.constant 0 : index
    %c0_197 = arith.constant 0 : index
    %281 = vector.load %arg27[%c0_194, %c1_195, %c0_196, %c0_197] : memref<1x4x4x128xf32, #tpu.memory_space<vmem>>, vector<1x2x2x128xf32>
    %282 = vector.extract_strided_slice %263 {offsets = [3, 0], sizes = [1, 128], strides = [1, 1]} : vector<9x128xf32> to vector<1x128xf32>
    %283 = vector.shape_cast %282 : vector<1x128xf32> to vector<1x1x1x128xf32>
    %284 = vector.broadcast %283 : vector<1x1x1x128xf32> to vector<1x2x2x128xf32>
    %285 = arith.mulf %281, %284 : vector<1x2x2x128xf32>
    %286 = arith.addf %280, %285 : vector<1x2x2x128xf32>
    %c0_198 = arith.constant 0 : index
    %c1_199 = arith.constant 1 : index
    %c1_200 = arith.constant 1 : index
    %c0_201 = arith.constant 0 : index
    %287 = vector.load %arg27[%c0_198, %c1_199, %c1_200, %c0_201] : memref<1x4x4x128xf32, #tpu.memory_space<vmem>>, vector<1x2x2x128xf32>
    %288 = vector.extract_strided_slice %263 {offsets = [4, 0], sizes = [1, 128], strides = [1, 1]} : vector<9x128xf32> to vector<1x128xf32>
    %289 = vector.shape_cast %288 : vector<1x128xf32> to vector<1x1x1x128xf32>
    %290 = vector.broadcast %289 : vector<1x1x1x128xf32> to vector<1x2x2x128xf32>
    %291 = arith.mulf %287, %290 : vector<1x2x2x128xf32>
    %292 = arith.addf %286, %291 : vector<1x2x2x128xf32>
    %c0_202 = arith.constant 0 : index
    %c1_203 = arith.constant 1 : index
    %c2_204 = arith.constant 2 : index
    %c0_205 = arith.constant 0 : index
    %293 = vector.load %arg27[%c0_202, %c1_203, %c2_204, %c0_205] : memref<1x4x4x128xf32, #tpu.memory_space<vmem>>, vector<1x2x2x128xf32>
    %294 = vector.extract_strided_slice %263 {offsets = [5, 0], sizes = [1, 128], strides = [1, 1]} : vector<9x128xf32> to vector<1x128xf32>
    %295 = vector.shape_cast %294 : vector<1x128xf32> to vector<1x1x1x128xf32>
    %296 = vector.broadcast %295 : vector<1x1x1x128xf32> to vector<1x2x2x128xf32>
    %297 = arith.mulf %293, %296 : vector<1x2x2x128xf32>
    %298 = arith.addf %292, %297 : vector<1x2x2x128xf32>
    %c0_206 = arith.constant 0 : index
    %c2_207 = arith.constant 2 : index
    %c0_208 = arith.constant 0 : index
    %c0_209 = arith.constant 0 : index
    %299 = vector.load %arg27[%c0_206, %c2_207, %c0_208, %c0_209] : memref<1x4x4x128xf32, #tpu.memory_space<vmem>>, vector<1x2x2x128xf32>
    %300 = vector.extract_strided_slice %263 {offsets = [6, 0], sizes = [1, 128], strides = [1, 1]} : vector<9x128xf32> to vector<1x128xf32>
    %301 = vector.shape_cast %300 : vector<1x128xf32> to vector<1x1x1x128xf32>
    %302 = vector.broadcast %301 : vector<1x1x1x128xf32> to vector<1x2x2x128xf32>
    %303 = arith.mulf %299, %302 : vector<1x2x2x128xf32>
    %304 = arith.addf %298, %303 : vector<1x2x2x128xf32>
    %c0_210 = arith.constant 0 : index
    %c2_211 = arith.constant 2 : index
    %c1_212 = arith.constant 1 : index
    %c0_213 = arith.constant 0 : index
    %305 = vector.load %arg27[%c0_210, %c2_211, %c1_212, %c0_213] : memref<1x4x4x128xf32, #tpu.memory_space<vmem>>, vector<1x2x2x128xf32>
    %306 = vector.extract_strided_slice %263 {offsets = [7, 0], sizes = [1, 128], strides = [1, 1]} : vector<9x128xf32> to vector<1x128xf32>
    %307 = vector.shape_cast %306 : vector<1x128xf32> to vector<1x1x1x128xf32>
    %308 = vector.broadcast %307 : vector<1x1x1x128xf32> to vector<1x2x2x128xf32>
    %309 = arith.mulf %305, %308 : vector<1x2x2x128xf32>
    %310 = arith.addf %304, %309 : vector<1x2x2x128xf32>
    %c0_214 = arith.constant 0 : index
    %c2_215 = arith.constant 2 : index
    %c2_216 = arith.constant 2 : index
    %c0_217 = arith.constant 0 : index
    %311 = vector.load %arg27[%c0_214, %c2_215, %c2_216, %c0_217] : memref<1x4x4x128xf32, #tpu.memory_space<vmem>>, vector<1x2x2x128xf32>
    %312 = vector.extract_strided_slice %263 {offsets = [8, 0], sizes = [1, 128], strides = [1, 1]} : vector<9x128xf32> to vector<1x128xf32>
    %313 = vector.shape_cast %312 : vector<1x128xf32> to vector<1x1x1x128xf32>
    %314 = vector.broadcast %313 : vector<1x1x1x128xf32> to vector<1x2x2x128xf32>
    %315 = arith.mulf %311, %314 : vector<1x2x2x128xf32>
    %316 = arith.addf %310, %315 : vector<1x2x2x128xf32>
    %c0_218 = arith.constant 0 : index
    %c0_219 = arith.constant 0 : index
    %317 = vector.load %arg15[%c0_218, %c0_219] : memref<1x128xf32, #tpu.memory_space<vmem>>, vector<1x128xf32>
    %318 = vector.shape_cast %317 : vector<1x128xf32> to vector<1x1x1x128xf32>
    %319 = vector.broadcast %318 : vector<1x1x1x128xf32> to vector<1x2x2x128xf32>
    %320 = arith.addf %316, %319 : vector<1x2x2x128xf32>
    %cst_220 = arith.constant 0.000000e+00 : f32
    %cst_221 = arith.constant 6.000000e+00 : f32
    %321 = vector.broadcast %cst_220 : f32 to vector<1x2x2x128xf32>
    %322 = arith.maximumf %321, %320 : vector<1x2x2x128xf32>
    %323 = vector.broadcast %cst_221 : f32 to vector<1x2x2x128xf32>
    %324 = arith.minimumf %323, %322 : vector<1x2x2x128xf32>
    %325 = vector.shape_cast %324 : vector<1x2x2x128xf32> to vector<4x128xf32>
    %326 = arith.truncf %325 : vector<4x128xf32> to vector<4x128xbf16>
    %c0_222 = arith.constant 0 : index
    %c0_223 = arith.constant 0 : index
    %327 = vector.load %arg16[%c0_222, %c0_223] : memref<128x128xbf16, #tpu.memory_space<vmem>>, vector<128x128xbf16>
    %cst_224 = arith.constant dense<0.000000e+00> : vector<4x128xf32>
    %328 = tpu.matmul %326, %327, %cst_224 {dimension_numbers = #tpu.dot_dimension_numbers<[1], [0], [0], [1], [0, 0, 1, 1], [], []>} : vector<4x128xbf16>, vector<128x128xbf16>, vector<4x128xf32> -> vector<4x128xf32>
    %c0_225 = arith.constant 0 : index
    %c0_226 = arith.constant 0 : index
    %329 = vector.load %arg17[%c0_225, %c0_226] : memref<1x128xf32, #tpu.memory_space<vmem>>, vector<1x128xf32>
    %330 = vector.broadcast %329 : vector<1x128xf32> to vector<4x128xf32>
    %331 = arith.addf %328, %330 : vector<4x128xf32>
    %cst_227 = arith.constant 0.000000e+00 : f32
    %cst_228 = arith.constant 6.000000e+00 : f32
    %332 = vector.broadcast %cst_227 : f32 to vector<4x128xf32>
    %333 = arith.maximumf %332, %331 : vector<4x128xf32>
    %334 = vector.broadcast %cst_228 : f32 to vector<4x128xf32>
    %335 = arith.minimumf %334, %333 : vector<4x128xf32>
    %336 = vector.extract_strided_slice %335 {offsets = [0, 0], sizes = [2, 128], strides = [1, 1]} : vector<4x128xf32> to vector<2x128xf32>
    %c0_229 = arith.constant 0 : index
    %c1_230 = arith.constant 1 : index
    %c1_231 = arith.constant 1 : index
    %c0_232 = arith.constant 0 : index
    %337 = vector.load %arg27[%c0_229, %c1_230, %c1_231, %c0_232] : memref<1x4x4x128xf32, #tpu.memory_space<vmem>>, vector<1x1x2x128xf32>
    %338 = vector.shape_cast %337 : vector<1x1x2x128xf32> to vector<2x128xf32>
    %339 = vector.shape_cast %336 : vector<2x128xf32> to vector<1x1x2x128xf32>
    tpu.vector_store %arg27[%c0_229, %c1_230, %c1_231, %c0_232], %339 {strides = array<i32>} : memref<1x4x4x128xf32, #tpu.memory_space<vmem>>, vector<1x1x2x128xf32>,
    %340 = vector.extract_strided_slice %335 {offsets = [2, 0], sizes = [2, 128], strides = [1, 1]} : vector<4x128xf32> to vector<2x128xf32>
    %c0_233 = arith.constant 0 : index
    %c2_234 = arith.constant 2 : index
    %c1_235 = arith.constant 1 : index
    %c0_236 = arith.constant 0 : index
    %341 = vector.load %arg27[%c0_233, %c2_234, %c1_235, %c0_236] : memref<1x4x4x128xf32, #tpu.memory_space<vmem>>, vector<1x1x2x128xf32>
    %342 = vector.shape_cast %341 : vector<1x1x2x128xf32> to vector<2x128xf32>
    %343 = vector.shape_cast %340 : vector<2x128xf32> to vector<1x1x2x128xf32>
    tpu.vector_store %arg27[%c0_233, %c2_234, %c1_235, %c0_236], %343 {strides = array<i32>} : memref<1x4x4x128xf32, #tpu.memory_space<vmem>>, vector<1x1x2x128xf32>,
    %c0_237 = arith.constant 0 : index
    %c0_238 = arith.constant 0 : index
    %344 = vector.load %arg18[%c0_237, %c0_238] : memref<9x128xf32, #tpu.memory_space<vmem>>, vector<9x128xf32>
    %c0_239 = arith.constant 0 : index
    %c0_240 = arith.constant 0 : index
    %c0_241 = arith.constant 0 : index
    %c0_242 = arith.constant 0 : index
    %345 = vector.load %arg27[%c0_239, %c0_240, %c0_241, %c0_242] : memref<1x4x4x128xf32, #tpu.memory_space<vmem>>, vector<1x2x2x128xf32>
    %346 = vector.extract_strided_slice %344 {offsets = [0, 0], sizes = [1, 128], strides = [1, 1]} : vector<9x128xf32> to vector<1x128xf32>
    %347 = vector.shape_cast %346 : vector<1x128xf32> to vector<1x1x1x128xf32>
    %348 = vector.broadcast %347 : vector<1x1x1x128xf32> to vector<1x2x2x128xf32>
    %349 = arith.mulf %345, %348 : vector<1x2x2x128xf32>
    %c0_243 = arith.constant 0 : index
    %c0_244 = arith.constant 0 : index
    %c1_245 = arith.constant 1 : index
    %c0_246 = arith.constant 0 : index
    %350 = vector.load %arg27[%c0_243, %c0_244, %c1_245, %c0_246] : memref<1x4x4x128xf32, #tpu.memory_space<vmem>>, vector<1x2x2x128xf32>
    %351 = vector.extract_strided_slice %344 {offsets = [1, 0], sizes = [1, 128], strides = [1, 1]} : vector<9x128xf32> to vector<1x128xf32>
    %352 = vector.shape_cast %351 : vector<1x128xf32> to vector<1x1x1x128xf32>
    %353 = vector.broadcast %352 : vector<1x1x1x128xf32> to vector<1x2x2x128xf32>
    %354 = arith.mulf %350, %353 : vector<1x2x2x128xf32>
    %355 = arith.addf %349, %354 : vector<1x2x2x128xf32>
    %c0_247 = arith.constant 0 : index
    %c0_248 = arith.constant 0 : index
    %c2_249 = arith.constant 2 : index
    %c0_250 = arith.constant 0 : index
    %356 = vector.load %arg27[%c0_247, %c0_248, %c2_249, %c0_250] : memref<1x4x4x128xf32, #tpu.memory_space<vmem>>, vector<1x2x2x128xf32>
    %357 = vector.extract_strided_slice %344 {offsets = [2, 0], sizes = [1, 128], strides = [1, 1]} : vector<9x128xf32> to vector<1x128xf32>
    %358 = vector.shape_cast %357 : vector<1x128xf32> to vector<1x1x1x128xf32>
    %359 = vector.broadcast %358 : vector<1x1x1x128xf32> to vector<1x2x2x128xf32>
    %360 = arith.mulf %356, %359 : vector<1x2x2x128xf32>
    %361 = arith.addf %355, %360 : vector<1x2x2x128xf32>
    %c0_251 = arith.constant 0 : index
    %c1_252 = arith.constant 1 : index
    %c0_253 = arith.constant 0 : index
    %c0_254 = arith.constant 0 : index
    %362 = vector.load %arg27[%c0_251, %c1_252, %c0_253, %c0_254] : memref<1x4x4x128xf32, #tpu.memory_space<vmem>>, vector<1x2x2x128xf32>
    %363 = vector.extract_strided_slice %344 {offsets = [3, 0], sizes = [1, 128], strides = [1, 1]} : vector<9x128xf32> to vector<1x128xf32>
    %364 = vector.shape_cast %363 : vector<1x128xf32> to vector<1x1x1x128xf32>
    %365 = vector.broadcast %364 : vector<1x1x1x128xf32> to vector<1x2x2x128xf32>
    %366 = arith.mulf %362, %365 : vector<1x2x2x128xf32>
    %367 = arith.addf %361, %366 : vector<1x2x2x128xf32>
    %c0_255 = arith.constant 0 : index
    %c1_256 = arith.constant 1 : index
    %c1_257 = arith.constant 1 : index
    %c0_258 = arith.constant 0 : index
    %368 = vector.load %arg27[%c0_255, %c1_256, %c1_257, %c0_258] : memref<1x4x4x128xf32, #tpu.memory_space<vmem>>, vector<1x2x2x128xf32>
    %369 = vector.extract_strided_slice %344 {offsets = [4, 0], sizes = [1, 128], strides = [1, 1]} : vector<9x128xf32> to vector<1x128xf32>
    %370 = vector.shape_cast %369 : vector<1x128xf32> to vector<1x1x1x128xf32>
    %371 = vector.broadcast %370 : vector<1x1x1x128xf32> to vector<1x2x2x128xf32>
    %372 = arith.mulf %368, %371 : vector<1x2x2x128xf32>
    %373 = arith.addf %367, %372 : vector<1x2x2x128xf32>
    %c0_259 = arith.constant 0 : index
    %c1_260 = arith.constant 1 : index
    %c2_261 = arith.constant 2 : index
    %c0_262 = arith.constant 0 : index
    %374 = vector.load %arg27[%c0_259, %c1_260, %c2_261, %c0_262] : memref<1x4x4x128xf32, #tpu.memory_space<vmem>>, vector<1x2x2x128xf32>
    %375 = vector.extract_strided_slice %344 {offsets = [5, 0], sizes = [1, 128], strides = [1, 1]} : vector<9x128xf32> to vector<1x128xf32>
    %376 = vector.shape_cast %375 : vector<1x128xf32> to vector<1x1x1x128xf32>
    %377 = vector.broadcast %376 : vector<1x1x1x128xf32> to vector<1x2x2x128xf32>
    %378 = arith.mulf %374, %377 : vector<1x2x2x128xf32>
    %379 = arith.addf %373, %378 : vector<1x2x2x128xf32>
    %c0_263 = arith.constant 0 : index
    %c2_264 = arith.constant 2 : index
    %c0_265 = arith.constant 0 : index
    %c0_266 = arith.constant 0 : index
    %380 = vector.load %arg27[%c0_263, %c2_264, %c0_265, %c0_266] : memref<1x4x4x128xf32, #tpu.memory_space<vmem>>, vector<1x2x2x128xf32>
    %381 = vector.extract_strided_slice %344 {offsets = [6, 0], sizes = [1, 128], strides = [1, 1]} : vector<9x128xf32> to vector<1x128xf32>
    %382 = vector.shape_cast %381 : vector<1x128xf32> to vector<1x1x1x128xf32>
    %383 = vector.broadcast %382 : vector<1x1x1x128xf32> to vector<1x2x2x128xf32>
    %384 = arith.mulf %380, %383 : vector<1x2x2x128xf32>
    %385 = arith.addf %379, %384 : vector<1x2x2x128xf32>
    %c0_267 = arith.constant 0 : index
    %c2_268 = arith.constant 2 : index
    %c1_269 = arith.constant 1 : index
    %c0_270 = arith.constant 0 : index
    %386 = vector.load %arg27[%c0_267, %c2_268, %c1_269, %c0_270] : memref<1x4x4x128xf32, #tpu.memory_space<vmem>>, vector<1x2x2x128xf32>
    %387 = vector.extract_strided_slice %344 {offsets = [7, 0], sizes = [1, 128], strides = [1, 1]} : vector<9x128xf32> to vector<1x128xf32>
    %388 = vector.shape_cast %387 : vector<1x128xf32> to vector<1x1x1x128xf32>
    %389 = vector.broadcast %388 : vector<1x1x1x128xf32> to vector<1x2x2x128xf32>
    %390 = arith.mulf %386, %389 : vector<1x2x2x128xf32>
    %391 = arith.addf %385, %390 : vector<1x2x2x128xf32>
    %c0_271 = arith.constant 0 : index
    %c2_272 = arith.constant 2 : index
    %c2_273 = arith.constant 2 : index
    %c0_274 = arith.constant 0 : index
    %392 = vector.load %arg27[%c0_271, %c2_272, %c2_273, %c0_274] : memref<1x4x4x128xf32, #tpu.memory_space<vmem>>, vector<1x2x2x128xf32>
    %393 = vector.extract_strided_slice %344 {offsets = [8, 0], sizes = [1, 128], strides = [1, 1]} : vector<9x128xf32> to vector<1x128xf32>
    %394 = vector.shape_cast %393 : vector<1x128xf32> to vector<1x1x1x128xf32>
    %395 = vector.broadcast %394 : vector<1x1x1x128xf32> to vector<1x2x2x128xf32>
    %396 = arith.mulf %392, %395 : vector<1x2x2x128xf32>
    %397 = arith.addf %391, %396 : vector<1x2x2x128xf32>
    %c0_275 = arith.constant 0 : index
    %c0_276 = arith.constant 0 : index
    %398 = vector.load %arg19[%c0_275, %c0_276] : memref<1x128xf32, #tpu.memory_space<vmem>>, vector<1x128xf32>
    %399 = vector.shape_cast %398 : vector<1x128xf32> to vector<1x1x1x128xf32>
    %400 = vector.broadcast %399 : vector<1x1x1x128xf32> to vector<1x2x2x128xf32>
    %401 = arith.addf %397, %400 : vector<1x2x2x128xf32>
    %cst_277 = arith.constant 0.000000e+00 : f32
    %cst_278 = arith.constant 6.000000e+00 : f32
    %402 = vector.broadcast %cst_277 : f32 to vector<1x2x2x128xf32>
    %403 = arith.maximumf %402, %401 : vector<1x2x2x128xf32>
    %404 = vector.broadcast %cst_278 : f32 to vector<1x2x2x128xf32>
    %405 = arith.minimumf %404, %403 : vector<1x2x2x128xf32>
    %406 = vector.shape_cast %405 : vector<1x2x2x128xf32> to vector<4x128xf32>
    %407 = arith.truncf %406 : vector<4x128xf32> to vector<4x128xbf16>
    %c0_279 = arith.constant 0 : index
    %c0_280 = arith.constant 0 : index
    %408 = vector.load %arg20[%c0_279, %c0_280] : memref<128x128xbf16, #tpu.memory_space<vmem>>, vector<128x128xbf16>
    %cst_281 = arith.constant dense<0.000000e+00> : vector<4x128xf32>
    %409 = tpu.matmul %407, %408, %cst_281 {dimension_numbers = #tpu.dot_dimension_numbers<[1], [0], [0], [1], [0, 0, 1, 1], [], []>} : vector<4x128xbf16>, vector<128x128xbf16>, vector<4x128xf32> -> vector<4x128xf32>
    %c0_282 = arith.constant 0 : index
    %c0_283 = arith.constant 0 : index
    %410 = vector.load %arg21[%c0_282, %c0_283] : memref<1x128xf32, #tpu.memory_space<vmem>>, vector<1x128xf32>
    %411 = vector.broadcast %410 : vector<1x128xf32> to vector<4x128xf32>
    %412 = arith.addf %409, %411 : vector<4x128xf32>
    %cst_284 = arith.constant 0.000000e+00 : f32
    %cst_285 = arith.constant 6.000000e+00 : f32
    %413 = vector.broadcast %cst_284 : f32 to vector<4x128xf32>
    %414 = arith.maximumf %413, %412 : vector<4x128xf32>
    %415 = vector.broadcast %cst_285 : f32 to vector<4x128xf32>
    %416 = arith.minimumf %415, %414 : vector<4x128xf32>
    %417 = vector.extract_strided_slice %416 {offsets = [0, 0], sizes = [2, 128], strides = [1, 1]} : vector<4x128xf32> to vector<2x128xf32>
    %c0_286 = arith.constant 0 : index
    %c1_287 = arith.constant 1 : index
    %c1_288 = arith.constant 1 : index
    %c0_289 = arith.constant 0 : index
    %418 = vector.load %arg27[%c0_286, %c1_287, %c1_288, %c0_289] : memref<1x4x4x128xf32, #tpu.memory_space<vmem>>, vector<1x1x2x128xf32>
    %419 = vector.shape_cast %418 : vector<1x1x2x128xf32> to vector<2x128xf32>
    %420 = vector.shape_cast %417 : vector<2x128xf32> to vector<1x1x2x128xf32>
    tpu.vector_store %arg27[%c0_286, %c1_287, %c1_288, %c0_289], %420 {strides = array<i32>} : memref<1x4x4x128xf32, #tpu.memory_space<vmem>>, vector<1x1x2x128xf32>,
    %421 = vector.extract_strided_slice %416 {offsets = [2, 0], sizes = [2, 128], strides = [1, 1]} : vector<4x128xf32> to vector<2x128xf32>
    %c0_290 = arith.constant 0 : index
    %c2_291 = arith.constant 2 : index
    %c1_292 = arith.constant 1 : index
    %c0_293 = arith.constant 0 : index
    %422 = vector.load %arg27[%c0_290, %c2_291, %c1_292, %c0_293] : memref<1x4x4x128xf32, #tpu.memory_space<vmem>>, vector<1x1x2x128xf32>
    %423 = vector.shape_cast %422 : vector<1x1x2x128xf32> to vector<2x128xf32>
    %424 = vector.shape_cast %421 : vector<2x128xf32> to vector<1x1x2x128xf32>
    tpu.vector_store %arg27[%c0_290, %c2_291, %c1_292, %c0_293], %424 {strides = array<i32>} : memref<1x4x4x128xf32, #tpu.memory_space<vmem>>, vector<1x1x2x128xf32>,
    %c0_294 = arith.constant 0 : index
    %c0_295 = arith.constant 0 : index
    %425 = vector.load %arg22[%c0_294, %c0_295] : memref<9x128xf32, #tpu.memory_space<vmem>>, vector<9x128xf32>
    %c0_296 = arith.constant 0 : index
    %c0_297 = arith.constant 0 : index
    %c0_298 = arith.constant 0 : index
    %c0_299 = arith.constant 0 : index
    %426 = vector.load %arg27[%c0_296, %c0_297, %c0_298, %c0_299] : memref<1x4x4x128xf32, #tpu.memory_space<vmem>>, vector<1x2x2x128xf32>
    %427 = vector.extract_strided_slice %425 {offsets = [0, 0], sizes = [1, 128], strides = [1, 1]} : vector<9x128xf32> to vector<1x128xf32>
    %428 = vector.shape_cast %427 : vector<1x128xf32> to vector<1x1x1x128xf32>
    %429 = vector.broadcast %428 : vector<1x1x1x128xf32> to vector<1x2x2x128xf32>
    %430 = arith.mulf %426, %429 : vector<1x2x2x128xf32>
    %c0_300 = arith.constant 0 : index
    %c0_301 = arith.constant 0 : index
    %c1_302 = arith.constant 1 : index
    %c0_303 = arith.constant 0 : index
    %431 = vector.load %arg27[%c0_300, %c0_301, %c1_302, %c0_303] : memref<1x4x4x128xf32, #tpu.memory_space<vmem>>, vector<1x2x2x128xf32>
    %432 = vector.extract_strided_slice %425 {offsets = [1, 0], sizes = [1, 128], strides = [1, 1]} : vector<9x128xf32> to vector<1x128xf32>
    %433 = vector.shape_cast %432 : vector<1x128xf32> to vector<1x1x1x128xf32>
    %434 = vector.broadcast %433 : vector<1x1x1x128xf32> to vector<1x2x2x128xf32>
    %435 = arith.mulf %431, %434 : vector<1x2x2x128xf32>
    %436 = arith.addf %430, %435 : vector<1x2x2x128xf32>
    %c0_304 = arith.constant 0 : index
    %c0_305 = arith.constant 0 : index
    %c2_306 = arith.constant 2 : index
    %c0_307 = arith.constant 0 : index
    %437 = vector.load %arg27[%c0_304, %c0_305, %c2_306, %c0_307] : memref<1x4x4x128xf32, #tpu.memory_space<vmem>>, vector<1x2x2x128xf32>
    %438 = vector.extract_strided_slice %425 {offsets = [2, 0], sizes = [1, 128], strides = [1, 1]} : vector<9x128xf32> to vector<1x128xf32>
    %439 = vector.shape_cast %438 : vector<1x128xf32> to vector<1x1x1x128xf32>
    %440 = vector.broadcast %439 : vector<1x1x1x128xf32> to vector<1x2x2x128xf32>
    %441 = arith.mulf %437, %440 : vector<1x2x2x128xf32>
    %442 = arith.addf %436, %441 : vector<1x2x2x128xf32>
    %c0_308 = arith.constant 0 : index
    %c1_309 = arith.constant 1 : index
    %c0_310 = arith.constant 0 : index
    %c0_311 = arith.constant 0 : index
    %443 = vector.load %arg27[%c0_308, %c1_309, %c0_310, %c0_311] : memref<1x4x4x128xf32, #tpu.memory_space<vmem>>, vector<1x2x2x128xf32>
    %444 = vector.extract_strided_slice %425 {offsets = [3, 0], sizes = [1, 128], strides = [1, 1]} : vector<9x128xf32> to vector<1x128xf32>
    %445 = vector.shape_cast %444 : vector<1x128xf32> to vector<1x1x1x128xf32>
    %446 = vector.broadcast %445 : vector<1x1x1x128xf32> to vector<1x2x2x128xf32>
    %447 = arith.mulf %443, %446 : vector<1x2x2x128xf32>
    %448 = arith.addf %442, %447 : vector<1x2x2x128xf32>
    %c0_312 = arith.constant 0 : index
    %c1_313 = arith.constant 1 : index
    %c1_314 = arith.constant 1 : index
    %c0_315 = arith.constant 0 : index
    %449 = vector.load %arg27[%c0_312, %c1_313, %c1_314, %c0_315] : memref<1x4x4x128xf32, #tpu.memory_space<vmem>>, vector<1x2x2x128xf32>
    %450 = vector.extract_strided_slice %425 {offsets = [4, 0], sizes = [1, 128], strides = [1, 1]} : vector<9x128xf32> to vector<1x128xf32>
    %451 = vector.shape_cast %450 : vector<1x128xf32> to vector<1x1x1x128xf32>
    %452 = vector.broadcast %451 : vector<1x1x1x128xf32> to vector<1x2x2x128xf32>
    %453 = arith.mulf %449, %452 : vector<1x2x2x128xf32>
    %454 = arith.addf %448, %453 : vector<1x2x2x128xf32>
    %c0_316 = arith.constant 0 : index
    %c1_317 = arith.constant 1 : index
    %c2_318 = arith.constant 2 : index
    %c0_319 = arith.constant 0 : index
    %455 = vector.load %arg27[%c0_316, %c1_317, %c2_318, %c0_319] : memref<1x4x4x128xf32, #tpu.memory_space<vmem>>, vector<1x2x2x128xf32>
    %456 = vector.extract_strided_slice %425 {offsets = [5, 0], sizes = [1, 128], strides = [1, 1]} : vector<9x128xf32> to vector<1x128xf32>
    %457 = vector.shape_cast %456 : vector<1x128xf32> to vector<1x1x1x128xf32>
    %458 = vector.broadcast %457 : vector<1x1x1x128xf32> to vector<1x2x2x128xf32>
    %459 = arith.mulf %455, %458 : vector<1x2x2x128xf32>
    %460 = arith.addf %454, %459 : vector<1x2x2x128xf32>
    %c0_320 = arith.constant 0 : index
    %c2_321 = arith.constant 2 : index
    %c0_322 = arith.constant 0 : index
    %c0_323 = arith.constant 0 : index
    %461 = vector.load %arg27[%c0_320, %c2_321, %c0_322, %c0_323] : memref<1x4x4x128xf32, #tpu.memory_space<vmem>>, vector<1x2x2x128xf32>
    %462 = vector.extract_strided_slice %425 {offsets = [6, 0], sizes = [1, 128], strides = [1, 1]} : vector<9x128xf32> to vector<1x128xf32>
    %463 = vector.shape_cast %462 : vector<1x128xf32> to vector<1x1x1x128xf32>
    %464 = vector.broadcast %463 : vector<1x1x1x128xf32> to vector<1x2x2x128xf32>
    %465 = arith.mulf %461, %464 : vector<1x2x2x128xf32>
    %466 = arith.addf %460, %465 : vector<1x2x2x128xf32>
    %c0_324 = arith.constant 0 : index
    %c2_325 = arith.constant 2 : index
    %c1_326 = arith.constant 1 : index
    %c0_327 = arith.constant 0 : index
    %467 = vector.load %arg27[%c0_324, %c2_325, %c1_326, %c0_327] : memref<1x4x4x128xf32, #tpu.memory_space<vmem>>, vector<1x2x2x128xf32>
    %468 = vector.extract_strided_slice %425 {offsets = [7, 0], sizes = [1, 128], strides = [1, 1]} : vector<9x128xf32> to vector<1x128xf32>
    %469 = vector.shape_cast %468 : vector<1x128xf32> to vector<1x1x1x128xf32>
    %470 = vector.broadcast %469 : vector<1x1x1x128xf32> to vector<1x2x2x128xf32>
    %471 = arith.mulf %467, %470 : vector<1x2x2x128xf32>
    %472 = arith.addf %466, %471 : vector<1x2x2x128xf32>
    %c0_328 = arith.constant 0 : index
    %c2_329 = arith.constant 2 : index
    %c2_330 = arith.constant 2 : index
    %c0_331 = arith.constant 0 : index
    %473 = vector.load %arg27[%c0_328, %c2_329, %c2_330, %c0_331] : memref<1x4x4x128xf32, #tpu.memory_space<vmem>>, vector<1x2x2x128xf32>
    %474 = vector.extract_strided_slice %425 {offsets = [8, 0], sizes = [1, 128], strides = [1, 1]} : vector<9x128xf32> to vector<1x128xf32>
    %475 = vector.shape_cast %474 : vector<1x128xf32> to vector<1x1x1x128xf32>
    %476 = vector.broadcast %475 : vector<1x1x1x128xf32> to vector<1x2x2x128xf32>
    %477 = arith.mulf %473, %476 : vector<1x2x2x128xf32>
    %478 = arith.addf %472, %477 : vector<1x2x2x128xf32>
    %c0_332 = arith.constant 0 : index
    %c0_333 = arith.constant 0 : index
    %479 = vector.load %arg23[%c0_332, %c0_333] : memref<1x128xf32, #tpu.memory_space<vmem>>, vector<1x128xf32>
    %480 = vector.shape_cast %479 : vector<1x128xf32> to vector<1x1x1x128xf32>
    %481 = vector.broadcast %480 : vector<1x1x1x128xf32> to vector<1x2x2x128xf32>
    %482 = arith.addf %478, %481 : vector<1x2x2x128xf32>
    %cst_334 = arith.constant 0.000000e+00 : f32
    %cst_335 = arith.constant 6.000000e+00 : f32
    %483 = vector.broadcast %cst_334 : f32 to vector<1x2x2x128xf32>
    %484 = arith.maximumf %483, %482 : vector<1x2x2x128xf32>
    %485 = vector.broadcast %cst_335 : f32 to vector<1x2x2x128xf32>
    %486 = arith.minimumf %485, %484 : vector<1x2x2x128xf32>
    %487 = vector.shape_cast %486 : vector<1x2x2x128xf32> to vector<4x128xf32>
    %488 = arith.truncf %487 : vector<4x128xf32> to vector<4x128xbf16>
    %c0_336 = arith.constant 0 : index
    %c0_337 = arith.constant 0 : index
    %489 = vector.load %arg24[%c0_336, %c0_337] : memref<128x128xbf16, #tpu.memory_space<vmem>>, vector<128x128xbf16>
    %cst_338 = arith.constant dense<0.000000e+00> : vector<4x128xf32>
    %490 = tpu.matmul %488, %489, %cst_338 {dimension_numbers = #tpu.dot_dimension_numbers<[1], [0], [0], [1], [0, 0, 1, 1], [], []>} : vector<4x128xbf16>, vector<128x128xbf16>, vector<4x128xf32> -> vector<4x128xf32>
    %c0_339 = arith.constant 0 : index
    %c0_340 = arith.constant 0 : index
    %491 = vector.load %arg25[%c0_339, %c0_340] : memref<1x128xf32, #tpu.memory_space<vmem>>, vector<1x128xf32>
    %492 = vector.broadcast %491 : vector<1x128xf32> to vector<4x128xf32>
    %493 = arith.addf %490, %492 : vector<4x128xf32>
    %cst_341 = arith.constant 0.000000e+00 : f32
    %cst_342 = arith.constant 6.000000e+00 : f32
    %494 = vector.broadcast %cst_341 : f32 to vector<4x128xf32>
    %495 = arith.maximumf %494, %493 : vector<4x128xf32>
    %496 = vector.broadcast %cst_342 : f32 to vector<4x128xf32>
    %497 = arith.minimumf %496, %495 : vector<4x128xf32>
    %498 = arith.truncf %497 : vector<4x128xf32> to vector<4x128xbf16>
    %c0_343 = arith.constant 0 : index
    %c0_344 = arith.constant 0 : index
    %c0_345 = arith.constant 0 : index
    %499 = vector.load %arg26[%c0_343, %c0_344, %c0_345] : memref<1x4x128xbf16, #tpu.memory_space<vmem>>, vector<1x4x128xbf16>
    %500 = vector.shape_cast %499 : vector<1x4x128xbf16> to vector<4x128xbf16>
    %501 = vector.shape_cast %498 : vector<4x128xbf16> to vector<1x4x128xbf16>
    tpu.vector_store %arg26[%c0_343, %c0_344, %c0_345], %501 {strides = array<i32>} : memref<1x4x128xbf16, #tpu.memory_space<vmem>>, vector<1x4x128xbf16>,
    return
  }
  func.func @transform_0(%arg0: i32) -> (i32, i32, i32, i32, i32) {
    %c0_i32 = arith.constant 0 : i32
    %c0_i32_0 = arith.constant 0 : i32
    %c0_i32_1 = arith.constant 0 : i32
    %c0_i32_2 = arith.constant 0 : i32
    %c0_i32_3 = arith.constant 0 : i32
    return %c0_i32, %arg0, %c0_i32_0, %c0_i32_1, %c0_i32_2 : i32, i32, i32, i32, i32
  }
  func.func @transform_1(%arg0: i32) -> (i32, i32) {
    %c0_i32 = arith.constant 0 : i32
    %c0_i32_0 = arith.constant 0 : i32
    %c0_i32_1 = arith.constant 0 : i32
    return %c0_i32, %c0_i32_0 : i32, i32
  }
  func.func @transform_2(%arg0: i32) -> (i32, i32) {
    %c0_i32 = arith.constant 0 : i32
    %c0_i32_0 = arith.constant 0 : i32
    %c0_i32_1 = arith.constant 0 : i32
    return %c0_i32, %c0_i32_0 : i32, i32
  }
  func.func @transform_3(%arg0: i32) -> (i32, i32) {
    %c0_i32 = arith.constant 0 : i32
    %c0_i32_0 = arith.constant 0 : i32
    %c0_i32_1 = arith.constant 0 : i32
    return %c0_i32, %c0_i32_0 : i32, i32
  }
  func.func @transform_4(%arg0: i32) -> (i32, i32) {
    %c0_i32 = arith.constant 0 : i32
    %c0_i32_0 = arith.constant 0 : i32
    %c0_i32_1 = arith.constant 0 : i32
    return %c0_i32, %c0_i32_0 : i32, i32
  }
  func.func @transform_5(%arg0: i32) -> (i32, i32) {
    %c0_i32 = arith.constant 0 : i32
    %c0_i32_0 = arith.constant 0 : i32
    %c0_i32_1 = arith.constant 0 : i32
    return %c0_i32, %c0_i32_0 : i32, i32
  }
  func.func @transform_6(%arg0: i32) -> (i32, i32) {
    %c0_i32 = arith.constant 0 : i32
    %c0_i32_0 = arith.constant 0 : i32
    %c0_i32_1 = arith.constant 0 : i32
    return %c0_i32, %c0_i32_0 : i32, i32
  }
  func.func @transform_7(%arg0: i32) -> (i32, i32) {
    %c0_i32 = arith.constant 0 : i32
    %c0_i32_0 = arith.constant 0 : i32
    %c0_i32_1 = arith.constant 0 : i32
    return %c0_i32, %c0_i32_0 : i32, i32
  }
  func.func @transform_8(%arg0: i32) -> (i32, i32) {
    %c0_i32 = arith.constant 0 : i32
    %c0_i32_0 = arith.constant 0 : i32
    %c0_i32_1 = arith.constant 0 : i32
    return %c0_i32, %c0_i32_0 : i32, i32
  }
  func.func @transform_9(%arg0: i32) -> (i32, i32) {
    %c0_i32 = arith.constant 0 : i32
    %c0_i32_0 = arith.constant 0 : i32
    %c0_i32_1 = arith.constant 0 : i32
    return %c0_i32, %c0_i32_0 : i32, i32
  }
  func.func @transform_10(%arg0: i32) -> (i32, i32) {
    %c0_i32 = arith.constant 0 : i32
    %c0_i32_0 = arith.constant 0 : i32
    %c0_i32_1 = arith.constant 0 : i32
    return %c0_i32, %c0_i32_0 : i32, i32
  }
  func.func @transform_11(%arg0: i32) -> (i32, i32) {
    %c0_i32 = arith.constant 0 : i32
    %c0_i32_0 = arith.constant 0 : i32
    %c0_i32_1 = arith.constant 0 : i32
    return %c0_i32, %c0_i32_0 : i32, i32
  }
  func.func @transform_12(%arg0: i32) -> (i32, i32) {
    %c0_i32 = arith.constant 0 : i32
    %c0_i32_0 = arith.constant 0 : i32
    %c0_i32_1 = arith.constant 0 : i32
    return %c0_i32, %c0_i32_0 : i32, i32
  }
  func.func @transform_13(%arg0: i32) -> (i32, i32) {
    %c0_i32 = arith.constant 0 : i32
    %c0_i32_0 = arith.constant 0 : i32
    %c0_i32_1 = arith.constant 0 : i32
    return %c0_i32, %c0_i32_0 : i32, i32
  }
  func.func @transform_14(%arg0: i32) -> (i32, i32) {
    %c0_i32 = arith.constant 0 : i32
    %c0_i32_0 = arith.constant 0 : i32
    %c0_i32_1 = arith.constant 0 : i32
    return %c0_i32, %c0_i32_0 : i32, i32
  }
  func.func @transform_15(%arg0: i32) -> (i32, i32) {
    %c0_i32 = arith.constant 0 : i32
    %c0_i32_0 = arith.constant 0 : i32
    %c0_i32_1 = arith.constant 0 : i32
    return %c0_i32, %c0_i32_0 : i32, i32
  }
  func.func @transform_16(%arg0: i32) -> (i32, i32) {
    %c0_i32 = arith.constant 0 : i32
    %c0_i32_0 = arith.constant 0 : i32
    %c0_i32_1 = arith.constant 0 : i32
    return %c0_i32, %c0_i32_0 : i32, i32
  }
  func.func @transform_17(%arg0: i32) -> (i32, i32) {
    %c0_i32 = arith.constant 0 : i32
    %c0_i32_0 = arith.constant 0 : i32
    %c0_i32_1 = arith.constant 0 : i32
    return %c0_i32, %c0_i32_0 : i32, i32
  }
  func.func @transform_18(%arg0: i32) -> (i32, i32) {
    %c0_i32 = arith.constant 0 : i32
    %c0_i32_0 = arith.constant 0 : i32
    %c0_i32_1 = arith.constant 0 : i32
    return %c0_i32, %c0_i32_0 : i32, i32
  }
  func.func @transform_19(%arg0: i32) -> (i32, i32) {
    %c0_i32 = arith.constant 0 : i32
    %c0_i32_0 = arith.constant 0 : i32
    %c0_i32_1 = arith.constant 0 : i32
    return %c0_i32, %c0_i32_0 : i32, i32
  }
  func.func @transform_20(%arg0: i32) -> (i32, i32) {
    %c0_i32 = arith.constant 0 : i32
    %c0_i32_0 = arith.constant 0 : i32
    %c0_i32_1 = arith.constant 0 : i32
    return %c0_i32, %c0_i32_0 : i32, i32
  }
  func.func @transform_21(%arg0: i32) -> (i32, i32) {
    %c0_i32 = arith.constant 0 : i32
    %c0_i32_0 = arith.constant 0 : i32
    %c0_i32_1 = arith.constant 0 : i32
    return %c0_i32, %c0_i32_0 : i32, i32
  }
  func.func @transform_22(%arg0: i32) -> (i32, i32) {
    %c0_i32 = arith.constant 0 : i32
    %c0_i32_0 = arith.constant 0 : i32
    %c0_i32_1 = arith.constant 0 : i32
    return %c0_i32, %c0_i32_0 : i32, i32
  }
  func.func @transform_23(%arg0: i32) -> (i32, i32) {
    %c0_i32 = arith.constant 0 : i32
    %c0_i32_0 = arith.constant 0 : i32
    %c0_i32_1 = arith.constant 0 : i32
    return %c0_i32, %c0_i32_0 : i32, i32
  }
  func.func @transform_24(%arg0: i32) -> (i32, i32) {
    %c0_i32 = arith.constant 0 : i32
    %c0_i32_0 = arith.constant 0 : i32
    %c0_i32_1 = arith.constant 0 : i32
    return %c0_i32, %c0_i32_0 : i32, i32
  }
  func.func @transform_25(%arg0: i32) -> (i32, i32, i32) {
    %c0_i32 = arith.constant 0 : i32
    %c0_i32_0 = arith.constant 0 : i32
    %c0_i32_1 = arith.constant 0 : i32
    return %arg0, %c0_i32, %c0_i32_0 : i32, i32, i32
  }
}

module attributes {stable_mosaic.version = 11 : i64} {
  func.func @kernel(%arg0: i32, %arg1: memref<4x1x2x2x128xbf16, #tpu.memory_space<vmem>>, %arg2: memref<9x128xf32, #tpu.memory_space<vmem>>, %arg3: memref<1x128xf32, #tpu.memory_space<vmem>>, %arg4: memref<128x256xbf16, #tpu.memory_space<vmem>>, %arg5: memref<1x256xf32, #tpu.memory_space<vmem>>, %arg6: memref<9x256xf32, #tpu.memory_space<vmem>>, %arg7: memref<1x256xf32, #tpu.memory_space<vmem>>, %arg8: memref<256x256xbf16, #tpu.memory_space<vmem>>, %arg9: memref<1x256xf32, #tpu.memory_space<vmem>>, %arg10: memref<1x1x256xbf16, #tpu.memory_space<vmem>>, %arg11: memref<1x3x3x256xf32, #tpu.memory_space<vmem>>) attributes {dimension_semantics = [#tpu.dimension_semantics<parallel>], iteration_bounds = array<i64: 2>, scalar_prefetch = 0 : i64, scratch_operands = 1 : i64, tpu.core_type = #tpu.core_type<tc>, window_params = [{transform_indices = @transform_0, window_bounds = array<i64: 4, 1, 2, 2, 128>}, {pipeline_mode = #tpu.pipeline_mode<synchronous>, transform_indices = @transform_1, window_bounds = array<i64: 9, 128>}, {pipeline_mode = #tpu.pipeline_mode<synchronous>, transform_indices = @transform_2, window_bounds = array<i64: 1, 128>}, {pipeline_mode = #tpu.pipeline_mode<synchronous>, transform_indices = @transform_3, window_bounds = array<i64: 128, 256>}, {pipeline_mode = #tpu.pipeline_mode<synchronous>, transform_indices = @transform_4, window_bounds = array<i64: 1, 256>}, {pipeline_mode = #tpu.pipeline_mode<synchronous>, transform_indices = @transform_5, window_bounds = array<i64: 9, 256>}, {pipeline_mode = #tpu.pipeline_mode<synchronous>, transform_indices = @transform_6, window_bounds = array<i64: 1, 256>}, {pipeline_mode = #tpu.pipeline_mode<synchronous>, transform_indices = @transform_7, window_bounds = array<i64: 256, 256>}, {pipeline_mode = #tpu.pipeline_mode<synchronous>, transform_indices = @transform_8, window_bounds = array<i64: 1, 256>}, {transform_indices = @transform_9, window_bounds = array<i64: 1, 1, 256>}]} {
    %cst = arith.constant 0.000000e+00 : f32
    %0 = vector.broadcast %cst : f32 to vector<1x3x3x256xf32>
    %c0 = arith.constant 0 : index
    %c0_0 = arith.constant 0 : index
    %c0_1 = arith.constant 0 : index
    %c0_2 = arith.constant 0 : index
    %1 = vector.load %arg11[%c0, %c0_0, %c0_1, %c0_2] : memref<1x3x3x256xf32, #tpu.memory_space<vmem>>, vector<1x3x3x256xf32>
    tpu.vector_store %arg11[%c0, %c0_0, %c0_1, %c0_2], %0 {strides = array<i32>} : memref<1x3x3x256xf32, #tpu.memory_space<vmem>>, vector<1x3x3x256xf32>,
    %c0_3 = arith.constant 0 : index
    %c0_4 = arith.constant 0 : index
    %2 = vector.load %arg2[%c0_3, %c0_4] : memref<9x128xf32, #tpu.memory_space<vmem>>, vector<9x128xf32>
    %c0_5 = arith.constant 0 : index
    %c0_6 = arith.constant 0 : index
    %c0_7 = arith.constant 0 : index
    %c0_8 = arith.constant 0 : index
    %c0_9 = arith.constant 0 : index
    %3 = vector.load %arg1[%c0_5, %c0_6, %c0_7, %c0_8, %c0_9] : memref<4x1x2x2x128xbf16, #tpu.memory_space<vmem>>, vector<1x1x1x1x128xbf16>
    %4 = vector.shape_cast %3 : vector<1x1x1x1x128xbf16> to vector<1x1x1x128xbf16>
    %5 = arith.extf %4 : vector<1x1x1x128xbf16> to vector<1x1x1x128xf32>
    %6 = vector.extract_strided_slice %2 {offsets = [0, 0], sizes = [1, 128], strides = [1, 1]} : vector<9x128xf32> to vector<1x128xf32>
    %7 = vector.shape_cast %6 : vector<1x128xf32> to vector<1x1x1x128xf32>
    %8 = arith.mulf %5, %7 : vector<1x1x1x128xf32>
    %c1 = arith.constant 1 : index
    %c0_10 = arith.constant 0 : index
    %c0_11 = arith.constant 0 : index
    %c0_12 = arith.constant 0 : index
    %c0_13 = arith.constant 0 : index
    %9 = vector.load %arg1[%c1, %c0_10, %c0_11, %c0_12, %c0_13] : memref<4x1x2x2x128xbf16, #tpu.memory_space<vmem>>, vector<1x1x1x1x128xbf16>
    %10 = vector.shape_cast %9 : vector<1x1x1x1x128xbf16> to vector<1x1x1x128xbf16>
    %11 = arith.extf %10 : vector<1x1x1x128xbf16> to vector<1x1x1x128xf32>
    %12 = vector.extract_strided_slice %2 {offsets = [1, 0], sizes = [1, 128], strides = [1, 1]} : vector<9x128xf32> to vector<1x128xf32>
    %13 = vector.shape_cast %12 : vector<1x128xf32> to vector<1x1x1x128xf32>
    %14 = arith.mulf %11, %13 : vector<1x1x1x128xf32>
    %15 = arith.addf %8, %14 : vector<1x1x1x128xf32>
    %c0_14 = arith.constant 0 : index
    %c0_15 = arith.constant 0 : index
    %c0_16 = arith.constant 0 : index
    %c1_17 = arith.constant 1 : index
    %c0_18 = arith.constant 0 : index
    %16 = vector.load %arg1[%c0_14, %c0_15, %c0_16, %c1_17, %c0_18] : memref<4x1x2x2x128xbf16, #tpu.memory_space<vmem>>, vector<1x1x1x1x128xbf16>
    %17 = vector.shape_cast %16 : vector<1x1x1x1x128xbf16> to vector<1x1x1x128xbf16>
    %18 = arith.extf %17 : vector<1x1x1x128xbf16> to vector<1x1x1x128xf32>
    %19 = vector.extract_strided_slice %2 {offsets = [2, 0], sizes = [1, 128], strides = [1, 1]} : vector<9x128xf32> to vector<1x128xf32>
    %20 = vector.shape_cast %19 : vector<1x128xf32> to vector<1x1x1x128xf32>
    %21 = arith.mulf %18, %20 : vector<1x1x1x128xf32>
    %22 = arith.addf %15, %21 : vector<1x1x1x128xf32>
    %c2 = arith.constant 2 : index
    %c0_19 = arith.constant 0 : index
    %c0_20 = arith.constant 0 : index
    %c0_21 = arith.constant 0 : index
    %c0_22 = arith.constant 0 : index
    %23 = vector.load %arg1[%c2, %c0_19, %c0_20, %c0_21, %c0_22] : memref<4x1x2x2x128xbf16, #tpu.memory_space<vmem>>, vector<1x1x1x1x128xbf16>
    %24 = vector.shape_cast %23 : vector<1x1x1x1x128xbf16> to vector<1x1x1x128xbf16>
    %25 = arith.extf %24 : vector<1x1x1x128xbf16> to vector<1x1x1x128xf32>
    %26 = vector.extract_strided_slice %2 {offsets = [3, 0], sizes = [1, 128], strides = [1, 1]} : vector<9x128xf32> to vector<1x128xf32>
    %27 = vector.shape_cast %26 : vector<1x128xf32> to vector<1x1x1x128xf32>
    %28 = arith.mulf %25, %27 : vector<1x1x1x128xf32>
    %29 = arith.addf %22, %28 : vector<1x1x1x128xf32>
    %c3 = arith.constant 3 : index
    %c0_23 = arith.constant 0 : index
    %c0_24 = arith.constant 0 : index
    %c0_25 = arith.constant 0 : index
    %c0_26 = arith.constant 0 : index
    %30 = vector.load %arg1[%c3, %c0_23, %c0_24, %c0_25, %c0_26] : memref<4x1x2x2x128xbf16, #tpu.memory_space<vmem>>, vector<1x1x1x1x128xbf16>
    %31 = vector.shape_cast %30 : vector<1x1x1x1x128xbf16> to vector<1x1x1x128xbf16>
    %32 = arith.extf %31 : vector<1x1x1x128xbf16> to vector<1x1x1x128xf32>
    %33 = vector.extract_strided_slice %2 {offsets = [4, 0], sizes = [1, 128], strides = [1, 1]} : vector<9x128xf32> to vector<1x128xf32>
    %34 = vector.shape_cast %33 : vector<1x128xf32> to vector<1x1x1x128xf32>
    %35 = arith.mulf %32, %34 : vector<1x1x1x128xf32>
    %36 = arith.addf %29, %35 : vector<1x1x1x128xf32>
    %c2_27 = arith.constant 2 : index
    %c0_28 = arith.constant 0 : index
    %c0_29 = arith.constant 0 : index
    %c1_30 = arith.constant 1 : index
    %c0_31 = arith.constant 0 : index
    %37 = vector.load %arg1[%c2_27, %c0_28, %c0_29, %c1_30, %c0_31] : memref<4x1x2x2x128xbf16, #tpu.memory_space<vmem>>, vector<1x1x1x1x128xbf16>
    %38 = vector.shape_cast %37 : vector<1x1x1x1x128xbf16> to vector<1x1x1x128xbf16>
    %39 = arith.extf %38 : vector<1x1x1x128xbf16> to vector<1x1x1x128xf32>
    %40 = vector.extract_strided_slice %2 {offsets = [5, 0], sizes = [1, 128], strides = [1, 1]} : vector<9x128xf32> to vector<1x128xf32>
    %41 = vector.shape_cast %40 : vector<1x128xf32> to vector<1x1x1x128xf32>
    %42 = arith.mulf %39, %41 : vector<1x1x1x128xf32>
    %43 = arith.addf %36, %42 : vector<1x1x1x128xf32>
    %c0_32 = arith.constant 0 : index
    %c0_33 = arith.constant 0 : index
    %c1_34 = arith.constant 1 : index
    %c0_35 = arith.constant 0 : index
    %c0_36 = arith.constant 0 : index
    %44 = vector.load %arg1[%c0_32, %c0_33, %c1_34, %c0_35, %c0_36] : memref<4x1x2x2x128xbf16, #tpu.memory_space<vmem>>, vector<1x1x1x1x128xbf16>
    %45 = vector.shape_cast %44 : vector<1x1x1x1x128xbf16> to vector<1x1x1x128xbf16>
    %46 = arith.extf %45 : vector<1x1x1x128xbf16> to vector<1x1x1x128xf32>
    %47 = vector.extract_strided_slice %2 {offsets = [6, 0], sizes = [1, 128], strides = [1, 1]} : vector<9x128xf32> to vector<1x128xf32>
    %48 = vector.shape_cast %47 : vector<1x128xf32> to vector<1x1x1x128xf32>
    %49 = arith.mulf %46, %48 : vector<1x1x1x128xf32>
    %50 = arith.addf %43, %49 : vector<1x1x1x128xf32>
    %c1_37 = arith.constant 1 : index
    %c0_38 = arith.constant 0 : index
    %c1_39 = arith.constant 1 : index
    %c0_40 = arith.constant 0 : index
    %c0_41 = arith.constant 0 : index
    %51 = vector.load %arg1[%c1_37, %c0_38, %c1_39, %c0_40, %c0_41] : memref<4x1x2x2x128xbf16, #tpu.memory_space<vmem>>, vector<1x1x1x1x128xbf16>
    %52 = vector.shape_cast %51 : vector<1x1x1x1x128xbf16> to vector<1x1x1x128xbf16>
    %53 = arith.extf %52 : vector<1x1x1x128xbf16> to vector<1x1x1x128xf32>
    %54 = vector.extract_strided_slice %2 {offsets = [7, 0], sizes = [1, 128], strides = [1, 1]} : vector<9x128xf32> to vector<1x128xf32>
    %55 = vector.shape_cast %54 : vector<1x128xf32> to vector<1x1x1x128xf32>
    %56 = arith.mulf %53, %55 : vector<1x1x1x128xf32>
    %57 = arith.addf %50, %56 : vector<1x1x1x128xf32>
    %c0_42 = arith.constant 0 : index
    %c0_43 = arith.constant 0 : index
    %c1_44 = arith.constant 1 : index
    %c1_45 = arith.constant 1 : index
    %c0_46 = arith.constant 0 : index
    %58 = vector.load %arg1[%c0_42, %c0_43, %c1_44, %c1_45, %c0_46] : memref<4x1x2x2x128xbf16, #tpu.memory_space<vmem>>, vector<1x1x1x1x128xbf16>
    %59 = vector.shape_cast %58 : vector<1x1x1x1x128xbf16> to vector<1x1x1x128xbf16>
    %60 = arith.extf %59 : vector<1x1x1x128xbf16> to vector<1x1x1x128xf32>
    %61 = vector.extract_strided_slice %2 {offsets = [8, 0], sizes = [1, 128], strides = [1, 1]} : vector<9x128xf32> to vector<1x128xf32>
    %62 = vector.shape_cast %61 : vector<1x128xf32> to vector<1x1x1x128xf32>
    %63 = arith.mulf %60, %62 : vector<1x1x1x128xf32>
    %64 = arith.addf %57, %63 : vector<1x1x1x128xf32>
    %c0_47 = arith.constant 0 : index
    %c0_48 = arith.constant 0 : index
    %65 = vector.load %arg3[%c0_47, %c0_48] : memref<1x128xf32, #tpu.memory_space<vmem>>, vector<1x128xf32>
    %66 = vector.shape_cast %65 : vector<1x128xf32> to vector<1x1x1x128xf32>
    %67 = arith.addf %64, %66 : vector<1x1x1x128xf32>
    %cst_49 = arith.constant 0.000000e+00 : f32
    %cst_50 = arith.constant 6.000000e+00 : f32
    %68 = vector.broadcast %cst_49 : f32 to vector<1x1x1x128xf32>
    %69 = arith.maximumf %68, %67 : vector<1x1x1x128xf32>
    %70 = vector.broadcast %cst_50 : f32 to vector<1x1x1x128xf32>
    %71 = arith.minimumf %70, %69 : vector<1x1x1x128xf32>
    %72 = vector.shape_cast %71 : vector<1x1x1x128xf32> to vector<1x128xf32>
    %73 = arith.truncf %72 : vector<1x128xf32> to vector<1x128xbf16>
    %c0_51 = arith.constant 0 : index
    %c0_52 = arith.constant 0 : index
    %74 = vector.load %arg4[%c0_51, %c0_52] : memref<128x256xbf16, #tpu.memory_space<vmem>>, vector<128x256xbf16>
    %cst_53 = arith.constant dense<0.000000e+00> : vector<1x256xf32>
    %75 = tpu.matmul %73, %74, %cst_53 {dimension_numbers = #tpu.dot_dimension_numbers<[1], [0], [0], [1], [0, 0, 1, 1], [], []>} : vector<1x128xbf16>, vector<128x256xbf16>, vector<1x256xf32> -> vector<1x256xf32>
    %c0_54 = arith.constant 0 : index
    %c0_55 = arith.constant 0 : index
    %76 = vector.load %arg5[%c0_54, %c0_55] : memref<1x256xf32, #tpu.memory_space<vmem>>, vector<1x256xf32>
    %77 = arith.addf %75, %76 : vector<1x256xf32>
    %cst_56 = arith.constant 0.000000e+00 : f32
    %cst_57 = arith.constant 6.000000e+00 : f32
    %78 = vector.broadcast %cst_56 : f32 to vector<1x256xf32>
    %79 = arith.maximumf %78, %77 : vector<1x256xf32>
    %80 = vector.broadcast %cst_57 : f32 to vector<1x256xf32>
    %81 = arith.minimumf %80, %79 : vector<1x256xf32>
    %c0_58 = arith.constant 0 : index
    %c1_59 = arith.constant 1 : index
    %c1_60 = arith.constant 1 : index
    %c0_61 = arith.constant 0 : index
    %82 = vector.load %arg11[%c0_58, %c1_59, %c1_60, %c0_61] : memref<1x3x3x256xf32, #tpu.memory_space<vmem>>, vector<1x1x1x256xf32>
    %83 = vector.shape_cast %82 : vector<1x1x1x256xf32> to vector<1x256xf32>
    %84 = vector.shape_cast %81 : vector<1x256xf32> to vector<1x1x1x256xf32>
    tpu.vector_store %arg11[%c0_58, %c1_59, %c1_60, %c0_61], %84 {strides = array<i32>} : memref<1x3x3x256xf32, #tpu.memory_space<vmem>>, vector<1x1x1x256xf32>,
    %c0_62 = arith.constant 0 : index
    %c0_63 = arith.constant 0 : index
    %85 = vector.load %arg6[%c0_62, %c0_63] : memref<9x256xf32, #tpu.memory_space<vmem>>, vector<9x256xf32>
    %c0_64 = arith.constant 0 : index
    %c0_65 = arith.constant 0 : index
    %c0_66 = arith.constant 0 : index
    %c0_67 = arith.constant 0 : index
    %86 = vector.load %arg11[%c0_64, %c0_65, %c0_66, %c0_67] : memref<1x3x3x256xf32, #tpu.memory_space<vmem>>, vector<1x1x1x256xf32>
    %87 = vector.extract_strided_slice %85 {offsets = [0, 0], sizes = [1, 256], strides = [1, 1]} : vector<9x256xf32> to vector<1x256xf32>
    %88 = vector.shape_cast %87 : vector<1x256xf32> to vector<1x1x1x256xf32>
    %89 = arith.mulf %86, %88 : vector<1x1x1x256xf32>
    %c0_68 = arith.constant 0 : index
    %c0_69 = arith.constant 0 : index
    %c1_70 = arith.constant 1 : index
    %c0_71 = arith.constant 0 : index
    %90 = vector.load %arg11[%c0_68, %c0_69, %c1_70, %c0_71] : memref<1x3x3x256xf32, #tpu.memory_space<vmem>>, vector<1x1x1x256xf32>
    %91 = vector.extract_strided_slice %85 {offsets = [1, 0], sizes = [1, 256], strides = [1, 1]} : vector<9x256xf32> to vector<1x256xf32>
    %92 = vector.shape_cast %91 : vector<1x256xf32> to vector<1x1x1x256xf32>
    %93 = arith.mulf %90, %92 : vector<1x1x1x256xf32>
    %94 = arith.addf %89, %93 : vector<1x1x1x256xf32>
    %c0_72 = arith.constant 0 : index
    %c0_73 = arith.constant 0 : index
    %c2_74 = arith.constant 2 : index
    %c0_75 = arith.constant 0 : index
    %95 = vector.load %arg11[%c0_72, %c0_73, %c2_74, %c0_75] : memref<1x3x3x256xf32, #tpu.memory_space<vmem>>, vector<1x1x1x256xf32>
    %96 = vector.extract_strided_slice %85 {offsets = [2, 0], sizes = [1, 256], strides = [1, 1]} : vector<9x256xf32> to vector<1x256xf32>
    %97 = vector.shape_cast %96 : vector<1x256xf32> to vector<1x1x1x256xf32>
    %98 = arith.mulf %95, %97 : vector<1x1x1x256xf32>
    %99 = arith.addf %94, %98 : vector<1x1x1x256xf32>
    %c0_76 = arith.constant 0 : index
    %c1_77 = arith.constant 1 : index
    %c0_78 = arith.constant 0 : index
    %c0_79 = arith.constant 0 : index
    %100 = vector.load %arg11[%c0_76, %c1_77, %c0_78, %c0_79] : memref<1x3x3x256xf32, #tpu.memory_space<vmem>>, vector<1x1x1x256xf32>
    %101 = vector.extract_strided_slice %85 {offsets = [3, 0], sizes = [1, 256], strides = [1, 1]} : vector<9x256xf32> to vector<1x256xf32>
    %102 = vector.shape_cast %101 : vector<1x256xf32> to vector<1x1x1x256xf32>
    %103 = arith.mulf %100, %102 : vector<1x1x1x256xf32>
    %104 = arith.addf %99, %103 : vector<1x1x1x256xf32>
    %c0_80 = arith.constant 0 : index
    %c1_81 = arith.constant 1 : index
    %c1_82 = arith.constant 1 : index
    %c0_83 = arith.constant 0 : index
    %105 = vector.load %arg11[%c0_80, %c1_81, %c1_82, %c0_83] : memref<1x3x3x256xf32, #tpu.memory_space<vmem>>, vector<1x1x1x256xf32>
    %106 = vector.extract_strided_slice %85 {offsets = [4, 0], sizes = [1, 256], strides = [1, 1]} : vector<9x256xf32> to vector<1x256xf32>
    %107 = vector.shape_cast %106 : vector<1x256xf32> to vector<1x1x1x256xf32>
    %108 = arith.mulf %105, %107 : vector<1x1x1x256xf32>
    %109 = arith.addf %104, %108 : vector<1x1x1x256xf32>
    %c0_84 = arith.constant 0 : index
    %c1_85 = arith.constant 1 : index
    %c2_86 = arith.constant 2 : index
    %c0_87 = arith.constant 0 : index
    %110 = vector.load %arg11[%c0_84, %c1_85, %c2_86, %c0_87] : memref<1x3x3x256xf32, #tpu.memory_space<vmem>>, vector<1x1x1x256xf32>
    %111 = vector.extract_strided_slice %85 {offsets = [5, 0], sizes = [1, 256], strides = [1, 1]} : vector<9x256xf32> to vector<1x256xf32>
    %112 = vector.shape_cast %111 : vector<1x256xf32> to vector<1x1x1x256xf32>
    %113 = arith.mulf %110, %112 : vector<1x1x1x256xf32>
    %114 = arith.addf %109, %113 : vector<1x1x1x256xf32>
    %c0_88 = arith.constant 0 : index
    %c2_89 = arith.constant 2 : index
    %c0_90 = arith.constant 0 : index
    %c0_91 = arith.constant 0 : index
    %115 = vector.load %arg11[%c0_88, %c2_89, %c0_90, %c0_91] : memref<1x3x3x256xf32, #tpu.memory_space<vmem>>, vector<1x1x1x256xf32>
    %116 = vector.extract_strided_slice %85 {offsets = [6, 0], sizes = [1, 256], strides = [1, 1]} : vector<9x256xf32> to vector<1x256xf32>
    %117 = vector.shape_cast %116 : vector<1x256xf32> to vector<1x1x1x256xf32>
    %118 = arith.mulf %115, %117 : vector<1x1x1x256xf32>
    %119 = arith.addf %114, %118 : vector<1x1x1x256xf32>
    %c0_92 = arith.constant 0 : index
    %c2_93 = arith.constant 2 : index
    %c1_94 = arith.constant 1 : index
    %c0_95 = arith.constant 0 : index
    %120 = vector.load %arg11[%c0_92, %c2_93, %c1_94, %c0_95] : memref<1x3x3x256xf32, #tpu.memory_space<vmem>>, vector<1x1x1x256xf32>
    %121 = vector.extract_strided_slice %85 {offsets = [7, 0], sizes = [1, 256], strides = [1, 1]} : vector<9x256xf32> to vector<1x256xf32>
    %122 = vector.shape_cast %121 : vector<1x256xf32> to vector<1x1x1x256xf32>
    %123 = arith.mulf %120, %122 : vector<1x1x1x256xf32>
    %124 = arith.addf %119, %123 : vector<1x1x1x256xf32>
    %c0_96 = arith.constant 0 : index
    %c2_97 = arith.constant 2 : index
    %c2_98 = arith.constant 2 : index
    %c0_99 = arith.constant 0 : index
    %125 = vector.load %arg11[%c0_96, %c2_97, %c2_98, %c0_99] : memref<1x3x3x256xf32, #tpu.memory_space<vmem>>, vector<1x1x1x256xf32>
    %126 = vector.extract_strided_slice %85 {offsets = [8, 0], sizes = [1, 256], strides = [1, 1]} : vector<9x256xf32> to vector<1x256xf32>
    %127 = vector.shape_cast %126 : vector<1x256xf32> to vector<1x1x1x256xf32>
    %128 = arith.mulf %125, %127 : vector<1x1x1x256xf32>
    %129 = arith.addf %124, %128 : vector<1x1x1x256xf32>
    %c0_100 = arith.constant 0 : index
    %c0_101 = arith.constant 0 : index
    %130 = vector.load %arg7[%c0_100, %c0_101] : memref<1x256xf32, #tpu.memory_space<vmem>>, vector<1x256xf32>
    %131 = vector.shape_cast %130 : vector<1x256xf32> to vector<1x1x1x256xf32>
    %132 = arith.addf %129, %131 : vector<1x1x1x256xf32>
    %cst_102 = arith.constant 0.000000e+00 : f32
    %cst_103 = arith.constant 6.000000e+00 : f32
    %133 = vector.broadcast %cst_102 : f32 to vector<1x1x1x256xf32>
    %134 = arith.maximumf %133, %132 : vector<1x1x1x256xf32>
    %135 = vector.broadcast %cst_103 : f32 to vector<1x1x1x256xf32>
    %136 = arith.minimumf %135, %134 : vector<1x1x1x256xf32>
    %137 = vector.shape_cast %136 : vector<1x1x1x256xf32> to vector<1x256xf32>
    %138 = arith.truncf %137 : vector<1x256xf32> to vector<1x256xbf16>
    %c0_104 = arith.constant 0 : index
    %c0_105 = arith.constant 0 : index
    %139 = vector.load %arg8[%c0_104, %c0_105] : memref<256x256xbf16, #tpu.memory_space<vmem>>, vector<256x256xbf16>
    %cst_106 = arith.constant dense<0.000000e+00> : vector<1x256xf32>
    %140 = tpu.matmul %138, %139, %cst_106 {dimension_numbers = #tpu.dot_dimension_numbers<[1], [0], [0], [1], [0, 0, 1, 1], [], []>} : vector<1x256xbf16>, vector<256x256xbf16>, vector<1x256xf32> -> vector<1x256xf32>
    %c0_107 = arith.constant 0 : index
    %c0_108 = arith.constant 0 : index
    %141 = vector.load %arg9[%c0_107, %c0_108] : memref<1x256xf32, #tpu.memory_space<vmem>>, vector<1x256xf32>
    %142 = arith.addf %140, %141 : vector<1x256xf32>
    %cst_109 = arith.constant 0.000000e+00 : f32
    %cst_110 = arith.constant 6.000000e+00 : f32
    %143 = vector.broadcast %cst_109 : f32 to vector<1x256xf32>
    %144 = arith.maximumf %143, %142 : vector<1x256xf32>
    %145 = vector.broadcast %cst_110 : f32 to vector<1x256xf32>
    %146 = arith.minimumf %145, %144 : vector<1x256xf32>
    %147 = arith.truncf %146 : vector<1x256xf32> to vector<1x256xbf16>
    %c0_111 = arith.constant 0 : index
    %c0_112 = arith.constant 0 : index
    %c0_113 = arith.constant 0 : index
    %148 = vector.load %arg10[%c0_111, %c0_112, %c0_113] : memref<1x1x256xbf16, #tpu.memory_space<vmem>>, vector<1x1x256xbf16>
    %149 = vector.shape_cast %148 : vector<1x1x256xbf16> to vector<1x256xbf16>
    %150 = vector.shape_cast %147 : vector<1x256xbf16> to vector<1x1x256xbf16>
    tpu.vector_store %arg10[%c0_111, %c0_112, %c0_113], %150 {strides = array<i32>} : memref<1x1x256xbf16, #tpu.memory_space<vmem>>, vector<1x1x256xbf16>,
    return
  }
  func.func @transform_0(%arg0: i32) -> (i32, i32, i32, i32, i32) {
    %c0_i32 = arith.constant 0 : i32
    %c0_i32_0 = arith.constant 0 : i32
    %c0_i32_1 = arith.constant 0 : i32
    %c0_i32_2 = arith.constant 0 : i32
    %c0_i32_3 = arith.constant 0 : i32
    return %c0_i32, %arg0, %c0_i32_0, %c0_i32_1, %c0_i32_2 : i32, i32, i32, i32, i32
  }
  func.func @transform_1(%arg0: i32) -> (i32, i32) {
    %c0_i32 = arith.constant 0 : i32
    %c0_i32_0 = arith.constant 0 : i32
    %c0_i32_1 = arith.constant 0 : i32
    return %c0_i32, %c0_i32_0 : i32, i32
  }
  func.func @transform_2(%arg0: i32) -> (i32, i32) {
    %c0_i32 = arith.constant 0 : i32
    %c0_i32_0 = arith.constant 0 : i32
    %c0_i32_1 = arith.constant 0 : i32
    return %c0_i32, %c0_i32_0 : i32, i32
  }
  func.func @transform_3(%arg0: i32) -> (i32, i32) {
    %c0_i32 = arith.constant 0 : i32
    %c0_i32_0 = arith.constant 0 : i32
    %c0_i32_1 = arith.constant 0 : i32
    return %c0_i32, %c0_i32_0 : i32, i32
  }
  func.func @transform_4(%arg0: i32) -> (i32, i32) {
    %c0_i32 = arith.constant 0 : i32
    %c0_i32_0 = arith.constant 0 : i32
    %c0_i32_1 = arith.constant 0 : i32
    return %c0_i32, %c0_i32_0 : i32, i32
  }
  func.func @transform_5(%arg0: i32) -> (i32, i32) {
    %c0_i32 = arith.constant 0 : i32
    %c0_i32_0 = arith.constant 0 : i32
    %c0_i32_1 = arith.constant 0 : i32
    return %c0_i32, %c0_i32_0 : i32, i32
  }
  func.func @transform_6(%arg0: i32) -> (i32, i32) {
    %c0_i32 = arith.constant 0 : i32
    %c0_i32_0 = arith.constant 0 : i32
    %c0_i32_1 = arith.constant 0 : i32
    return %c0_i32, %c0_i32_0 : i32, i32
  }
  func.func @transform_7(%arg0: i32) -> (i32, i32) {
    %c0_i32 = arith.constant 0 : i32
    %c0_i32_0 = arith.constant 0 : i32
    %c0_i32_1 = arith.constant 0 : i32
    return %c0_i32, %c0_i32_0 : i32, i32
  }
  func.func @transform_8(%arg0: i32) -> (i32, i32) {
    %c0_i32 = arith.constant 0 : i32
    %c0_i32_0 = arith.constant 0 : i32
    %c0_i32_1 = arith.constant 0 : i32
    return %c0_i32, %c0_i32_0 : i32, i32
  }
  func.func @transform_9(%arg0: i32) -> (i32, i32, i32) {
    %c0_i32 = arith.constant 0 : i32
    %c0_i32_0 = arith.constant 0 : i32
    %c0_i32_1 = arith.constant 0 : i32
    return %arg0, %c0_i32, %c0_i32_0 : i32, i32, i32
  }
}

</mosaic_0001>

<bundles_post_ra>
// kernel: _lambda_.5
= control target key start
LH: loop header
LB: loop body
LE: loop exit
PB: predicated region body
PF: predicated region fallthrough
CT: control target
= control target key end

     0   :  { %s2598_s24 = smov 0   ;;  %s3721_s0 = inlined_call_operand.vmem [shape: bf16[2,256,32], index: 0, kind: input, shape index: {}]   ;;  %s3722_s1 = inlined_call_operand.vmem [shape: bf16[32,8], index: 1, kind: input, shape index: {}]   ;;  %s3723_s2 = inlined_call_operand.vmem [shape: f32[1,8], index: 2, kind: input, shape index: {}, may-alias: {2,4}]   ;;  %s3724_s3 = inlined_call_operand.vmem [shape: f32[9,8], index: 3, kind: input, shape index: {}]   ;;  %s3725_s4 = inlined_call_operand.vmem [shape: f32[1,8], index: 4, kind: input, shape index: {}, may-alias: {2,4}]   ;;  %s3726_s5 = inlined_call_operand.vmem [shape: bf16[8,16], index: 5, kind: input, shape index: {}]   ;;  %s3727_s6 = inlined_call_operand.vmem [shape: f32[1,16], index: 6, kind: input, shape index: {}]   ;;  %s3728_s7 = inlined_call_operand.vmem [shape: bf16[2,256,16], index: 7, kind: output, shape index: {}]  }
   0x1 LB: > { %s2283_s25 = sadd.s32 4294967295, %s2555_s24   ;;  %p2287_p0 = scmp.ge.s32.totalorder %s2555_s24, 1  ;;  %s2555_s24 = sphi %s2598_s24, %s17_s24  }
   0x2   : > { %p237_p1 = scmp.lt.s32.totalorder %s2555_s24, 3 }
   0x4   : > { %p238_p2 = pnand %p2287_p0, %p237_p1 }
   0x5   : > { %p269_p3 = scmp.lt.s32.totalorder (!%p238_p2), %s2283_s25, 1 }
   0x6   : > { %241 = sbr.rel (%p238_p2) target bundleno = 629 (0x275), region = 48 }
   0xb   : > { %v2529_v0 = vld [vmem:[%s3722_s1 + $0x8] sm:$0xff]   ;;  %v2530_v1 = vld [vmem:[%s3722_s1] sm:$0xff]   ;;  %s3730_s25 = smov (!%p269_p3, %s2283_s25), 1  ;;  %vm280_vm0 = vcmask 64512   ;;  %v2557_v2 = vmov 0.0   ;;  %vm471_vm1 = vcmask 261120   ;;  %v827_v21 = vlaneseq }
   0xc   : > { %2449 = vmatprep.subr.bf16.mxu0 %v2529_v0  ;;  %288 = vst.msk [vmem:[#allocation2 + $0x30] sm:$0xff] %vm280_vm0, %v2557_v2  ;;  %289 = vst.msk [vmem:[#allocation2 + $0x38] sm:$0xff] %vm280_vm0, %v2557_v2  ;;  %s2380_s30 = sshll.u32 %s3730_s25, 7  ;;  %vm283_vm2 = vcmask 58368   ;;  %v1782_v19 = vld [vmem:[%s3726_s5] sm:$0xf] }
   0xd   : > { %2450 = vmatpush3.bf16.msra.mxu0 %v2529_v0  ;;  %281 = vst.msk [vmem:[#allocation2] sm:$0xff] %vm280_vm0, %v2557_v2  ;;  %282 = vst.msk [vmem:[#allocation2 + $0x8] sm:$0xff] %vm280_vm0, %v2557_v2  ;;  %s2692_s10 = scalar_lea.vmem %s3721_s0, %s2380_s30  ;;  %vm1838_vm3 = vcmask 1043456   ;;  %v2765_v22 = vshrl.u32 %v827_v21, 7  ;;  %v793_v24 = vld [vmem:[%s3724_s3] sm:$0xff]  ;;  %s3623_s9 = scalar_lea.vmem %s3728_s7, %s2380_s30  ;;  %vm2195_vm4 = vcmask 125952  }
   0xe   : > { %285 = vst.msk [vmem:[#allocation2 + $0x18] sm:$0xff] %vm280_vm0, %v2557_v2  ;;  %286 = vst.msk [vmem:[#allocation2 + $0x20] sm:$0xff] %vm280_vm0, %v2557_v2  ;;  %2451 = vmatprep.subr.bf16.mxu0 %v2530_v1  ;;  %v2531_v3 = vld [vmem:[%s2692_s10] sm:$0xff]   ;;  %v2532_v4 = vld [vmem:[%s2692_s10 + $0x8] sm:$0xff]   ;;  %2519 = vmatprep.subr.msk.bf16.mxu1 %vm1838_vm3, %v1782_v19  ;;  %v1840_v20 = vsel %vm1838_vm3, %v1782_v19, 0 }
   0xf   : > { %291 = vst.msk [vmem:[#allocation2 + $0x48] sm:$0xff] %vm280_vm0, %v2557_v2  ;;  %292 = vst.msk [vmem:[#allocation2 + $0x50] sm:$0xff] %vm280_vm0, %v2557_v2  ;;  %2453 = vmatprep.mubr.msk.bf16.mxu0 %vm471_vm1, %v2531_v3  ;;  %v2533_v5 = vld [vmem:[%s2692_s10 + $0x10] sm:$0xff]   ;;  %v2534_v6 = vld [vmem:[%s2692_s10 + $0x18] sm:$0xff]   ;;  %2486 = vmatpush3.bf16.msra.mxu1 %v1840_v20  ;;  %v829_v23 = vsub.s32 0, %v2765_v22  ;;  %v897_v25 = vsub.s32 1, %v2765_v22 }
  0x10   : > { %294 = vst.msk [vmem:[#allocation2 + $0x60] sm:$0xff] %vm280_vm0, %v2557_v2  ;;  %295 = vst.msk [vmem:[#allocation2 + $0x68] sm:$0xff] %vm280_vm0, %v2557_v2  ;;  %v2535_v7 = vld [vmem:[%s2692_s10 + $0x20] sm:$0xff]   ;;  %v2536_v8 = vld [vmem:[%s2692_s10 + $0x28] sm:$0xff]   ;;  %v997_v34 = vsub.s32 2, %v2765_v22  ;;  %v1397_v54 = vsub.s32 6, %v2765_v22 }
  0x11   : > { %297 = vst.msk [vmem:[#allocation2 + $0x78] sm:$0xff] %vm280_vm0, %v2557_v2  ;;  %298 = vst.msk [vmem:[#allocation2 + $0x80] sm:$0xff] %vm280_vm0, %v2557_v2  ;;  %2452 = vmatpush3.bf16.msra.mxu0 %v2530_v1  ;;  %v2537_v9 = vld [vmem:[%s2692_s10 + $0x30] sm:$0xff]   ;;  %v2538_v10 = vld [vmem:[%s2692_s10 + $0x38] sm:$0xff]   ;;  %v2777_v28 = vrot.slane %v793_v24, %v829_v23  ;;  %v2780_v31 = vrot.slane %v793_v24, %v897_v25  ;;  %v1097_v56 = vsub.s32 3, %v2765_v22  ;;  %v1197_v57 = vsub.s32 4, %v2765_v22 }
  0x12   : > { %300 = vst.msk [vmem:[#allocation2 + $0x90] sm:$0xff] %vm280_vm0, %v2557_v2  ;;  %301 = vst.msk [vmem:[#allocation2 + $0x98] sm:$0xff] %vm280_vm0, %v2557_v2  ;;  %v2539_v11 = vld [vmem:[%s2692_s10 + $0x40] sm:$0xff]   ;;  %v2540_v12 = vld [vmem:[%s2692_s10 + $0x48] sm:$0xff]   ;;  %v2789_v48 = vrot.slane %v793_v24, %v997_v34  ;;  %v1497_v58 = vsub.s32 7, %v2765_v22  ;;  %v1297_v3 = vsub.s32 5, %v2765_v22 }
  0x13   : > { %303 = vst.msk [vmem:[#allocation2 + $0xa8] sm:$0xff] %vm280_vm0, %v2557_v2  ;;  %304 = vst.msk [vmem:[#allocation2 + $0xb0] sm:$0xff] %vm280_vm0, %v2557_v2  ;;  %v2541_v13 = vld [vmem:[%s2692_s10 + $0x50] sm:$0xff]   ;;  %v2542_v14 = vld [vmem:[%s2692_s10 + $0x58] sm:$0xff]  }
  0x14   : > { %306 = vst.msk [vmem:[#allocation2 + $0xc0] sm:$0xff] %vm280_vm0, %v2557_v2  ;;  %307 = vst.msk [vmem:[#allocation2 + $0xc8] sm:$0xff] %vm280_vm0, %v2557_v2  ;;  %2454 = vmatmul.mubr.msk.bf16.vlgmr.msra.gmra.mxu0 %vm471_vm1, %v2532_v4  ;;  %v2543_v15 = vld [vmem:[%s2692_s10 + $0x60] sm:$0xff]   ;;  %v2544_v16 = vld [vmem:[%s2692_s10 + $0x68] sm:$0xff]  }
  0x15   : > { %309 = vst.msk [vmem:[#allocation2 + $0xd8] sm:$0xff] %vm280_vm0, %v2557_v2  ;;  %310 = vst.msk [vmem:[#allocation2 + $0xe0] sm:$0xff] %vm280_vm0, %v2557_v2  ;;  %2457 = vmatprep.mubr.msk.bf16.mxu0 %vm471_vm1, %v2533_v5  ;;  %v2545_v17 = vld [vmem:[%s2692_s10 + $0x70] sm:$0xff]   ;;  %v2546_v18 = vld [vmem:[%s2692_s10 + $0x78] sm:$0xff]  }
  0x16   : > { %312 = vst.msk [vmem:[#allocation2 + $0xf0] sm:$0xff] %vm280_vm0, %v2557_v2  ;;  %313 = vst.msk [vmem:[#allocation2 + $0xf8] sm:$0xff] %vm280_vm0, %v2557_v2  ;;  %v2775_v26 = vld [vmem:[%s3723_s2] ss:$0 sm:$0xff]  ;;  %v863_v33 = vld [vmem:[#allocation2 + $0x1] sm:$0xff] }
  0x17   : > { %315 = vst.msk [vmem:[#allocation2 + $0x108] sm:$0xff] %vm280_vm0, %v2557_v2  ;;  %316 = vst.msk [vmem:[#allocation2 + $0x110] sm:$0xff] %vm280_vm0, %v2557_v2  ;;  %v795_v30 = vld [vmem:[#allocation2] sm:$0xff]  ;;  %v796_v37 = vld [vmem:[#allocation2 + $0x8] sm:$0xff]  ;;  %v899_v44 = vmul.f32 %v2780_v31, %v863_v33 }
  0x18   : > { %318 = vst.msk [vmem:[#allocation2 + $0x120] sm:$0xff] %vm280_vm0, %v2557_v2  ;;  %319 = vst.msk [vmem:[#allocation2 + $0x128] sm:$0xff] %vm280_vm0, %v2557_v2  ;;  %v831_v40 = vmul.f32 %v2777_v28, %v795_v30  ;;  %v832_v46 = vmul.f32 %v2777_v28, %v796_v37  ;;  %v963_v52 = vld [vmem:[#allocation2 + $0x2] sm:$0xff] }
  0x19   : > { %321 = vst.msk [vmem:[#allocation2 + $0x138] sm:$0xff] %vm280_vm0, %v2557_v2  ;;  %322 = vst.msk [vmem:[#allocation2 + $0x140] sm:$0xff] %vm280_vm0, %v2557_v2  ;;  %v999_v1 = vmul.f32 %v2789_v48, %v963_v52 }
  0x1a   : > { %324 = vst.msk [vmem:[#allocation2 + $0x150] sm:$0xff] %vm280_vm0, %v2557_v2  ;;  %325 = vst.msk [vmem:[#allocation2 + $0x158] sm:$0xff] %vm280_vm0, %v2557_v2  ;;  %v931_v62 = vadd.f32 %v899_v44, %v831_v40 }
  0x1b   : > { %327 = vst.msk [vmem:[#allocation2 + $0x168] sm:$0xff] %vm280_vm0, %v2557_v2  ;;  %328 = vst.msk [vmem:[#allocation2 + $0x170] sm:$0xff] %vm280_vm0, %v2557_v2 }
  0x1c   : > { %330 = vst.msk [vmem:[#allocation2 + $0x180] sm:$0xff] %vm280_vm0, %v2557_v2  ;;  %331 = vst.msk [vmem:[#allocation2 + $0x188] sm:$0xff] %vm280_vm0, %v2557_v2  ;;  %2458 = vmatmul.mubr.msk.bf16.gmra.mxu0 %vm471_vm1, %v2534_v6 }
  0x1d   : > { %333 = vst.msk [vmem:[#allocation2 + $0x198] sm:$0xff] %vm280_vm0, %v2557_v2  ;;  %334 = vst.msk [vmem:[#allocation2 + $0x1a0] sm:$0xff] %vm280_vm0, %v2557_v2  ;;  %2461 = vmatprep.mubr.msk.bf16.mxu0 %vm471_vm1, %v2535_v7  ;;  %v2804_v7 = vrot.slane %v793_v24, %v1397_v54 }
  0x1e   : > { %290 = vst.msk [vmem:[#allocation2 + $0x40] sm:$0x3] %vm283_vm2, %v2557_v2  ;;  %284 = vst.msk [vmem:[#allocation2 + $0x10] sm:$0x3] %vm283_vm2, %v2557_v2 }
  0x1f   : > { %287 = vst.msk [vmem:[#allocation2 + $0x28] sm:$0x3] %vm283_vm2, %v2557_v2  ;;  %293 = vst.msk [vmem:[#allocation2 + $0x58] sm:$0x3] %vm283_vm2, %v2557_v2 }
  0x20   : > { %296 = vst.msk [vmem:[#allocation2 + $0x70] sm:$0x3] %vm283_vm2, %v2557_v2  ;;  %299 = vst.msk [vmem:[#allocation2 + $0x88] sm:$0x3] %vm283_vm2, %v2557_v2 }
  0x21   : > { %302 = vst.msk [vmem:[#allocation2 + $0xa0] sm:$0x3] %vm283_vm2, %v2557_v2  ;;  %305 = vst.msk [vmem:[#allocation2 + $0xb8] sm:$0x3] %vm283_vm2, %v2557_v2 }
  0x22   : > { %308 = vst.msk [vmem:[#allocation2 + $0xd0] sm:$0x3] %vm283_vm2, %v2557_v2  ;;  %311 = vst.msk [vmem:[#allocation2 + $0xe8] sm:$0x3] %vm283_vm2, %v2557_v2 }
  0x23   : > { %314 = vst.msk [vmem:[#allocation2 + $0x100] sm:$0x3] %vm283_vm2, %v2557_v2  ;;  %317 = vst.msk [vmem:[#allocation2 + $0x118] sm:$0x3] %vm283_vm2, %v2557_v2 }
  0x24   : > { %2462 = vmatmul.mubr.msk.bf16.gmra.mxu0 %vm471_vm1, %v2536_v8  ;;  %320 = vst.msk [vmem:[#allocation2 + $0x130] sm:$0x3] %vm283_vm2, %v2557_v2  ;;  %323 = vst.msk [vmem:[#allocation2 + $0x148] sm:$0x3] %vm283_vm2, %v2557_v2 }
  0x25   : > { %2465 = vmatprep.mubr.msk.bf16.mxu0 %vm471_vm1, %v2537_v9  ;;  %326 = vst.msk [vmem:[#allocation2 + $0x160] sm:$0x3] %vm283_vm2, %v2557_v2  ;;  %329 = vst.msk [vmem:[#allocation2 + $0x178] sm:$0x3] %vm283_vm2, %v2557_v2  ;;  %v864_v38 = vld [vmem:[#allocation2 + $0x9] sm:$0xff]  ;;  %v2806_v9 = vrot.slane %v793_v24, %v1097_v56 }
  0x26   : > { %332 = vst.msk [vmem:[#allocation2 + $0x190] sm:$0x3] %vm283_vm2, %v2557_v2  ;;  %335 = vst.msk [vmem:[#allocation2 + $0x1a8] sm:$0x3] %vm283_vm2, %v2557_v2  ;;  %v900_v47 = vmul.f32 %v2780_v31, %v864_v38  ;;  %v964_v53 = vld [vmem:[#allocation2 + $0xa] sm:$0xff] }
  0x27   : > { %v1000_v2 = vmul.f32 %v2789_v48, %v964_v53  ;;  %v2838_v38 = vld [vmem:[%s3724_s3 + $0x8] ss:$0 sm:$0xff] }
  0x28   : > { %v932_v0 = vadd.f32 %v900_v47, %v832_v46 }
  0x2c   : > { %2466 = vmatmul.mubr.msk.bf16.gmra.mxu0 %vm471_vm1, %v2538_v10  ;;  %v2808_v10 = vrot.slane %v793_v24, %v1197_v57 }
  0x2d   : > { %2469 = vmatprep.mubr.msk.bf16.mxu0 %vm471_vm1, %v2539_v11  ;;  %v2810_v11 = vrot.slane %v793_v24, %v1497_v58 }
  0x34   : > { %2470 = vmatmul.mubr.msk.bf16.gmra.mxu0 %vm471_vm1, %v2540_v12 }
  0x35   : > { %2473 = vmatprep.mubr.msk.bf16.mxu0 %vm471_vm1, %v2541_v13 }
  0x3c   : > { %2474 = vmatmul.mubr.msk.bf16.gmra.mxu0 %vm471_vm1, %v2542_v14 }
  0x3d   : > { %2477 = vmatprep.mubr.msk.bf16.mxu0 %vm471_vm1, %v2543_v15 }
  0x44   : > { %2478 = vmatmul.mubr.msk.bf16.gmra.mxu0 %vm471_vm1, %v2544_v16  ;;  %v1031_v16 = vadd.f32 %v999_v1, %v931_v62 }
  0x45   : > { %2481 = vmatprep.mubr.msk.bf16.mxu0 %vm471_vm1, %v2545_v17  ;;  %v1032_v17 = vadd.f32 %v1000_v2, %v932_v0 }
  0x4c   : > { %2482 = vmatmul.mubr.msk.bf16.gmra.mxu0 %vm471_vm1, %v2546_v18  ;;  %v2814_v18 = vrot.slane %v793_v24, %v1297_v3 }
  0xd4   : > { %v2455_v27 = vpop.f32.mrf.mxu0 }
  0xd5   : > { %v563_v29 = vadd.f32 %v2455_v27, %v2775_v26 }
  0xd6   : > { %v554_v32 = vpop.f32.mrf.mxu0 }
  0xd7   : > { %v683_v35 = vmax.f32 %v563_v29, 0.0  ;;  %v555_v36 = vadd.f32 %v2775_v26, %v554_v32 }
  0xd8   : > { %v2456_v39 = vpop.f32.mrf.mxu0 }
  0xd9   : > { %v715_v41 = vmin.f32 %v683_v35, 6.0  ;;  %v681_v42 = vmax.f32 %v555_v36, 0.0  ;;  %v566_v43 = vadd.f32 %v2456_v39, %v2775_v26 }
  0xda   : > { %v557_v45 = vpop.f32.mrf.mxu0 }
  0xdb   : > { %749 = vst.msk [vmem:[#allocation2 + $0x31] sm:$0xff] %vm280_vm0, %v715_v41  ;;  %v713_v49 = vmin.f32 %v681_v42, 6.0  ;;  %v684_v50 = vmax.f32 %v566_v43, 0.0  ;;  %v558_v51 = vadd.f32 %v2775_v26, %v557_v45 }
  0xdc   : > { %v2459_v55 = vpop.f32.mrf.mxu0 }
  0xdd   : > { %746 = vst.msk [vmem:[#allocation2 + $0x19] sm:$0xff] %vm280_vm0, %v713_v49  ;;  %v716_v59 = vmin.f32 %v684_v50, 6.0  ;;  %v682_v60 = vmax.f32 %v558_v51, 0.0  ;;  %v579_v61 = vadd.f32 %v2459_v55, %v2775_v26 }
  0xde   : > { %v570_v63 = vpop.f32.mrf.mxu0 }
  0xdf   : > { %750 = vst.msk [vmem:[#allocation2 + $0x39] sm:$0xff] %vm280_vm0, %v716_v59  ;;  %v714_v4 = vmin.f32 %v682_v60, 6.0  ;;  %v687_v5 = vmax.f32 %v579_v61, 0.0  ;;  %v571_v6 = vadd.f32 %v2775_v26, %v570_v63 }
  0xe0   : > { %v2460_v8 = vpop.f32.mrf.mxu0 }
  0xe1   : > { %747 = vst.msk [vmem:[#allocation2 + $0x21] sm:$0xff] %vm280_vm0, %v714_v4  ;;  %v719_v12 = vmin.f32 %v687_v5, 6.0  ;;  %v685_v13 = vmax.f32 %v571_v6, 0.0  ;;  %v582_v14 = vadd.f32 %v2460_v8, %v2775_v26 }
  0xe2   : > { %v573_v15 = vpop.f32.mrf.mxu0  ;;  %v1363_v19 = vld [vmem:[#allocation2 + $0x30] sm:$0xff] }
  0xe3   : > { %v1463_v20 = vld [vmem:[#allocation2 + $0x31] sm:$0xff]  ;;  %755 = vst.msk [vmem:[#allocation2 + $0x61] sm:$0xff] %vm280_vm0, %v719_v12  ;;  %v717_v21 = vmin.f32 %v685_v13, 6.0  ;;  %v688_v22 = vmax.f32 %v582_v14, 0.0  ;;  %v574_v23 = vadd.f32 %v2775_v26, %v573_v15  ;;  %v2819_v25 = vmul.f32 %v2804_v7, %v1363_v19 }
  0xe4   : > { %v2463_v27 = vpop.f32.mrf.mxu0  ;;  %v1063_v29 = vld [vmem:[#allocation2 + $0x18] sm:$0xff]  ;;  %v2822_v32 = vmul.f32 %v2810_v11, %v1463_v20  ;;  %v2825_v24 = vmul.f32 %v1363_v19, %v2806_v9  ;;  %v2828_v33 = vmul.f32 %v1463_v20, %v2808_v10  ;;  %v2831_v34 = vmul.f32 %v1363_v19, %v2777_v28 }
  0xe5   : > { %v1163_v30 = vld [vmem:[#allocation2 + $0x19] sm:$0xff]  ;;  %752 = vst.msk [vmem:[#allocation2 + $0x49] sm:$0xff] %vm280_vm0, %v717_v21  ;;  %v720_v35 = vmin.f32 %v688_v22, 6.0  ;;  %v686_v36 = vmax.f32 %v574_v23, 0.0  ;;  %v595_v37 = vadd.f32 %v2463_v27, %v2775_v26  ;;  %v1099_v39 = vmul.f32 %v2806_v9, %v1063_v29 }
  0xe6   : > { %v586_v40 = vpop.f32.mrf.mxu0  ;;  %v1199_v41 = vmul.f32 %v2808_v10, %v1163_v30  ;;  %v2842_v42 = vld [vmem:[#allocation2 + $0x38] sm:$0xff]  ;;  %v833_v45 = vmul.f32 %v1063_v29, %v2777_v28  ;;  %v901_v46 = vmul.f32 %v1163_v30, %v2780_v31  ;;  %v2851_v47 = vmul.f32 %v1463_v20, %v2780_v31 }
  0xe7   : > { %v2844_v43 = vld [vmem:[#allocation2 + $0x39] sm:$0xff]  ;;  %756 = vst.msk [vmem:[#allocation2 + $0x69] sm:$0xff] %vm280_vm0, %v720_v35  ;;  %v718_v49 = vmin.f32 %v686_v36, 6.0  ;;  %v691_v50 = vmax.f32 %v595_v37, 0.0  ;;  %v587_v51 = vadd.f32 %v2775_v26, %v586_v40  ;;  %v1131_v52 = vadd.f32 %v1099_v39, %v1031_v16 }
  0xe8   : > { %v2846_v44 = vld [vmem:[#allocation2 + $0x32] sm:$0xff]  ;;  %v2855_v53 = vld [vmem:[#allocation2 + $0x3a] sm:$0xff]  ;;  %v2464_v54 = vpop.f32.mrf.mxu0  ;;  %v1400_v58 = vmul.f32 %v2804_v7, %v2842_v42  ;;  %v1500_v59 = vmul.f32 %v2810_v11, %v2844_v43  ;;  %v1264_v2 = vld [vmem:[#allocation2 + $0x22] sm:$0xff]  ;;  %v933_v22 = vadd.f32 %v901_v46, %v833_v45 }
  0xe9   : > { %v1064_v55 = vld [vmem:[#allocation2 + $0x20] sm:$0xff]  ;;  %v1599_v60 = vmul.f32 %v2838_v38, %v2846_v44  ;;  %v2865_v61 = vmul.f32 %v2838_v38, %v2855_v53  ;;  %753 = vst.msk [vmem:[#allocation2 + $0x51] sm:$0xff] %vm280_vm0, %v718_v49  ;;  %v723_v62 = vmin.f32 %v691_v50, 6.0  ;;  %v689_v63 = vmax.f32 %v587_v51, 0.0 }
  0xea   : > { %v1164_v56 = vld [vmem:[#allocation2 + $0x21] sm:$0xff]  ;;  %v598_v0 = vadd.f32 %v2464_v54, %v2775_v26  ;;  %v1100_v1 = vmul.f32 %v2806_v9, %v1064_v55  ;;  %v589_v3 = vpop.f32.mrf.mxu0  ;;  %v1231_v5 = vadd.f32 %v1199_v41, %v1131_v52  ;;  %v1300_v8 = vmul.f32 %v2814_v18, %v1264_v2 }
  0xeb   : > { %v1263_v57 = vld [vmem:[#allocation2 + $0x1a] sm:$0xff]  ;;  %v1200_v4 = vmul.f32 %v2808_v10, %v1164_v56  ;;  %761 = vst.msk [vmem:[#allocation2 + $0x91] sm:$0xff] %vm280_vm0, %v723_v62  ;;  %v721_v12 = vmin.f32 %v689_v63, 6.0  ;;  %v590_v14 = vadd.f32 %v2775_v26, %v589_v3  ;;  %v834_v20 = vmul.f32 %v1064_v55, %v2777_v28 }
  0xec   : > { %v1299_v6 = vmul.f32 %v2814_v18, %v1263_v57  ;;  %v692_v13 = vmax.f32 %v598_v0, 0.0  ;;  %v1132_v15 = vadd.f32 %v1100_v1, %v1032_v17  ;;  %v2467_v16 = vpop.f32.mrf.mxu0  ;;  %v902_v21 = vmul.f32 %v1164_v56, %v2780_v31  ;;  %v2892_v62 = vld [vmem:[%s3725_s4] ss:$0 sm:$0xff] }
  0xed   : > { %758 = vst.msk [vmem:[#allocation2 + $0x79] sm:$0xff] %vm280_vm0, %v721_v12  ;;  %v690_v27 = vmax.f32 %v590_v14, 0.0  ;;  %v611_v29 = vadd.f32 %v2467_v16, %v2775_v26  ;;  %v1001_v17 = vmul.f32 %v1263_v57, %v2789_v48  ;;  %v1002_v39 = vmul.f32 %v1264_v2, %v2789_v48 }
  0xee   : > { %v1331_v19 = vadd.f32 %v1299_v6, %v1231_v5  ;;  %v724_v23 = vmin.f32 %v692_v13, 6.0  ;;  %v1232_v30 = vadd.f32 %v1200_v4, %v1132_v15  ;;  %v602_v35 = vpop.f32.mrf.mxu0  ;;  %v934_v37 = vadd.f32 %v902_v21, %v834_v20  ;;  %v2899_v6 = vld [vmem:[#allocation2 + $0x48] sm:$0xff] }
  0xef   : > { %v722_v40 = vmin.f32 %v690_v27, 6.0  ;;  %v695_v41 = vmax.f32 %v611_v29, 0.0  ;;  %v603_v45 = vadd.f32 %v2775_v26, %v602_v35  ;;  %v1033_v51 = vadd.f32 %v1001_v17, %v933_v22 }
  0xf0   : > { %v1431_v36 = vadd.f32 %v2819_v25, %v1331_v19  ;;  %762 = vst.msk [vmem:[#allocation2 + $0x99] sm:$0xff] %vm280_vm0, %v724_v23  ;;  %v1332_v46 = vadd.f32 %v1300_v8, %v1232_v30  ;;  %v2468_v49 = vpop.f32.mrf.mxu0  ;;  %v1034_v52 = vadd.f32 %v1002_v39, %v934_v37  ;;  %v1102_v25 = vmul.f32 %v2842_v42, %v2806_v9  ;;  %v2921_v37 = vld [vmem:[#allocation2 + $0x4a] sm:$0xff] }
  0xf1   : > { %759 = vst.msk [vmem:[#allocation2 + $0x81] sm:$0xff] %vm280_vm0, %v722_v40  ;;  %v727_v54 = vmin.f32 %v695_v41, 6.0  ;;  %v693_v55 = vmax.f32 %v603_v45, 0.0  ;;  %v614_v56 = vadd.f32 %v2468_v49, %v2775_v26  ;;  %v1202_v2 = vmul.f32 %v2844_v43, %v2808_v10 }
  0xf2   : > { %v1531_v50 = vadd.f32 %v2822_v32, %v1431_v36  ;;  %v1432_v57 = vadd.f32 %v1400_v58, %v1332_v46  ;;  %v605_v63 = vpop.f32.mrf.mxu0  ;;  %v1133_v32 = vadd.f32 %v2825_v24, %v1033_v51  ;;  %v1134_v1 = vadd.f32 %v1102_v25, %v1034_v52  ;;  %v2919_v36 = vld [vmem:[#allocation2 + $0x51] sm:$0xff] }
  0xf3   : > { %767 = vst.msk [vmem:[#allocation2 + $0xc1] sm:$0xff] %vm280_vm0, %v727_v54  ;;  %v725_v3 = vmin.f32 %v693_v55, 6.0  ;;  %v696_v4 = vmax.f32 %v614_v56, 0.0  ;;  %v606_v5 = vadd.f32 %v2775_v26, %v605_v63  ;;  %v1301_v24 = vmul.f32 %v2846_v44, %v2814_v18  ;;  %v2927_v52 = vld [vmem:[#allocation2 + $0x52] sm:$0xff] }
  0xf4   : > { %v1631_v0 = vadd.f32 %v1599_v60, %v1531_v50  ;;  %v1532_v58 = vadd.f32 %v1500_v59, %v1432_v57  ;;  %v2471_v8 = vpop.f32.mrf.mxu0  ;;  %v1233_v60 = vadd.f32 %v2828_v33, %v1133_v32  ;;  %v1234_v13 = vadd.f32 %v1202_v2, %v1134_v1  ;;  %v2908_v59 = vld [vmem:[#allocation2 + $0x50] sm:$0xff] }
  0xf5   : > { %764 = vst.msk [vmem:[#allocation2 + $0xa9] sm:$0xff] %vm280_vm0, %v725_v3  ;;  %v728_v14 = vmin.f32 %v696_v4, 6.0  ;;  %v694_v15 = vmax.f32 %v606_v5, 0.0  ;;  %v627_v16 = vadd.f32 %v2471_v8, %v2775_v26  ;;  %v1302_v22 = vmul.f32 %v2855_v53, %v2814_v18 }
  0xf6   : > { %v1670_v12 = vadd.f32 %v2892_v62, %v1631_v0  ;;  %v1632_v19 = vadd.f32 %v2865_v61, %v1532_v58  ;;  %v618_v20 = vpop.f32.mrf.mxu0  ;;  %v1333_v33 = vadd.f32 %v1301_v24, %v1233_v60  ;;  %v1401_v23 = vmul.f32 %v2804_v7, %v2899_v6  ;;  %v2917_v61 = vld [vmem:[#allocation2 + $0x49] sm:$0xff] }
  0xf7   : > { %768 = vst.msk [vmem:[#allocation2 + $0xc9] sm:$0xff] %vm280_vm0, %v728_v14  ;;  %v726_v27 = vmin.f32 %v694_v15, 6.0  ;;  %v699_v29 = vmax.f32 %v627_v16, 0.0  ;;  %v619_v30 = vadd.f32 %v2775_v26, %v618_v20  ;;  %v1334_v40 = vadd.f32 %v1302_v22, %v1234_v13 }
  0xf8   : > { %v1702_v21 = vmax.f32 %v1670_v12, 0.0  ;;  %v1671_v35 = vadd.f32 %v2892_v62, %v1632_v19  ;;  %v2472_v17 = vpop.f32.mrf.mxu0  ;;  %v1402_v41 = vmul.f32 %v2804_v7, %v2908_v59  ;;  %v1433_v45 = vadd.f32 %v1401_v23, %v1333_v33 }
  0xf9   : > { %765 = vst.msk [vmem:[#allocation2 + $0xb1] sm:$0xff] %vm280_vm0, %v726_v27  ;;  %v731_v46 = vmin.f32 %v699_v29, 6.0  ;;  %v697_v49 = vmax.f32 %v619_v30, 0.0  ;;  %v630_v50 = vadd.f32 %v2472_v17, %v2775_v26  ;;  %v1501_v55 = vmul.f32 %v2810_v11, %v2917_v61 }
  0xfa   : > { %v1734_v39 = vmin.f32 %v1702_v21, 6.0  ;;  %v1703_v51 = vmax.f32 %v1671_v35, 0.0  ;;  %v621_v25 = vpop.f32.mrf.mxu0  ;;  %v1434_v54 = vadd.f32 %v1402_v41, %v1334_v40  ;;  %v1502_v56 = vmul.f32 %v2810_v11, %v2919_v36 }
  0xfb   : > { %v1601_v57 = vmul.f32 %v2838_v38, %v2921_v37  ;;  %773 = vst.msk [vmem:[#allocation2 + $0xf1] sm:$0xff] %vm280_vm0, %v731_v46  ;;  %v729_v63 = vmin.f32 %v697_v49, 6.0  ;;  %v700_v0 = vmax.f32 %v630_v50, 0.0  ;;  %v622_v32 = vadd.f32 %v2775_v26, %v621_v25 }
  0xfc   : > { %v1735_v1 = vmin.f32 %v1703_v51, 6.0  ;;  %v2475_v2 = vpop.f32.mrf.mxu0  ;;  %v1533_v3 = vadd.f32 %v1501_v55, %v1433_v45  ;;  %v1534_v4 = vadd.f32 %v1502_v56, %v1434_v54  ;;  %v1602_v5 = vmul.f32 %v2838_v38, %v2927_v52 }
  0xfd   : > { %v836_v58 = vmul.f32 %v2842_v42, %v2777_v28  ;;  %770 = vst.msk [vmem:[#allocation2 + $0xd9] sm:$0xff] %vm280_vm0, %v729_v63  ;;  %v732_v8 = vmin.f32 %v700_v0, 6.0  ;;  %v698_v12 = vmax.f32 %v622_v32, 0.0  ;;  %v643_v60 = vadd.f32 %v2475_v2, %v2775_v26  ;;  %v2968_v32 = vld [vmem:[#allocation2 + $0x60] sm:$0xff] }
  0xfe   : > { %v1766_v13 = vpack.c.bf16 %v1735_v1, %v1734_v39  ;;  %v634_v24 = vpop.f32.mrf.mxu0  ;;  %v1633_v14 = vadd.f32 %v1601_v57, %v1533_v3  ;;  %v1634_v15 = vadd.f32 %v1602_v5, %v1534_v4  ;;  %v904_v16 = vmul.f32 %v2844_v43, %v2780_v31  ;;  %v2970_v1 = vld [vmem:[#allocation2 + $0x68] sm:$0xff] }
  0xff   : > { %v935_v19 = vadd.f32 %v2851_v47, %v2831_v34  ;;  %774 = vst.msk [vmem:[#allocation2 + $0xf9] sm:$0xff] %vm280_vm0, %v732_v8  ;;  %v730_v20 = vmin.f32 %v698_v12, 6.0  ;;  %v703_v42 = vmax.f32 %v643_v60, 0.0  ;;  %v635_v21 = vadd.f32 %v2775_v26, %v634_v24  ;;  %v2976_v8 = vld [vmem:[#allocation2 + $0x61] sm:$0xff]  ;;  %v2978_v12 = vld [vmem:[#allocation2 + $0x69] sm:$0xff] }
 0x100   : > { %2487 = vmatprep.mubr.msk.bf16.mxu1 %vm280_vm0, %v1766_v13  ;;  %v1003_v22 = vmul.f32 %v2846_v44, %v2789_v48  ;;  %v2476_v33 = vpop.f32.mrf.mxu0  ;;  %v1672_v23 = vadd.f32 %v2892_v62, %v1633_v14  ;;  %v1673_v27 = vadd.f32 %v2892_v62, %v1634_v15  ;;  %v936_v43 = vadd.f32 %v904_v16, %v836_v58  ;;  %v2984_v15 = vld [vmem:[#allocation2 + $0x62] sm:$0xff]  ;;  %v2986_v16 = vld [vmem:[#allocation2 + $0x6a] sm:$0xff] }
 0x101   : > { %v1004_v34 = vmul.f32 %v2855_v53, %v2789_v48  ;;  %771 = vst.msk [vmem:[#allocation2 + $0xe1] sm:$0xff] %vm280_vm0, %v730_v20  ;;  %v735_v47 = vmin.f32 %v703_v42, 6.0  ;;  %v701_v29 = vmax.f32 %v635_v21, 0.0  ;;  %v646_v30 = vadd.f32 %v2476_v33, %v2775_v26 }
 0x102   : > { %v1035_v35 = vadd.f32 %v1003_v22, %v935_v19  ;;  %v637_v17 = vpop.f32.mrf.mxu0  ;;  %v1704_v39 = vmax.f32 %v1672_v23, 0.0  ;;  %v1705_v40 = vmax.f32 %v1673_v27, 0.0  ;;  %v1103_v41 = vmul.f32 %v2899_v6, %v2806_v9 }
 0x103   : > { %v1036_v44 = vadd.f32 %v1004_v34, %v936_v43  ;;  %779 = vst.msk [vmem:[#allocation2 + $0x121] sm:$0xff] %vm280_vm0, %v735_v47  ;;  %v733_v45 = vmin.f32 %v701_v29, 6.0  ;;  %v704_v46 = vmax.f32 %v646_v30, 0.0  ;;  %v638_v53 = vadd.f32 %v2775_v26, %v637_v17 }
 0x104   : > { %v1104_v49 = vmul.f32 %v2908_v59, %v2806_v9  ;;  %v1736_v50 = vmin.f32 %v1704_v39, 6.0  ;;  %v1737_v51 = vmin.f32 %v1705_v40, 6.0  ;;  %v2479_v25 = vpop.f32.mrf.mxu0  ;;  %v1135_v54 = vadd.f32 %v1103_v41, %v1035_v35 }
 0x105   : > { %v1203_v55 = vmul.f32 %v2917_v61, %v2808_v10  ;;  %776 = vst.msk [vmem:[#allocation2 + $0x109] sm:$0xff] %vm280_vm0, %v733_v45  ;;  %v736_v56 = vmin.f32 %v704_v46, 6.0  ;;  %v702_v57 = vmax.f32 %v638_v53, 0.0  ;;  %v659_v63 = vadd.f32 %v2479_v25, %v2775_v26 }
 0x106   : > { %v1136_v0 = vadd.f32 %v1104_v49, %v1036_v44  ;;  %v1767_v2 = vpack.c.bf16 %v1737_v51, %v1736_v50  ;;  %v650_v3 = vpop.f32.mrf.mxu0  ;;  %v1204_v4 = vmul.f32 %v2919_v36, %v2808_v10  ;;  %v1303_v58 = vmul.f32 %v2921_v37, %v2814_v18 }
 0x107   : > { %v1235_v5 = vadd.f32 %v1203_v55, %v1135_v54  ;;  %780 = vst.msk [vmem:[#allocation2 + $0x129] sm:$0xff] %vm280_vm0, %v736_v56  ;;  %v734_v60 = vmin.f32 %v702_v57, 6.0  ;;  %v707_v13 = vmax.f32 %v659_v63, 0.0  ;;  %v651_v24 = vadd.f32 %v2775_v26, %v650_v3 }
 0x108   : > { %v1304_v14 = vmul.f32 %v2927_v52, %v2814_v18  ;;  %2488 = vmatmul.mubr.msk.bf16.vlgmr.msra.gmra.mxu1 %vm280_vm0, %v1767_v2  ;;  %v1236_v19 = vadd.f32 %v1204_v4, %v1136_v0  ;;  %v1403_v42 = vmul.f32 %v2804_v7, %v2968_v32  ;;  %v1404_v21 = vmul.f32 %v2804_v7, %v2970_v1  ;;  %v2480_v22 = vpop.f32.mrf.mxu0  ;;  %v3023_v4 = vld [vmem:[#allocation2 + $0x78] sm:$0xff] }
 0x109   : > { %v1335_v20 = vadd.f32 %v1303_v58, %v1235_v5  ;;  %777 = vst.msk [vmem:[#allocation2 + $0x111] sm:$0xff] %vm280_vm0, %v734_v60  ;;  %v739_v33 = vmin.f32 %v707_v13, 6.0  ;;  %v705_v23 = vmax.f32 %v651_v24, 0.0  ;;  %v1503_v27 = vmul.f32 %v2810_v11, %v2976_v8  ;;  %v3025_v5 = vld [vmem:[#allocation2 + $0x80] sm:$0xff] }
 0x10a   : > { %v1504_v43 = vmul.f32 %v2810_v11, %v2978_v12  ;;  %v1336_v34 = vadd.f32 %v1304_v14, %v1236_v19  ;;  %v1603_v29 = vmul.f32 %v2838_v38, %v2984_v15  ;;  %v1604_v30 = vmul.f32 %v2838_v38, %v2986_v16  ;;  %v653_v35 = vpop.f32.mrf.mxu0  ;;  %v3027_v58 = vld [vmem:[#allocation2 + $0x79] sm:$0xff]  ;;  %v3037_v14 = vld [vmem:[#allocation2 + $0x81] sm:$0xff] }
 0x10b   : > { %v1435_v47 = vadd.f32 %v1403_v42, %v1335_v20  ;;  %785 = vst.msk [vmem:[#allocation2 + $0x151] sm:$0xff] %vm280_vm0, %v739_v33  ;;  %v737_v17 = vmin.f32 %v705_v23, 6.0  ;;  %v662_v39 = vadd.f32 %v2480_v22, %v2775_v26  ;;  %v654_v40 = vadd.f32 %v2775_v26, %v653_v35  ;;  %v3042_v22 = vld [vmem:[#allocation2 + $0x7a] sm:$0xff]  ;;  %v3044_v33 = vld [vmem:[#allocation2 + $0x82] sm:$0xff] }
 0x10c   : > { %v837_v44 = vmul.f32 %v2899_v6, %v2777_v28  ;;  %v1436_v41 = vadd.f32 %v1404_v21, %v1336_v34  ;;  %v838_v46 = vmul.f32 %v2908_v59, %v2777_v28  ;;  %v905_v53 = vmul.f32 %v2917_v61, %v2780_v31  ;;  %v2483_v0 = vpop.f32.mrf.mxu0 }
 0x10d   : > { %v1535_v45 = vadd.f32 %v1503_v27, %v1435_v47  ;;  %782 = vst.msk [vmem:[#allocation2 + $0x139] sm:$0xff] %vm280_vm0, %v737_v17  ;;  %v708_v49 = vmax.f32 %v662_v39, 0.0  ;;  %v706_v50 = vmax.f32 %v654_v40, 0.0  ;;  %v906_v51 = vmul.f32 %v2919_v36, %v2780_v31 }
 0x10e   : > { %v1005_v25 = vmul.f32 %v2921_v37, %v2789_v48  ;;  %v1536_v54 = vadd.f32 %v1504_v43, %v1436_v41  ;;  %v937_v55 = vadd.f32 %v905_v53, %v837_v44  ;;  %v1006_v56 = vmul.f32 %v2927_v52, %v2789_v48  ;;  %v666_v47 = vpop.f32.mrf.mxu0 }
 0x10f   : > { %v1635_v6 = vadd.f32 %v1603_v29, %v1535_v45  ;;  %v740_v59 = vmin.f32 %v708_v49, 6.0  ;;  %v738_v57 = vmin.f32 %v706_v50, 6.0  ;;  %v938_v63 = vadd.f32 %v906_v51, %v838_v46 }
 0x110   : > { %v1105_v61 = vmul.f32 %v2968_v32, %v2806_v9  ;;  %v1636_v2 = vadd.f32 %v1604_v30, %v1536_v54  ;;  %v1037_v36 = vadd.f32 %v1005_v25, %v937_v55  ;;  %v1106_v37 = vmul.f32 %v2970_v1, %v2806_v9 }
 0x111   : > { %v1674_v3 = vadd.f32 %v2892_v62, %v1635_v6  ;;  %786 = vst.msk [vmem:[#allocation2 + $0x159] sm:$0xff] %vm280_vm0, %v740_v59  ;;  %783 = vst.msk [vmem:[#allocation2 + $0x141] sm:$0xff] %vm280_vm0, %v738_v57  ;;  %v1038_v52 = vadd.f32 %v1006_v56, %v938_v63  ;;  %v1205_v60 = vmul.f32 %v2976_v8, %v2808_v10 }
 0x112   : > { %v1206_v13 = vmul.f32 %v2978_v12, %v2808_v10  ;;  %v1305_v24 = vmul.f32 %v2984_v15, %v2814_v18  ;;  %v1675_v19 = vadd.f32 %v2892_v62, %v1636_v2  ;;  %v1137_v42 = vadd.f32 %v1105_v61, %v1037_v36 }
 0x113   : > { %v1706_v20 = vmax.f32 %v1674_v3, 0.0  ;;  %v1306_v21 = vmul.f32 %v2986_v16, %v2814_v18  ;;  %v1138_v23 = vadd.f32 %v1106_v37, %v1038_v52  ;;  %v1405_v27 = vmul.f32 %v2804_v7, %v3023_v4  ;;  %v2484_v3 = vpop.f32.mrf.mxu0 }
 0x114   : > { %v1406_v43 = vmul.f32 %v2804_v7, %v3025_v5  ;;  %v1505_v34 = vmul.f32 %v2810_v11, %v3027_v58  ;;  %v1707_v29 = vmax.f32 %v1675_v19, 0.0  ;;  %v1237_v35 = vadd.f32 %v1205_v60, %v1137_v42  ;;  %v3080_v60 = vld [vmem:[#allocation2 + $0x98] sm:$0xff] }
 0x115   : > { %v1738_v30 = vmin.f32 %v1706_v20, 6.0  ;;  %v1506_v17 = vmul.f32 %v2810_v11, %v3037_v14  ;;  %v1238_v39 = vadd.f32 %v1206_v13, %v1138_v23  ;;  %v1605_v40 = vmul.f32 %v2838_v38, %v3042_v22  ;;  %v3087_v20 = vld [vmem:[#allocation2 + $0x91] sm:$0xff]  ;;  %v3089_v42 = vld [vmem:[#allocation2 + $0x99] sm:$0xff] }
 0x116   : > { %v1606_v44 = vmul.f32 %v2838_v38, %v3044_v33  ;;  %v675_v41 = vadd.f32 %v2483_v0, %v2775_v26  ;;  %v1739_v45 = vmin.f32 %v1707_v29, 6.0  ;;  %v1337_v46 = vadd.f32 %v1305_v24, %v1237_v35 }
 0x117   : > { %v667_v53 = vadd.f32 %v2775_v26, %v666_v47  ;;  %v839_v49 = vmul.f32 %v2968_v32, %v2777_v28  ;;  %v1338_v50 = vadd.f32 %v1306_v21, %v1238_v39  ;;  %v840_v25 = vmul.f32 %v2970_v1, %v2777_v28  ;;  %v3097_v47 = vld [vmem:[#allocation2 + $0x9a] sm:$0xff]  ;;  %v669_v39 = vpop.f32.mrf.mxu0 }
 0x118   : > { %v711_v51 = vmax.f32 %v675_v41, 0.0  ;;  %v907_v54 = vmul.f32 %v2976_v8, %v2780_v31  ;;  %v1768_v6 = vpack.c.bf16 %v1739_v45, %v1738_v30  ;;  %v1437_v55 = vadd.f32 %v1405_v27, %v1337_v46 }
 0x119   : > { %v709_v56 = vmax.f32 %v667_v53, 0.0  ;;  %v908_v59 = vmul.f32 %v2978_v12, %v2780_v31  ;;  %v1438_v57 = vadd.f32 %v1406_v43, %v1338_v50  ;;  %v1007_v32 = vmul.f32 %v2984_v15, %v2789_v48  ;;  %v3078_v15 = vld [vmem:[#allocation2 + $0x90] sm:$0xff] }
 0x11a   : > { %v743_v63 = vmin.f32 %v711_v51, 6.0  ;;  %v939_v61 = vadd.f32 %v907_v54, %v839_v49  ;;  %2491 = vmatprep.mubr.msk.bf16.mxu1 %vm280_vm0, %v1768_v6  ;;  %v1537_v0 = vadd.f32 %v1505_v34, %v1437_v55  ;;  %v1008_v8 = vmul.f32 %v2986_v16, %v2789_v48  ;;  %v3095_v34 = vld [vmem:[#allocation2 + $0x92] sm:$0xff] }
 0x11b   : > { %v741_v2 = vmin.f32 %v709_v56, 6.0  ;;  %v940_v1 = vadd.f32 %v908_v59, %v840_v25  ;;  %v1538_v36 = vadd.f32 %v1506_v17, %v1438_v57  ;;  %v1107_v12 = vmul.f32 %v3023_v4, %v2806_v9 }
 0x11c   : > { %791 = vst.msk [vmem:[#allocation2 + $0x181] sm:$0xff] %vm280_vm0, %v743_v63  ;;  %v1039_v37 = vadd.f32 %v1007_v32, %v939_v61  ;;  %v1108_v52 = vmul.f32 %v3025_v5, %v2806_v9  ;;  %v1637_v13 = vadd.f32 %v1605_v40, %v1537_v0  ;;  %v1207_v16 = vmul.f32 %v3027_v58, %v2808_v10 }
 0x11d   : > { %788 = vst.msk [vmem:[#allocation2 + $0x169] sm:$0xff] %vm280_vm0, %v741_v2  ;;  %v1040_v24 = vadd.f32 %v1008_v8, %v940_v1  ;;  %v1208_v19 = vmul.f32 %v3037_v14, %v2808_v10  ;;  %v1638_v21 = vadd.f32 %v1606_v44, %v1538_v36  ;;  %v1307_v27 = vmul.f32 %v3042_v22, %v2814_v18 }
 0x11e   : > { %v1139_v23 = vadd.f32 %v1107_v12, %v1039_v37  ;;  %v1308_v43 = vmul.f32 %v3044_v33, %v2814_v18  ;;  %v1676_v29 = vadd.f32 %v2892_v62, %v1637_v13  ;;  %v1407_v35 = vmul.f32 %v2804_v7, %v3078_v15 }
 0x11f   : > { %v1140_v30 = vadd.f32 %v1108_v52, %v1040_v24  ;;  %v1408_v17 = vmul.f32 %v2804_v7, %v3080_v60  ;;  %v1677_v40 = vadd.f32 %v2892_v62, %v1638_v21  ;;  %v1507_v41 = vmul.f32 %v2810_v11, %v3087_v20  ;;  %v3127_v24 = vld [vmem:[#allocation2 + $0xa8] sm:$0xff] }
 0x120   : > { %v1239_v44 = vadd.f32 %v1207_v16, %v1139_v23  ;;  %v1508_v45 = vmul.f32 %v2810_v11, %v3089_v42  ;;  %v1708_v46 = vmax.f32 %v1676_v29, 0.0  ;;  %v1607_v49 = vmul.f32 %v2838_v38, %v3095_v34  ;;  %v3144_v29 = vld [vmem:[#allocation2 + $0xb1] sm:$0xff] }
 0x121   : > { %v1240_v53 = vadd.f32 %v1208_v19, %v1140_v30  ;;  %v1608_v50 = vmul.f32 %v2838_v38, %v3097_v47  ;;  %v1709_v51 = vmax.f32 %v1677_v40, 0.0  ;;  %v678_v54 = vadd.f32 %v2484_v3, %v2775_v26  ;;  %v3138_v19 = vld [vmem:[#allocation2 + $0xb0] sm:$0xff] }
 0x122   : > { %v1339_v25 = vadd.f32 %v1307_v27, %v1239_v44  ;;  %v670_v6 = vadd.f32 %v2775_v26, %v669_v39  ;;  %v1740_v55 = vmin.f32 %v1708_v46, 6.0  ;;  %v841_v59 = vmul.f32 %v3023_v4, %v2777_v28  ;;  %v3146_v30 = vld [vmem:[#allocation2 + $0xaa] sm:$0xff]  ;;  %v3155_v44 = vld [vmem:[#allocation2 + $0xb2] sm:$0xff] }
 0x123   : > { %v1340_v56 = vadd.f32 %v1308_v43, %v1240_v53  ;;  %v842_v57 = vmul.f32 %v3025_v5, %v2777_v28  ;;  %v1741_v63 = vmin.f32 %v1709_v51, 6.0  ;;  %v712_v32 = vmax.f32 %v678_v54, 0.0  ;;  %v3142_v43 = vld [vmem:[#allocation2 + $0xa9] sm:$0xff] }
 0x124   : > { %v1439_v61 = vadd.f32 %v1407_v35, %v1339_v25  ;;  %v710_v0 = vmax.f32 %v670_v6, 0.0  ;;  %v909_v1 = vmul.f32 %v3027_v58, %v2780_v31  ;;  %v910_v8 = vmul.f32 %v3037_v14, %v2780_v31 }
 0x125   : > { %v1440_v2 = vadd.f32 %v1408_v17, %v1340_v56  ;;  %v1009_v26 = vmul.f32 %v3042_v22, %v2789_v48  ;;  %v1769_v3 = vpack.c.bf16 %v1741_v63, %v1740_v55  ;;  %v744_v4 = vmin.f32 %v712_v32, 6.0 }
 0x126   : > { %v1539_v36 = vadd.f32 %v1507_v41, %v1439_v61  ;;  %v742_v37 = vmin.f32 %v710_v0, 6.0  ;;  %v941_v5 = vadd.f32 %v909_v1, %v841_v59  ;;  %v942_v52 = vadd.f32 %v910_v8, %v842_v57 }
 0x127   : > { %v1540_v12 = vadd.f32 %v1508_v45, %v1440_v2  ;;  %v1010_v13 = vmul.f32 %v3044_v33, %v2789_v48  ;;  %2492 = vmatmul.mubr.msk.bf16.gmra.mxu1 %vm280_vm0, %v1769_v3  ;;  %792 = vst.msk [vmem:[#allocation2 + $0x189] sm:$0xff] %vm280_vm0, %v744_v4  ;;  %v1109_v14 = vmul.f32 %v3078_v15, %v2806_v9 }
 0x128   : > { %v1639_v58 = vadd.f32 %v1607_v49, %v1539_v36  ;;  %789 = vst.msk [vmem:[#allocation2 + $0x171] sm:$0xff] %vm280_vm0, %v742_v37  ;;  %v1110_v22 = vmul.f32 %v3080_v60, %v2806_v9  ;;  %v1209_v16 = vmul.f32 %v3087_v20, %v2808_v10  ;;  %v1041_v21 = vadd.f32 %v1009_v26, %v941_v5  ;;  %v3182_v37 = vld [vmem:[#allocation2 + $0xc0] sm:$0xff] }
 0x129   : > { %v1640_v33 = vadd.f32 %v1608_v50, %v1540_v12  ;;  %v1042_v23 = vadd.f32 %v1010_v13, %v942_v52  ;;  %v1210_v27 = vmul.f32 %v3089_v42, %v2808_v10  ;;  %v1309_v17 = vmul.f32 %v3095_v34, %v2814_v18  ;;  %v3184_v12 = vld [vmem:[#allocation2 + $0xc8] sm:$0xff] }
 0x12a   : > { %v1678_v35 = vadd.f32 %v2892_v62, %v1639_v58  ;;  %v1310_v39 = vmul.f32 %v3097_v47, %v2814_v18  ;;  %v1409_v40 = vmul.f32 %v2804_v7, %v3127_v24  ;;  %v1141_v45 = vadd.f32 %v1109_v14, %v1041_v21  ;;  %v3192_v52 = vld [vmem:[#allocation2 + $0xc1] sm:$0xff]  ;;  %v3201_v21 = vld [vmem:[#allocation2 + $0xca] sm:$0xff] }
 0x12b   : > { %v1679_v41 = vadd.f32 %v2892_v62, %v1640_v33  ;;  %v1142_v46 = vadd.f32 %v1110_v22, %v1042_v23  ;;  %v1410_v53 = vmul.f32 %v2804_v7, %v3138_v19  ;;  %v1509_v50 = vmul.f32 %v2810_v11, %v3142_v43  ;;  %v3199_v33 = vld [vmem:[#allocation2 + $0xc2] sm:$0xff] }
 0x12c   : > { %v1710_v49 = vmax.f32 %v1678_v35, 0.0  ;;  %v1510_v51 = vmul.f32 %v2810_v11, %v3144_v29  ;;  %v1609_v25 = vmul.f32 %v2838_v38, %v3146_v30  ;;  %v1241_v6 = vadd.f32 %v1209_v16, %v1141_v45  ;;  %v3197_v16 = vld [vmem:[#allocation2 + $0xc9] sm:$0xff] }
 0x12d   : > { %v1711_v54 = vmax.f32 %v1679_v41, 0.0  ;;  %v1242_v55 = vadd.f32 %v1210_v27, %v1142_v46  ;;  %v1610_v56 = vmul.f32 %v2838_v38, %v3155_v44  ;;  %v843_v57 = vmul.f32 %v3078_v15, %v2777_v28 }
 0x12e   : > { %v1742_v59 = vmin.f32 %v1710_v49, 6.0  ;;  %v844_v63 = vmul.f32 %v3080_v60, %v2777_v28  ;;  %v911_v61 = vmul.f32 %v3087_v20, %v2780_v31  ;;  %v1341_v0 = vadd.f32 %v1309_v17, %v1241_v6 }
 0x12f   : > { %v1743_v32 = vmin.f32 %v1711_v54, 6.0  ;;  %v1342_v2 = vadd.f32 %v1310_v39, %v1242_v55  ;;  %v912_v1 = vmul.f32 %v3089_v42, %v2780_v31  ;;  %v1011_v26 = vmul.f32 %v3095_v34, %v2789_v48 }
 0x130   : > { %v943_v8 = vadd.f32 %v911_v61, %v843_v57  ;;  %v1012_v3 = vmul.f32 %v3097_v47, %v2789_v48  ;;  %v1111_v15 = vmul.f32 %v3127_v24, %v2806_v9  ;;  %v1441_v36 = vadd.f32 %v1409_v40, %v1341_v0 }
 0x131   : > { %v1770_v60 = vpack.c.bf16 %v1743_v32, %v1742_v59  ;;  %v1442_v4 = vadd.f32 %v1410_v53, %v1342_v2  ;;  %v944_v20 = vadd.f32 %v912_v1, %v844_v63  ;;  %v1112_v42 = vmul.f32 %v3138_v19, %v2806_v9 }
 0x132   : > { %v1043_v5 = vadd.f32 %v1011_v26, %v943_v8  ;;  %v1211_v34 = vmul.f32 %v3142_v43, %v2808_v10  ;;  %v1212_v47 = vmul.f32 %v3144_v29, %v2808_v10  ;;  %v1541_v13 = vadd.f32 %v1509_v50, %v1441_v36 }
 0x133   : > { %2495 = vmatprep.mubr.msk.bf16.mxu1 %vm280_vm0, %v1770_v60  ;;  %v1542_v58 = vadd.f32 %v1510_v51, %v1442_v4  ;;  %v1044_v14 = vadd.f32 %v1012_v3, %v944_v20  ;;  %v1311_v22 = vmul.f32 %v3146_v30, %v2814_v18  ;;  %v1312_v27 = vmul.f32 %v3155_v44, %v2814_v18  ;;  %v3235_v4 = vld [vmem:[#allocation2 + $0xd8] sm:$0xff] }
 0x134   : > { %v1143_v23 = vadd.f32 %v1111_v15, %v1043_v5  ;;  %v1411_v35 = vmul.f32 %v2804_v7, %v3182_v37  ;;  %v1412_v17 = vmul.f32 %v2804_v7, %v3184_v12  ;;  %v1641_v39 = vadd.f32 %v1609_v25, %v1541_v13 }
 0x135   : > { %v1642_v40 = vadd.f32 %v1610_v56, %v1542_v58  ;;  %v1144_v41 = vadd.f32 %v1112_v42, %v1044_v14  ;;  %v1511_v45 = vmul.f32 %v2810_v11, %v3192_v52  ;;  %v1512_v53 = vmul.f32 %v2810_v11, %v3197_v16 }
 0x136   : > { %v1243_v46 = vadd.f32 %v1211_v34, %v1143_v23  ;;  %v1611_v49 = vmul.f32 %v2838_v38, %v3199_v33  ;;  %v1612_v50 = vmul.f32 %v2838_v38, %v3201_v21  ;;  %v1680_v51 = vadd.f32 %v2892_v62, %v1641_v39  ;;  %v3243_v34 = vld [vmem:[#allocation2 + $0xd9] sm:$0xff] }
 0x137   : > { %v1681_v54 = vadd.f32 %v2892_v62, %v1642_v40  ;;  %v1244_v25 = vadd.f32 %v1212_v47, %v1144_v41  ;;  %v845_v6 = vmul.f32 %v3127_v24, %v2777_v28  ;;  %v846_v56 = vmul.f32 %v3138_v19, %v2777_v28  ;;  %v3249_v23 = vld [vmem:[#allocation2 + $0xda] sm:$0xff] }
 0x138   : > { %v1343_v55 = vadd.f32 %v1311_v22, %v1243_v46  ;;  %v913_v59 = vmul.f32 %v3142_v43, %v2780_v31  ;;  %v914_v57 = vmul.f32 %v3144_v29, %v2780_v31  ;;  %v1712_v63 = vmax.f32 %v1680_v51, 0.0  ;;  %v3247_v22 = vld [vmem:[#allocation2 + $0xe1] sm:$0xff] }
 0x139   : > { %v1713_v61 = vmax.f32 %v1681_v54, 0.0  ;;  %v1344_v32 = vadd.f32 %v1312_v27, %v1244_v25  ;;  %v1013_v0 = vmul.f32 %v3146_v30, %v2789_v48  ;;  %v1014_v24 = vmul.f32 %v3155_v44, %v2789_v48  ;;  %v3237_v30 = vld [vmem:[#allocation2 + $0xe0] sm:$0xff] }
 0x13a   : > { %v1443_v2 = vadd.f32 %v1411_v35, %v1343_v55  ;;  %v945_v1 = vadd.f32 %v913_v59, %v845_v6  ;;  %v946_v8 = vadd.f32 %v914_v57, %v846_v56  ;;  %v1744_v26 = vmin.f32 %v1712_v63, 6.0  ;;  %v3251_v27 = vld [vmem:[#allocation2 + $0xe2] sm:$0xff] }
 0x13b   : > { %v1745_v19 = vmin.f32 %v1713_v61, 6.0  ;;  %v1444_v3 = vadd.f32 %v1412_v17, %v1344_v32  ;;  %v1113_v43 = vmul.f32 %v3182_v37, %v2806_v9  ;;  %v1114_v36 = vmul.f32 %v3184_v12, %v2806_v9 }
 0x13c   : > { %v1543_v15 = vadd.f32 %v1511_v45, %v1443_v2  ;;  %v1045_v29 = vadd.f32 %v1013_v0, %v945_v1  ;;  %v1046_v60 = vadd.f32 %v1014_v24, %v946_v8  ;;  %v1213_v44 = vmul.f32 %v3192_v52, %v2808_v10 }
 0x13d   : > { %v1771_v20 = vpack.c.bf16 %v1745_v19, %v1744_v26  ;;  %v1544_v5 = vadd.f32 %v1512_v53, %v1444_v3  ;;  %v1214_v42 = vmul.f32 %v3197_v16, %v2808_v10  ;;  %v1313_v14 = vmul.f32 %v3199_v33, %v2814_v18 }
 0x13e   : > { %v1643_v47 = vadd.f32 %v1611_v49, %v1543_v15  ;;  %v1145_v13 = vadd.f32 %v1113_v43, %v1045_v29  ;;  %v1146_v58 = vadd.f32 %v1114_v36, %v1046_v60  ;;  %v1314_v17 = vmul.f32 %v3201_v21, %v2814_v18  ;;  %v3286_v15 = vld [vmem:[#allocation2 + $0xf0] sm:$0xff] }
 0x13f   : > { %2496 = vmatmul.mubr.msk.bf16.gmra.mxu1 %vm280_vm0, %v1771_v20  ;;  %v1644_v35 = vadd.f32 %v1612_v50, %v1544_v5  ;;  %v1413_v39 = vmul.f32 %v2804_v7, %v3235_v4  ;;  %v1414_v40 = vmul.f32 %v2804_v7, %v3237_v30  ;;  %v1513_v53 = vmul.f32 %v2810_v11, %v3243_v34  ;;  %v3294_v20 = vld [vmem:[#allocation2 + $0xf1] sm:$0xff]  ;;  %v3296_v5 = vld [vmem:[#allocation2 + $0xf9] sm:$0xff] }
 0x140   : > { %v1682_v41 = vadd.f32 %v2892_v62, %v1643_v47  ;;  %v1245_v45 = vadd.f32 %v1213_v44, %v1145_v13  ;;  %v1246_v46 = vadd.f32 %v1214_v42, %v1146_v58  ;;  %v1514_v50 = vmul.f32 %v2810_v11, %v3247_v22  ;;  %v3303_v58 = vld [vmem:[#allocation2 + $0xf2] sm:$0xff] }
 0x141   : > { %v1683_v49 = vadd.f32 %v2892_v62, %v1644_v35  ;;  %v1613_v51 = vmul.f32 %v2838_v38, %v3249_v23  ;;  %v1614_v54 = vmul.f32 %v2838_v38, %v3251_v27  ;;  %v847_v56 = vmul.f32 %v3182_v37, %v2777_v28 }
 0x142   : > { %v1714_v25 = vmax.f32 %v1682_v41, 0.0  ;;  %v1345_v6 = vadd.f32 %v1313_v14, %v1245_v45  ;;  %v1346_v55 = vadd.f32 %v1314_v17, %v1246_v46  ;;  %v848_v57 = vmul.f32 %v3184_v12, %v2777_v28 }
 0x143   : > { %v1715_v59 = vmax.f32 %v1683_v49, 0.0  ;;  %v915_v63 = vmul.f32 %v3192_v52, %v2780_v31  ;;  %v916_v61 = vmul.f32 %v3197_v16, %v2780_v31  ;;  %v1015_v38 = vmul.f32 %v3199_v33, %v2789_v48  ;;  %v3288_v33 = vld [vmem:[#allocation2 + $0xf8] sm:$0xff] }
 0x144   : > { %v1746_v32 = vmin.f32 %v1714_v25, 6.0  ;;  %v1445_v0 = vadd.f32 %v1413_v39, %v1345_v6  ;;  %v1446_v2 = vadd.f32 %v1414_v40, %v1346_v55  ;;  %v1016_v37 = vmul.f32 %v3201_v21, %v2789_v48 }
 0x145   : > { %v1747_v1 = vmin.f32 %v1715_v59, 6.0  ;;  %v947_v8 = vadd.f32 %v915_v63, %v847_v56  ;;  %v948_v24 = vadd.f32 %v916_v61, %v848_v57  ;;  %v1115_v52 = vmul.f32 %v3235_v4, %v2806_v9 }
 0x146   : > { %v1545_v26 = vadd.f32 %v1513_v53, %v1445_v0  ;;  %v1546_v12 = vadd.f32 %v1514_v50, %v1446_v2  ;;  %v1116_v16 = vmul.f32 %v3237_v30, %v2806_v9  ;;  %v1215_v21 = vmul.f32 %v3243_v34, %v2808_v10  ;;  %v1580_v50 = vld [vmem:[#allocation2 + $0xfa] sm:$0xff] }
 0x147   : > { %v1772_v19 = vpack.c.bf16 %v1747_v1, %v1746_v32  ;;  %v1047_v3 = vadd.f32 %v1015_v38, %v947_v8  ;;  %v1048_v43 = vadd.f32 %v1016_v37, %v948_v24  ;;  %v1216_v36 = vmul.f32 %v3247_v22, %v2808_v10 }
 0x148   : > { %v1645_v29 = vadd.f32 %v1613_v51, %v1545_v26  ;;  %v1646_v60 = vadd.f32 %v1614_v54, %v1546_v12  ;;  %v1315_v47 = vmul.f32 %v3249_v23, %v2814_v18  ;;  %v1316_v13 = vmul.f32 %v3251_v27, %v2814_v18  ;;  %v3318_v51 = vld [vmem:[%s3724_s3 + $0x8] ss:$0 sm:$0xff]  ;;  %v3341_v12 = vld [vmem:[#allocation2 + $0x110] sm:$0xff] }
 0x149   : > { %2499 = vmatprep.mubr.msk.bf16.mxu1 %vm280_vm0, %v1772_v19  ;;  %v1147_v44 = vadd.f32 %v1115_v52, %v1047_v3  ;;  %v1148_v42 = vadd.f32 %v1116_v16, %v1048_v43  ;;  %v1415_v17 = vmul.f32 %v2804_v7, %v3286_v15  ;;  %v1416_v39 = vmul.f32 %v2804_v7, %v3288_v33  ;;  %v3343_v52 = vld [vmem:[#allocation2 + $0x109] sm:$0xff]  ;;  %v3352_v43 = vld [vmem:[#allocation2 + $0x111] sm:$0xff] }
 0x14a   : > { %v1684_v14 = vadd.f32 %v2892_v62, %v1645_v29  ;;  %v1685_v35 = vadd.f32 %v2892_v62, %v1646_v60  ;;  %v1515_v45 = vmul.f32 %v2810_v11, %v3294_v20  ;;  %v1516_v46 = vmul.f32 %v2810_v11, %v3296_v5 }
 0x14b   : > { %v1247_v40 = vadd.f32 %v1215_v21, %v1147_v44  ;;  %v1248_v41 = vadd.f32 %v1216_v36, %v1148_v42  ;;  %v1615_v54 = vmul.f32 %v3318_v51, %v3303_v58  ;;  %v849_v25 = vmul.f32 %v3235_v4, %v2777_v28  ;;  %v3355_v44 = vld [vmem:[#allocation2 + $0x10a] sm:$0xff] }
 0x14c   : > { %v1716_v53 = vmax.f32 %v1684_v14, 0.0  ;;  %v1717_v49 = vmax.f32 %v1685_v35, 0.0  ;;  %v850_v56 = vmul.f32 %v3237_v30, %v2777_v28  ;;  %v917_v59 = vmul.f32 %v3243_v34, %v2780_v31 }
 0x14d   : > { %v1347_v6 = vadd.f32 %v1315_v47, %v1247_v40  ;;  %v1348_v55 = vadd.f32 %v1316_v13, %v1248_v41  ;;  %v918_v61 = vmul.f32 %v3247_v22, %v2780_v31  ;;  %v1017_v32 = vmul.f32 %v3249_v23, %v2789_v48  ;;  %v3339_v23 = vld [vmem:[#allocation2 + $0x108] sm:$0xff] }
 0x14e   : > { %v1748_v57 = vmin.f32 %v1716_v53, 6.0  ;;  %v1749_v63 = vmin.f32 %v1717_v49, 6.0  ;;  %v1616_v4 = vmul.f32 %v3318_v51, %v1580_v50  ;;  %v949_v38 = vadd.f32 %v917_v59, %v849_v25 }
 0x14f   : > { %v1447_v0 = vadd.f32 %v1415_v17, %v1347_v6  ;;  %v1448_v2 = vadd.f32 %v1416_v39, %v1348_v55  ;;  %v950_v8 = vadd.f32 %v918_v61, %v850_v56  ;;  %v1018_v30 = vmul.f32 %v3251_v27, %v2789_v48  ;;  %v1582_v55 = vld [vmem:[#allocation2 + $0x112] sm:$0xff] }
 0x150   : > { %v1773_v1 = vpack.c.bf16 %v1749_v63, %v1748_v57  ;;  %v1117_v34 = vmul.f32 %v3286_v15, %v2806_v9  ;;  %v1049_v26 = vadd.f32 %v1017_v32, %v949_v38  ;;  %v1118_v22 = vmul.f32 %v3288_v33, %v2806_v9 }
 0x151   : > { %v1547_v24 = vadd.f32 %v1515_v45, %v1447_v0  ;;  %v1548_v37 = vadd.f32 %v1516_v46, %v1448_v2  ;;  %v1050_v16 = vadd.f32 %v1018_v30, %v950_v8  ;;  %v1217_v27 = vmul.f32 %v3294_v20, %v2808_v10 }
 0x152   : > { %2500 = vmatmul.mubr.msk.bf16.gmra.mxu1 %vm280_vm0, %v1773_v1  ;;  %v1218_v19 = vmul.f32 %v3296_v5, %v2808_v10  ;;  %v1317_v3 = vmul.f32 %v3303_v58, %v2814_v18  ;;  %v1149_v21 = vadd.f32 %v1117_v34, %v1049_v26  ;;  %v1318_v36 = vmul.f32 %v1580_v50, %v2814_v18  ;;  %v3395_v26 = vld [vmem:[#allocation2 + $0x129] sm:$0xff] }
 0x153   : > { %v1647_v29 = vadd.f32 %v1615_v54, %v1547_v24  ;;  %v1648_v60 = vadd.f32 %v1616_v4, %v1548_v37  ;;  %v1150_v42 = vadd.f32 %v1118_v22, %v1050_v16  ;;  %v1417_v47 = vmul.f32 %v2804_v7, %v3339_v23  ;;  %v3393_v37 = vld [vmem:[#allocation2 + $0x121] sm:$0xff] }
 0x154   : > { %v1418_v13 = vmul.f32 %v2804_v7, %v3341_v12  ;;  %v1517_v14 = vmul.f32 %v2810_v11, %v3343_v52  ;;  %v1249_v39 = vadd.f32 %v1217_v27, %v1149_v21  ;;  %v1518_v40 = vmul.f32 %v2810_v11, %v3352_v43 }
 0x155   : > { %v1686_v35 = vadd.f32 %v2892_v62, %v1647_v29  ;;  %v1687_v17 = vadd.f32 %v2892_v62, %v1648_v60  ;;  %v1250_v41 = vadd.f32 %v1218_v19, %v1150_v42  ;;  %v1617_v45 = vmul.f32 %v3318_v51, %v3355_v44  ;;  %v3410_v42 = vld [vmem:[%s3725_s4] ss:$0 sm:$0xff] }
 0x156   : > { %v851_v46 = vmul.f32 %v3286_v15, %v2777_v28  ;;  %v852_v53 = vmul.f32 %v3288_v33, %v2777_v28  ;;  %v1349_v25 = vadd.f32 %v1317_v3, %v1249_v39  ;;  %v919_v62 = vmul.f32 %v3294_v20, %v2780_v31  ;;  %v3401_v3 = vld [vmem:[#allocation2 + $0x122] sm:$0xff] }
 0x157   : > { %v1718_v49 = vmax.f32 %v1686_v35, 0.0  ;;  %v1719_v54 = vmax.f32 %v1687_v17, 0.0  ;;  %v1350_v6 = vadd.f32 %v1318_v36, %v1250_v41  ;;  %v920_v56 = vmul.f32 %v3296_v5, %v2780_v31 }
 0x158   : > { %v1019_v59 = vmul.f32 %v3303_v58, %v2789_v48  ;;  %v1020_v57 = vmul.f32 %v1580_v50, %v2789_v48  ;;  %v1449_v61 = vadd.f32 %v1417_v47, %v1349_v25  ;;  %v951_v33 = vadd.f32 %v919_v62, %v851_v46  ;;  %v3385_v58 = vld [vmem:[#allocation2 + $0x120] sm:$0xff]  ;;  %v3387_v50 = vld [vmem:[#allocation2 + $0x128] sm:$0xff] }
 0x159   : > { %v1750_v15 = vmin.f32 %v1718_v49, 6.0  ;;  %v1751_v63 = vmin.f32 %v1719_v54, 6.0  ;;  %v1450_v32 = vadd.f32 %v1418_v13, %v1350_v6  ;;  %v952_v0 = vadd.f32 %v920_v56, %v852_v53 }
 0x15a   : > { %v1119_v2 = vmul.f32 %v3339_v23, %v2806_v9  ;;  %v1120_v20 = vmul.f32 %v3341_v12, %v2806_v9  ;;  %v1549_v38 = vadd.f32 %v1517_v14, %v1449_v61  ;;  %v1618_v5 = vmul.f32 %v3318_v51, %v1582_v55 }
 0x15b   : > { %v1774_v4 = vpack.c.bf16 %v1751_v63, %v1750_v15  ;;  %v1051_v1 = vadd.f32 %v1019_v59, %v951_v33  ;;  %v1550_v8 = vadd.f32 %v1518_v40, %v1450_v32  ;;  %v1052_v30 = vadd.f32 %v1020_v57, %v952_v0  ;;  %v1584_v40 = vld [vmem:[#allocation2 + $0x12a] sm:$0xff] }
 0x15c   : > { %v1219_v34 = vmul.f32 %v3343_v52, %v2808_v10  ;;  %v1220_v24 = vmul.f32 %v3352_v43, %v2808_v10  ;;  %v1649_v22 = vadd.f32 %v1617_v45, %v1549_v38  ;;  %v1319_v27 = vmul.f32 %v3355_v44, %v2814_v18 }
 0x15d   : > { %2503 = vmatprep.mubr.msk.bf16.mxu1 %vm280_vm0, %v1774_v4  ;;  %v1151_v16 = vadd.f32 %v1119_v2, %v1051_v1  ;;  %v1320_v19 = vmul.f32 %v1582_v55, %v2814_v18  ;;  %v1650_v29 = vadd.f32 %v1618_v5, %v1550_v8  ;;  %v1152_v60 = vadd.f32 %v1120_v20, %v1052_v30  ;;  %v3436_v2 = vld [vmem:[#allocation2 + $0x138] sm:$0xff]  ;;  %v3440_v5 = vld [vmem:[#allocation2 + $0x140] sm:$0xff] }
 0x15e   : > { %v1419_v21 = vmul.f32 %v2804_v7, %v3385_v58  ;;  %v1420_v36 = vmul.f32 %v2804_v7, %v3387_v50  ;;  %v1688_v47 = vadd.f32 %v3410_v42, %v1649_v22  ;;  %v1519_v14 = vmul.f32 %v2810_v11, %v3393_v37  ;;  %v3442_v1 = vld [vmem:[#allocation2 + $0x139] sm:$0xff] }
 0x15f   : > { %v1251_v13 = vadd.f32 %v1219_v34, %v1151_v16  ;;  %v1520_v35 = vmul.f32 %v2810_v11, %v3395_v26  ;;  %v1689_v17 = vadd.f32 %v3410_v42, %v1650_v29  ;;  %v1252_v39 = vadd.f32 %v1220_v24, %v1152_v60  ;;  %v3448_v24 = vld [vmem:[#allocation2 + $0x141] sm:$0xff] }
 0x160   : > { %v1619_v41 = vmul.f32 %v3318_v51, %v3401_v3  ;;  %v853_v45 = vmul.f32 %v3339_v23, %v2777_v28  ;;  %v1720_v46 = vmax.f32 %v1688_v47, 0.0  ;;  %v854_v49 = vmul.f32 %v3341_v12, %v2777_v28  ;;  %v3450_v22 = vld [vmem:[#allocation2 + $0x13a] sm:$0xff] }
 0x161   : > { %v1351_v53 = vadd.f32 %v1319_v27, %v1251_v13  ;;  %v921_v54 = vmul.f32 %v3343_v52, %v2780_v31  ;;  %v1721_v25 = vmax.f32 %v1689_v17, 0.0  ;;  %v1352_v62 = vadd.f32 %v1320_v19, %v1252_v39 }
 0x162   : > { %v922_v6 = vmul.f32 %v3352_v43, %v2780_v31  ;;  %v1021_v56 = vmul.f32 %v3355_v44, %v2789_v48  ;;  %v1752_v59 = vmin.f32 %v1720_v46, 6.0  ;;  %v1620_v23 = vmul.f32 %v3318_v51, %v1584_v40 }
 0x163   : > { %v1451_v57 = vadd.f32 %v1419_v21, %v1351_v53  ;;  %v953_v15 = vadd.f32 %v921_v54, %v853_v45  ;;  %v1753_v63 = vmin.f32 %v1721_v25, 6.0  ;;  %v1452_v61 = vadd.f32 %v1420_v36, %v1352_v62  ;;  %v1586_v54 = vld [vmem:[#allocation2 + $0x142] sm:$0xff] }
 0x164   : > { %v954_v33 = vadd.f32 %v922_v6, %v854_v49  ;;  %v1022_v12 = vmul.f32 %v1582_v55, %v2789_v48  ;;  %v1121_v0 = vmul.f32 %v3385_v58, %v2806_v9  ;;  %v1122_v43 = vmul.f32 %v3387_v50, %v2806_v9 }
 0x165   : > { %v1551_v32 = vadd.f32 %v1519_v14, %v1451_v57  ;;  %v1053_v52 = vadd.f32 %v1021_v56, %v953_v15  ;;  %v1775_v44 = vpack.c.bf16 %v1753_v63, %v1752_v59  ;;  %v1552_v20 = vadd.f32 %v1520_v35, %v1452_v61 }
 0x166   : > { %v1054_v4 = vadd.f32 %v1022_v12, %v954_v33  ;;  %v1221_v38 = vmul.f32 %v3393_v37, %v2808_v10  ;;  %v1222_v30 = vmul.f32 %v3395_v26, %v2808_v10  ;;  %v1321_v34 = vmul.f32 %v3401_v3, %v2814_v18 }
 0x167   : > { %v1651_v55 = vadd.f32 %v1619_v41, %v1551_v32  ;;  %v1153_v8 = vadd.f32 %v1121_v0, %v1053_v52  ;;  %2504 = vmatmul.mubr.msk.bf16.gmra.mxu1 %vm280_vm0, %v1775_v44  ;;  %v1652_v16 = vadd.f32 %v1620_v23, %v1552_v20  ;;  %v1322_v19 = vmul.f32 %v1584_v40, %v2814_v18  ;;  %v3490_v20 = vld [vmem:[#allocation2 + $0x151] sm:$0xff] }
 0x168   : > { %v1154_v27 = vadd.f32 %v1122_v43, %v1054_v4  ;;  %v1421_v29 = vmul.f32 %v2804_v7, %v3436_v2  ;;  %v1422_v36 = vmul.f32 %v2804_v7, %v3440_v5  ;;  %v1521_v47 = vmul.f32 %v2810_v11, %v3442_v1 }
 0x169   : > { %v1690_v60 = vadd.f32 %v3410_v42, %v1651_v55  ;;  %v1253_v21 = vadd.f32 %v1221_v38, %v1153_v8  ;;  %v1691_v13 = vadd.f32 %v3410_v42, %v1652_v16  ;;  %v1522_v35 = vmul.f32 %v2810_v11, %v3448_v24 }
 0x16a   : > { %v1254_v14 = vadd.f32 %v1222_v30, %v1154_v27  ;;  %v1621_v17 = vmul.f32 %v3318_v51, %v3450_v22  ;;  %v855_v45 = vmul.f32 %v3385_v58, %v2777_v28  ;;  %v856_v46 = vmul.f32 %v3387_v50, %v2777_v28  ;;  %v3495_v30 = vld [vmem:[#allocation2 + $0x159] sm:$0xff] }
 0x16b   : > { %v1722_v39 = vmax.f32 %v1690_v60, 0.0  ;;  %v1353_v41 = vadd.f32 %v1321_v34, %v1253_v21  ;;  %v1723_v53 = vmax.f32 %v1691_v13, 0.0  ;;  %v923_v25 = vmul.f32 %v3393_v37, %v2780_v31 }
 0x16c   : > { %v1354_v49 = vadd.f32 %v1322_v19, %v1254_v14  ;;  %v924_v62 = vmul.f32 %v3395_v26, %v2780_v31  ;;  %v1023_v59 = vmul.f32 %v3401_v3, %v2789_v48  ;;  %v1024_v57 = vmul.f32 %v1584_v40, %v2789_v48  ;;  %v3482_v3 = vld [vmem:[#allocation2 + $0x150] sm:$0xff]  ;;  %v3484_v40 = vld [vmem:[#allocation2 + $0x158] sm:$0xff] }
 0x16d   : > { %v1754_v6 = vmin.f32 %v1722_v39, 6.0  ;;  %v1453_v56 = vadd.f32 %v1421_v29, %v1353_v41  ;;  %v1755_v58 = vmin.f32 %v1723_v53, 6.0  ;;  %v955_v15 = vadd.f32 %v923_v25, %v855_v45 }
 0x16e   : > { %v1454_v23 = vadd.f32 %v1422_v36, %v1354_v49  ;;  %v956_v50 = vadd.f32 %v924_v62, %v856_v46  ;;  %v1622_v61 = vmul.f32 %v3318_v51, %v1586_v54  ;;  %v1123_v37 = vmul.f32 %v3436_v2, %v2806_v9  ;;  %v1588_v46 = vld [vmem:[#allocation2 + $0x15a] sm:$0xff] }
 0x16f   : > { %v1553_v63 = vadd.f32 %v1521_v47, %v1453_v56  ;;  %v1124_v26 = vmul.f32 %v3440_v5, %v2806_v9  ;;  %v1776_v33 = vpack.c.bf16 %v1755_v58, %v1754_v6  ;;  %v1055_v32 = vadd.f32 %v1023_v59, %v955_v15  ;;  %v1587_v47 = vld [vmem:[#allocation2 + $0x152] sm:$0xff] }
 0x170   : > { %v1554_v12 = vadd.f32 %v1522_v35, %v1454_v23  ;;  %v1056_v52 = vadd.f32 %v1024_v57, %v956_v50  ;;  %v1223_v43 = vmul.f32 %v3442_v1, %v2808_v10  ;;  %v1224_v44 = vmul.f32 %v3448_v24, %v2808_v10 }
 0x171   : > { %v1653_v0 = vadd.f32 %v1621_v17, %v1553_v63  ;;  %2507 = vmatprep.mubr.msk.bf16.mxu1 %vm280_vm0, %v1776_v33  ;;  %v1155_v38 = vadd.f32 %v1123_v37, %v1055_v32  ;;  %v1323_v8 = vmul.f32 %v3450_v22, %v2814_v18  ;;  %v1324_v16 = vmul.f32 %v1586_v54, %v2814_v18  ;;  %v3525_v37 = vld [vmem:[#allocation2 + $0x170] sm:$0xff] }
 0x172   : > { %v1654_v4 = vadd.f32 %v1622_v61, %v1554_v12  ;;  %v1156_v55 = vadd.f32 %v1124_v26, %v1056_v52  ;;  %v1423_v27 = vmul.f32 %v2804_v7, %v3482_v3  ;;  %v1424_v19 = vmul.f32 %v2804_v7, %v3484_v40  ;;  %v3533_v12 = vld [vmem:[#allocation2 + $0x169] sm:$0xff] }
 0x173   : > { %v1692_v34 = vadd.f32 %v3410_v42, %v1653_v0  ;;  %v1255_v60 = vadd.f32 %v1223_v43, %v1155_v38  ;;  %v1523_v36 = vmul.f32 %v2810_v11, %v3490_v20  ;;  %v1524_v14 = vmul.f32 %v2810_v11, %v3495_v30 }
 0x174   : > { %v1693_v29 = vadd.f32 %v3410_v42, %v1654_v4  ;;  %v1256_v21 = vadd.f32 %v1224_v44, %v1156_v55  ;;  %v857_v35 = vmul.f32 %v3436_v2, %v2777_v28  ;;  %v858_v17 = vmul.f32 %v3440_v5, %v2777_v28  ;;  %v3537_v44 = vld [vmem:[#allocation2 + $0x171] sm:$0xff] }
 0x175   : > { %v1724_v13 = vmax.f32 %v1692_v34, 0.0  ;;  %v1355_v41 = vadd.f32 %v1323_v8, %v1255_v60  ;;  %v925_v53 = vmul.f32 %v3442_v1, %v2780_v31  ;;  %v1623_v25 = vmul.f32 %v3318_v51, %v1587_v47 }
 0x176   : > { %v1725_v39 = vmax.f32 %v1693_v29, 0.0  ;;  %v1356_v45 = vadd.f32 %v1324_v16, %v1256_v21  ;;  %v926_v62 = vmul.f32 %v3448_v24, %v2780_v31  ;;  %v1025_v6 = vmul.f32 %v3450_v22, %v2789_v48  ;;  %v3523_v24 = vld [vmem:[#allocation2 + $0x168] sm:$0xff] }
 0x177   : > { %v1756_v49 = vmin.f32 %v1724_v13, 6.0  ;;  %v1455_v56 = vadd.f32 %v1423_v27, %v1355_v41  ;;  %v957_v5 = vadd.f32 %v925_v53, %v857_v35  ;;  %v1624_v57 = vmul.f32 %v3318_v51, %v1588_v46  ;;  %v1589_v41 = vld [vmem:[#allocation2 + $0x16a] sm:$0xff] }
 0x178   : > { %v1757_v2 = vmin.f32 %v1725_v39, 6.0  ;;  %v1456_v59 = vadd.f32 %v1424_v19, %v1356_v45  ;;  %v958_v58 = vadd.f32 %v926_v62, %v858_v17  ;;  %v1026_v23 = vmul.f32 %v1586_v54, %v2789_v48 }
 0x179   : > { %v1125_v1 = vmul.f32 %v3482_v3, %v2806_v9  ;;  %v1555_v50 = vadd.f32 %v1523_v36, %v1455_v56  ;;  %v1057_v61 = vadd.f32 %v1025_v6, %v957_v5  ;;  %v1126_v26 = vmul.f32 %v3484_v40, %v2806_v9  ;;  %v1590_v6 = vld [vmem:[#allocation2 + $0x172] sm:$0xff] }
 0x17a   : > { %v1777_v15 = vpack.c.bf16 %v1757_v2, %v1756_v49  ;;  %v1556_v63 = vadd.f32 %v1524_v14, %v1456_v59  ;;  %v1058_v22 = vadd.f32 %v1026_v23, %v958_v58  ;;  %v1225_v33 = vmul.f32 %v3490_v20, %v2808_v10  ;;  %v1391_v58 = vld [vmem:[#allocation2 + $0x180] sm:$0xff] }
 0x17b   : > { %v1226_v54 = vmul.f32 %v3495_v30, %v2808_v10  ;;  %v1655_v32 = vadd.f32 %v1623_v25, %v1555_v50  ;;  %v1157_v0 = vadd.f32 %v1125_v1, %v1057_v61  ;;  %v1325_v43 = vmul.f32 %v1587_v47, %v2814_v18  ;;  %v1392_v50 = vld [vmem:[#allocation2 + $0x188] sm:$0xff] }
 0x17c   : > { %2508 = vmatmul.mubr.msk.bf16.gmra.mxu1 %vm280_vm0, %v1777_v15  ;;  %v1656_v52 = vadd.f32 %v1624_v57, %v1556_v63  ;;  %v1158_v4 = vadd.f32 %v1126_v26, %v1058_v22  ;;  %v1326_v38 = vmul.f32 %v1588_v46, %v2814_v18  ;;  %v1425_v55 = vmul.f32 %v2804_v7, %v3523_v24  ;;  %v1491_v63 = vld [vmem:[#allocation2 + $0x181] sm:$0xff] }
 0x17d   : > { %v1426_v8 = vmul.f32 %v2804_v7, %v3525_v37  ;;  %v1694_v34 = vadd.f32 %v3410_v42, %v1655_v32  ;;  %v1257_v27 = vadd.f32 %v1225_v33, %v1157_v0  ;;  %v1525_v19 = vmul.f32 %v2810_v11, %v3533_v12 }
 0x17e   : > { %v1695_v16 = vadd.f32 %v3410_v42, %v1656_v52  ;;  %v1258_v29 = vadd.f32 %v1226_v54, %v1158_v4  ;;  %v1526_v60 = vmul.f32 %v2810_v11, %v3537_v44  ;;  %v859_v21 = vmul.f32 %v3482_v3, %v2777_v28  ;;  %v1492_v54 = vld [vmem:[#allocation2 + $0x189] sm:$0xff] }
 0x17f   : > { %v860_v36 = vmul.f32 %v3484_v40, %v2777_v28  ;;  %v1726_v13 = vmax.f32 %v1694_v34, 0.0  ;;  %v1357_v35 = vadd.f32 %v1325_v43, %v1257_v27  ;;  %v927_v17 = vmul.f32 %v3490_v20, %v2780_v31 }
 0x180   : > { %v1727_v14 = vmax.f32 %v1695_v16, 0.0  ;;  %v1358_v39 = vadd.f32 %v1326_v38, %v1258_v29  ;;  %v928_v45 = vmul.f32 %v3495_v30, %v2780_v31  ;;  %v1027_v53 = vmul.f32 %v1587_v47, %v2789_v48 }
 0x181   : > { %v1028_v49 = vmul.f32 %v1588_v46, %v2789_v48  ;;  %v1758_v25 = vmin.f32 %v1726_v13, 6.0  ;;  %v1457_v62 = vadd.f32 %v1425_v55, %v1357_v35  ;;  %v959_v40 = vadd.f32 %v927_v17, %v859_v21  ;;  %v1592_v17 = vld [vmem:[#allocation2 + $0x18a] sm:$0xff] }
 0x182   : > { %v1759_v3 = vmin.f32 %v1727_v14, 6.0  ;;  %v1458_v2 = vadd.f32 %v1426_v8, %v1358_v39  ;;  %v960_v56 = vadd.f32 %v928_v45, %v860_v36  ;;  %v1127_v59 = vmul.f32 %v3523_v24, %v2806_v9 }
 0x183   : > { %v1128_v20 = vmul.f32 %v3525_v37, %v2806_v9  ;;  %v1557_v57 = vadd.f32 %v1525_v19, %v1457_v62  ;;  %v1625_v30 = vmul.f32 %v3318_v51, %v1589_v41  ;;  %v1059_v47 = vadd.f32 %v1027_v53, %v959_v40  ;;  %v1591_v19 = vld [vmem:[#allocation2 + $0x182] sm:$0xff] }
 0x184   : > { %v1778_v5 = vpack.c.bf16 %v1759_v3, %v1758_v25  ;;  %v1558_v46 = vadd.f32 %v1526_v60, %v1458_v2  ;;  %v1626_v23 = vmul.f32 %v3318_v51, %v1590_v6  ;;  %v1060_v1 = vadd.f32 %v1028_v49, %v960_v56 }
 0x185   : > { %v1227_v15 = vmul.f32 %v3533_v12, %v2808_v10  ;;  %v1657_v61 = vadd.f32 %v1625_v30, %v1557_v57  ;;  %v1159_v22 = vadd.f32 %v1127_v59, %v1059_v47  ;;  %v1228_v26 = vmul.f32 %v3537_v44, %v2808_v10  ;;  %v1394_v47 = vld [vmem:[#allocation2 + $0x1a0] sm:$0xff] }
 0x186   : > { %2511 = vmatprep.mubr.msk.bf16.mxu1 %vm280_vm0, %v1778_v5  ;;  %v1327_v33 = vmul.f32 %v1589_v41, %v2814_v18  ;;  %v1658_v32 = vadd.f32 %v1626_v23, %v1558_v46  ;;  %v1160_v52 = vadd.f32 %v1128_v20, %v1060_v1  ;;  %v1328_v0 = vmul.f32 %v1590_v6, %v2814_v18  ;;  %v1393_v20 = vld [vmem:[#allocation2 + $0x198] sm:$0xff] }
 0x187   : > { %v1427_v43 = vmul.f32 %v2804_v7, %v1391_v58  ;;  %v1696_v4 = vadd.f32 %v3410_v42, %v1657_v61  ;;  %v1259_v38 = vadd.f32 %v1227_v15, %v1159_v22  ;;  %v1428_v55 = vmul.f32 %v2804_v7, %v1392_v50  ;;  %v1493_v23 = vld [vmem:[#allocation2 + $0x199] sm:$0xff] }
 0x188   : > { %v1527_v8 = vmul.f32 %v2810_v11, %v1491_v63  ;;  %v1697_v34 = vadd.f32 %v3410_v42, %v1658_v32  ;;  %v1260_v16 = vadd.f32 %v1228_v26, %v1160_v52  ;;  %v1528_v27 = vmul.f32 %v2810_v11, %v1492_v54 }
 0x189   : > { %v861_v29 = vmul.f32 %v3523_v24, %v2777_v28  ;;  %v1728_v60 = vmax.f32 %v1696_v4, 0.0  ;;  %v1359_v21 = vadd.f32 %v1327_v33, %v1259_v38  ;;  %v862_v36 = vmul.f32 %v3525_v37, %v2777_v28  ;;  %v1593_v33 = vld [vmem:[#allocation2 + $0x19a] sm:$0xff] }
 0x18a   : > { %v929_v13 = vmul.f32 %v3533_v12, %v2780_v31  ;;  %v1729_v14 = vmax.f32 %v1697_v34, 0.0  ;;  %v1360_v35 = vadd.f32 %v1328_v0, %v1260_v16  ;;  %v930_v39 = vmul.f32 %v3537_v44, %v2780_v31 }
 0x18b   : > { %v1029_v45 = vmul.f32 %v1589_v41, %v2789_v48  ;;  %v1760_v53 = vmin.f32 %v1728_v60, 6.0  ;;  %v1459_v49 = vadd.f32 %v1427_v43, %v1359_v21  ;;  %v1627_v24 = vmul.f32 %v3318_v51, %v1591_v19 }
 0x18c   : > { %v961_v25 = vadd.f32 %v929_v13, %v861_v29  ;;  %v1761_v3 = vmin.f32 %v1729_v14, 6.0  ;;  %v1460_v62 = vadd.f32 %v1428_v55, %v1360_v35  ;;  %v962_v40 = vadd.f32 %v930_v39, %v862_v36 }
 0x18d   : > { %v1030_v28 = vmul.f32 %v1590_v6, %v2789_v48  ;;  %v1559_v37 = vadd.f32 %v1527_v8, %v1459_v49  ;;  %v1628_v12 = vmul.f32 %v3318_v51, %v1592_v17  ;;  %v1129_v56 = vmul.f32 %v1391_v58, %v2806_v9 }
 0x18e   : > { %v1061_v2 = vadd.f32 %v1029_v45, %v961_v25  ;;  %v1779_v59 = vpack.c.bf16 %v1761_v3, %v1760_v53  ;;  %v1560_v31 = vadd.f32 %v1528_v27, %v1460_v62  ;;  %v1130_v41 = vmul.f32 %v1392_v50, %v2806_v9  ;;  %v1494_v50 = vld [vmem:[#allocation2 + $0x1a1] sm:$0xff] }
 0x18f   : > { %v1062_v44 = vadd.f32 %v1030_v28, %v962_v40  ;;  %v1659_v5 = vadd.f32 %v1627_v24, %v1559_v37  ;;  %v1229_v30 = vmul.f32 %v1491_v63, %v2808_v10  ;;  %v1230_v46 = vmul.f32 %v1492_v54, %v2808_v10  ;;  %v1594_v54 = vld [vmem:[#allocation2 + $0x1a2] sm:$0xff] }
 0x190   : > { %v1161_v57 = vadd.f32 %v1129_v56, %v1061_v2  ;;  %2512 = vmatmul.mubr.msk.bf16.gmra.mxu1 %vm280_vm0, %v1779_v59  ;;  %v1660_v48 = vadd.f32 %v1628_v12, %v1560_v31  ;;  %v1329_v15 = vmul.f32 %v1591_v19, %v2814_v18  ;;  %v1429_v9 = vmul.f32 %v2804_v7, %v1393_v20 }
 0x191   : > { %v1162_v6 = vadd.f32 %v1130_v41, %v1062_v44  ;;  %v1698_v58 = vadd.f32 %v3410_v42, %v1659_v5  ;;  %v1330_v63 = vmul.f32 %v1592_v17, %v2814_v18  ;;  %v1430_v26 = vmul.f32 %v2804_v7, %v1394_v47 }
 0x192   : > { %v1261_v1 = vadd.f32 %v1229_v30, %v1161_v57  ;;  %v1699_v61 = vadd.f32 %v3410_v42, %v1660_v48  ;;  %v1529_v10 = vmul.f32 %v2810_v11, %v1493_v23  ;;  %v1530_v4 = vmul.f32 %v2810_v11, %v1494_v50 }
 0x193   : > { %v1262_v22 = vadd.f32 %v1230_v46, %v1162_v6  ;;  %v1730_v32 = vmax.f32 %v1698_v58, 0.0  ;;  %v1629_v55 = vmul.f32 %v3318_v51, %v1593_v33  ;;  %v1630_v18 = vmul.f32 %v3318_v51, %v1594_v54  ;;  %v3613_v51 = vld [vmem:[%s3727_s6] ss:$0 sm:$0xff] }
 0x194   : > { %v1361_v52 = vadd.f32 %v1329_v15, %v1261_v1  ;;  %v1731_v0 = vmax.f32 %v1699_v61, 0.0 }
 0x195   : > { %v1362_v43 = vadd.f32 %v1330_v63, %v1262_v22  ;;  %v1762_v8 = vmin.f32 %v1730_v32, 6.0 }
 0x196   : > { %v1461_v38 = vadd.f32 %v1429_v9, %v1361_v52  ;;  %v1763_v34 = vmin.f32 %v1731_v0, 6.0 }
 0x197   : > { %v1462_v16 = vadd.f32 %v1430_v26, %v1362_v43 }
 0x198   : > { %v1561_v27 = vadd.f32 %v1529_v10, %v1461_v38  ;;  %v1780_v7 = vpack.c.bf16 %v1763_v34, %v1762_v8 }
 0x199   : > { %v1562_v19 = vadd.f32 %v1530_v4, %v1462_v16 }
 0x19a   : > { %v1661_v29 = vadd.f32 %v1629_v55, %v1561_v27  ;;  %2515 = vmatprep.mubr.msk.bf16.mxu1 %vm280_vm0, %v1780_v7 }
 0x19b   : > { %v1662_v60 = vadd.f32 %v1630_v18, %v1562_v19 }
 0x19c   : > { %v1700_v21 = vadd.f32 %v3410_v42, %v1661_v29 }
 0x19d   : > { %v1701_v36 = vadd.f32 %v3410_v42, %v1662_v60 }
 0x19e   : > { %v1732_v11 = vmax.f32 %v1700_v21, 0.0 }
 0x19f   : > { %v1733_v13 = vmax.f32 %v1701_v36, 0.0 }
 0x1a0   : > { %v1764_v14 = vmin.f32 %v1732_v11, 6.0 }
 0x1a1   : > { %v1765_v35 = vmin.f32 %v1733_v13, 6.0 }
 0x1a3   : > { %v1781_v17 = vpack.c.bf16 %v1765_v35, %v1764_v14 }
 0x1a5   : > { %2516 = vmatmul.mubr.msk.bf16.gmra.mxu1 %vm280_vm0, %v1781_v17 }
 0x1c8   : > { %v2489_v39 = vpop.f32.mrf.mxu1 }
 0x1c9   : > { %v1885_v45 = vadd.f32 %v2489_v39, %v3613_v51 }
 0x1ca   : > { %v1876_v53 = vpop.f32.mrf.mxu1 }
 0x1cb   : > { %v2005_v49 = vmax.f32 %v1885_v45, 0.0  ;;  %v1877_v42 = vadd.f32 %v3613_v51, %v1876_v53 }
 0x1cc   : > { %v2490_v24 = vpop.f32.mrf.mxu1 }
 0x1cd   : > { %v2037_v25 = vmin.f32 %v2005_v49, 6.0  ;;  %v2003_v3 = vmax.f32 %v1877_v42, 0.0  ;;  %v1888_v62 = vadd.f32 %v2490_v24, %v3613_v51 }
 0x1ce   : > { %v1879_v40 = vpop.f32.mrf.mxu1 }
 0x1cf   : > { %v2384_v28 = vpack.c.bf16 %v2037_v25, %v2037_v25  ;;  %v2035_v37 = vmin.f32 %v2003_v3, 6.0  ;;  %v2006_v12 = vmax.f32 %v1888_v62, 0.0  ;;  %v1880_v2 = vadd.f32 %v3613_v51, %v1879_v40 }
 0x1d1   : > { %2198 = vst.msk [vmem:[%s3623_s9 + $0x8] sm:$0xf] %vm2195_vm4, %v2384_v28  ;;  %v2382_v56 = vpack.c.bf16 %v2035_v37, %v2035_v37  ;;  %v2038_v59 = vmin.f32 %v2006_v12, 6.0  ;;  %v2004_v31 = vmax.f32 %v1880_v2, 0.0 }
 0x1d3   : > { %2196 = vst.msk [vmem:[%s3623_s9] sm:$0xf] %vm2195_vm4, %v2382_v56  ;;  %v2385_v44 = vpack.c.bf16 %v2038_v59, %v2038_v59  ;;  %v2036_v41 = vmin.f32 %v2004_v31, 6.0 }
 0x1d5   : > { %2199 = vst.msk [vmem:[%s3623_s9 + $0xc] sm:$0xf] %vm2195_vm4, %v2385_v44  ;;  %v2383_v20 = vpack.c.bf16 %v2036_v41, %v2036_v41 }
 0x1d7   : > { %2197 = vst.msk [vmem:[%s3623_s9 + $0x4] sm:$0xf] %vm2195_vm4, %v2383_v20 }
 0x1e7   : > { %v2493_v5 = vpop.f32.mrf.mxu1 }
 0x1e8   : > { %v1901_v57 = vadd.f32 %v2493_v5, %v3613_v51 }
 0x1e9   : > { %v1892_v30 = vpop.f32.mrf.mxu1 }
 0x1ea   : > { %v2009_v47 = vmax.f32 %v1901_v57, 0.0  ;;  %v1893_v48 = vadd.f32 %v3613_v51, %v1892_v30 }
 0x1eb   : > { %v2494_v6 = vpop.f32.mrf.mxu1 }
 0x1ec   : > { %v2041_v46 = vmin.f32 %v2009_v47, 6.0  ;;  %v2007_v23 = vmax.f32 %v1893_v48, 0.0  ;;  %v1904_v58 = vadd.f32 %v2494_v6, %v3613_v51 }
 0x1ed   : > { %v1895_v1 = vpop.f32.mrf.mxu1 }
 0x1ee   : > { %v2388_v15 = vpack.c.bf16 %v2041_v46, %v2041_v46  ;;  %v2039_v9 = vmin.f32 %v2007_v23, 6.0  ;;  %v2010_v50 = vmax.f32 %v1904_v58, 0.0  ;;  %v1896_v61 = vadd.f32 %v3613_v51, %v1895_v1 }
 0x1f0   : > { %2202 = vst.msk [vmem:[%s3623_s9 + $0x18] sm:$0xf] %vm2195_vm4, %v2388_v15  ;;  %v2386_v22 = vpack.c.bf16 %v2039_v9, %v2039_v9  ;;  %v2042_v63 = vmin.f32 %v2010_v50, 6.0  ;;  %v2008_v26 = vmax.f32 %v1896_v61, 0.0 }
 0x1f2   : > { %2200 = vst.msk [vmem:[%s3623_s9 + $0x10] sm:$0xf] %vm2195_vm4, %v2386_v22  ;;  %v2389_v33 = vpack.c.bf16 %v2042_v63, %v2042_v63  ;;  %v2040_v32 = vmin.f32 %v2008_v26, 6.0 }
 0x1f4   : > { %2203 = vst.msk [vmem:[%s3623_s9 + $0x1c] sm:$0xf] %vm2195_vm4, %v2389_v33  ;;  %v2387_v52 = vpack.c.bf16 %v2040_v32, %v2040_v32 }
 0x1f6   : > { %2201 = vst.msk [vmem:[%s3623_s9 + $0x14] sm:$0xf] %vm2195_vm4, %v2387_v52 }
 0x1ff   : > { %v2497_v10 = vpop.f32.mrf.mxu1 }
 0x200   : > { %v1917_v54 = vadd.f32 %v2497_v10, %v3613_v51 }
 0x201   : > { %v1908_v0 = vpop.f32.mrf.mxu1 }
 0x202   : > { %v2013_v43 = vmax.f32 %v1917_v54, 0.0  ;;  %v1909_v4 = vadd.f32 %v3613_v51, %v1908_v0 }
 0x203   : > { %v2498_v38 = vpop.f32.mrf.mxu1 }
 0x204   : > { %v2045_v55 = vmin.f32 %v2013_v43, 6.0  ;;  %v2011_v8 = vmax.f32 %v1909_v4, 0.0  ;;  %v1920_v34 = vadd.f32 %v2498_v38, %v3613_v51 }
 0x205   : > { %v1911_v16 = vpop.f32.mrf.mxu1 }
 0x206   : > { %v2392_v18 = vpack.c.bf16 %v2045_v55, %v2045_v55  ;;  %v2043_v27 = vmin.f32 %v2011_v8, 6.0  ;;  %v2014_v7 = vmax.f32 %v1920_v34, 0.0  ;;  %v1912_v19 = vadd.f32 %v3613_v51, %v1911_v16 }
 0x208   : > { %2206 = vst.msk [vmem:[%s3623_s9 + $0x28] sm:$0xf] %vm2195_vm4, %v2392_v18  ;;  %v2390_v29 = vpack.c.bf16 %v2043_v27, %v2043_v27  ;;  %v2046_v60 = vmin.f32 %v2014_v7, 6.0  ;;  %v2012_v21 = vmax.f32 %v1912_v19, 0.0 }
 0x20a   : > { %2204 = vst.msk [vmem:[%s3623_s9 + $0x20] sm:$0xf] %vm2195_vm4, %v2390_v29  ;;  %v2393_v36 = vpack.c.bf16 %v2046_v60, %v2046_v60  ;;  %v2044_v11 = vmin.f32 %v2012_v21, 6.0 }
 0x20c   : > { %2207 = vst.msk [vmem:[%s3623_s9 + $0x2c] sm:$0xf] %vm2195_vm4, %v2393_v36  ;;  %v2391_v13 = vpack.c.bf16 %v2044_v11, %v2044_v11 }
 0x20e   : > { %2205 = vst.msk [vmem:[%s3623_s9 + $0x24] sm:$0xf] %vm2195_vm4, %v2391_v13 }
 0x212   : > { %v2501_v14 = vpop.f32.mrf.mxu1 }
 0x213   : > { %v1933_v35 = vadd.f32 %v2501_v14, %v3613_v51 }
 0x214   : > { %v1924_v17 = vpop.f32.mrf.mxu1 }
 0x215   : > { %v2017_v39 = vmax.f32 %v1933_v35, 0.0  ;;  %v1925_v45 = vadd.f32 %v3613_v51, %v1924_v17 }
 0x216   : > { %v2502_v53 = vpop.f32.mrf.mxu1 }
 0x217   : > { %v2049_v49 = vmin.f32 %v2017_v39, 6.0  ;;  %v2015_v42 = vmax.f32 %v1925_v45, 0.0  ;;  %v1936_v24 = vadd.f32 %v2502_v53, %v3613_v51 }
 0x218   : > { %v1927_v25 = vpop.f32.mrf.mxu1 }
 0x219   : > { %v2396_v3 = vpack.c.bf16 %v2049_v49, %v2049_v49  ;;  %v2047_v62 = vmin.f32 %v2015_v42, 6.0  ;;  %v2018_v40 = vmax.f32 %v1936_v24, 0.0  ;;  %v1928_v28 = vadd.f32 %v3613_v51, %v1927_v25 }
 0x21b   : > { %2210 = vst.msk [vmem:[%s3623_s9 + $0x38] sm:$0xf] %vm2195_vm4, %v2396_v3  ;;  %v2394_v37 = vpack.c.bf16 %v2047_v62, %v2047_v62  ;;  %v2050_v12 = vmin.f32 %v2018_v40, 6.0  ;;  %v2016_v2 = vmax.f32 %v1928_v28, 0.0 }
 0x21d   : > { %2208 = vst.msk [vmem:[%s3623_s9 + $0x30] sm:$0xf] %vm2195_vm4, %v2394_v37  ;;  %v2397_v56 = vpack.c.bf16 %v2050_v12, %v2050_v12  ;;  %v2048_v59 = vmin.f32 %v2016_v2, 6.0 }
 0x21f   : > { %2211 = vst.msk [vmem:[%s3623_s9 + $0x3c] sm:$0xf] %vm2195_vm4, %v2397_v56  ;;  %v2395_v31 = vpack.c.bf16 %v2048_v59, %v2048_v59 }
 0x221   : > { %2209 = vst.msk [vmem:[%s3623_s9 + $0x34] sm:$0xf] %vm2195_vm4, %v2395_v31 }
 0x227   : > { %v2505_v44 = vpop.f32.mrf.mxu1 }
 0x228   : > { %v1949_v41 = vadd.f32 %v2505_v44, %v3613_v51 }
 0x229   : > { %v1940_v20 = vpop.f32.mrf.mxu1 }
 0x22a   : > { %v2021_v5 = vmax.f32 %v1949_v41, 0.0  ;;  %v1941_v57 = vadd.f32 %v3613_v51, %v1940_v20 }
 0x22b   : > { %v2506_v30 = vpop.f32.mrf.mxu1 }
 0x22c   : > { %v2053_v47 = vmin.f32 %v2021_v5, 6.0  ;;  %v2019_v48 = vmax.f32 %v1941_v57, 0.0  ;;  %v1952_v6 = vadd.f32 %v2506_v30, %v3613_v51 }
 0x22d   : > { %v1943_v46 = vpop.f32.mrf.mxu1 }
 0x22e   : > { %v2400_v23 = vpack.c.bf16 %v2053_v47, %v2053_v47  ;;  %v2051_v58 = vmin.f32 %v2019_v48, 6.0  ;;  %v2022_v1 = vmax.f32 %v1952_v6, 0.0  ;;  %v1944_v15 = vadd.f32 %v3613_v51, %v1943_v46 }
 0x230   : > { %2214 = vst.msk [vmem:[%s3623_s9 + $0x48] sm:$0xf] %vm2195_vm4, %v2400_v23  ;;  %v2398_v9 = vpack.c.bf16 %v2051_v58, %v2051_v58  ;;  %v2054_v50 = vmin.f32 %v2022_v1, 6.0  ;;  %v2020_v61 = vmax.f32 %v1944_v15, 0.0 }
 0x232   : > { %2212 = vst.msk [vmem:[%s3623_s9 + $0x40] sm:$0xf] %vm2195_vm4, %v2398_v9  ;;  %v2401_v22 = vpack.c.bf16 %v2054_v50, %v2054_v50  ;;  %v2052_v63 = vmin.f32 %v2020_v61, 6.0 }
 0x234   : > { %2215 = vst.msk [vmem:[%s3623_s9 + $0x4c] sm:$0xf] %vm2195_vm4, %v2401_v22  ;;  %v2399_v26 = vpack.c.bf16 %v2052_v63, %v2052_v63 }
 0x236   : > { %2213 = vst.msk [vmem:[%s3623_s9 + $0x44] sm:$0xf] %vm2195_vm4, %v2399_v26 }
 0x23c   : > { %v2509_v33 = vpop.f32.mrf.mxu1 }
 0x23d   : > { %v1965_v32 = vadd.f32 %v2509_v33, %v3613_v51 }
 0x23e   : > { %v1956_v52 = vpop.f32.mrf.mxu1 }
 0x23f   : > { %v2025_v10 = vmax.f32 %v1965_v32, 0.0  ;;  %v1957_v54 = vadd.f32 %v3613_v51, %v1956_v52 }
 0x240   : > { %v2510_v0 = vpop.f32.mrf.mxu1 }
 0x241   : > { %v2057_v43 = vmin.f32 %v2025_v10, 6.0  ;;  %v2023_v4 = vmax.f32 %v1957_v54, 0.0  ;;  %v1968_v38 = vadd.f32 %v2510_v0, %v3613_v51 }
 0x242   : > { %v1959_v55 = vpop.f32.mrf.mxu1 }
 0x243   : > { %v2404_v8 = vpack.c.bf16 %v2057_v43, %v2057_v43  ;;  %v2055_v34 = vmin.f32 %v2023_v4, 6.0  ;;  %v2026_v16 = vmax.f32 %v1968_v38, 0.0  ;;  %v1960_v18 = vadd.f32 %v3613_v51, %v1959_v55 }
 0x245   : > { %2218 = vst.msk [vmem:[%s3623_s9 + $0x58] sm:$0xf] %vm2195_vm4, %v2404_v8  ;;  %v2402_v27 = vpack.c.bf16 %v2055_v34, %v2055_v34  ;;  %v2058_v7 = vmin.f32 %v2026_v16, 6.0  ;;  %v2024_v19 = vmax.f32 %v1960_v18, 0.0 }
 0x247   : > { %2216 = vst.msk [vmem:[%s3623_s9 + $0x50] sm:$0xf] %vm2195_vm4, %v2402_v27  ;;  %v2405_v29 = vpack.c.bf16 %v2058_v7, %v2058_v7  ;;  %v2056_v60 = vmin.f32 %v2024_v19, 6.0 }
 0x249   : > { %2219 = vst.msk [vmem:[%s3623_s9 + $0x5c] sm:$0xf] %vm2195_vm4, %v2405_v29  ;;  %v2403_v21 = vpack.c.bf16 %v2056_v60, %v2056_v60 }
 0x24b   : > { %2217 = vst.msk [vmem:[%s3623_s9 + $0x54] sm:$0xf] %vm2195_vm4, %v2403_v21 }
 0x250   : > { %v2513_v36 = vpop.f32.mrf.mxu1 }
 0x251   : > { %v1981_v11 = vadd.f32 %v2513_v36, %v3613_v51 }
 0x252   : > { %v1972_v13 = vpop.f32.mrf.mxu1 }
 0x253   : > { %v2029_v14 = vmax.f32 %v1981_v11, 0.0  ;;  %v1973_v35 = vadd.f32 %v3613_v51, %v1972_v13 }
 0x254   : > { %v2514_v17 = vpop.f32.mrf.mxu1 }
 0x255   : > { %v2061_v39 = vmin.f32 %v2029_v14, 6.0  ;;  %v2027_v45 = vmax.f32 %v1973_v35, 0.0  ;;  %v1984_v53 = vadd.f32 %v2514_v17, %v3613_v51 }
 0x256   : > { %v1975_v49 = vpop.f32.mrf.mxu1 }
 0x257   : > { %v2408_v42 = vpack.c.bf16 %v2061_v39, %v2061_v39  ;;  %v2059_v24 = vmin.f32 %v2027_v45, 6.0  ;;  %v2030_v25 = vmax.f32 %v1984_v53, 0.0  ;;  %v1976_v3 = vadd.f32 %v3613_v51, %v1975_v49 }
 0x259   : > { %2222 = vst.msk [vmem:[%s3623_s9 + $0x68] sm:$0xf] %vm2195_vm4, %v2408_v42  ;;  %v2406_v62 = vpack.c.bf16 %v2059_v24, %v2059_v24  ;;  %v2062_v40 = vmin.f32 %v2030_v25, 6.0  ;;  %v2028_v28 = vmax.f32 %v1976_v3, 0.0 }
 0x25b   : > { %2220 = vst.msk [vmem:[%s3623_s9 + $0x60] sm:$0xf] %vm2195_vm4, %v2406_v62  ;;  %v2409_v37 = vpack.c.bf16 %v2062_v40, %v2062_v40  ;;  %v2060_v12 = vmin.f32 %v2028_v28, 6.0 }
 0x25d   : > { %2223 = vst.msk [vmem:[%s3623_s9 + $0x6c] sm:$0xf] %vm2195_vm4, %v2409_v37  ;;  %v2407_v2 = vpack.c.bf16 %v2060_v12, %v2060_v12 }
 0x25f   : > { %2221 = vst.msk [vmem:[%s3623_s9 + $0x64] sm:$0xf] %vm2195_vm4, %v2407_v2 }
 0x265   : > { %v2517_v56 = vpop.f32.mrf.mxu1 }
 0x266   : > { %v1997_v59 = vadd.f32 %v2517_v56, %v3613_v51 }
 0x267   : > { %v1988_v31 = vpop.f32.mrf.mxu1 }
 0x268   : > { %v2033_v44 = vmax.f32 %v1997_v59, 0.0  ;;  %v1989_v41 = vadd.f32 %v3613_v51, %v1988_v31 }
 0x269   : > { %v2518_v20 = vpop.f32.mrf.mxu1 }
 0x26a   : > { %v2065_v5 = vmin.f32 %v2033_v44, 6.0  ;;  %v2031_v57 = vmax.f32 %v1989_v41, 0.0  ;;  %v2000_v30 = vadd.f32 %v2518_v20, %v3613_v51 }
 0x26b   : > { %v1991_v47 = vpop.f32.mrf.mxu1 }
 0x26c   : > { %v2412_v48 = vpack.c.bf16 %v2065_v5, %v2065_v5  ;;  %v2063_v6 = vmin.f32 %v2031_v57, 6.0  ;;  %v2034_v46 = vmax.f32 %v2000_v30, 0.0  ;;  %v1992_v23 = vadd.f32 %v3613_v51, %v1991_v47 }
 0x26e   : > { %2226 = vst.msk [vmem:[%s3623_s9 + $0x78] sm:$0xf] %vm2195_vm4, %v2412_v48  ;;  %v2410_v58 = vpack.c.bf16 %v2063_v6, %v2063_v6  ;;  %v2066_v1 = vmin.f32 %v2034_v46, 6.0  ;;  %v2032_v15 = vmax.f32 %v1992_v23, 0.0 }
 0x270   : > { %2224 = vst.msk [vmem:[%s3623_s9 + $0x70] sm:$0xf] %vm2195_vm4, %v2410_v58  ;;  %v2413_v9 = vpack.c.bf16 %v2066_v1, %v2066_v1  ;;  %v2064_v50 = vmin.f32 %v2032_v15, 6.0 }
 0x272   : > { %2227 = vst.msk [vmem:[%s3623_s9 + $0x7c] sm:$0xf] %vm2195_vm4, %v2413_v9  ;;  %v2411_v61 = vpack.c.bf16 %v2064_v50, %v2064_v50 }
 0x274   : > { %2225 = vst.msk [vmem:[%s3623_s9 + $0x74] sm:$0xf] %vm2195_vm4, %v2411_v61 }
 0x275 PF: > { %s17_s24 = sadd.s32 1, %s2555_s24  }
 0x276   : > { %p14_p4 = scmp.ge.s32.totalorder %s17_s24, 4  }
 0x278   :  { %16 = sbr.rel (!%p14_p4) target bundleno = 1 (0x1), region = 94 }

// kernel: _lambda_.7
= control target key start
LH: loop header
LB: loop body
LE: loop exit
PB: predicated region body
PF: predicated region fallthrough
CT: control target
= control target key end

     0   :  { %s1315_s30 = smov 0   ;;  %s1317_s10 = smov 0   ;;  %s1542_s0 = inlined_call_operand.vmem [shape: bf16[4,2,5,5,32], index: 0, kind: input, shape index: {}]   ;;  %s1543_s1 = inlined_call_operand.vmem [shape: f32[9,32], index: 1, kind: input, shape index: {}]   ;;  %s1544_s2 = inlined_call_operand.vmem [shape: f32[1,32], index: 2, kind: input, shape index: {}]   ;;  %s1545_s3 = inlined_call_operand.vmem [shape: bf16[32,64], index: 3, kind: input, shape index: {}]   ;;  %s1546_s4 = inlined_call_operand.vmem [shape: f32[1,64], index: 4, kind: input, shape index: {}, may-alias: {4,6,8}]   ;;  %s1547_s5 = inlined_call_operand.vmem [shape: f32[9,64], index: 5, kind: input, shape index: {}]   ;;  %s1548_s6 = inlined_call_operand.vmem [shape: f32[1,64], index: 6, kind: input, shape index: {}, may-alias: {4,6,8}]   ;;  %s1549_s7 = inlined_call_operand.vmem [shape: bf16[64,64], index: 7, kind: input, shape index: {}]   ;;  %s1550_s8 = inlined_call_operand.vmem [shape: f32[1,64], index: 8, kind: input, shape index: {}, may-alias: {4,6,8}]   ;;  %s1551_s9 = inlined_call_operand.vmem [shape: bf16[2,16,64], index: 9, kind: output, shape index: {}]  }
   0x1   :  { %s1319_s11 = smov 0  }
   0x2 LB: > { %s1119_s12 = sadd.s32 4294967295, %s1261_s11   ;;  %s1332_s13 = sadd.s32 1, %s1261_s11   ;;  %s1261_s11 = sphi %s1319_s11, %s1554_s11   ;;  %s1257_s10 = sphi %s1317_s10, %s1553_s10   ;;  %s1253_s30 = sphi %s1315_s30, %s1552_s30  }
   0x3   : > { %s23_s14 = ssub.s32 %s1261_s11, %s1332_s13  ;;  %s26_s15 = sadd.s32 1, %s1257_s10 }
   0x4   : > { %p24_p0 = scmp.eq.s32.totalorder %s23_s14, 0  ;;  %p33_p1 = scmp.ne.s32.totalorder %s1257_s10, %s1253_s30 }
   0x5   : > { %p34_p2 = scmp.eq.s32.totalorder %s1261_s11, 0  ;;  %p1122_p4 = scmp.ge.s32.totalorder %s1261_s11, 2 }
   0x6   : > { %s1341_s16 = scalar_select %p24_p0, %s1257_s10, %s26_s15  }
   0x7   : > { %p35_p3 = por %p34_p2, %p33_p1  ;;  %277 = sbr.rel (%p1122_p4) target bundleno = 23 (0x17), region = 48 }
   0xc   : > { %280 = sbr.rel (!%p35_p3) target bundleno = 23 (0x17), region = 52  ;;  %s282_s17 = sand.u32 (%p35_p3), 1, %s1257_s10  }
   0xd   : > { %s1205_s18 = smul.u32 (%p35_p3), 20, %s1261_s11 }
   0xe   : > { %s1204_s19 = smul.u32 (%p35_p3), 80, %s282_s17 }
   0xf   : > { %s287_s22 = scalar_lea.vmem (%p35_p3), %s1542_s0, %s1205_s18 }
  0x10   : > { %v304_v0 = vld [vmem:[%s287_s22] sm:$0xff] (%p35_p3)   ;;  %v308_v1 = vld [vmem:[%s287_s22 + $0x8] sm:$0xff] (%p35_p3)   ;;  %v312_v2 = vld [vmem:[%s287_s22 + $0x10] sm:$0xf] (%p35_p3)  ;;  %s284_s23 = scalar_lea.vmem (%p35_p3), [#allocation3], %s1204_s19 }
  0x11   : > { %305 = vst [vmem:[%s284_s23] sm:$0xff] %v304_v0   ;;  %309 = vst [vmem:[%s284_s23 + $0x8] sm:$0xff] %v308_v1   ;;  %v314_v3 = vld [vmem:[%s287_s22 + $0x28] sm:$0xff]   ;;  %v318_v4 = vld [vmem:[%s287_s22 + $0x30] sm:$0xff]  }
  0x12   : > { %313 = vst [vmem:[%s284_s23 + $0x10] sm:$0xf] %v312_v2  ;;  %v322_v5 = vld [vmem:[%s287_s22 + $0x38] sm:$0xf]  ;;  %315 = vst [vmem:[%s284_s23 + $0x14] sm:$0xff] %v314_v3   ;;  %v324_v6 = vld [vmem:[%s287_s22 + $0x50] sm:$0xff]  }
  0x13   : > { %319 = vst [vmem:[%s284_s23 + $0x1c] sm:$0xff] %v318_v4   ;;  %323 = vst [vmem:[%s284_s23 + $0x24] sm:$0xf] %v322_v5  ;;  %v328_v7 = vld [vmem:[%s287_s22 + $0x58] sm:$0xff]   ;;  %v332_v8 = vld [vmem:[%s287_s22 + $0x60] sm:$0xf] }
  0x14   : > { %325 = vst [vmem:[%s284_s23 + $0x28] sm:$0xff] %v324_v6   ;;  %329 = vst [vmem:[%s284_s23 + $0x30] sm:$0xff] %v328_v7   ;;  %v334_v9 = vld [vmem:[%s287_s22 + $0x78] sm:$0xff]   ;;  %v338_v10 = vld [vmem:[%s287_s22 + $0x80] sm:$0xff]  }
  0x15   : > { %333 = vst [vmem:[%s284_s23 + $0x38] sm:$0xf] %v332_v8  ;;  %v342_v11 = vld [vmem:[%s287_s22 + $0x88] sm:$0xf]  ;;  %335 = vst [vmem:[%s284_s23 + $0x3c] sm:$0xff] %v334_v9  }
  0x16   : > { %339 = vst [vmem:[%s284_s23 + $0x44] sm:$0xff] %v338_v10   ;;  %343 = vst [vmem:[%s284_s23 + $0x4c] sm:$0xf] %v342_v11 }
  0x17 PF: > { %p1124_p5 = scmp.ge.s32.totalorder %s1261_s11, 1  ;;  %p406_p6 = scmp.lt.s32.totalorder %s1261_s11, 3 }
  0x19   : > { %p407_p7 = pnand %p1124_p5, %p406_p6 }
  0x1a   : > { %s413_s28 = sand.u32 (!%p407_p7), 1, %s1253_s30   ;;  %p448_p8 = scmp.lt.s32.totalorder (!%p407_p7), %s1119_s12, 1 }
  0x1b   : > { %410 = sbr.rel (%p407_p7) target bundleno = 528 (0x210), region = 93 }
  0x1c   : > { %s1206_s29 = smul.u32 (!%p407_p7), 80, %s413_s28 }
  0x1e   : > { %s1384_s30 = scalar_lea.vmem (!%p407_p7), [#allocation3], %s1206_s29 }
  0x20   : > { %v1233_v12 = vld [vmem:[%s1545_s3 + $0x8] sm:$0xff]   ;;  %v471_v13 = vlaneseq  ;;  %v1263_v14 = vmov 0.0   ;;  %v1234_v15 = vld [vmem:[%s1545_s3] sm:$0xff]   ;;  %vm1264_vm0 = vmmov 0   ;;  %vm454_vm1 = vcmask 521216   ;;  %s1556_s12 = smov (!%p448_p8, %s1119_s12), 1 }
  0x21   : > { %1184 = vmatprep.subr.bf16.mxu0 %v1263_v14  ;;  %1192 = vmatprep.subr.bf16.mxu1 %v1263_v14  ;;  %v1367_v17 = vld [vmem:[%s1543_s1] sm:$0xff]  ;;  %455 = vst.msk [vmem:[#allocation2] sm:$0x3f] %vm454_vm1, %v1263_v14  ;;  %456 = vst.msk [vmem:[#allocation2 + $0x8] sm:$0x3f] %vm454_vm1, %v1263_v14  ;;  %vm731_vm2 = vcmask 261120  }
  0x22   : > { %1185 = vmatpush3.bf16.msra.mxu0 %v1233_v12  ;;  %1188 = vmatprep.mubr.msk.bf16.mxu0 %vm1264_vm0, %v1263_v14  ;;  %v1361_v16 = vshrl.u32 %v471_v13, 7  ;;  %457 = vst.msk [vmem:[#allocation2 + $0x10] sm:$0x3f] %vm454_vm1, %v1263_v14  ;;  %460 = vst.msk [vmem:[#allocation2 + $0x28] sm:$0x3f] %vm454_vm1, %v1263_v14  ;;  %vm781_vm3 = vcmask 519168  }
  0x23   : > { %1186 = vmatprep.subr.bf16.mxu0 %v1263_v14  ;;  %1200 = vmatprep.mubr.msk.bf16.mxu1 %vm1264_vm0, %v1263_v14  ;;  %458 = vst.msk [vmem:[#allocation2 + $0x18] sm:$0x3f] %vm454_vm1, %v1263_v14  ;;  %459 = vst.msk [vmem:[#allocation2 + $0x20] sm:$0x3f] %vm454_vm1, %v1263_v14  ;;  %v463_v26 = vld [vmem:[%s1384_s30] sm:$0x3] }
  0x24   : > { %v473_v18 = vsub.s32 0, %v1361_v16  ;;  %v490_v19 = vsub.s32 1, %v1361_v16  ;;  %v510_v20 = vsub.s32 2, %v1361_v16  ;;  %v543_v21 = vsub.s32 3, %v1361_v16  ;;  %v464_v27 = vld [vmem:[%s1384_s30 + $0x4] sm:$0x3] }
  0x25   : > { %v564_v22 = vsub.s32 4, %v1361_v16  ;;  %v584_v23 = vsub.s32 5, %v1361_v16  ;;  %v617_v24 = vsub.s32 6, %v1361_v16  ;;  %v638_v25 = vsub.s32 7, %v1361_v16  ;;  %v465_v28 = vld [vmem:[%s1384_s30 + $0x8] sm:$0x3] }
  0x26   : > { %1187 = vmatpush3.bf16.msra.mxu0 %v1234_v15  ;;  %v474_v29 = vrot.slane %v1367_v17, %v473_v18  ;;  %v491_v30 = vrot.slane %v1367_v17, %v490_v19  ;;  %v511_v31 = vrot.slane %v1367_v17, %v510_v20  ;;  %v1401_v32 = vrot.slane %v1367_v17, %v543_v21  ;;  %v466_v33 = vld [vmem:[%s1384_s30 + $0xc] sm:$0x3]  ;;  %v1127_v37 = vld [vmem:[%s1384_s30 + $0x14] sm:$0x3]  ;;  %v1128_v38 = vld [vmem:[%s1384_s30 + $0x18] sm:$0x3] }
  0x27   : > { %v467_v34 = vunpack.c.l.bf16 %v463_v26  ;;  %v468_v35 = vunpack.c.l.bf16 %v464_v27  ;;  %v469_v36 = vunpack.c.l.bf16 %v465_v28  ;;  %v1409_v39 = vrot.slane %v1367_v17, %v564_v22  ;;  %v1129_v41 = vld [vmem:[%s1384_s30 + $0x1c] sm:$0x3]  ;;  %v1130_v42 = vld [vmem:[%s1384_s30 + $0x20] sm:$0x3]  ;;  %v501_v51 = vld [vmem:[%s1384_s30 + $0x4] sm:$0x7] }
  0x28   : > { %v470_v40 = vunpack.c.l.bf16 %v466_v33  ;;  %v484_v43 = vunpack.c.l.bf16 %v1127_v37  ;;  %v485_v44 = vunpack.c.l.bf16 %v1128_v38  ;;  %v500_v45 = vld [vmem:[%s1384_s30] sm:$0x7]  ;;  %v1417_v46 = vrot.slane %v1367_v17, %v584_v23  ;;  %v502_v52 = vld [vmem:[%s1384_s30 + $0x8] sm:$0x7]  ;;  %v503_v53 = vld [vmem:[%s1384_s30 + $0xc] sm:$0x7] }
  0x29   : > { %v475_v47 = vmul.f32 %v474_v29, %v467_v34  ;;  %v476_v48 = vmul.f32 %v474_v29, %v468_v35  ;;  %v477_v49 = vmul.f32 %v474_v29, %v469_v36  ;;  %v486_v50 = vunpack.c.l.bf16 %v1129_v41  ;;  %v1131_v62 = vld [vmem:[%s1384_s30 + $0x28] sm:$0x3]  ;;  %v1132_v63 = vld [vmem:[%s1384_s30 + $0x2c] sm:$0x3]  ;;  %v1133_v4 = vld [vmem:[%s1384_s30 + $0x30] sm:$0x3] }
  0x2a   : > { %v478_v54 = vmul.f32 %v474_v29, %v470_v40  ;;  %v487_v55 = vunpack.c.l.bf16 %v1130_v42  ;;  %v492_v56 = vmul.f32 %v491_v30, %v484_v43  ;;  %v493_v57 = vmul.f32 %v491_v30, %v485_v44  ;;  %v1134_v9 = vld [vmem:[%s1384_s30 + $0x34] sm:$0x3]  ;;  %v1135_v15 = vld [vmem:[%s1384_s30 + $0x3c] sm:$0x3]  ;;  %v1138_v42 = vld [vmem:[%s1384_s30 + $0x48] sm:$0x3] }
  0x2b   : > { %v494_v58 = vmul.f32 %v491_v30, %v486_v50  ;;  %v504_v59 = vunpack.c.l.bf16 %v500_v45  ;;  %v505_v60 = vunpack.c.l.bf16 %v501_v51  ;;  %v506_v61 = vunpack.c.l.bf16 %v502_v52  ;;  %v1139_v43 = vld [vmem:[%s1384_s30 + $0x28] sm:$0x7]  ;;  %v1141_v50 = vld [vmem:[%s1384_s30 + $0x30] sm:$0x7]  ;;  %v1142_v51 = vld [vmem:[%s1384_s30 + $0x34] sm:$0x7] }
  0x2c   : > { %v495_v0 = vmul.f32 %v491_v30, %v487_v55  ;;  %v496_v1 = vadd.f32 %v492_v56, %v475_v47  ;;  %v497_v2 = vadd.f32 %v493_v57, %v476_v48  ;;  %v507_v3 = vunpack.c.l.bf16 %v503_v53  ;;  %v1136_v30 = vld [vmem:[%s1384_s30 + $0x40] sm:$0x3]  ;;  %s1173_s23 = sshll.u32 %s1556_s12, 3 }
  0x2d   : > { %v498_v5 = vadd.f32 %v494_v58, %v477_v49  ;;  %v512_v6 = vmul.f32 %v511_v31, %v504_v59  ;;  %v513_v7 = vmul.f32 %v511_v31, %v505_v60  ;;  %v514_v8 = vmul.f32 %v511_v31, %v506_v61  ;;  %v1140_v49 = vld [vmem:[%s1384_s30 + $0x2c] sm:$0x7]  ;;  %s452_s26 = scalar_lea.vmem %s1551_s9, %s1173_s23 }
  0x2e   : > { %v499_v10 = vadd.f32 %v495_v0, %v478_v54  ;;  %v515_v11 = vmul.f32 %v511_v31, %v507_v3  ;;  %v537_v12 = vunpack.c.l.bf16 %v1131_v62  ;;  %v538_v13 = vunpack.c.l.bf16 %v1132_v63  ;;  %v1137_v31 = vld [vmem:[%s1384_s30 + $0x44] sm:$0x3]  ;;  %v1144_v0 = vld [vmem:[%s1384_s30 + $0x8] sm:$0x3] }
  0x2f   : > { %v520_v26 = vrot.slane %v512_v6, 1  ;;  %v521_v27 = vrot.slane %v513_v7, 1  ;;  %v522_v28 = vrot.slane %v514_v8, 1  ;;  %v539_v29 = vunpack.c.l.bf16 %v1133_v4  ;;  %v1143_v63 = vld [vmem:[%s1384_s30 + $0x4] sm:$0x3] }
  0x30   : > { %v523_v33 = vrot.slane %v515_v11, 1  ;;  %v540_v34 = vunpack.c.l.bf16 %v1134_v9  ;;  %v545_v35 = vmul.f32 %v1401_v32, %v537_v12  ;;  %v546_v36 = vmul.f32 %v1401_v32, %v538_v13  ;;  %v1147_v11 = vld [vmem:[%s1384_s30 + $0x18] sm:$0x3] }
  0x31   : > { %v528_v37 = vadd.f32 %v520_v26, %v496_v1  ;;  %v529_v38 = vadd.f32 %v521_v27, %v497_v2  ;;  %v530_v40 = vadd.f32 %v522_v28, %v498_v5  ;;  %v547_v41 = vmul.f32 %v1401_v32, %v539_v29  ;;  %v1145_v5 = vld [vmem:[%s1384_s30 + $0xc] sm:$0x3]  ;;  %v1148_v26 = vld [vmem:[%s1384_s30 + $0x1c] sm:$0x3] }
  0x32   : > { %v531_v44 = vadd.f32 %v523_v33, %v499_v10  ;;  %v548_v45 = vmul.f32 %v1401_v32, %v540_v34  ;;  %v558_v47 = vunpack.c.l.bf16 %v1135_v15  ;;  %v559_v48 = vunpack.c.l.bf16 %v1136_v30  ;;  %v1146_v10 = vld [vmem:[%s1384_s30 + $0x10] sm:$0x3] }
  0x33   : > { %v549_v52 = vadd.f32 %v545_v35, %v528_v37  ;;  %v550_v53 = vadd.f32 %v546_v36, %v529_v38  ;;  %v551_v54 = vadd.f32 %v547_v41, %v530_v40  ;;  %v560_v55 = vunpack.c.l.bf16 %v1137_v31  ;;  %v1149_v36 = vld [vmem:[%s1384_s30 + $0x20] sm:$0x3]  ;;  %v1150_v31 = vld [vmem:[%s1384_s30 + $0x24] sm:$0x3] }
  0x34   : > { %v552_v56 = vadd.f32 %v548_v45, %v531_v44  ;;  %v561_v57 = vunpack.c.l.bf16 %v1138_v42  ;;  %v566_v58 = vmul.f32 %v1409_v39, %v558_v47  ;;  %v567_v59 = vmul.f32 %v1409_v39, %v559_v48  ;;  %v1151_v42 = vld [vmem:[%s1384_s30 + $0x4] sm:$0x7] }
  0x35   : > { %v568_v32 = vmul.f32 %v1409_v39, %v560_v55  ;;  %v578_v60 = vunpack.c.l.bf16 %v1139_v43  ;;  %v579_v61 = vunpack.c.l.bf16 %v1140_v49  ;;  %v580_v62 = vunpack.c.l.bf16 %v1141_v50  ;;  %v1155_v55 = vld [vmem:[%s1543_s1 + $0x8] ss:$0 sm:$0xff] }
  0x36   : > { %v569_v1 = vmul.f32 %v1409_v39, %v561_v57  ;;  %v570_v2 = vadd.f32 %v566_v58, %v549_v52  ;;  %v571_v3 = vadd.f32 %v567_v59, %v550_v53  ;;  %v581_v4 = vunpack.c.l.bf16 %v1142_v51  ;;  %v1152_v52 = vld [vmem:[%s1384_s30 + $0x8] sm:$0x7]  ;;  %v1153_v53 = vld [vmem:[%s1384_s30 + $0xc] sm:$0x7] }
  0x37   : > { %v572_v6 = vadd.f32 %v568_v32, %v551_v54  ;;  %v586_v7 = vmul.f32 %v1417_v46, %v578_v60  ;;  %v587_v8 = vmul.f32 %v1417_v46, %v579_v61  ;;  %v588_v9 = vmul.f32 %v1417_v46, %v580_v62  ;;  %v1154_v54 = vld [vmem:[%s1384_s30 + $0x10] sm:$0x7] }
  0x38   : > { %v573_v12 = vadd.f32 %v569_v1, %v552_v56  ;;  %v589_v13 = vmul.f32 %v1417_v46, %v581_v4  ;;  %v611_v15 = vunpack.c.l.bf16 %v1143_v63  ;;  %v612_v39 = vunpack.c.l.bf16 %v1144_v0 }
  0x39   : > { %v594_v27 = vrot.slane %v586_v7, 1  ;;  %v595_v28 = vrot.slane %v587_v8, 1  ;;  %v596_v29 = vrot.slane %v588_v9, 1  ;;  %v613_v30 = vunpack.c.l.bf16 %v1145_v5 }
  0x3a   : > { %v597_v33 = vrot.slane %v589_v13, 1  ;;  %v614_v34 = vunpack.c.l.bf16 %v1146_v10  ;;  %v618_v35 = vrot.slane %v1367_v17, %v617_v24  ;;  %v632_v37 = vunpack.c.l.bf16 %v1147_v11 }
  0x3b   : > { %v602_v46 = vadd.f32 %v594_v27, %v570_v2  ;;  %v603_v38 = vadd.f32 %v595_v28, %v571_v3  ;;  %v604_v40 = vadd.f32 %v596_v29, %v572_v6  ;;  %v633_v41 = vunpack.c.l.bf16 %v1148_v26 }
  0x3c   : > { %v605_v43 = vadd.f32 %v597_v33, %v573_v12  ;;  %v619_v44 = vmul.f32 %v618_v35, %v611_v15  ;;  %v620_v45 = vmul.f32 %v618_v35, %v612_v39  ;;  %v621_v47 = vmul.f32 %v618_v35, %v613_v30  ;;  %v1156_v15 = vld [vmem:[%s1544_s2] ss:$0 sm:$0xff] }
  0x3d   : > { %v622_v48 = vmul.f32 %v618_v35, %v614_v34  ;;  %v634_v49 = vunpack.c.l.bf16 %v1149_v36  ;;  %v635_v50 = vunpack.c.l.bf16 %v1150_v31  ;;  %v639_v51 = vrot.slane %v1367_v17, %v638_v25 }
  0x3e   : > { %v623_v56 = vadd.f32 %v619_v44, %v602_v46  ;;  %v624_v57 = vadd.f32 %v620_v45, %v603_v38  ;;  %v625_v58 = vadd.f32 %v621_v47, %v604_v40  ;;  %v652_v59 = vunpack.c.l.bf16 %v1151_v42  ;;  %v1235_v45 = vld [vmem:[%s1549_s7 + $0x18] sm:$0xff]   ;;  %v1236_v47 = vld [vmem:[%s1549_s7 + $0x10] sm:$0xff]  }
  0x3f   : > { %v626_v32 = vadd.f32 %v622_v48, %v605_v43  ;;  %v640_v60 = vmul.f32 %v639_v51, %v632_v37  ;;  %v641_v61 = vmul.f32 %v639_v51, %v633_v41  ;;  %v642_v62 = vmul.f32 %v639_v51, %v634_v49  ;;  %1193 = vmatpush3.bf16.msra.mxu1 %v1235_v45  ;;  %v1237_v48 = vld [vmem:[%s1549_s7 + $0x8] sm:$0xff]   ;;  %v1238_v49 = vld [vmem:[%s1549_s7] sm:$0xff]  }
  0x40   : > { %v643_v63 = vmul.f32 %v639_v51, %v635_v50  ;;  %v653_v0 = vunpack.c.l.bf16 %v1152_v52  ;;  %v654_v1 = vunpack.c.l.bf16 %v1153_v53  ;;  %v655_v2 = vunpack.c.l.bf16 %v1154_v54  ;;  %1194 = vmatprep.subr.bf16.mxu1 %v1263_v14  ;;  %v1157_v50 = vld [vmem:[%s1546_s4] ss:$0 sm:$0xff] }
  0x41   : > { %v644_v17 = vadd.f32 %v640_v60, %v623_v56  ;;  %v645_v3 = vadd.f32 %v641_v61, %v624_v57  ;;  %v646_v4 = vadd.f32 %v642_v62, %v625_v58  ;;  %v660_v5 = vmul.f32 %v1155_v55, %v652_v59  ;;  %v790_v53 = vld [vmem:[%s1547_s5] sm:$0xff] }
  0x42   : > { %v647_v6 = vadd.f32 %v643_v63, %v626_v32  ;;  %v661_v7 = vmul.f32 %v1155_v55, %v653_v0  ;;  %v662_v8 = vmul.f32 %v1155_v55, %v654_v1  ;;  %v663_v9 = vmul.f32 %v1155_v55, %v655_v2  ;;  %v792_v32 = vld [vmem:[#allocation2] sm:$0xf] }
  0x43   : > { %v668_v10 = vrot.slane %v660_v5, 1  ;;  %1195 = vmatpush3.bf16.msra.mxu1 %v1236_v47  ;;  %vm784_vm4 = vcmask 523268   ;;  %v799_v57 = vrot.slane %v790_v53, %v473_v18  ;;  %v804_v60 = vld [vmem:[#allocation2 + $0x1] sm:$0xf]  ;;  %v827_v1 = vrot.slane %v790_v53, %v510_v20 }
  0x44   : > { %v669_v11 = vrot.slane %v661_v7, 1  ;;  %v670_v12 = vrot.slane %v662_v8, 1  ;;  %v671_v13 = vrot.slane %v663_v9, 1  ;;  %1196 = vmatprep.subr.bf16.mxu1 %v1263_v14  ;;  %v820_v18 = vld [vmem:[#allocation2 + $0x2] sm:$0xf]  ;;  %vm999_vm5 = vcmask 523264  }
  0x45   : > { %v676_v39 = vadd.f32 %v668_v10, %v644_v17  ;;  %v800_v63 = vmul.f32 %v799_v57, %v792_v32  ;;  %v828_v17 = vmul.f32 %v827_v1, %v820_v18 }
  0x46   : > { %v677_v26 = vadd.f32 %v669_v11, %v645_v3  ;;  %v678_v27 = vadd.f32 %v670_v12, %v646_v4  ;;  %v679_v28 = vadd.f32 %v671_v13, %v647_v6  ;;  %v843_v3 = vrot.slane %v790_v53, %v543_v21  ;;  %v887_v4 = vld [vmem:[#allocation2 + $0x28] sm:$0xf] }
  0x47   : > { %v687_v29 = vadd.f32 %v1156_v15, %v676_v39  ;;  %1197 = vmatpush3.bf16.msra.mxu1 %v1237_v48  ;;  %v891_v21 = vrot.slane %v790_v53, %v617_v24 }
  0x48   : > { %v688_v30 = vadd.f32 %v1156_v15, %v677_v26  ;;  %v689_v33 = vadd.f32 %v1156_v15, %v678_v27  ;;  %v690_v34 = vadd.f32 %v1156_v15, %v679_v28  ;;  %1198 = vmatprep.subr.bf16.mxu1 %v1263_v14  ;;  %v811_v14 = vrot.slane %v790_v53, %v490_v19 }
  0x49   : > { %v691_v35 = vmax.f32 %v687_v29, 0.0  ;;  %v859_v27 = vrot.slane %v790_v53, %v564_v22  ;;  %v907_v22 = vrot.slane %v790_v53, %v638_v25 }
  0x4a   : > { %v692_v36 = vmax.f32 %v688_v30, 0.0  ;;  %v693_v31 = vmax.f32 %v689_v33, 0.0  ;;  %v694_v37 = vmax.f32 %v690_v34, 0.0  ;;  %v812_v0 = vmul.f32 %v811_v14, %v804_v60 }
  0x4b   : > { %v695_v46 = vmin.f32 %v691_v35, 6.0  ;;  %1199 = vmatpush3.bf16.msra.mxu1 %v1238_v49  ;;  %v875_v35 = vrot.slane %v790_v53, %v584_v23 }
  0x4c   : > { %v696_v38 = vmin.f32 %v692_v36, 6.0  ;;  %v697_v40 = vmin.f32 %v693_v31, 6.0  ;;  %v698_v41 = vmin.f32 %v694_v37, 6.0  ;;  %v816_v19 = vadd.f32 %v812_v0, %v800_v63 }
  0x4e   : > { %v703_v42 = vcombine.low %v695_v46, %v696_v38  ;;  %v704_v43 = vcombine.low %v697_v40, %v698_v41  ;;  %v832_v15 = vadd.f32 %v828_v17, %v816_v19  ;;  %v1509_v40 = vmul.f32 %v891_v21, %v887_v4 }
  0x50   : > { %v707_v44 = vpack.c.bf16 %v704_v43, %v703_v42 }
  0x52   : > { %1189 = vmatmul.mubr.msk.bf16.vlgmr.msra.gmra.mxu0 %vm731_vm2, %v707_v44 }
 0x112   : > { %v769_v51 = vpop.f32.mrf.mxu0 }
 0x113   : > { %v770_v52 = vadd.f32 %v1157_v50, %v769_v51 }
 0x114   : > { %v1190_v54 = vpop.f32.mrf.mxu0 }
 0x115   : > { %v776_v55 = vmax.f32 %v770_v52, 0.0 }
 0x116   : > { %v772_v56 = vpop.f32.mrf.mxu0 }
 0x117   : > { %v778_v58 = vmin.f32 %v776_v55, 6.0  ;;  %v773_v59 = vadd.f32 %v1157_v50, %v772_v56 }
 0x118   : > { %v1191_v61 = vpop.f32.mrf.mxu0 }
 0x119   : > { %782 = vst.msk [vmem:[#allocation2 + $0x9] sm:$0xf] %vm781_vm3, %v778_v58  ;;  %v777_v62 = vmax.f32 %v773_v59, 0.0 }
 0x11a   : > { %785 = vst.msk [vmem:[#allocation2 + $0xd] sm:$0xf0] %vm784_vm4, %v778_v58 }
 0x11b   : > { %v779_v2 = vmin.f32 %v777_v62, 6.0 }
 0x11d   : > { %787 = vst.msk [vmem:[#allocation2 + $0x19] sm:$0xf] %vm781_vm3, %v779_v2 }
 0x11e   : > { %789 = vst.msk [vmem:[#allocation2 + $0x1d] sm:$0xf0] %vm784_vm4, %v779_v2 }
 0x120   : > { %v793_v5 = vld [vmem:[#allocation2 + $0x8] sm:$0xf] }
 0x121   : > { %v794_v6 = vld [vmem:[#allocation2 + $0x10] sm:$0xf]  ;;  %v805_v7 = vld [vmem:[#allocation2 + $0x9] sm:$0xf]  ;;  %v801_v8 = vmul.f32 %v799_v57, %v793_v5 }
 0x122   : > { %v802_v9 = vmul.f32 %v799_v57, %v794_v6  ;;  %v806_v10 = vld [vmem:[#allocation2 + $0x11] sm:$0xf]  ;;  %v813_v11 = vmul.f32 %v811_v14, %v805_v7  ;;  %v821_v20 = vld [vmem:[#allocation2 + $0xa] sm:$0xf]  ;;  %v1161_v7 = vld [vmem:[%s1547_s5 + $0x8] ss:$0 sm:$0xff] }
 0x123   : > { %v822_v12 = vld [vmem:[#allocation2 + $0x12] sm:$0xf]  ;;  %v814_v13 = vmul.f32 %v811_v14, %v806_v10  ;;  %v836_v39 = vld [vmem:[#allocation2 + $0x8] sm:$0xf]  ;;  %v829_v29 = vmul.f32 %v827_v1, %v821_v20 }
 0x124   : > { %v837_v26 = vld [vmem:[#allocation2 + $0x10] sm:$0xf]  ;;  %v817_v28 = vadd.f32 %v813_v11, %v801_v8  ;;  %v844_v30 = vmul.f32 %v843_v3, %v836_v39  ;;  %v852_v33 = vld [vmem:[#allocation2 + $0x9] sm:$0xf]  ;;  %v795_v36 = vld [vmem:[#allocation2 + $0x18] sm:$0xf]  ;;  %v830_v38 = vmul.f32 %v827_v1, %v822_v12 }
 0x125   : > { %v853_v34 = vld [vmem:[#allocation2 + $0x11] sm:$0xf]  ;;  %v807_v31 = vld [vmem:[#allocation2 + $0x19] sm:$0xf]  ;;  %v818_v37 = vadd.f32 %v814_v13, %v802_v9  ;;  %v803_v41 = vmul.f32 %v799_v57, %v795_v36  ;;  %v845_v44 = vmul.f32 %v843_v3, %v837_v26  ;;  %v868_v47 = vld [vmem:[#allocation2 + $0xa] sm:$0xf]  ;;  %v860_v51 = vmul.f32 %v859_v27, %v852_v33 }
 0x126   : > { %v823_v46 = vld [vmem:[#allocation2 + $0x1a] sm:$0xf]  ;;  %v815_v24 = vmul.f32 %v811_v14, %v807_v31  ;;  %v833_v42 = vadd.f32 %v829_v29, %v817_v28  ;;  %v839_v49 = vld [vmem:[#allocation2 + $0x20] sm:$0xf]  ;;  %v848_v50 = vadd.f32 %v844_v30, %v832_v15  ;;  %v869_v52 = vld [vmem:[#allocation2 + $0x12] sm:$0xf]  ;;  %v861_v58 = vmul.f32 %v859_v27, %v853_v34 }
 0x127   : > { %v838_v43 = vld [vmem:[#allocation2 + $0x18] sm:$0xf]  ;;  %v834_v48 = vadd.f32 %v830_v38, %v818_v37  ;;  %v831_v55 = vmul.f32 %v827_v1, %v823_v46  ;;  %v884_v16 = vld [vmem:[#allocation2 + $0x10] sm:$0xf]  ;;  %v855_v53 = vld [vmem:[#allocation2 + $0x21] sm:$0xf]  ;;  %v876_v32 = vmul.f32 %v875_v35, %v868_v47  ;;  %v847_v62 = vmul.f32 %v843_v3, %v839_v49 }
 0x128   : > { %v854_v45 = vld [vmem:[#allocation2 + $0x19] sm:$0xf]  ;;  %v846_v23 = vmul.f32 %v843_v3, %v838_v43  ;;  %v819_v54 = vadd.f32 %v815_v24, %v803_v41  ;;  %v849_v56 = vadd.f32 %v845_v44, %v833_v42  ;;  %v864_v14 = vadd.f32 %v860_v51, %v848_v50  ;;  %v886_v2 = vld [vmem:[#allocation2 + $0x20] sm:$0xf]  ;;  %v900_v18 = vld [vmem:[#allocation2 + $0x11] sm:$0xf] }
 0x129   : > { %v870_v59 = vld [vmem:[#allocation2 + $0x1a] sm:$0xf]  ;;  %v862_v57 = vmul.f32 %v859_v27, %v854_v45  ;;  %v877_v0 = vmul.f32 %v875_v35, %v869_v52  ;;  %v871_v17 = vld [vmem:[#allocation2 + $0x22] sm:$0xf]  ;;  %v892_v5 = vmul.f32 %v891_v21, %v884_v16  ;;  %v863_v9 = vmul.f32 %v859_v27, %v855_v53  ;;  %v916_v3 = vld [vmem:[#allocation2 + $0x12] sm:$0xf] }
 0x12a   : > { %v850_v25 = vadd.f32 %v846_v23, %v834_v48  ;;  %v885_v60 = vld [vmem:[#allocation2 + $0x18] sm:$0xf]  ;;  %v835_v61 = vadd.f32 %v831_v55, %v819_v54  ;;  %v865_v63 = vadd.f32 %v861_v58, %v849_v56  ;;  %v878_v4 = vmul.f32 %v875_v35, %v870_v59  ;;  %v902_v20 = vld [vmem:[#allocation2 + $0x21] sm:$0xf]  ;;  %v903_v39 = vld [vmem:[#allocation2 + $0x29] sm:$0xf] }
 0x12b   : > { %v880_v1 = vadd.f32 %v876_v32, %v864_v14  ;;  %v901_v6 = vld [vmem:[#allocation2 + $0x19] sm:$0xf]  ;;  %v893_v11 = vmul.f32 %v891_v21, %v885_v60  ;;  %v894_v13 = vmul.f32 %v891_v21, %v886_v2  ;;  %v908_v26 = vmul.f32 %v907_v22, %v900_v18  ;;  %v918_v36 = vld [vmem:[#allocation2 + $0x22] sm:$0xf]  ;;  %v919_v38 = vld [vmem:[#allocation2 + $0x2a] sm:$0xf] }
 0x12c   : > { %v866_v19 = vadd.f32 %v862_v57, %v850_v25  ;;  %v851_v8 = vadd.f32 %v847_v62, %v835_v61  ;;  %v881_v10 = vadd.f32 %v877_v0, %v865_v63  ;;  %v917_v28 = vld [vmem:[#allocation2 + $0x1a] sm:$0xf]  ;;  %v879_v30 = vmul.f32 %v875_v35, %v871_v17  ;;  %v1162_v47 = vld [vmem:[%s1548_s6] ss:$0 sm:$0xff] }
 0x12d   : > { %v896_v15 = vadd.f32 %v892_v5, %v880_v1  ;;  %v909_v34 = vmul.f32 %v907_v22, %v901_v6  ;;  %v910_v37 = vmul.f32 %v907_v22, %v902_v20  ;;  %v924_v27 = vmul.f32 %v1161_v7, %v916_v3  ;;  %v1163_v61 = vld [vmem:[%s1550_s8] ss:$0 sm:$0xff] }
 0x12e   : > { %v882_v12 = vadd.f32 %v878_v4, %v866_v19  ;;  %v867_v29 = vadd.f32 %v863_v9, %v851_v8  ;;  %v897_v33 = vadd.f32 %v893_v11, %v881_v10  ;;  %v911_v24 = vmul.f32 %v907_v22, %v903_v39 }
 0x12f   : > { %v912_v46 = vadd.f32 %v908_v26, %v896_v15  ;;  %v925_v43 = vmul.f32 %v1161_v7, %v917_v28  ;;  %v926_v21 = vmul.f32 %v1161_v7, %v918_v36  ;;  %v927_v48 = vmul.f32 %v1161_v7, %v919_v38 }
 0x130   : > { %v898_v31 = vadd.f32 %v894_v13, %v882_v12  ;;  %v883_v41 = vadd.f32 %v879_v30, %v867_v29  ;;  %v913_v42 = vadd.f32 %v909_v34, %v897_v33 }
 0x131   : > { %v928_v45 = vadd.f32 %v924_v27, %v912_v46 }
 0x132   : > { %v914_v44 = vadd.f32 %v910_v37, %v898_v31  ;;  %v899_v35 = vadd.f32 %v1509_v40, %v883_v41  ;;  %v929_v49 = vadd.f32 %v925_v43, %v913_v42 }
 0x133   : > { %v939_v51 = vadd.f32 %v1162_v47, %v928_v45 }
 0x134   : > { %v930_v23 = vadd.f32 %v926_v21, %v914_v44  ;;  %v915_v50 = vadd.f32 %v911_v24, %v899_v35  ;;  %v940_v52 = vadd.f32 %v1162_v47, %v929_v49 }
 0x135   : > { %v943_v58 = vmax.f32 %v939_v51, 0.0 }
 0x136   : > { %v941_v54 = vadd.f32 %v1162_v47, %v930_v23  ;;  %v931_v22 = vadd.f32 %v927_v48, %v915_v50  ;;  %v944_v55 = vmax.f32 %v940_v52, 0.0 }
 0x137   : > { %v947_v53 = vmin.f32 %v943_v58, 6.0 }
 0x138   : > { %v942_v56 = vadd.f32 %v1162_v47, %v931_v22  ;;  %v945_v59 = vmax.f32 %v941_v54, 0.0  ;;  %v948_v25 = vmin.f32 %v944_v55, 6.0 }
 0x13a   : > { %v946_v16 = vmax.f32 %v942_v56, 0.0  ;;  %v949_v57 = vmin.f32 %v945_v59, 6.0  ;;  %v955_v40 = vcombine.low %v947_v53, %v948_v25 }
 0x13c   : > { %v950_v14 = vmin.f32 %v946_v16, 6.0 }
 0x13e   : > { %v956_v32 = vcombine.low %v949_v57, %v950_v14 }
 0x140   : > { %v959_v60 = vpack.c.bf16 %v956_v32, %v955_v40 }
 0x142   : > { %1201 = vmatmul.mubr.msk.bf16.vlgmr.msra.gmra.mxu1 %vm999_vm5, %v959_v60 }
 0x202   : > { %v1037_v62 = vpop.f32.mrf.mxu1 }
 0x203   : > { %v1038_v63 = vadd.f32 %v1163_v61, %v1037_v62 }
 0x204   : > { %v1202_v0 = vpop.f32.mrf.mxu1 }
 0x205   : > { %v1044_v2 = vmax.f32 %v1038_v63, 0.0 }
 0x206   : > { %v1040_v18 = vpop.f32.mrf.mxu1 }
 0x207   : > { %v1046_v19 = vmin.f32 %v1044_v2, 6.0  ;;  %v1041_v17 = vadd.f32 %v1163_v61, %v1040_v18 }
 0x208   : > { %v1203_v4 = vpop.f32.mrf.mxu1 }
 0x209   : > { %v1174_v1 = vpack.c.bf16 %v1046_v19, %v1046_v19  ;;  %v1045_v5 = vmax.f32 %v1041_v17, 0.0 }
 0x20b   : > { %1056 = vst.msk [vmem:[%s452_s26] sm:$0xf] %vm781_vm3, %v1174_v1  ;;  %v1047_v6 = vmin.f32 %v1045_v5, 6.0 }
 0x20d   : > { %v1175_v7 = vpack.c.bf16 %v1047_v6, %v1047_v6 }
 0x20f   : > { %1057 = vst.msk [vmem:[%s452_s26 + $0x4] sm:$0xf] %vm781_vm3, %v1175_v7 }
 0x210 PF: > { %p16_p9 = scmp.ge.s32.totalorder %s1332_s13, 4   ;;  %s1552_s30 = smov %s1257_s10 }
 0x211   : > { %s1553_s10 = smov %s1341_s16  ;;  %s1554_s11 = smov %s1332_s13 }
 0x212   :  { %18 = sbr.rel (!%p16_p9) target bundleno = 2 (0x2), region = 141 }

// kernel: _lambda_.6
= control target key start
LH: loop header
LB: loop body
LE: loop exit
PB: predicated region body
PF: predicated region fallthrough
CT: control target
= control target key end

     0   :  { %s2074_s30 = smov 0   ;;  %s2076_s10 = smov 0   ;;  %s2671_s0 = inlined_call_operand.vmem [shape: bf16[4,2,9,9,16], index: 0, kind: input, shape index: {}]   ;;  %s2672_s1 = inlined_call_operand.vmem [shape: f32[9,16], index: 1, kind: input, shape index: {}]   ;;  %s2673_s2 = inlined_call_operand.vmem [shape: f32[1,16], index: 2, kind: input, shape index: {}]   ;;  %s2674_s3 = inlined_call_operand.vmem [shape: bf16[16,32], index: 3, kind: input, shape index: {}]   ;;  %s2675_s4 = inlined_call_operand.vmem [shape: f32[1,32], index: 4, kind: input, shape index: {}, may-alias: {4,6,8}]   ;;  %s2676_s5 = inlined_call_operand.vmem [shape: f32[9,32], index: 5, kind: input, shape index: {}]   ;;  %s2677_s6 = inlined_call_operand.vmem [shape: f32[1,32], index: 6, kind: input, shape index: {}, may-alias: {4,6,8}]   ;;  %s2678_s7 = inlined_call_operand.vmem [shape: bf16[32,32], index: 7, kind: input, shape index: {}]   ;;  %s2679_s8 = inlined_call_operand.vmem [shape: f32[1,32], index: 8, kind: input, shape index: {}, may-alias: {4,6,8}]   ;;  %s2680_s9 = inlined_call_operand.vmem [shape: bf16[2,64,32], index: 9, kind: output, shape index: {}]  }
   0x1   :  { %s2078_s11 = smov 0  }
   0x2 LB: > { %s1835_s12 = sadd.s32 4294967295, %s2021_s11   ;;  %s2091_s13 = sadd.s32 1, %s2021_s11   ;;  %s2021_s11 = sphi %s2078_s11, %s2683_s11   ;;  %s2017_s10 = sphi %s2076_s10, %s2682_s10   ;;  %s2013_s30 = sphi %s2074_s30, %s2681_s30  }
   0x3   : > { %s23_s14 = ssub.s32 %s2021_s11, %s2091_s13  ;;  %s26_s15 = sadd.s32 1, %s2017_s10 }
   0x4   : > { %p24_p0 = scmp.eq.s32.totalorder %s23_s14, 0  ;;  %p33_p1 = scmp.ne.s32.totalorder %s2017_s10, %s2013_s30 }
   0x5   : > { %p34_p2 = scmp.eq.s32.totalorder %s2021_s11, 0  ;;  %p1838_p4 = scmp.ge.s32.totalorder %s2021_s11, 2 }
   0x6   : > { %s2100_s16 = scalar_select %p24_p0, %s2017_s10, %s26_s15  }
   0x7   : > { %p35_p3 = por %p34_p2, %p33_p1  ;;  %277 = sbr.rel (%p1838_p4) target bundleno = 35 (0x23), region = 48 }
   0xc   : > { %280 = sbr.rel (!%p35_p3) target bundleno = 35 (0x23), region = 52  ;;  %s282_s17 = sand.u32 (%p35_p3), 1, %s2017_s10  }
   0xd   : > { %s1969_s18 = smul.u32 (%p35_p3), 72, %s2021_s11 }
   0xe   : > { %s1968_s19 = smul.u32 (%p35_p3), 288, %s282_s17 }
   0xf   : > { %s2108_s22 = scalar_lea.vmem (%p35_p3), %s2671_s0, %s1969_s18 }
  0x10   : > { %v304_v0 = vld [vmem:[%s2108_s22] sm:$0xff] (%p35_p3)   ;;  %v308_v1 = vld [vmem:[%s2108_s22 + $0x8] sm:$0xff] (%p35_p3)   ;;  %v312_v2 = vld [vmem:[%s2108_s22 + $0x10] sm:$0xff] (%p35_p3)   ;;  %s2113_s23 = scalar_lea.vmem (%p35_p3), [#allocation3], %s1968_s19 }
  0x11   : > { %305 = vst [vmem:[%s2113_s23] sm:$0xff] %v304_v0   ;;  %309 = vst [vmem:[%s2113_s23 + $0x8] sm:$0xff] %v308_v1   ;;  %v316_v3 = vld [vmem:[%s2108_s22 + $0x18] sm:$0xff]   ;;  %v320_v4 = vld [vmem:[%s2108_s22 + $0x20] sm:$0xff]  }
  0x12   : > { %313 = vst [vmem:[%s2113_s23 + $0x10] sm:$0xff] %v312_v2   ;;  %v324_v5 = vld [vmem:[%s2108_s22 + $0x28] sm:$0xff]   ;;  %317 = vst [vmem:[%s2113_s23 + $0x18] sm:$0xff] %v316_v3   ;;  %v328_v6 = vld [vmem:[%s2108_s22 + $0x30] sm:$0xff]  }
  0x13   : > { %321 = vst [vmem:[%s2113_s23 + $0x20] sm:$0xff] %v320_v4   ;;  %325 = vst [vmem:[%s2113_s23 + $0x28] sm:$0xff] %v324_v5   ;;  %v332_v7 = vld [vmem:[%s2108_s22 + $0x38] sm:$0xff]   ;;  %v336_v8 = vld [vmem:[%s2108_s22 + $0x40] sm:$0xff]  }
  0x14   : > { %329 = vst [vmem:[%s2113_s23 + $0x30] sm:$0xff] %v328_v6   ;;  %333 = vst [vmem:[%s2113_s23 + $0x38] sm:$0xff] %v332_v7   ;;  %v340_v9 = vld [vmem:[%s2108_s22 + $0x90] sm:$0xff]   ;;  %v344_v10 = vld [vmem:[%s2108_s22 + $0x98] sm:$0xff]  }
  0x15   : > { %337 = vst [vmem:[%s2113_s23 + $0x40] sm:$0xff] %v336_v8   ;;  %v348_v11 = vld [vmem:[%s2108_s22 + $0xa0] sm:$0xff]   ;;  %341 = vst [vmem:[%s2113_s23 + $0x48] sm:$0xff] %v340_v9   ;;  %v352_v12 = vld [vmem:[%s2108_s22 + $0xa8] sm:$0xff]  }
  0x16   : > { %345 = vst [vmem:[%s2113_s23 + $0x50] sm:$0xff] %v344_v10   ;;  %349 = vst [vmem:[%s2113_s23 + $0x58] sm:$0xff] %v348_v11   ;;  %v356_v13 = vld [vmem:[%s2108_s22 + $0xb0] sm:$0xff]   ;;  %v360_v14 = vld [vmem:[%s2108_s22 + $0xb8] sm:$0xff]  }
  0x17   : > { %353 = vst [vmem:[%s2113_s23 + $0x60] sm:$0xff] %v352_v12   ;;  %357 = vst [vmem:[%s2113_s23 + $0x68] sm:$0xff] %v356_v13   ;;  %v364_v15 = vld [vmem:[%s2108_s22 + $0xc0] sm:$0xff]   ;;  %v368_v16 = vld [vmem:[%s2108_s22 + $0xc8] sm:$0xff]  }
  0x18   : > { %361 = vst [vmem:[%s2113_s23 + $0x70] sm:$0xff] %v360_v14   ;;  %v372_v17 = vld [vmem:[%s2108_s22 + $0xd0] sm:$0xff]   ;;  %365 = vst [vmem:[%s2113_s23 + $0x78] sm:$0xff] %v364_v15   ;;  %v376_v18 = vld [vmem:[%s2108_s22 + $0x120] sm:$0xff]  }
  0x19   : > { %369 = vst [vmem:[%s2113_s23 + $0x80] sm:$0xff] %v368_v16   ;;  %373 = vst [vmem:[%s2113_s23 + $0x88] sm:$0xff] %v372_v17   ;;  %v380_v19 = vld [vmem:[%s2108_s22 + $0x128] sm:$0xff]   ;;  %v384_v20 = vld [vmem:[%s2108_s22 + $0x130] sm:$0xff]  }
  0x1a   : > { %377 = vst [vmem:[%s2113_s23 + $0x90] sm:$0xff] %v376_v18   ;;  %381 = vst [vmem:[%s2113_s23 + $0x98] sm:$0xff] %v380_v19   ;;  %v388_v21 = vld [vmem:[%s2108_s22 + $0x138] sm:$0xff]   ;;  %v392_v22 = vld [vmem:[%s2108_s22 + $0x140] sm:$0xff]  }
  0x1b   : > { %385 = vst [vmem:[%s2113_s23 + $0xa0] sm:$0xff] %v384_v20   ;;  %v396_v23 = vld [vmem:[%s2108_s22 + $0x148] sm:$0xff]   ;;  %389 = vst [vmem:[%s2113_s23 + $0xa8] sm:$0xff] %v388_v21   ;;  %v400_v24 = vld [vmem:[%s2108_s22 + $0x150] sm:$0xff]  }
  0x1c   : > { %393 = vst [vmem:[%s2113_s23 + $0xb0] sm:$0xff] %v392_v22   ;;  %397 = vst [vmem:[%s2113_s23 + $0xb8] sm:$0xff] %v396_v23   ;;  %v404_v25 = vld [vmem:[%s2108_s22 + $0x158] sm:$0xff]   ;;  %v408_v26 = vld [vmem:[%s2108_s22 + $0x160] sm:$0xff]  }
  0x1d   : > { %401 = vst [vmem:[%s2113_s23 + $0xc0] sm:$0xff] %v400_v24   ;;  %405 = vst [vmem:[%s2113_s23 + $0xc8] sm:$0xff] %v404_v25   ;;  %v412_v27 = vld [vmem:[%s2108_s22 + $0x1b0] sm:$0xff]   ;;  %v416_v28 = vld [vmem:[%s2108_s22 + $0x1b8] sm:$0xff]  }
  0x1e   : > { %409 = vst [vmem:[%s2113_s23 + $0xd0] sm:$0xff] %v408_v26   ;;  %v420_v29 = vld [vmem:[%s2108_s22 + $0x1c0] sm:$0xff]   ;;  %413 = vst [vmem:[%s2113_s23 + $0xd8] sm:$0xff] %v412_v27   ;;  %v424_v30 = vld [vmem:[%s2108_s22 + $0x1c8] sm:$0xff]  }
  0x1f   : > { %417 = vst [vmem:[%s2113_s23 + $0xe0] sm:$0xff] %v416_v28   ;;  %421 = vst [vmem:[%s2113_s23 + $0xe8] sm:$0xff] %v420_v29   ;;  %v428_v31 = vld [vmem:[%s2108_s22 + $0x1d0] sm:$0xff]   ;;  %v432_v32 = vld [vmem:[%s2108_s22 + $0x1d8] sm:$0xff]  }
  0x20   : > { %425 = vst [vmem:[%s2113_s23 + $0xf0] sm:$0xff] %v424_v30   ;;  %429 = vst [vmem:[%s2113_s23 + $0xf8] sm:$0xff] %v428_v31   ;;  %v436_v33 = vld [vmem:[%s2108_s22 + $0x1e0] sm:$0xff]   ;;  %v440_v34 = vld [vmem:[%s2108_s22 + $0x1e8] sm:$0xff]  }
  0x21   : > { %433 = vst [vmem:[%s2113_s23 + $0x100] sm:$0xff] %v432_v32   ;;  %v444_v35 = vld [vmem:[%s2108_s22 + $0x1f0] sm:$0xff]   ;;  %437 = vst [vmem:[%s2113_s23 + $0x108] sm:$0xff] %v436_v33  }
  0x22   : > { %441 = vst [vmem:[%s2113_s23 + $0x110] sm:$0xff] %v440_v34   ;;  %445 = vst [vmem:[%s2113_s23 + $0x118] sm:$0xff] %v444_v35  }
  0x23 PF: > { %p1840_p5 = scmp.ge.s32.totalorder %s2021_s11, 1  ;;  %p614_p6 = scmp.lt.s32.totalorder %s2021_s11, 3 }
  0x25   : > { %p615_p7 = pnand %p1840_p5, %p614_p6 }
  0x26   : > { %s621_s26 = sand.u32 (!%p615_p7), 1, %s2013_s30   ;;  %p656_p8 = scmp.lt.s32.totalorder (!%p615_p7), %s1835_s12, 1 }
  0x27   : > { %618 = sbr.rel (%p615_p7) target bundleno = 593 (0x251), region = 93 }
  0x28   : > { %s1970_s27 = smul.u32 (!%p615_p7), 288, %s621_s26 }
  0x2a   : > { %s2217_s30 = scalar_lea.vmem (!%p615_p7), [#allocation3], %s1970_s27 }
  0x2c   : > { %v1996_v36 = vld [vmem:[%s2674_s3] sm:$0xff]   ;;  %v702_v37 = vlaneseq  ;;  %vm662_vm0 = vcmask 261120   ;;  %vm664_vm1 = vcmask 254976   ;;  %v2023_v40 = vmov 0.0   ;;  %v1843_v43 = vld [vmem:[%s2217_s30 + $0x48] ss:$8 sps:$4 sm:$0xff]  }
  0x2d   : > { %1946 = vmatprep.subr.bf16.mxu0 %v1996_v36  ;;  %v2195_v39 = vld [vmem:[%s2672_s1] sm:$0xff]  ;;  %670 = vst.msk [vmem:[#allocation2 + $0x30] sm:$0xff] %vm662_vm0, %v2023_v40  ;;  %663 = vst.msk [vmem:[#allocation2] sm:$0xff] %vm662_vm0, %v2023_v40  ;;  %vm803_vm2 = vcmask 1046528   ;;  %v723_v47 = vunpack.c.l.bf16 %v1843_v43  ;;  %v724_v48 = vunpack.c.h.bf16 %v1843_v43  ;;  %v752_v50 = vld [vmem:[%s2217_s30 + $0xc] sm:$0x1] }
  0x2e   : > { %v2190_v38 = vshrl.u32 %v702_v37, 7  ;;  %1947 = vmatpush3.bf16.msra.mxu0 %v1996_v36  ;;  %671 = vst.msk [vmem:[#allocation2 + $0x38] sm:$0x3] %vm664_vm1, %v2023_v40  ;;  %665 = vst.msk [vmem:[#allocation2 + $0x8] sm:$0x3] %vm664_vm1, %v2023_v40  ;;  %v760_v55 = vunpack.c.l.bf16 %v752_v50  ;;  %vm1226_vm3 = vcmask 130048  }
  0x2f   : > { %666 = vst.msk [vmem:[#allocation2 + $0x10] sm:$0xff] %vm662_vm0, %v2023_v40  ;;  %668 = vst.msk [vmem:[#allocation2 + $0x20] sm:$0xff] %vm662_vm0, %v2023_v40  ;;  %v686_v41 = vld [vmem:[%s2217_s30] ss:$8 sps:$4 sm:$0xff]   ;;  %v751_v49 = vld [vmem:[%s2217_s30 + $0x4] sm:$0x1] }
  0x30   : > { %667 = vst.msk [vmem:[#allocation2 + $0x18] sm:$0x3] %vm664_vm1, %v2023_v40  ;;  %669 = vst.msk [vmem:[#allocation2 + $0x28] sm:$0x3] %vm664_vm1, %v2023_v40  ;;  %v704_v42 = vsub.s32 0, %v2190_v38  ;;  %v733_v44 = vsub.s32 1, %v2190_v38  ;;  %v694_v45 = vunpack.c.l.bf16 %v686_v41  ;;  %v695_v46 = vunpack.c.h.bf16 %v686_v41 }
  0x31   : > { %672 = vst.msk [vmem:[#allocation2 + $0x40] sm:$0xff] %vm662_vm0, %v2023_v40  ;;  %674 = vst.msk [vmem:[#allocation2 + $0x50] sm:$0xff] %vm662_vm0, %v2023_v40  ;;  %v1851_v51 = vld [vmem:[%s2217_s30 + $0x90] ss:$8 sps:$4 sm:$0xff]   ;;  %v759_v54 = vunpack.c.l.bf16 %v751_v49  ;;  %v769_v57 = vsub.s32 2, %v2190_v38  ;;  %v863_v60 = vsub.s32 3, %v2190_v38 }
  0x32   : > { %673 = vst.msk [vmem:[#allocation2 + $0x48] sm:$0x3] %vm664_vm1, %v2023_v40  ;;  %675 = vst.msk [vmem:[#allocation2 + $0x58] sm:$0x3] %vm664_vm1, %v2023_v40  ;;  %v2229_v52 = vrot.slane %v2195_v39, %v704_v42  ;;  %v2234_v53 = vrot.slane %v2195_v39, %v733_v44  ;;  %v1859_v56 = vld [vmem:[%s2217_s30 + $0xd8] ss:$8 sps:$4 sm:$0xff]   ;;  %v853_v58 = vunpack.c.l.bf16 %v1851_v51  ;;  %v854_v59 = vunpack.c.h.bf16 %v1851_v51 }
  0x33   : > { %676 = vst.msk [vmem:[#allocation2 + $0x60] sm:$0xff] %vm662_vm0, %v2023_v40  ;;  %678 = vst.msk [vmem:[#allocation2 + $0x70] sm:$0xff] %vm662_vm0, %v2023_v40  ;;  %v1867_v61 = vld [vmem:[%s2217_s30 + $0x94] sm:$0x1]  ;;  %v2247_v2 = vrot.slane %v2195_v39, %v769_v57  ;;  %v2252_v3 = vrot.slane %v2195_v39, %v863_v60  ;;  %v890_v4 = vunpack.c.l.bf16 %v1859_v56  ;;  %v891_v5 = vunpack.c.h.bf16 %v1859_v56  ;;  %v1868_v6 = vld [vmem:[%s2217_s30 + $0x9c] sm:$0x1] }
  0x34   : > { %677 = vst.msk [vmem:[#allocation2 + $0x68] sm:$0x3] %vm664_vm1, %v2023_v40  ;;  %679 = vst.msk [vmem:[#allocation2 + $0x78] sm:$0x3] %vm664_vm1, %v2023_v40  ;;  %v706_v62 = vmul.f32 %v2229_v52, %v694_v45  ;;  %v707_v63 = vmul.f32 %v2229_v52, %v695_v46  ;;  %v735_v0 = vmul.f32 %v2234_v53, %v723_v47  ;;  %v900_v9 = vsub.s32 4, %v2190_v38  ;;  %s2685_s12 = smov (!%p656_p8, %s1835_s12), 1 }
  0x35   : > { %680 = vst.msk [vmem:[#allocation2 + $0x80] sm:$0xff] %vm662_vm0, %v2023_v40  ;;  %682 = vst.msk [vmem:[#allocation2 + $0x90] sm:$0xff] %vm662_vm0, %v2023_v40  ;;  %v736_v1 = vmul.f32 %v2234_v53, %v724_v48  ;;  %v926_v10 = vunpack.c.l.bf16 %v1867_v61  ;;  %v771_v11 = vmul.f32 %v2247_v2, %v694_v45  ;;  %v772_v12 = vmul.f32 %v2247_v2, %v759_v54  ;;  %v1875_v15 = vld [vmem:[%s2217_s30 + $0x8] ss:$8 sps:$4 sm:$0xff]   ;;  %v1891_v29 = vld [vmem:[%s2217_s30 + $0xc] sm:$0x1] }
  0x36   : > { %681 = vst.msk [vmem:[#allocation2 + $0x88] sm:$0x3] %vm664_vm1, %v2023_v40  ;;  %683 = vst.msk [vmem:[#allocation2 + $0x98] sm:$0x3] %vm664_vm1, %v2023_v40  ;;  %v743_v7 = vadd.f32 %v735_v0, %v706_v62  ;;  %v773_v13 = vmul.f32 %v2247_v2, %v695_v46  ;;  %v774_v14 = vmul.f32 %v2247_v2, %v760_v55  ;;  %v927_v19 = vunpack.c.l.bf16 %v1868_v6  ;;  %v1883_v24 = vld [vmem:[%s2217_s30 + $0x50] ss:$8 sps:$4 sm:$0xff]  }
  0x37   : > { %v744_v8 = vadd.f32 %v736_v1, %v707_v63  ;;  %v865_v16 = vmul.f32 %v2252_v3, %v853_v58  ;;  %v866_v17 = vmul.f32 %v2252_v3, %v854_v59  ;;  %v2266_v18 = vrot.slane %v2195_v39, %v900_v9  ;;  %v1892_v50 = vld [vmem:[%s2217_s30 + $0x14] sm:$0x1]  ;;  %v2293_v51 = vld [vmem:[%s2672_s1 + $0x8] ss:$0 sm:$0xff]  ;;  %s1926_s17 = sshll.u32 %s2685_s12, 5 }
  0x38   : > { %v804_v20 = vrot.slane %v771_v11, 1  ;;  %v805_v21 = vrot.slane %v772_v12, 1  ;;  %v807_v22 = vrot.slane %v773_v13, 1  ;;  %v808_v23 = vrot.slane %v774_v14, 1  ;;  %v688_v11 = vld [vmem:[%s2217_s30 + $0x10] ss:$8 sps:$4 sm:$0xff]   ;;  %s2643_s20 = scalar_lea.vmem %s2680_s9, %s1926_s17 }
  0x39   : > { %v902_v25 = vmul.f32 %v2266_v18, %v890_v4  ;;  %v903_v26 = vmul.f32 %v2266_v18, %v891_v5  ;;  %v936_v27 = vsub.s32 5, %v2190_v38  ;;  %v1019_v28 = vunpack.c.l.bf16 %v1875_v15 }
  0x3a   : > { %v806_v30 = vsel %vm803_vm2, %v804_v20, %v805_v21  ;;  %v809_v31 = vsel %vm803_vm2, %v807_v22, %v808_v23  ;;  %v1020_v32 = vunpack.c.h.bf16 %v1875_v15  ;;  %v1029_v33 = vsub.s32 6, %v2190_v38  ;;  %v1845_v15 = vld [vmem:[%s2217_s30 + $0x58] ss:$8 sps:$4 sm:$0xff]  }
  0x3b   : > { %v836_v34 = vadd.f32 %v806_v30, %v743_v7  ;;  %v837_v35 = vadd.f32 %v809_v31, %v744_v8  ;;  %v2279_v36 = vrot.slane %v2195_v39, %v936_v27  ;;  %v1056_v37 = vunpack.c.l.bf16 %v1883_v24  ;;  %v754_v31 = vld [vmem:[%s2217_s30 + $0x1c] sm:$0x1] }
  0x3c   : > { %v2284_v40 = vrot.slane %v2195_v39, %v1029_v33  ;;  %v1057_v41 = vunpack.c.h.bf16 %v1883_v24  ;;  %v1066_v43 = vsub.s32 7, %v2190_v38  ;;  %v1092_v45 = vunpack.c.l.bf16 %v1891_v29  ;;  %v2531_v38 = vld [vmem:[%s2676_s5 + $0x8] ss:$0 sm:$0xff] }
  0x3d   : > { %v873_v46 = vadd.f32 %v865_v16, %v836_v34  ;;  %v874_v47 = vadd.f32 %v866_v17, %v837_v35  ;;  %v938_v48 = vmul.f32 %v2279_v36, %v853_v58  ;;  %v939_v49 = vmul.f32 %v2279_v36, %v926_v10 }
  0x3e   : > { %v940_v54 = vmul.f32 %v2279_v36, %v854_v59  ;;  %v941_v55 = vmul.f32 %v2279_v36, %v927_v19  ;;  %v1031_v56 = vmul.f32 %v2284_v40, %v1019_v28  ;;  %v1032_v61 = vmul.f32 %v2284_v40, %v1020_v32 }
  0x3f   : > { %v910_v62 = vadd.f32 %v902_v25, %v873_v46  ;;  %v911_v63 = vadd.f32 %v903_v26, %v874_v47  ;;  %v970_v58 = vrot.slane %v938_v48, 1  ;;  %v971_v0 = vrot.slane %v939_v49, 1  ;;  %v753_v25 = vld [vmem:[%s2217_s30 + $0x14] sm:$0x1]  ;;  %v2323_v46 = vld [vmem:[%s2673_s2] ss:$0 sm:$0xff] }
  0x40   : > { %v973_v1 = vrot.slane %v940_v54, 1  ;;  %v974_v4 = vrot.slane %v941_v55, 1  ;;  %v2302_v5 = vrot.slane %v2195_v39, %v1066_v43  ;;  %v1093_v59 = vunpack.c.l.bf16 %v1892_v50 }
  0x41   : > { %v972_v6 = vsel %vm803_vm2, %v970_v58, %v971_v0  ;;  %v1104_v7 = vmul.f32 %v2293_v51, %v1019_v28  ;;  %v1105_v8 = vmul.f32 %v2293_v51, %v1092_v45  ;;  %v1106_v10 = vmul.f32 %v2293_v51, %v1020_v32  ;;  %v1861_v0 = vld [vmem:[%s2217_s30 + $0xe8] ss:$8 sps:$4 sm:$0xff]  }
  0x42   : > { %v975_v12 = vsel %vm803_vm2, %v973_v1, %v974_v4  ;;  %v1002_v13 = vadd.f32 %v972_v6, %v910_v62  ;;  %v1068_v14 = vmul.f32 %v2302_v5, %v1056_v37  ;;  %v1069_v39 = vmul.f32 %v2302_v5, %v1057_v41 }
  0x43   : > { %v1003_v16 = vadd.f32 %v975_v12, %v911_v63  ;;  %v1107_v17 = vmul.f32 %v2293_v51, %v1093_v59  ;;  %v1136_v19 = vrot.slane %v1104_v7, 1  ;;  %v1137_v20 = vrot.slane %v1105_v8, 1 }
  0x44   : > { %v1039_v21 = vadd.f32 %v1031_v56, %v1002_v13  ;;  %v1139_v22 = vrot.slane %v1106_v10, 1  ;;  %v696_v23 = vunpack.c.l.bf16 %v688_v11  ;;  %v697_v24 = vunpack.c.h.bf16 %v688_v11  ;;  %v1853_v56 = vld [vmem:[%s2217_s30 + $0xa0] ss:$8 sps:$4 sm:$0xff]  }
  0x45   : > { %v1040_v26 = vadd.f32 %v1032_v61, %v1003_v16  ;;  %v1138_v28 = vsel %vm803_vm2, %v1136_v19, %v1137_v20  ;;  %v1140_v29 = vrot.slane %v1107_v17, 1  ;;  %v725_v30 = vunpack.c.l.bf16 %v1845_v15  ;;  %v1869_v20 = vld [vmem:[%s2217_s30 + $0xa4] sm:$0x1] }
  0x46   : > { %v1076_v32 = vadd.f32 %v1068_v14, %v1039_v21  ;;  %v708_v34 = vmul.f32 %v2229_v52, %v696_v23  ;;  %v709_v35 = vmul.f32 %v2229_v52, %v697_v24  ;;  %v726_v37 = vunpack.c.h.bf16 %v1845_v15  ;;  %v1870_v21 = vld [vmem:[%s2217_s30 + $0xac] sm:$0x1] }
  0x47   : > { %v1077_v41 = vadd.f32 %v1069_v39, %v1040_v26  ;;  %v1141_v45 = vsel %vm803_vm2, %v1139_v22, %v1140_v29  ;;  %v737_v47 = vmul.f32 %v2234_v53, %v725_v30  ;;  %v761_v48 = vunpack.c.l.bf16 %v753_v25  ;;  %v1877_v26 = vld [vmem:[%s2217_s30 + $0x18] ss:$8 sps:$4 sm:$0xff]  }
  0x48   : > { %v1168_v49 = vadd.f32 %v1138_v28, %v1076_v32  ;;  %v738_v50 = vmul.f32 %v2234_v53, %v726_v37  ;;  %v762_v54 = vunpack.c.l.bf16 %v754_v31  ;;  %v775_v55 = vmul.f32 %v2247_v2, %v696_v23 }
  0x49   : > { %v1169_v61 = vadd.f32 %v1141_v45, %v1077_v41  ;;  %v745_v62 = vadd.f32 %v737_v47, %v708_v34  ;;  %v776_v63 = vmul.f32 %v2247_v2, %v761_v48  ;;  %v777_v58 = vmul.f32 %v2247_v2, %v697_v24 }
  0x4a   : > { %v1183_v1 = vadd.f32 %v2323_v46, %v1168_v49  ;;  %v746_v4 = vadd.f32 %v738_v50, %v709_v35  ;;  %v778_v59 = vmul.f32 %v2247_v2, %v762_v54  ;;  %v810_v6 = vrot.slane %v775_v55, 1  ;;  %v1885_v49 = vld [vmem:[%s2217_s30 + $0x60] ss:$8 sps:$4 sm:$0xff]  }
  0x4b   : > { %v1184_v7 = vadd.f32 %v2323_v46, %v1169_v61  ;;  %v811_v8 = vrot.slane %v776_v63, 1  ;;  %v813_v10 = vrot.slane %v777_v58, 1  ;;  %v855_v11 = vunpack.c.l.bf16 %v1853_v56  ;;  %v1893_v61 = vld [vmem:[%s2217_s30 + $0x1c] sm:$0x1] }
  0x4c   : > { %v1191_v12 = vmax.f32 %v1183_v1, 0.0  ;;  %v814_v13 = vrot.slane %v778_v59, 1  ;;  %v856_v14 = vunpack.c.h.bf16 %v1853_v56  ;;  %v892_v39 = vunpack.c.l.bf16 %v1861_v0 }
  0x4d   : > { %v1192_v15 = vmax.f32 %v1184_v7, 0.0  ;;  %v812_v16 = vsel %vm803_vm2, %v810_v6, %v811_v8  ;;  %v867_v17 = vmul.f32 %v2252_v3, %v855_v11  ;;  %v893_v19 = vunpack.c.h.bf16 %v1861_v0 }
  0x4e   : > { %v1199_v22 = vmin.f32 %v1191_v12, 6.0  ;;  %v815_v23 = vsel %vm803_vm2, %v813_v10, %v814_v13  ;;  %v838_v24 = vadd.f32 %v812_v16, %v745_v62  ;;  %v868_v25 = vmul.f32 %v2252_v3, %v856_v14  ;;  %v1894_v62 = vld [vmem:[%s2217_s30 + $0x24] sm:$0x1]  ;;  %v690_v13 = vld [vmem:[%s2217_s30 + $0x20] ss:$8 sps:$4 sm:$0xff]  }
  0x4f   : > { %v1200_v28 = vmin.f32 %v1192_v15, 6.0  ;;  %v839_v29 = vadd.f32 %v815_v23, %v746_v4  ;;  %v904_v30 = vmul.f32 %v2266_v18, %v892_v39  ;;  %v905_v31 = vmul.f32 %v2266_v18, %v893_v19 }
  0x50   : > { %v875_v32 = vadd.f32 %v867_v17, %v838_v24  ;;  %v928_v34 = vunpack.c.l.bf16 %v1869_v20  ;;  %v929_v35 = vunpack.c.l.bf16 %v1870_v21  ;;  %v942_v37 = vmul.f32 %v2279_v36, %v855_v11 }
  0x51   : > { %v1207_v41 = vpack.c.bf16 %v1200_v28, %v1199_v22  ;;  %v876_v45 = vadd.f32 %v868_v25, %v839_v29  ;;  %v944_v47 = vmul.f32 %v2279_v36, %v856_v14  ;;  %v1021_v48 = vunpack.c.l.bf16 %v1877_v26  ;;  %v1847_v22 = vld [vmem:[%s2217_s30 + $0x68] ss:$8 sps:$4 sm:$0xff]  }
  0x52   : > { %v912_v50 = vadd.f32 %v904_v30, %v875_v32  ;;  %v943_v54 = vmul.f32 %v2279_v36, %v928_v34  ;;  %v945_v55 = vmul.f32 %v2279_v36, %v929_v35  ;;  %v976_v56 = vrot.slane %v942_v37, 1  ;;  %v755_v32 = vld [vmem:[%s2217_s30 + $0x24] sm:$0x1]  ;;  %v756_v34 = vld [vmem:[%s2217_s30 + $0x2c] sm:$0x1] }
  0x53   : > { %1948 = vmatprep.mubr.msk.bf16.mxu0 %vm1226_vm3, %v1207_v41  ;;  %v913_v63 = vadd.f32 %v905_v31, %v876_v45  ;;  %v979_v58 = vrot.slane %v944_v47, 1  ;;  %v1022_v0 = vunpack.c.h.bf16 %v1877_v26  ;;  %v1033_v1 = vmul.f32 %v2284_v40, %v1021_v48 }
  0x54   : > { %v977_v4 = vrot.slane %v943_v54, 1  ;;  %v980_v59 = vrot.slane %v945_v55, 1  ;;  %v1058_v6 = vunpack.c.l.bf16 %v1885_v49  ;;  %v1059_v7 = vunpack.c.h.bf16 %v1885_v49 }
  0x55   : > { %v1034_v8 = vmul.f32 %v2284_v40, %v1022_v0  ;;  %v1094_v10 = vunpack.c.l.bf16 %v1893_v61  ;;  %v1095_v11 = vunpack.c.l.bf16 %v1894_v62  ;;  %v1108_v12 = vmul.f32 %v2293_v51, %v1021_v48 }
  0x56   : > { %v978_v14 = vsel %vm803_vm2, %v976_v56, %v977_v4  ;;  %v981_v39 = vsel %vm803_vm2, %v979_v58, %v980_v59  ;;  %v1070_v15 = vmul.f32 %v2302_v5, %v1058_v6  ;;  %v1071_v16 = vmul.f32 %v2302_v5, %v1059_v7 }
  0x57   : > { %v1004_v17 = vadd.f32 %v978_v14, %v912_v50  ;;  %v1005_v19 = vadd.f32 %v981_v39, %v913_v63  ;;  %v1109_v20 = vmul.f32 %v2293_v51, %v1094_v10  ;;  %v1110_v21 = vmul.f32 %v2293_v51, %v1022_v0 }
  0x58   : > { %v1111_v23 = vmul.f32 %v2293_v51, %v1095_v11  ;;  %v1142_v24 = vrot.slane %v1108_v12, 1  ;;  %v698_v25 = vunpack.c.l.bf16 %v690_v13  ;;  %v699_v26 = vunpack.c.h.bf16 %v690_v13 }
  0x59   : > { %v1041_v28 = vadd.f32 %v1033_v1, %v1004_v17  ;;  %v1042_v29 = vadd.f32 %v1034_v8, %v1005_v19  ;;  %v1143_v30 = vrot.slane %v1109_v20, 1  ;;  %v1145_v31 = vrot.slane %v1110_v21, 1  ;;  %v1855_v1 = vld [vmem:[%s2217_s30 + $0xb0] ss:$8 sps:$4 sm:$0xff]  }
  0x5a   : > { %v1146_v35 = vrot.slane %v1111_v23, 1  ;;  %v710_v37 = vmul.f32 %v2229_v52, %v698_v25  ;;  %v711_v41 = vmul.f32 %v2229_v52, %v699_v26  ;;  %v727_v45 = vunpack.c.l.bf16 %v1847_v22  ;;  %v1863_v8 = vld [vmem:[%s2217_s30 + $0xf8] ss:$8 sps:$4 sm:$0xff]  }
  0x5b   : > { %v1078_v47 = vadd.f32 %v1070_v15, %v1041_v28  ;;  %v1079_v48 = vadd.f32 %v1071_v16, %v1042_v29  ;;  %v1144_v49 = vsel %vm803_vm2, %v1142_v24, %v1143_v30  ;;  %v728_v50 = vunpack.c.h.bf16 %v1847_v22  ;;  %v1871_v22 = vld [vmem:[%s2217_s30 + $0xb4] sm:$0x1]  ;;  %v1872_v28 = vld [vmem:[%s2217_s30 + $0xbc] sm:$0x1] }
  0x5c   : > { %v1147_v54 = vsel %vm803_vm2, %v1145_v31, %v1146_v35  ;;  %v739_v55 = vmul.f32 %v2234_v53, %v727_v45  ;;  %v763_v56 = vunpack.c.l.bf16 %v755_v32  ;;  %v764_v61 = vunpack.c.l.bf16 %v756_v34  ;;  %v1879_v34 = vld [vmem:[%s2217_s30 + $0x28] ss:$8 sps:$4 sm:$0xff]  }
  0x5d   : > { %v1170_v62 = vadd.f32 %v1144_v49, %v1078_v47  ;;  %v1171_v63 = vadd.f32 %v1147_v54, %v1079_v48  ;;  %v740_v58 = vmul.f32 %v2234_v53, %v728_v50  ;;  %v779_v0 = vmul.f32 %v2247_v2, %v698_v25 }
  0x5e   : > { %v747_v4 = vadd.f32 %v739_v55, %v710_v37  ;;  %v780_v59 = vmul.f32 %v2247_v2, %v763_v56  ;;  %v781_v6 = vmul.f32 %v2247_v2, %v699_v26  ;;  %v782_v7 = vmul.f32 %v2247_v2, %v764_v61 }
  0x5f   : > { %v1185_v10 = vadd.f32 %v2323_v46, %v1170_v62  ;;  %v1186_v11 = vadd.f32 %v2323_v46, %v1171_v63  ;;  %v748_v12 = vadd.f32 %v740_v58, %v711_v41  ;;  %v816_v13 = vrot.slane %v779_v0, 1  ;;  %v1887_v62 = vld [vmem:[%s2217_s30 + $0x70] ss:$8 sps:$4 sm:$0xff]  }
  0x60   : > { %v817_v14 = vrot.slane %v780_v59, 1  ;;  %v819_v39 = vrot.slane %v781_v6, 1  ;;  %v820_v15 = vrot.slane %v782_v7, 1  ;;  %v857_v16 = vunpack.c.l.bf16 %v1855_v1  ;;  %v1896_v59 = vld [vmem:[%s2217_s30 + $0x34] sm:$0x1] }
  0x61   : > { %v1193_v17 = vmax.f32 %v1185_v10, 0.0  ;;  %v1194_v19 = vmax.f32 %v1186_v11, 0.0  ;;  %v858_v20 = vunpack.c.h.bf16 %v1855_v1  ;;  %v894_v21 = vunpack.c.l.bf16 %v1863_v8 }
  0x62   : > { %v818_v23 = vsel %vm803_vm2, %v816_v13, %v817_v14  ;;  %v821_v24 = vsel %vm803_vm2, %v819_v39, %v820_v15  ;;  %v869_v25 = vmul.f32 %v2252_v3, %v857_v16  ;;  %v895_v26 = vunpack.c.h.bf16 %v1863_v8 }
  0x63   : > { %v1201_v29 = vmin.f32 %v1193_v17, 6.0  ;;  %v1202_v30 = vmin.f32 %v1194_v19, 6.0  ;;  %v840_v31 = vadd.f32 %v818_v23, %v747_v4  ;;  %v841_v32 = vadd.f32 %v821_v24, %v748_v12  ;;  %v1895_v4 = vld [vmem:[%s2217_s30 + $0x2c] sm:$0x1]  ;;  %v692_v19 = vld [vmem:[%s2217_s30 + $0x30] ss:$8 sps:$4 sm:$0xff]  }
  0x64   : > { %v870_v35 = vmul.f32 %v2252_v3, %v858_v20  ;;  %v906_v37 = vmul.f32 %v2266_v18, %v894_v21  ;;  %v907_v41 = vmul.f32 %v2266_v18, %v895_v26  ;;  %v930_v45 = vunpack.c.l.bf16 %v1871_v22 }
  0x65   : > { %v1208_v47 = vpack.c.bf16 %v1202_v30, %v1201_v29  ;;  %v877_v48 = vadd.f32 %v869_v25, %v840_v31  ;;  %v931_v49 = vunpack.c.l.bf16 %v1872_v28  ;;  %v946_v50 = vmul.f32 %v2279_v36, %v857_v16  ;;  %v1849_v29 = vld [vmem:[%s2217_s30 + $0x78] ss:$8 sps:$4 sm:$0xff]  }
  0x66   : > { %v878_v54 = vadd.f32 %v870_v35, %v841_v32  ;;  %v947_v55 = vmul.f32 %v2279_v36, %v930_v45  ;;  %v948_v56 = vmul.f32 %v2279_v36, %v858_v20  ;;  %v1023_v61 = vunpack.c.l.bf16 %v1879_v34  ;;  %v757_v35 = vld [vmem:[%s2217_s30 + $0x34] sm:$0x1] }
  0x67   : > { %1949 = vmatmul.mubr.msk.bf16.vlgmr.msra.gmra.mxu0 %vm1226_vm3, %v1208_v47  ;;  %v914_v63 = vadd.f32 %v906_v37, %v877_v48  ;;  %v949_v58 = vmul.f32 %v2279_v36, %v931_v49  ;;  %v982_v0 = vrot.slane %v946_v50, 1  ;;  %v1024_v1 = vunpack.c.h.bf16 %v1879_v34  ;;  %v758_v48 = vld [vmem:[%s2217_s30 + $0x3c] sm:$0x1] }
  0x68   : > { %v915_v6 = vadd.f32 %v907_v41, %v878_v54  ;;  %v983_v7 = vrot.slane %v947_v55, 1  ;;  %v985_v8 = vrot.slane %v948_v56, 1  ;;  %v1035_v10 = vmul.f32 %v2284_v40, %v1023_v61 }
  0x69   : > { %v986_v11 = vrot.slane %v949_v58, 1  ;;  %v1036_v12 = vmul.f32 %v2284_v40, %v1024_v1  ;;  %v1060_v13 = vunpack.c.l.bf16 %v1887_v62  ;;  %v1061_v14 = vunpack.c.h.bf16 %v1887_v62 }
  0x6a   : > { %v984_v39 = vsel %vm803_vm2, %v982_v0, %v983_v7  ;;  %v1096_v15 = vunpack.c.l.bf16 %v1895_v4  ;;  %v1097_v16 = vunpack.c.l.bf16 %v1896_v59  ;;  %v1112_v17 = vmul.f32 %v2293_v51, %v1023_v61 }
  0x6b   : > { %v987_v20 = vsel %vm803_vm2, %v985_v8, %v986_v11  ;;  %v1006_v21 = vadd.f32 %v984_v39, %v914_v63  ;;  %v1072_v22 = vmul.f32 %v2302_v5, %v1060_v13  ;;  %v1073_v23 = vmul.f32 %v2302_v5, %v1061_v14  ;;  %v1857_v8 = vld [vmem:[%s2217_s30 + $0xc0] ss:$8 sps:$4 sm:$0xff]  }
  0x6c   : > { %v1007_v24 = vadd.f32 %v987_v20, %v915_v6  ;;  %v1113_v25 = vmul.f32 %v2293_v51, %v1096_v15  ;;  %v1114_v26 = vmul.f32 %v2293_v51, %v1024_v1  ;;  %v1115_v28 = vmul.f32 %v2293_v51, %v1097_v16  ;;  %v1865_v14 = vld [vmem:[%s2217_s30 + $0x108] ss:$8 sps:$4 sm:$0xff]  }
  0x6d   : > { %v1043_v30 = vadd.f32 %v1035_v10, %v1006_v21  ;;  %v1148_v31 = vrot.slane %v1112_v17, 1  ;;  %v700_v32 = vunpack.c.l.bf16 %v692_v19  ;;  %v701_v34 = vunpack.c.h.bf16 %v692_v19 }
  0x6e   : > { %v1044_v37 = vadd.f32 %v1036_v12, %v1007_v24  ;;  %v1149_v41 = vrot.slane %v1113_v25, 1  ;;  %v1151_v45 = vrot.slane %v1114_v26, 1  ;;  %v1152_v47 = vrot.slane %v1115_v28, 1  ;;  %v1873_v26 = vld [vmem:[%s2217_s30 + $0xc4] sm:$0x1] }
  0x6f   : > { %v1080_v49 = vadd.f32 %v1072_v22, %v1043_v30  ;;  %v712_v50 = vmul.f32 %v2229_v52, %v700_v32  ;;  %v713_v54 = vmul.f32 %v2229_v52, %v701_v34  ;;  %v729_v55 = vunpack.c.l.bf16 %v1849_v29  ;;  %v1874_v28 = vld [vmem:[%s2217_s30 + $0xcc] sm:$0x1] }
  0x70   : > { %v1081_v56 = vadd.f32 %v1073_v23, %v1044_v37  ;;  %v1150_v61 = vsel %vm803_vm2, %v1148_v31, %v1149_v41  ;;  %v1153_v62 = vsel %vm803_vm2, %v1151_v45, %v1152_v47  ;;  %v730_v63 = vunpack.c.h.bf16 %v1849_v29  ;;  %v1881_v41 = vld [vmem:[%s2217_s30 + $0x38] ss:$8 sps:$4 sm:$0xff]  }
  0x71   : > { %v1172_v58 = vadd.f32 %v1150_v61, %v1080_v49  ;;  %v741_v0 = vmul.f32 %v2234_v53, %v729_v55  ;;  %v765_v1 = vunpack.c.l.bf16 %v757_v35  ;;  %v766_v4 = vunpack.c.l.bf16 %v758_v48 }
  0x72   : > { %v1173_v59 = vadd.f32 %v1153_v62, %v1081_v56  ;;  %v742_v6 = vmul.f32 %v2234_v53, %v730_v63  ;;  %v783_v7 = vmul.f32 %v2247_v2, %v700_v32  ;;  %v785_v52 = vmul.f32 %v2247_v2, %v701_v34 }
  0x73   : > { %v1187_v10 = vadd.f32 %v2323_v46, %v1172_v58  ;;  %v749_v11 = vadd.f32 %v741_v0, %v712_v50  ;;  %v784_v12 = vmul.f32 %v2247_v2, %v765_v1  ;;  %v786_v13 = vmul.f32 %v2247_v2, %v766_v4  ;;  %v1889_v58 = vld [vmem:[%s2217_s30 + $0x80] ss:$8 sps:$4 sm:$0xff]   ;;  %v1897_v0 = vld [vmem:[%s2217_s30 + $0x3c] sm:$0x1] }
  0x74   : > { %v1188_v39 = vadd.f32 %v2323_v46, %v1173_v59  ;;  %v750_v15 = vadd.f32 %v742_v6, %v713_v54  ;;  %v822_v16 = vrot.slane %v783_v7, 1  ;;  %v825_v53 = vrot.slane %v785_v52, 1  ;;  %v1898_v6 = vld [vmem:[%s2217_s30 + $0x44] sm:$0x1] }
  0x75   : > { %v1195_v17 = vmax.f32 %v1187_v10, 0.0  ;;  %v823_v19 = vrot.slane %v784_v12, 1  ;;  %v826_v20 = vrot.slane %v786_v13, 1  ;;  %v859_v21 = vunpack.c.l.bf16 %v1857_v8 }
  0x76   : > { %v1196_v22 = vmax.f32 %v1188_v39, 0.0  ;;  %v860_v23 = vunpack.c.h.bf16 %v1857_v8  ;;  %v896_v24 = vunpack.c.l.bf16 %v1865_v14  ;;  %v897_v25 = vunpack.c.h.bf16 %v1865_v14 }
  0x77   : > { %v1203_v29 = vmin.f32 %v1195_v17, 6.0  ;;  %v824_v2 = vsel %vm803_vm2, %v822_v16, %v823_v19  ;;  %v827_v30 = vsel %vm803_vm2, %v825_v53, %v826_v20  ;;  %v871_v31 = vmul.f32 %v2252_v3, %v859_v21 }
  0x78   : > { %v1204_v32 = vmin.f32 %v1196_v22, 6.0  ;;  %v842_v34 = vadd.f32 %v824_v2, %v749_v11  ;;  %v843_v35 = vadd.f32 %v827_v30, %v750_v15  ;;  %v872_v37 = vmul.f32 %v2252_v3, %v860_v23 }
  0x79   : > { %v908_v45 = vmul.f32 %v2266_v18, %v896_v24  ;;  %v909_v47 = vmul.f32 %v2266_v18, %v897_v25  ;;  %v932_v48 = vunpack.c.l.bf16 %v1873_v26  ;;  %v933_v49 = vunpack.c.l.bf16 %v1874_v28 }
  0x7a   : > { %v1209_v50 = vpack.c.bf16 %v1204_v32, %v1203_v29  ;;  %v879_v54 = vadd.f32 %v871_v31, %v842_v34  ;;  %v880_v55 = vadd.f32 %v872_v37, %v843_v35  ;;  %v950_v56 = vmul.f32 %v2279_v36, %v859_v21 }
  0x7b   : > { %v951_v61 = vmul.f32 %v2279_v36, %v932_v48  ;;  %v952_v62 = vmul.f32 %v2279_v36, %v860_v23  ;;  %v953_v63 = vmul.f32 %v2279_v36, %v933_v49  ;;  %v1025_v3 = vunpack.c.l.bf16 %v1881_v41  ;;  %v1997_v49 = vld [vmem:[%s2678_s7 + $0x8] sm:$0xff]  }
  0x7c   : > { %1952 = vmatprep.mubr.msk.bf16.mxu0 %vm1226_vm3, %v1209_v50  ;;  %v916_v18 = vadd.f32 %v908_v45, %v879_v54  ;;  %v917_v1 = vadd.f32 %v909_v47, %v880_v55  ;;  %v988_v4 = vrot.slane %v950_v56, 1  ;;  %v1026_v59 = vunpack.c.h.bf16 %v1881_v41  ;;  %v1998_v50 = vld [vmem:[%s2678_s7] sm:$0xff]   ;;  %1956 = vmatprep.subr.bf16.mxu1 %v1997_v49 }
  0x7d   : > { %v989_v7 = vrot.slane %v951_v61, 1  ;;  %v991_v52 = vrot.slane %v952_v62, 1  ;;  %v992_v8 = vrot.slane %v953_v63, 1  ;;  %v1037_v10 = vmul.f32 %v2284_v40, %v1025_v3  ;;  %1957 = vmatpush3.bf16.msra.mxu1 %v1997_v49  ;;  %v1336_v54 = vld [vmem:[%s2676_s5] sm:$0xff] }
  0x7e   : > { %v1038_v11 = vmul.f32 %v2284_v40, %v1026_v59  ;;  %v1062_v12 = vunpack.c.l.bf16 %v1889_v58  ;;  %v1063_v13 = vunpack.c.h.bf16 %v1889_v58  ;;  %v1098_v36 = vunpack.c.l.bf16 %v1897_v0  ;;  %1958 = vmatprep.subr.bf16.mxu1 %v1998_v50  ;;  %v1338_v0 = vld [vmem:[#allocation2] sm:$0xff] }
  0x7f   : > { %v990_v14 = vsel %vm803_vm2, %v988_v4, %v989_v7  ;;  %v993_v39 = vsel %vm803_vm2, %v991_v52, %v992_v8  ;;  %v1099_v15 = vunpack.c.l.bf16 %v1898_v6  ;;  %v1116_v16 = vmul.f32 %v2293_v51, %v1025_v3 }
  0x80   : > { %v1008_v53 = vadd.f32 %v990_v14, %v916_v18  ;;  %v1009_v17 = vadd.f32 %v993_v39, %v917_v1  ;;  %v1074_v19 = vmul.f32 %v2302_v5, %v1062_v12  ;;  %v1075_v20 = vmul.f32 %v2302_v5, %v1063_v13  ;;  %v1358_v18 = vld [vmem:[#allocation2 + $0x1] sm:$0xff] }
  0x81   : > { %v1117_v21 = vmul.f32 %v2293_v51, %v1098_v36  ;;  %v1118_v40 = vmul.f32 %v2293_v51, %v1026_v59  ;;  %v1119_v22 = vmul.f32 %v2293_v51, %v1099_v15  ;;  %v1154_v23 = vrot.slane %v1116_v16, 1  ;;  %1959 = vmatpush3.bf16.msra.mxu1 %v1998_v50  ;;  %v1386_v12 = vld [vmem:[#allocation2 + $0x2] sm:$0xff] }
  0x82   : > { %v1045_v24 = vadd.f32 %v1037_v10, %v1008_v53  ;;  %v1046_v25 = vadd.f32 %v1038_v11, %v1009_v17  ;;  %v2474_v62 = vrot.slane %v1336_v54, %v704_v42  ;;  %v2478_v63 = vrot.slane %v1336_v54, %v733_v44 }
  0x83   : > { %v1155_v26 = vrot.slane %v1117_v21, 1  ;;  %v1157_v28 = vrot.slane %v1118_v40, 1  ;;  %v1158_v29 = vrot.slane %v1119_v22, 1  ;;  %v2488_v11 = vrot.slane %v1336_v54, %v769_v57 }
  0x84   : > { %v1082_v2 = vadd.f32 %v1074_v19, %v1045_v24  ;;  %v1083_v30 = vadd.f32 %v1075_v20, %v1046_v25  ;;  %v1350_v52 = vmul.f32 %v2474_v62, %v1338_v0  ;;  %v1370_v42 = vmul.f32 %v2478_v63, %v1358_v18 }
  0x85   : > { %v1156_v31 = vsel %vm803_vm2, %v1154_v23, %v1155_v26  ;;  %v1159_v32 = vsel %vm803_vm2, %v1157_v28, %v1158_v29  ;;  %v1398_v15 = vmul.f32 %v2488_v11, %v1386_v12  ;;  %v2496_v53 = vrot.slane %v1336_v54, %v863_v60 }
  0x86   : > { %v1174_v34 = vadd.f32 %v1156_v31, %v1082_v2  ;;  %v1175_v5 = vadd.f32 %v1159_v32, %v1083_v30  ;;  %v1378_v39 = vadd.f32 %v1370_v42, %v1350_v52  ;;  %v2503_v22 = vrot.slane %v1336_v54, %v900_v9 }
  0x87   : > { %v2507_v23 = vrot.slane %v1336_v54, %v936_v27  ;;  %v2513_v2 = vrot.slane %v1336_v54, %v1029_v33  ;;  %vm1765_vm4 = vcmask 257024  }
  0x88   : > { %v1189_v35 = vadd.f32 %v2323_v46, %v1174_v34  ;;  %v1190_v37 = vadd.f32 %v2323_v46, %v1175_v5  ;;  %v2466_v46 = vld [vmem:[%s2675_s4] ss:$0 sm:$0xff]  ;;  %v1406_v16 = vadd.f32 %v1398_v15, %v1378_v39 }
  0x8a   : > { %v1197_v41 = vmax.f32 %v1189_v35, 0.0  ;;  %v1198_v51 = vmax.f32 %v1190_v37, 0.0  ;;  %v2521_v35 = vrot.slane %v1336_v54, %v1066_v43 }
  0x8c   : > { %v1205_v45 = vmin.f32 %v1197_v41, 6.0  ;;  %v1206_v47 = vmin.f32 %v1198_v51, 6.0 }
  0x8e   : > { %v1210_v48 = vpack.c.bf16 %v1206_v47, %v1205_v45 }
  0x90   : > { %1953 = vmatmul.mubr.msk.bf16.gmra.mxu0 %vm1226_vm3, %v1210_v48 }
 0x127   : > { %v1950_v55 = vpop.f32.mrf.mxu0 }
 0x128   : > { %v1282_v56 = vadd.f32 %v1950_v55, %v2466_v46 }
 0x129   : > { %v1273_v61 = vpop.f32.mrf.mxu0 }
 0x12a   : > { %v1306_v3 = vmax.f32 %v1282_v56, 0.0  ;;  %v1274_v58 = vadd.f32 %v2466_v46, %v1273_v61 }
 0x12b   : > { %v1951_v1 = vpop.f32.mrf.mxu0 }
 0x12c   : > { %v1314_v4 = vmin.f32 %v1306_v3, 6.0  ;;  %v1304_v59 = vmax.f32 %v1274_v58, 0.0  ;;  %v1285_v6 = vadd.f32 %v1951_v1, %v2466_v46 }
 0x12d   : > { %v1276_v7 = vpop.f32.mrf.mxu0 }
 0x12e   : > { %1325 = vst.msk [vmem:[#allocation2 + $0x31] sm:$0xff] %vm662_vm0, %v1314_v4  ;;  %v1312_v8 = vmin.f32 %v1304_v59, 6.0  ;;  %v1307_v44 = vmax.f32 %v1285_v6, 0.0  ;;  %v1277_v10 = vadd.f32 %v2466_v46, %v1276_v7  ;;  %v2540_v59 = vld [vmem:[%s2677_s6] ss:$0 sm:$0xff] }
 0x130   : > { %1321 = vst.msk [vmem:[#allocation2 + $0x11] sm:$0xff] %vm662_vm0, %v1312_v8  ;;  %v1315_v13 = vmin.f32 %v1307_v44, 6.0  ;;  %v1305_v36 = vmax.f32 %v1277_v10, 0.0 }
 0x132   : > { %1327 = vst.msk [vmem:[#allocation2 + $0x41] sm:$0xff] %vm662_vm0, %v1315_v13  ;;  %v1313_v14 = vmin.f32 %v1305_v36, 6.0 }
 0x134   : > { %1323 = vst.msk [vmem:[#allocation2 + $0x21] sm:$0xff] %vm662_vm0, %v1313_v14 }
 0x135   : > { %v1499_v51 = vld [vmem:[#allocation2 + $0x30] sm:$0xff] }
 0x136   : > { %v1527_v55 = vld [vmem:[#allocation2 + $0x31] sm:$0xff]  ;;  %v1511_v43 = vmul.f32 %v2513_v2, %v1499_v51  ;;  %v1428_v54 = vmul.f32 %v1499_v51, %v2496_v53 }
 0x137   : > { %v1339_v57 = vld [vmem:[#allocation2 + $0x10] sm:$0xff]  ;;  %v1539_v1 = vmul.f32 %v2521_v35, %v1527_v55  ;;  %v1456_v42 = vmul.f32 %v1527_v55, %v2503_v22 }
 0x138   : > { %v1359_v17 = vld [vmem:[#allocation2 + $0x11] sm:$0xff]  ;;  %v1351_v20 = vmul.f32 %v2474_v62, %v1339_v57  ;;  %v1426_v40 = vmul.f32 %v2496_v53, %v1339_v57  ;;  %v1353_v57 = vmul.f32 %v1499_v51, %v2474_v62 }
 0x139   : > { %v1387_v19 = vld [vmem:[#allocation2 + $0x12] sm:$0xff]  ;;  %v1371_v21 = vmul.f32 %v2478_v63, %v1359_v17  ;;  %v1454_v26 = vmul.f32 %v2503_v22, %v1359_v17  ;;  %v1417_v14 = vld [vmem:[#allocation2 + $0x40] sm:$0xff]  ;;  %v1373_v17 = vmul.f32 %v1527_v55, %v2478_v63 }
 0x13a   : > { %v1399_v60 = vmul.f32 %v2488_v11, %v1387_v19  ;;  %v1434_v25 = vadd.f32 %v1426_v40, %v1406_v16  ;;  %v1482_v27 = vmul.f32 %v2507_v23, %v1387_v19  ;;  %v1555_v4 = vld [vmem:[#allocation2 + $0x32] sm:$0xff] }
 0x13b   : > { %v1379_v24 = vadd.f32 %v1371_v21, %v1351_v20  ;;  %v1415_v28 = vld [vmem:[#allocation2 + $0x20] sm:$0xff]  ;;  %v1567_v44 = vmul.f32 %v2531_v38, %v1555_v4  ;;  %v1484_v36 = vmul.f32 %v1555_v4, %v2507_v23  ;;  %v1512_v20 = vmul.f32 %v2513_v2, %v1417_v14 }
 0x13c   : > { %v1443_v29 = vld [vmem:[#allocation2 + $0x21] sm:$0xff]  ;;  %v1427_v9 = vmul.f32 %v2496_v53, %v1415_v28  ;;  %v1462_v31 = vadd.f32 %v1454_v26, %v1434_v25  ;;  %v1510_v5 = vmul.f32 %v2513_v2, %v1415_v28  ;;  %v1352_v33 = vmul.f32 %v1415_v28, %v2474_v62 }
 0x13d   : > { %v1407_v30 = vadd.f32 %v1399_v60, %v1379_v24  ;;  %v1471_v32 = vld [vmem:[#allocation2 + $0x22] sm:$0xff]  ;;  %v1455_v34 = vmul.f32 %v2503_v22, %v1443_v29  ;;  %v1372_v45 = vmul.f32 %v1443_v29, %v2478_v63  ;;  %v1538_v48 = vmul.f32 %v2521_v35, %v1443_v29 }
 0x13e   : > { %v1490_v41 = vadd.f32 %v1482_v27, %v1462_v31  ;;  %v1483_v47 = vmul.f32 %v2507_v23, %v1471_v32  ;;  %v1400_v61 = vmul.f32 %v1471_v32, %v2488_v11  ;;  %v1566_v0 = vmul.f32 %v2531_v38, %v1471_v32  ;;  %v1445_v21 = vld [vmem:[#allocation2 + $0x41] sm:$0xff] }
 0x13f   : > { %v1435_v37 = vadd.f32 %v1427_v9, %v1407_v30  ;;  %v1380_v56 = vadd.f32 %v1372_v45, %v1352_v33  ;;  %v1381_v25 = vadd.f32 %v1373_v17, %v1353_v57  ;;  %v1540_v29 = vmul.f32 %v2521_v35, %v1445_v21  ;;  %v1473_v31 = vld [vmem:[#allocation2 + $0x42] sm:$0xff] }
 0x140   : > { %v1518_v50 = vadd.f32 %v1510_v5, %v1490_v41  ;;  %v1401_v9 = vmul.f32 %v1555_v4, %v2488_v11  ;;  %v1429_v41 = vmul.f32 %v2496_v53, %v1417_v14  ;;  %v1568_v33 = vmul.f32 %v2531_v38, %v1473_v31 }
 0x141   : > { %v1463_v49 = vadd.f32 %v1455_v34, %v1435_v37  ;;  %v1408_v18 = vadd.f32 %v1400_v61, %v1380_v56 }
 0x142   : > { %v1546_v58 = vadd.f32 %v1538_v48, %v1518_v50  ;;  %v1409_v37 = vadd.f32 %v1401_v9, %v1381_v25 }
 0x143   : > { %v1491_v3 = vadd.f32 %v1483_v47, %v1463_v49  ;;  %v1436_v52 = vadd.f32 %v1428_v54, %v1408_v18  ;;  %v1457_v54 = vmul.f32 %v2503_v22, %v1445_v21  ;;  %v1374_v18 = vmul.f32 %v1445_v21, %v2478_v63 }
 0x144   : > { %v1574_v7 = vadd.f32 %v1566_v0, %v1546_v58  ;;  %v1354_v0 = vmul.f32 %v1417_v14, %v2474_v62 }
 0x145   : > { %v1519_v6 = vadd.f32 %v1511_v43, %v1491_v3  ;;  %v1464_v12 = vadd.f32 %v1456_v42, %v1436_v52  ;;  %v1437_v43 = vadd.f32 %v1429_v41, %v1409_v37 }
 0x146   : > { %v1589_v10 = vadd.f32 %v2540_v59, %v1574_v7  ;;  %v1382_v7 = vadd.f32 %v1374_v18, %v1354_v0 }
 0x147   : > { %v1547_v8 = vadd.f32 %v1539_v1, %v1519_v6  ;;  %v1492_v16 = vadd.f32 %v1484_v36, %v1464_v12  ;;  %v1465_v6 = vadd.f32 %v1457_v54, %v1437_v43  ;;  %v1402_v12 = vmul.f32 %v1473_v31, %v2488_v11 }
 0x148   : > { %v1597_v15 = vmax.f32 %v1589_v10, 0.0 }
 0x149   : > { %v1575_v13 = vadd.f32 %v1567_v44, %v1547_v8  ;;  %v1520_v60 = vadd.f32 %v1512_v20, %v1492_v16  ;;  %v1505_v44 = vld [vmem:[#allocation2 + $0x90] sm:$0xff] }
 0x14a   : > { %v1605_v40 = vmin.f32 %v1597_v15, 6.0  ;;  %v2579_v20 = vmul.f32 %v2513_v2, %v1505_v44 }
 0x14b   : > { %v1590_v39 = vadd.f32 %v2540_v59, %v1575_v13  ;;  %v1548_v27 = vadd.f32 %v1540_v29, %v1520_v60 }
 0x14d   : > { %v1598_v19 = vmax.f32 %v1590_v39, 0.0  ;;  %v1576_v50 = vadd.f32 %v1568_v33, %v1548_v27 }
 0x14f   : > { %v1606_v24 = vmin.f32 %v1598_v19, 6.0  ;;  %v1591_v1 = vadd.f32 %v2540_v59, %v1576_v50  ;;  %v1410_v19 = vadd.f32 %v1402_v12, %v1382_v7  ;;  %v1533_v12 = vld [vmem:[#allocation2 + $0x91] sm:$0xff] }
 0x150   : > { %v1954_v26 = vpop.f32.mrf.mxu0 }
 0x151   : > { %v1613_v28 = vpack.c.bf16 %v1606_v24, %v1605_v40  ;;  %v1298_v30 = vadd.f32 %v1954_v26, %v2466_v46  ;;  %v1599_v52 = vmax.f32 %v1591_v1, 0.0 }
 0x152   : > { %v1289_v32 = vpop.f32.mrf.mxu0 }
 0x153   : > { %1960 = vmatprep.mubr.msk.bf16.mxu1 %vm662_vm0, %v1613_v28  ;;  %v1310_v34 = vmax.f32 %v1298_v30, 0.0  ;;  %v1290_v5 = vadd.f32 %v2466_v46, %v1289_v32  ;;  %v2581_v21 = vmin.f32 %v1599_v52, 6.0 }
 0x154   : > { %v1955_v51 = vpop.f32.mrf.mxu0 }
 0x155   : > { %v1318_v45 = vmin.f32 %v1310_v34, 6.0  ;;  %v1308_v47 = vmax.f32 %v1290_v5, 0.0  ;;  %v1301_v48 = vadd.f32 %v1955_v51, %v2466_v46 }
 0x156   : > { %v1292_v49 = vpop.f32.mrf.mxu0 }
 0x157   : > { %1333 = vst.msk [vmem:[#allocation2 + $0x71] sm:$0xff] %vm662_vm0, %v1318_v45  ;;  %v1316_v55 = vmin.f32 %v1308_v47, 6.0  ;;  %v1311_v56 = vmax.f32 %v1301_v48, 0.0  ;;  %v1293_v61 = vadd.f32 %v2466_v46, %v1292_v49  ;;  %v1485_v46 = vmul.f32 %v2507_v23, %v1473_v31 }
 0x159   : > { %1329 = vst.msk [vmem:[#allocation2 + $0x51] sm:$0xff] %vm662_vm0, %v1316_v55  ;;  %v1319_v3 = vmin.f32 %v1311_v56, 6.0  ;;  %v1309_v58 = vmax.f32 %v1293_v61, 0.0  ;;  %v1493_v10 = vadd.f32 %v1485_v46, %v1465_v6 }
 0x15b   : > { %1335 = vst.msk [vmem:[#allocation2 + $0x81] sm:$0xff] %vm662_vm0, %v1319_v3  ;;  %v1317_v4 = vmin.f32 %v1309_v58, 6.0 }
 0x15d   : > { %1331 = vst.msk [vmem:[#allocation2 + $0x61] sm:$0xff] %vm662_vm0, %v1317_v4 }
 0x15e   : > { %v1503_v42 = vld [vmem:[#allocation2 + $0x70] sm:$0xff] }
 0x15f   : > { %v2568_v8 = vld [vmem:[#allocation2 + $0x71] sm:$0xff]  ;;  %v1357_v15 = vmul.f32 %v1503_v42, %v2474_v62  ;;  %v1515_v60 = vmul.f32 %v2513_v2, %v1503_v42 }
 0x160   : > { %v2571_v13 = vld [vmem:[#allocation2 + $0x72] sm:$0xff]  ;;  %v1377_v16 = vmul.f32 %v2568_v8, %v2478_v63 }
 0x161   : > { %v1501_v36 = vld [vmem:[#allocation2 + $0x50] sm:$0xff]  ;;  %v1405_v29 = vmul.f32 %v2571_v13, %v2488_v11 }
 0x162   : > { %v1529_v14 = vld [vmem:[#allocation2 + $0x51] sm:$0xff]  ;;  %v1513_v57 = vmul.f32 %v2513_v2, %v1501_v36  ;;  %v1355_v17 = vmul.f32 %v1501_v36, %v2474_v62  ;;  %v1430_v24 = vmul.f32 %v1501_v36, %v2496_v53  ;;  %v1421_v30 = vld [vmem:[#allocation2 + $0x80] sm:$0xff]  ;;  %v1385_v37 = vadd.f32 %v1377_v16, %v1357_v15 }
 0x163   : > { %v1557_v39 = vld [vmem:[#allocation2 + $0x52] sm:$0xff]  ;;  %v1375_v40 = vmul.f32 %v1529_v14, %v2478_v63  ;;  %v1541_v26 = vmul.f32 %v2521_v35, %v1529_v14  ;;  %v2590_v9 = vld [vmem:[#allocation2 + $0x81] sm:$0xff]  ;;  %v1458_v5 = vmul.f32 %v1529_v14, %v2503_v22  ;;  %v1433_v50 = vmul.f32 %v2496_v53, %v1421_v30 }
 0x164   : > { %v1521_v25 = vadd.f32 %v1513_v57, %v1493_v10  ;;  %v1403_v28 = vmul.f32 %v1557_v39, %v2488_v11  ;;  %v1419_v32 = vld [vmem:[#allocation2 + $0x60] sm:$0xff]  ;;  %v1438_v27 = vadd.f32 %v1430_v24, %v1410_v19  ;;  %v1569_v51 = vmul.f32 %v2531_v38, %v1557_v39  ;;  %v1561_v19 = vld [vmem:[#allocation2 + $0x92] sm:$0xff] }
 0x165   : > { %v1383_v31 = vadd.f32 %v1375_v40, %v1355_v17  ;;  %v1447_v34 = vld [vmem:[#allocation2 + $0x61] sm:$0xff]  ;;  %v1431_v33 = vmul.f32 %v2496_v53, %v1419_v32  ;;  %v1486_v45 = vmul.f32 %v1557_v39, %v2507_v23  ;;  %v1461_v55 = vmul.f32 %v2503_v22, %v2590_v9 }
 0x166   : > { %v1549_v41 = vadd.f32 %v1541_v26, %v1521_v25  ;;  %v1466_v48 = vadd.f32 %v1458_v5, %v1438_v27  ;;  %v1475_v49 = vld [vmem:[#allocation2 + $0x62] sm:$0xff]  ;;  %v1459_v61 = vmul.f32 %v2503_v22, %v1447_v34  ;;  %v1356_v43 = vmul.f32 %v1419_v32, %v2474_v62 }
 0x167   : > { %v1411_v47 = vadd.f32 %v1403_v28, %v1383_v31  ;;  %v1376_v54 = vmul.f32 %v1447_v34, %v2478_v63  ;;  %v1514_v0 = vmul.f32 %v2513_v2, %v1419_v32  ;;  %v1413_v18 = vadd.f32 %v1405_v29, %v1385_v37  ;;  %v1477_v7 = vld [vmem:[#allocation2 + $0x82] sm:$0xff] }
 0x168   : > { %v1577_v56 = vadd.f32 %v1569_v51, %v1549_v41  ;;  %v1494_v58 = vadd.f32 %v1486_v45, %v1466_v48  ;;  %v1487_v4 = vmul.f32 %v2507_v23, %v1475_v49  ;;  %v1404_v46 = vmul.f32 %v1475_v49, %v2488_v11 }
 0x169   : > { %v1439_v3 = vadd.f32 %v1431_v33, %v1411_v47  ;;  %v1384_v6 = vadd.f32 %v1376_v54, %v1356_v43  ;;  %v1542_v10 = vmul.f32 %v2521_v35, %v1447_v34  ;;  %v1441_v62 = vadd.f32 %v1433_v50, %v1413_v18 }
 0x16a   : > { %v1592_v1 = vadd.f32 %v2540_v59, %v1577_v56  ;;  %v1522_v44 = vadd.f32 %v1514_v0, %v1494_v58  ;;  %v1570_v36 = vmul.f32 %v2531_v38, %v1475_v49  ;;  %v1432_v39 = vmul.f32 %v1503_v42, %v2496_v53 }
 0x16b   : > { %v1467_v52 = vadd.f32 %v1459_v61, %v1439_v3  ;;  %v1412_v14 = vadd.f32 %v1404_v46, %v1384_v6  ;;  %v1469_v57 = vadd.f32 %v1461_v55, %v1441_v62  ;;  %v1489_v17 = vmul.f32 %v2507_v23, %v1477_v7 }
 0x16c   : > { %v1600_v63 = vmax.f32 %v1592_v1, 0.0  ;;  %v1550_v16 = vadd.f32 %v1542_v10, %v1522_v44  ;;  %v1460_v24 = vmul.f32 %v2568_v8, %v2503_v22  ;;  %v1545_v25 = vmul.f32 %v2521_v35, %v1533_v12 }
 0x16d   : > { %v1495_v15 = vadd.f32 %v1487_v4, %v1467_v52  ;;  %v1440_v40 = vadd.f32 %v1432_v39, %v1412_v14  ;;  %v1543_v28 = vmul.f32 %v2521_v35, %v2568_v8  ;;  %v1497_v31 = vadd.f32 %v1489_v17, %v1469_v57 }
 0x16e   : > { %v1608_v11 = vmin.f32 %v1600_v63, 6.0  ;;  %v1578_v29 = vadd.f32 %v1570_v36, %v1550_v16  ;;  %v1488_v32 = vmul.f32 %v2571_v13, %v2507_v23  ;;  %v1573_v27 = vmul.f32 %v2531_v38, %v1561_v19 }
 0x16f   : > { %v1523_v26 = vadd.f32 %v1515_v60, %v1495_v15  ;;  %v1468_v42 = vadd.f32 %v1460_v24, %v1440_v40  ;;  %v1571_v22 = vmul.f32 %v2531_v38, %v2571_v13  ;;  %v1525_v60 = vadd.f32 %v2579_v20, %v1497_v31 }
 0x170   : > { %v1614_v53 = vpack.c.bf16 %v1608_v11, %v2581_v21  ;;  %v1593_v5 = vadd.f32 %v2540_v59, %v1578_v29  ;;  %v1516_v37 = vmul.f32 %v2513_v2, %v1421_v30  ;;  %v1544_v23 = vmul.f32 %v2521_v35, %v2590_v9 }
 0x171   : > { %v1551_v34 = vadd.f32 %v1543_v28, %v1523_v26  ;;  %v1496_v8 = vadd.f32 %v1488_v32, %v1468_v42  ;;  %v1553_v41 = vadd.f32 %v1545_v25, %v1525_v60  ;;  %v1572_v48 = vmul.f32 %v2531_v38, %v1477_v7  ;;  %v1909_v38 = vld [vmem:[%s2679_s8] ss:$0 sm:$0xff] }
 0x172   : > { %1961 = vmatmul.mubr.msk.bf16.vlgmr.msra.gmra.mxu1 %vm662_vm0, %v1614_v53  ;;  %v1601_v45 = vmax.f32 %v1593_v5, 0.0 }
 0x173   : > { %v1579_v21 = vadd.f32 %v1571_v22, %v1551_v34  ;;  %v1524_v51 = vadd.f32 %v1516_v37, %v1496_v8  ;;  %v1581_v47 = vadd.f32 %v1573_v27, %v1553_v41 }
 0x174   : > { %v1609_v2 = vmin.f32 %v1601_v45, 6.0 }
 0x175   : > { %v1594_v33 = vadd.f32 %v2540_v59, %v1579_v21  ;;  %v1552_v13 = vadd.f32 %v1544_v23, %v1524_v51  ;;  %v1596_v49 = vadd.f32 %v2540_v59, %v1581_v47 }
 0x177   : > { %v1602_v20 = vmax.f32 %v1594_v33, 0.0  ;;  %v1580_v50 = vadd.f32 %v1572_v48, %v1552_v13  ;;  %v1604_v56 = vmax.f32 %v1596_v49, 0.0 }
 0x179   : > { %v1610_v30 = vmin.f32 %v1602_v20, 6.0  ;;  %v1595_v55 = vadd.f32 %v2540_v59, %v1580_v50  ;;  %v1612_v43 = vmin.f32 %v1604_v56, 6.0 }
 0x17b   : > { %v1615_v61 = vpack.c.bf16 %v1610_v30, %v1609_v2  ;;  %v1603_v35 = vmax.f32 %v1595_v55, 0.0 }
 0x17d   : > { %1964 = vmatprep.mubr.msk.bf16.mxu1 %vm662_vm0, %v1615_v61  ;;  %v1611_v9 = vmin.f32 %v1603_v35, 6.0 }
 0x17f   : > { %v1616_v54 = vpack.c.bf16 %v1612_v43, %v1611_v9 }
 0x181   : > { %1965 = vmatmul.mubr.msk.bf16.gmra.mxu1 %vm662_vm0, %v1616_v54 }
 0x232   : > { %v1962_v3 = vpop.f32.mrf.mxu1 }
 0x233   : > { %v1695_v59 = vadd.f32 %v1962_v3, %v1909_v38 }
 0x234   : > { %v1686_v58 = vpop.f32.mrf.mxu1 }
 0x235   : > { %v1719_v0 = vmax.f32 %v1695_v59, 0.0  ;;  %v1687_v18 = vadd.f32 %v1909_v38, %v1686_v58 }
 0x236   : > { %v1963_v1 = vpop.f32.mrf.mxu1 }
 0x237   : > { %v1727_v4 = vmin.f32 %v1719_v0, 6.0  ;;  %v1717_v6 = vmax.f32 %v1687_v18, 0.0  ;;  %v1698_v46 = vadd.f32 %v1963_v1, %v1909_v38 }
 0x238   : > { %v1689_v7 = vpop.f32.mrf.mxu1 }
 0x239   : > { %v1929_v52 = vpack.c.bf16 %v1727_v4, %v1727_v4  ;;  %v1725_v44 = vmin.f32 %v1717_v6, 6.0  ;;  %v1720_v10 = vmax.f32 %v1698_v46, 0.0  ;;  %v1690_v62 = vadd.f32 %v1909_v38, %v1689_v7 }
 0x23b   : > { %1768 = vst.msk [vmem:[%s2643_s20 + $0x8] sm:$0xf] %vm1765_vm4, %v1929_v52  ;;  %v1927_v12 = vpack.c.bf16 %v1725_v44, %v1725_v44  ;;  %v1728_v63 = vmin.f32 %v1720_v10, 6.0  ;;  %v1718_v36 = vmax.f32 %v1690_v62, 0.0 }
 0x23d   : > { %1766 = vst.msk [vmem:[%s2643_s20] sm:$0xf] %vm1765_vm4, %v1927_v12  ;;  %v1930_v14 = vpack.c.bf16 %v1728_v63, %v1728_v63  ;;  %v1726_v39 = vmin.f32 %v1718_v36, 6.0 }
 0x23f   : > { %1769 = vst.msk [vmem:[%s2643_s20 + $0xc] sm:$0xf] %vm1765_vm4, %v1930_v14  ;;  %v1928_v15 = vpack.c.bf16 %v1726_v39, %v1726_v39 }
 0x241   : > { %1767 = vst.msk [vmem:[%s2643_s20 + $0x4] sm:$0xf] %vm1765_vm4, %v1928_v15  ;;  %v1966_v16 = vpop.f32.mrf.mxu1 }
 0x242   : > { %v1711_v57 = vadd.f32 %v1966_v16, %v1909_v38 }
 0x243   : > { %v1702_v17 = vpop.f32.mrf.mxu1 }
 0x244   : > { %v1723_v19 = vmax.f32 %v1711_v57, 0.0  ;;  %v1703_v11 = vadd.f32 %v1909_v38, %v1702_v17 }
 0x245   : > { %v1967_v40 = vpop.f32.mrf.mxu1 }
 0x246   : > { %v1731_v24 = vmin.f32 %v1723_v19, 6.0  ;;  %v1721_v25 = vmax.f32 %v1703_v11, 0.0  ;;  %v1714_v26 = vadd.f32 %v1967_v40, %v1909_v38 }
 0x247   : > { %v1705_v28 = vpop.f32.mrf.mxu1 }
 0x248   : > { %v1933_v29 = vpack.c.bf16 %v1731_v24, %v1731_v24  ;;  %v1729_v31 = vmin.f32 %v1721_v25, 6.0  ;;  %v1724_v53 = vmax.f32 %v1714_v26, 0.0  ;;  %v1706_v42 = vadd.f32 %v1909_v38, %v1705_v28 }
 0x24a   : > { %1772 = vst.msk [vmem:[%s2643_s20 + $0x18] sm:$0xf] %vm1765_vm4, %v1933_v29  ;;  %v1931_v32 = vpack.c.bf16 %v1729_v31, %v1729_v31  ;;  %v1732_v27 = vmin.f32 %v1724_v53, 6.0  ;;  %v1722_v34 = vmax.f32 %v1706_v42, 0.0 }
 0x24c   : > { %1770 = vst.msk [vmem:[%s2643_s20 + $0x10] sm:$0xf] %vm1765_vm4, %v1931_v32  ;;  %v1934_v22 = vpack.c.bf16 %v1732_v27, %v1732_v27  ;;  %v1730_v5 = vmin.f32 %v1722_v34, 6.0 }
 0x24e   : > { %1773 = vst.msk [vmem:[%s2643_s20 + $0x1c] sm:$0xf] %vm1765_vm4, %v1934_v22  ;;  %v1932_v60 = vpack.c.bf16 %v1730_v5, %v1730_v5 }
 0x250   : > { %1771 = vst.msk [vmem:[%s2643_s20 + $0x14] sm:$0xf] %vm1765_vm4, %v1932_v60 }
 0x251 PF: > { %p16_p9 = scmp.ge.s32.totalorder %s2091_s13, 4   ;;  %s2681_s30 = smov %s2017_s10 }
 0x252   : > { %s2682_s10 = smov %s2100_s16  ;;  %s2683_s11 = smov %s2091_s13 }
 0x253   :  { %18 = sbr.rel (!%p16_p9) target bundleno = 2 (0x2), region = 145 }

// kernel: _lambda_.9
= control target key start
LH: loop header
LB: loop body
LE: loop exit
PB: predicated region body
PF: predicated region fallthrough
CT: control target
= control target key end

     0   :  { %s1388_s30 = smov 0   ;;  %s1390_s10 = smov 0   ;;  %s1653_s0 = inlined_call_operand.vmem [shape: bf16[4,2,2,2,128], index: 0, kind: input, shape index: {}]   ;;  %s1654_s1 = inlined_call_operand.vmem [shape: f32[9,128], index: 1, kind: input, shape index: {}]   ;;  %s1655_s2 = inlined_call_operand.vmem [shape: f32[1,128], index: 2, kind: input, shape index: {}]   ;;  %s1656_s3 = inlined_call_operand.vmem [shape: bf16[128,256], index: 3, kind: input, shape index: {}]   ;;  %s1657_s4 = inlined_call_operand.vmem [shape: f32[1,256], index: 4, kind: input, shape index: {}, may-alias: {4,6,8}]   ;;  %s1658_s5 = inlined_call_operand.vmem [shape: f32[9,256], index: 5, kind: input, shape index: {}]   ;;  %s1659_s6 = inlined_call_operand.vmem [shape: f32[1,256], index: 6, kind: input, shape index: {}, may-alias: {4,6,8}]   ;;  %s1660_s7 = inlined_call_operand.vmem [shape: bf16[256,256], index: 7, kind: input, shape index: {}]   ;;  %s1661_s8 = inlined_call_operand.vmem [shape: f32[1,256], index: 8, kind: input, shape index: {}, may-alias: {4,6,8}]   ;;  %s1662_s9 = inlined_call_operand.vmem [shape: bf16[2,1,256], index: 9, kind: output, shape index: {}]  }
   0x1   :  { %s1392_s11 = smov 0  }
   0x2 LB: > { %s1134_s12 = sadd.s32 4294967295, %s1332_s11   ;;  %s1405_s13 = sadd.s32 1, %s1332_s11   ;;  %s1332_s11 = sphi %s1392_s11, %s1665_s11   ;;  %s1328_s10 = sphi %s1390_s10, %s1664_s10   ;;  %s1324_s30 = sphi %s1388_s30, %s1663_s30  }
   0x3   : > { %s23_s14 = ssub.s32 %s1332_s11, %s1405_s13  ;;  %s26_s15 = sadd.s32 1, %s1328_s10 }
   0x4   : > { %p24_p0 = scmp.eq.s32.totalorder %s23_s14, 0  ;;  %p33_p1 = scmp.ne.s32.totalorder %s1328_s10, %s1324_s30 }
   0x5   : > { %p34_p2 = scmp.eq.s32.totalorder %s1332_s11, 0  ;;  %p1137_p4 = scmp.ge.s32.totalorder %s1332_s11, 2 }
   0x6   : > { %s1414_s16 = scalar_select %p24_p0, %s1328_s10, %s26_s15  }
   0x7   : > { %p35_p3 = por %p34_p2, %p33_p1  ;;  %277 = sbr.rel (%p1137_p4) target bundleno = 18 (0x12), region = 48 }
   0xc   : > { %280 = sbr.rel (!%p35_p3) target bundleno = 18 (0x12), region = 52  ;;  %s282_s17 = sand.u32 (%p35_p3), 1, %s1328_s10  }
   0xd   : > { %s1139_s18 = sshll.u32 (%p35_p3), %s1332_s11, 1  ;;  %s1138_s19 = sshll.u32 (%p35_p3), %s282_s17, 3 }
   0xe   : > { %s286_s22 = scalar_lea.vmem (%p35_p3), %s1653_s0, %s1139_s18  ;;  %s284_s23 = scalar_lea.vmem (%p35_p3), [#allocation3], %s1138_s19 }
   0xf   : > { %v303_v0 = vld [vmem:[%s286_s22] sm:$0x3] (%p35_p3)  ;;  %v305_v1 = vld [vmem:[%s286_s22 + $0x4] sm:$0x3] (%p35_p3)  ;;  %v307_v2 = vld [vmem:[%s286_s22 + $0x8] sm:$0x3] (%p35_p3) }
  0x10   : > { %304 = vst [vmem:[%s284_s23] sm:$0x3] (%p35_p3), %v303_v0  ;;  %306 = vst [vmem:[%s284_s23 + $0x2] sm:$0x3] (%p35_p3), %v305_v1  ;;  %v309_v3 = vld [vmem:[%s286_s22 + $0xc] sm:$0x3] (%p35_p3) }
  0x11   : > { %308 = vst [vmem:[%s284_s23 + $0x4] sm:$0x3] %v307_v2  ;;  %310 = vst [vmem:[%s284_s23 + $0x6] sm:$0x3] %v309_v3 }
  0x12 PF: > { %p1140_p5 = scmp.ge.s32.totalorder %s1332_s11, 1  ;;  %p341_p6 = scmp.lt.s32.totalorder %s1332_s11, 3 }
  0x14   : > { %p342_p7 = pnand %p1140_p5, %p341_p6 }
  0x15   : > { %s348_s14 = sand.u32 (!%p342_p7), 1, %s1324_s30   ;;  %p382_p8 = scmp.lt.s32.totalorder (!%p342_p7), %s1134_s12, 1 }
  0x16   : > { %345 = sbr.rel (%p342_p7) target bundleno = 515 (0x203), region = 93  ;;  %s1141_s20 = sshll.u32 (!%p342_p7), %s348_s14, 3 }
  0x17   : > { %s1456_s28 = scalar_lea.vmem (!%p342_p7), [#allocation3], %s1141_s20 }
  0x1b   : > { %v1233_v4 = vld [vmem:[%s1656_s3 + $0x74] ss:$8 sps:$4 sm:$0xff]   ;;  %v1235_v5 = vld [vmem:[%s1656_s3 + $0x70] ss:$8 sps:$4 sm:$0xff]   ;;  %v1334_v6 = vmov 0   ;;  %v402_v7 = vlaneseq  ;;  %v390_v18 = vld [vmem:[%s1654_s1] sm:$0xff] }
  0x1c   : > { %623 = vmatprep.mubr.bf16.mxu0 %v1334_v6  ;;  %591 = vmatprep.subr.bf16.mxu0 %v1233_v4  ;;  %v1236_v8 = vld [vmem:[%s1656_s3 + $0x64] ss:$8 sps:$4 sm:$0xff]   ;;  %v1238_v9 = vld [vmem:[%s1656_s3 + $0x60] ss:$8 sps:$4 sm:$0xff]   ;;  %v1239_v10 = vld [vmem:[%s1656_s3 + $0x54] ss:$8 sps:$4 sm:$0xff]   ;;  %v430_v22 = vcombine.high %v390_v18, %v390_v18 }
  0x1d   : > { %592 = vmatpush1.bf16.msra.mxu0 %v1235_v5  ;;  %v1335_v11 = vmov 1983009808   ;;  %v1441_v13 = vshrl.u32 %v402_v7, 7  ;;  %v1241_v14 = vld [vmem:[%s1656_s3 + $0x50] ss:$8 sps:$4 sm:$0xff]   ;;  %vm657_vm0 = vcmp.lt.s32.totalorder %v402_v7, 256 }
  0x1e   : > { %593 = vmatprep.subr.bf16.mxu0 %v1236_v8  ;;  %v400_v12 = vunpack.c.l.s4 %v1335_v11  ;;  %v1242_v16 = vld [vmem:[%s1656_s3 + $0x44] ss:$8 sps:$4 sm:$0xff]   ;;  %v1244_v19 = vld [vmem:[%s1656_s3 + $0x40] ss:$8 sps:$4 sm:$0xff]   ;;  %v1245_v23 = vld [vmem:[%s1656_s3 + $0x34] ss:$8 sps:$4 sm:$0xff]  }
  0x1f   : > { %v392_v20 = vld [vmem:[%s1456_s28] sm:$0x1]  ;;  %v1143_v25 = vld [vmem:[%s1456_s28 + $0x2] sm:$0x1]  ;;  %v1146_v26 = vld [vmem:[%s1456_s28 + $0x4] sm:$0x1] }
  0x20   : > { %v401_v15 = vunpack.c.0.s8 %v400_v12  ;;  %v393_v24 = vunpack.c.l.bf16 %v392_v20  ;;  %v1247_v27 = vld [vmem:[%s1656_s3 + $0x30] ss:$8 sps:$4 sm:$0xff]   ;;  %v397_v28 = vunpack.c.l.bf16 %v1143_v25  ;;  %v1147_v32 = vld [vmem:[%s1456_s28 + $0x6] sm:$0x1]  ;;  %v422_v37 = vunpack.c.l.bf16 %v1146_v26  ;;  %v1250_v42 = vld [vmem:[%s1656_s3 + $0x20] ss:$8 sps:$4 sm:$0xff]  }
  0x21   : > { %594 = vmatpush1.bf16.msra.mxu0 %v1238_v9  ;;  %v1258_v33 = vld [vmem:[%s1660_s7 + $0x74] ss:$8 sps:$4 sm:$0xff]   ;;  %v1152_v34 = vld.sshfl [vmem:[%s1654_s1 + $0x8] sm:$0x1 pattern:$0x76325410]  ;;  %v429_v46 = vunpack.c.l.bf16 %v1147_v32 }
  0x22   : > { %595 = vmatprep.subr.bf16.mxu0 %v1239_v10  ;;  %v404_v17 = vsub.s32 %v401_v15, %v1441_v13  ;;  %v394_v31 = vmul.f32 %v393_v24, %v390_v18  ;;  %v1260_v39 = vld [vmem:[%s1660_s7 + $0x70] ss:$8 sps:$4 sm:$0xff]   ;;  %v1248_v40 = vld [vmem:[%s1656_s3 + $0x24] ss:$8 sps:$4 sm:$0xff]   ;;  %996 = vmatprep.subr.bf16.mxu1 %v1258_v33  ;;  %v1263_v48 = vld [vmem:[%s1660_s7 + $0x60] ss:$8 sps:$4 sm:$0xff]  }
  0x23   : > { %v1261_v41 = vld [vmem:[%s1660_s7 + $0x64] ss:$8 sps:$4 sm:$0xff]   ;;  %v1149_v47 = vld [vmem:[%s1456_s28 + $0x1] sm:$0x1]  ;;  %997 = vmatpush1.bf16.msra.mxu1 %v1260_v39  ;;  %v1251_v49 = vld [vmem:[%s1656_s3 + $0x14] ss:$8 sps:$4 sm:$0xff]  }
  0x24   : > { %v405_v21 = vrot.slane %v390_v18, %v404_v17  ;;  %v437_v38 = vrot.slane %v430_v22, %v404_v17  ;;  %998 = vmatprep.subr.bf16.mxu1 %v1261_v41  ;;  %v1264_v50 = vld [vmem:[%s1660_s7 + $0x54] ss:$8 sps:$4 sm:$0xff]   ;;  %v1150_v55 = vld [vmem:[%s1456_s28 + $0x3] sm:$0x1]  ;;  %v470_v56 = vrot.slane %v1152_v34, 7  ;;  %v449_v62 = vunpack.c.l.bf16 %v1149_v47  ;;  %s1667_s12 = smov (!%p382_p8, %s1134_s12), 1 }
  0x25   : > { %596 = vmatpush1.bf16.msra.mxu0 %v1241_v14  ;;  %v1266_v57 = vld [vmem:[%s1660_s7 + $0x50] ss:$8 sps:$4 sm:$0xff]   ;;  %v1267_v58 = vld [vmem:[%s1660_s7 + $0x44] ss:$8 sps:$4 sm:$0xff]   ;;  %v456_v2 = vunpack.c.l.bf16 %v1150_v55  ;;  %v1269_v4 = vld [vmem:[%s1660_s7 + $0x40] ss:$8 sps:$4 sm:$0xff]  }
  0x26   : > { %597 = vmatprep.subr.bf16.mxu0 %v1242_v16  ;;  %v1144_v29 = vrot.slane %v405_v21, 9  ;;  %v411_v30 = vcombine.high %v405_v21, %v405_v21  ;;  %v441_v53 = vmul.f32 %v437_v38, %v422_v37  ;;  %v450_v54 = vcombine.high %v437_v38, %v437_v38  ;;  %v1253_v59 = vld [vmem:[%s1656_s3 + $0x10] ss:$8 sps:$4 sm:$0xff]   ;;  %v1254_v63 = vld [vmem:[%s1656_s3 + $0x4] ss:$8 sps:$4 sm:$0xff]   ;;  %s1142_s14 = sshll.u32 %s1667_s12, 1 }
  0x27   : > { %v439_v61 = vmul.f32 %v437_v38, %v429_v46  ;;  %999 = vmatpush1.bf16.msra.mxu1 %v1263_v48  ;;  %v472_v5 = vmul.f32 %v470_v56, %v449_v62  ;;  %v1270_v6 = vld [vmem:[%s1660_s7 + $0x34] ss:$8 sps:$4 sm:$0xff]   ;;  %v1256_v8 = vld [vmem:[%s1656_s3] ss:$8 sps:$4 sm:$0xff]   ;;  %v1272_v16 = vld [vmem:[%s1660_s7 + $0x30] ss:$8 sps:$4 sm:$0xff]   ;;  %s385_s18 = scalar_lea.vmem %s1662_s9, %s1142_s14 }
  0x28   : > { %v409_v35 = vmul.f32 %v1144_v29, %v397_v28  ;;  %v412_v36 = vrot.slane %v411_v30, 7  ;;  %1000 = vmatprep.subr.bf16.mxu1 %v1264_v50  ;;  %v1148_v1 = vrot.slane %v441_v53, 9  ;;  %v1151_v3 = vrot.slane %v450_v54, 9  ;;  %v478_v18 = vld [vmem:[%s1655_s2] sm:$0x1] }
  0x29   : > { %598 = vmatpush1.bf16.msra.mxu0 %v1244_v19  ;;  %v452_v10 = vmul.f32 %v450_v54, %v449_v62  ;;  %v1153_v14 = vrot.slane %v472_v5, 9  ;;  %v1275_v25 = vld [vmem:[%s1660_s7 + $0x20] ss:$8 sps:$4 sm:$0xff]   ;;  %v1276_v26 = vld [vmem:[%s1660_s7 + $0x14] ss:$8 sps:$4 sm:$0xff]   ;;  %v1336_v28 = vmov 0.0  }
  0x2a   : > { %599 = vmatprep.subr.bf16.mxu0 %v1245_v23  ;;  %v410_v43 = vadd.f32 %v409_v35, %v394_v31  ;;  %v414_v44 = vmul.f32 %v412_v36, %v393_v24  ;;  %v423_v45 = vrot.slane %v412_v36, 2  ;;  %v460_v12 = vmul.f32 %v1151_v3, %v456_v2  ;;  %v1273_v24 = vld [vmem:[%s1660_s7 + $0x24] ss:$8 sps:$4 sm:$0xff]   ;;  %387 = vst [vmem:[#allocation2] sm:$0x77] %v1336_v28 }
  0x2b   : > { %1001 = vmatpush1.bf16.msra.mxu1 %v1266_v57  ;;  %388 = vst [vmem:[#allocation2 + $0x8] sm:$0x77] %v1336_v28  ;;  %389 = vst [vmem:[#allocation2 + $0x10] sm:$0x77] %v1336_v28  ;;  %v1279_v29 = vld [vmem:[%s1660_s7 + $0x4] ss:$8 sps:$4 sm:$0xff]  }
  0x2c   : > { %v1145_v51 = vrot.slane %v414_v44, 9  ;;  %v425_v52 = vmul.f32 %v423_v45, %v422_v37  ;;  %1002 = vmatprep.subr.bf16.mxu1 %v1267_v58  ;;  %v1281_v30 = vld [vmem:[%s1660_s7] ss:$8 sps:$4 sm:$0xff]   ;;  %v1282_v31 = vld [vmem:[%s1660_s7 + $0xf4] ss:$8 sps:$4 sm:$0xff]   ;;  %v1603_v54 = vsub.s32 1, %v1441_v13 }
  0x2d   : > { %600 = vmatpush1.bf16.msra.mxu0 %v1247_v27  ;;  %v1278_v27 = vld [vmem:[%s1660_s7 + $0x10] ss:$8 sps:$4 sm:$0xff]   ;;  %v1285_v33 = vld [vmem:[%s1660_s7 + $0xe4] ss:$8 sps:$4 sm:$0xff]   ;;  %v1287_v34 = vld [vmem:[%s1660_s7 + $0xe0] ss:$8 sps:$4 sm:$0xff]  }
  0x2e   : > { %601 = vmatprep.subr.bf16.mxu0 %v1248_v40  ;;  %v419_v60 = vadd.f32 %v1145_v51, %v410_v43  ;;  %v1284_v32 = vld [vmem:[%s1660_s7 + $0xf0] ss:$8 sps:$4 sm:$0xff]   ;;  %v1288_v35 = vld [vmem:[%s1660_s7 + $0xd4] ss:$8 sps:$4 sm:$0xff]   ;;  %v1291_v37 = vld [vmem:[%s1660_s7 + $0xc4] ss:$8 sps:$4 sm:$0xff]  }
  0x2f   : > { %1003 = vmatpush1.bf16.msra.mxu1 %v1269_v4  ;;  %v1290_v36 = vld [vmem:[%s1660_s7 + $0xd0] ss:$8 sps:$4 sm:$0xff]   ;;  %v1293_v38 = vld [vmem:[%s1660_s7 + $0xc0] ss:$8 sps:$4 sm:$0xff]   ;;  %v1294_v39 = vld [vmem:[%s1660_s7 + $0xb4] ss:$8 sps:$4 sm:$0xff]  }
  0x30   : > { %v426_v0 = vadd.f32 %v425_v52, %v419_v60  ;;  %1004 = vmatprep.subr.bf16.mxu1 %v1270_v6  ;;  %v1296_v40 = vld [vmem:[%s1660_s7 + $0xb0] ss:$8 sps:$4 sm:$0xff]   ;;  %v1297_v41 = vld [vmem:[%s1660_s7 + $0xa4] ss:$8 sps:$4 sm:$0xff]   ;;  %v1300_v43 = vld [vmem:[%s1660_s7 + $0x94] ss:$8 sps:$4 sm:$0xff]  }
  0x31   : > { %602 = vmatpush1.bf16.msra.mxu0 %v1250_v42  ;;  %v1299_v42 = vld [vmem:[%s1660_s7 + $0xa0] ss:$8 sps:$4 sm:$0xff]   ;;  %v1302_v44 = vld [vmem:[%s1660_s7 + $0x90] ss:$8 sps:$4 sm:$0xff]   ;;  %v1303_v45 = vld [vmem:[%s1660_s7 + $0x84] ss:$8 sps:$4 sm:$0xff]  }
  0x32   : > { %603 = vmatprep.subr.bf16.mxu0 %v1251_v49  ;;  %v440_v9 = vadd.f32 %v439_v61, %v426_v0  ;;  %v1305_v46 = vld [vmem:[%s1660_s7 + $0x80] ss:$8 sps:$4 sm:$0xff]   ;;  %v1337_v47 = vmov 1966171168   ;;  %v1594_v51 = vsub.s32 0, %v1441_v13  ;;  %vm1061_vm1 = vcmask 1040384  }
  0x33   : > { %1005 = vmatpush1.bf16.msra.mxu1 %v1272_v16  ;;  %v640_v48 = vunpack.c.l.s4 %v1337_v47  ;;  %v1306_v52 = vld [vmem:[%s1658_s5] ss:$8 sps:$4 sm:$0xff]   ;;  %vm1062_vm2 = vsmask.f32 256  ;;  %vm1064_vm3 = vcmask 1041409  }
  0x34   : > { %v446_v11 = vadd.f32 %v1148_v1, %v440_v9  ;;  %1006 = vmatprep.subr.bf16.mxu1 %v1273_v24  ;;  %v499_v53 = vld [vmem:[%s1657_s4] sm:$0x3]  ;;  %v1308_v9 = vld [vmem:[%s1658_s5 + $0x4] ss:$8 sps:$4 sm:$0xff]   ;;  %vm1065_vm4 = vsmask.f32 1280  ;;  %vm1063_vm5 = vmand %vm1061_vm1, %vm1062_vm2 }
  0x35   : > { %604 = vmatpush1.bf16.msra.mxu0 %v1253_v59  ;;  %v641_v49 = vunpack.c.0.s8 %v640_v48  ;;  %v584_v55 = vrot.slane %v499_v53, %v1594_v51  ;;  %v588_v57 = vrot.slane %v499_v53, %v1603_v54  ;;  %v665_v4 = vld [vmem:[#allocation2] ss:$4 sm:$0x3]  ;;  %v686_v5 = vld [vmem:[#allocation2 + $0x1] ss:$4 sm:$0x3]  ;;  %vm1066_vm6 = vmand %vm1064_vm3, %vm1065_vm4 }
  0x36   : > { %605 = vmatprep.subr.bf16.mxu0 %v1254_v63  ;;  %v453_v15 = vadd.f32 %v452_v10, %v446_v11  ;;  %v775_v47 = vld [vmem:[%s1659_s6] sm:$0x3]  ;;  %vm1067_vm7 = vmor %vm1066_vm6, %vm1063_vm5 }
  0x37   : > { %1007 = vmatpush1.bf16.msra.mxu1 %v1275_v25  ;;  %v1591_v50 = vsub.s32 %v641_v49, %v1441_v13 }
  0x38   : > { %v461_v17 = vadd.f32 %v460_v12, %v453_v15  ;;  %1008 = vmatprep.subr.bf16.mxu1 %v1276_v26  ;;  %v699_v15 = vld [vmem:[#allocation2 + $0x2] ss:$4 sm:$0x3]  ;;  %v1309_v26 = vld [vmem:[%s1658_s5 + $0x10] ss:$8 sps:$4 sm:$0x11]  }
  0x39   : > { %606 = vmatpush1.bf16.msra.mxu0 %v1256_v8  ;;  %v675_v56 = vrot.slane %v1306_v52, %v1591_v50 }
  0x3a   : > { %v477_v19 = vadd.f32 %v1153_v14, %v461_v17  ;;  %v717_v17 = vrot.slane %v1308_v9, %v1591_v50 }
  0x3b   : > { %1009 = vmatpush1.bf16.msra.mxu1 %v1278_v27  ;;  %v687_v60 = vcombine.high %v675_v56, %v675_v56  ;;  %v682_v2 = vrot.slane %v675_v56, %v1591_v50 }
  0x3c   : > { %v479_v20 = vadd.f32 %v478_v18, %v477_v19  ;;  %1010 = vmatprep.subr.bf16.mxu1 %v1279_v29  ;;  %v724_v27 = vrot.slane %v717_v17, %v1591_v50  ;;  %v729_v29 = vld [vmem:[#allocation2 + $0xa] ss:$4 sm:$0x3] }
  0x3d   : > { %v694_v3 = vrot.slane %v687_v60, %v1591_v50  ;;  %v684_v11 = vmul.f32 %v682_v2, %v665_v4  ;;  %v700_v14 = vcombine.high %v682_v2, %v682_v2 }
  0x3e   : > { %v480_v21 = vmax.f32 %v479_v20, 0.0 }
  0x3f   : > { %1011 = vmatpush1.bf16.msra.mxu1 %v1281_v30  ;;  %v696_v12 = vmul.f32 %v694_v3, %v686_v5  ;;  %v702_v20 = vmul.f32 %v700_v14, %v699_v15  ;;  %v743_v30 = vcombine.high %v724_v27, %v724_v27 }
  0x40   : > { %v481_v22 = vmin.f32 %v480_v21, 6.0  ;;  %1012 = vmatprep.subr.bf16.mxu1 %v1282_v31  ;;  %v705_v21 = vcombine.high %v694_v3, %v694_v3  ;;  %v764_v31 = vrot.slane %v1309_v26, %v1591_v50 }
  0x41   : > { %v697_v19 = vadd.f32 %v696_v12, %v684_v11 }
  0x42   : > { %v482_v23 = vpack.c.bf16 %v481_v22, %v481_v22  ;;  %v704_v22 = vld [vmem:[#allocation2 + $0x8] ss:$4 sm:$0x3] }
  0x43   : > { %1013 = vmatpush2.bf16.msra.mxu1 %v1284_v32  ;;  %v703_v24 = vadd.f32 %v702_v20, %v697_v19  ;;  %v707_v25 = vmul.f32 %v705_v21, %v704_v22 }
  0x44   : > { %624 = vmatmul.mubr.bf16.vlgmr.msra.gmra.mxu0 %v482_v23  ;;  %1014 = vmatprep.subr.bf16.mxu1 %v1285_v33  ;;  %v730_v23 = vcombine.high %v717_v17, %v717_v17  ;;  %v742_v33 = vld [vmem:[#allocation2 + $0x10] ss:$4 sm:$0x3] }
  0x45   : > { %v708_v7 = vadd.f32 %v707_v25, %v703_v24 }
  0x46   : > { %v737_v28 = vrot.slane %v730_v23, %v1591_v50 }
  0x47   : > { %1015 = vmatpush2.bf16.msra.mxu1 %v1287_v34 }
  0x48   : > { %1016 = vmatprep.subr.bf16.mxu1 %v1288_v35  ;;  %v739_v35 = vmul.f32 %v737_v28, %v729_v29 }
  0x4b   : > { %1017 = vmatpush2.bf16.msra.mxu1 %v1290_v36  ;;  %v749_v36 = vcombine.high %v737_v28, %v737_v28 }
  0x4c   : > { %1018 = vmatprep.subr.bf16.mxu1 %v1291_v37  ;;  %v748_v37 = vld [vmem:[#allocation2 + $0x11] ss:$4 sm:$0x3] }
  0x4f   : > { %1019 = vmatpush2.bf16.msra.mxu1 %v1293_v38 }
  0x50   : > { %1020 = vmatprep.subr.bf16.mxu1 %v1294_v39  ;;  %v745_v39 = vmul.f32 %v743_v30, %v742_v33 }
  0x53   : > { %1021 = vmatpush2.bf16.msra.mxu1 %v1296_v40  ;;  %v771_v40 = vrot.slane %v764_v31, %v1591_v50 }
  0x54   : > { %1022 = vmatprep.subr.bf16.mxu1 %v1297_v41  ;;  %v754_v41 = vld [vmem:[#allocation2 + $0x12] ss:$4 sm:$0x3] }
  0x57   : > { %1023 = vmatpush2.bf16.msra.mxu1 %v1299_v42 }
  0x58   : > { %1024 = vmatprep.subr.bf16.mxu1 %v1300_v43  ;;  %v751_v43 = vmul.f32 %v749_v36, %v748_v37 }
  0x5b   : > { %1025 = vmatpush2.bf16.msra.mxu1 %v1302_v44 }
  0x5c   : > { %1026 = vmatprep.subr.bf16.mxu1 %v1303_v45  ;;  %v773_v45 = vmul.f32 %v771_v40, %v754_v41 }
  0x5f   : > { %1027 = vmatpush2.bf16.msra.mxu1 %v1305_v46 }
 0x104   : > { %v625_v58 = vpop.f32.mrf.mxu0 }
 0x105   : > { %v626_v59 = vadd.f32 %v625_v58, %v584_v55 }
 0x106   : > { %v627_v61 = vpop.f32.mrf.mxu0 }
 0x107   : > { %v632_v62 = vmax.f32 %v626_v59, 0.0  ;;  %v628_v63 = vadd.f32 %v627_v61, %v588_v57  ;;  %v824_v59 = vld [vmem:[%s1661_s8] sm:$0x3] }
 0x108   : > { %v629_v0 = vpop.f32.mrf.mxu0  ;;  %v989_v60 = vrot.slane %v824_v59, %v1594_v51  ;;  %v993_v61 = vrot.slane %v824_v59, %v1603_v54 }
 0x109   : > { %v633_v1 = vmax.f32 %v628_v63, 0.0  ;;  %v634_v6 = vmin.f32 %v632_v62, 6.0 }
 0x10a   : > { %v630_v13 = vpop.f32.mrf.mxu0 }
 0x10b   : > { %v635_v8 = vmin.f32 %v633_v1, 6.0 }
 0x10d   : > { %v638_v10 = vcombine.low %v634_v6, %v635_v8  ;;  %v1068_v8 = vld [vmem:[%s385_s18] sm:$0x3] }
 0x10f   : > { %v645_v16 = vrot.slane %v638_v10, %v1591_v50 }
 0x111   : > { %v652_v18 = vrot.slane %v645_v16, %v1591_v50 }
 0x113   : > { %660 = vst.msk [vmem:[#allocation2 + $0x9] ss:$4 sm:$0x3] %vm657_vm0, %v652_v18 }
 0x11a   : > { %v709_v32 = vld [vmem:[#allocation2 + $0x9] ss:$4 sm:$0x3] }
 0x11b   : > { %v726_v34 = vmul.f32 %v724_v27, %v709_v32 }
 0x11d   : > { %v727_v38 = vadd.f32 %v726_v34, %v708_v7 }
 0x11f   : > { %v740_v42 = vadd.f32 %v739_v35, %v727_v38 }
 0x121   : > { %v746_v44 = vadd.f32 %v745_v39, %v740_v42 }
 0x123   : > { %v752_v46 = vadd.f32 %v751_v43, %v746_v44 }
 0x125   : > { %v774_v48 = vadd.f32 %v773_v45, %v752_v46 }
 0x127   : > { %v776_v49 = vadd.f32 %v775_v47, %v774_v48 }
 0x129   : > { %v777_v52 = vmax.f32 %v776_v49, 0.0 }
 0x12b   : > { %v778_v53 = vmin.f32 %v777_v52, 6.0 }
 0x12d   : > { %v787_v55 = vrot.slane %v778_v53, %v1603_v54  ;;  %v783_v56 = vrot.slane %v778_v53, %v1594_v51 }
 0x12f   : > { %v791_v57 = vpack.c.bf16 %v787_v55, %v787_v55  ;;  %v790_v58 = vpack.c.bf16 %v783_v56, %v783_v56 }
 0x131   : > { %1028 = vmatprep.mubr.bf16.mxu1 %v791_v57 }
 0x132   : > { %1029 = vmatmul.mubr.bf16.vlgmr.msra.gmra.mxu1 %v790_v58 }
 0x1f2   : > { %v1030_v62 = vpop.f32.mrf.mxu1 }
 0x1f3   : > { %v1031_v63 = vadd.f32 %v1030_v62, %v989_v60 }
 0x1f4   : > { %v1032_v0 = vpop.f32.mrf.mxu1 }
 0x1f5   : > { %v1037_v1 = vmax.f32 %v1031_v63, 0.0  ;;  %v1033_v2 = vadd.f32 %v1032_v0, %v993_v61 }
 0x1f6   : > { %v1034_v3 = vpop.f32.mrf.mxu1 }
 0x1f7   : > { %v1038_v13 = vmax.f32 %v1033_v2, 0.0  ;;  %v1039_v51 = vmin.f32 %v1037_v1, 6.0 }
 0x1f8   : > { %v1035_v4 = vpop.f32.mrf.mxu1 }
 0x1f9   : > { %v1040_v5 = vmin.f32 %v1038_v13, 6.0 }
 0x1fb   : > { %v1202_v54 = vpack.c.bf16 %v1040_v5, %v1039_v51 }
 0x1fd   : > { %v1052_v6 = vrot.slane %v1202_v54, %v1591_v50 }
 0x1ff   : > { %v1059_v9 = vrot.slane %v1052_v6, %v1591_v50 }
 0x201   : > { %v1069_v10 = vsel %vm1067_vm7, %v1059_v9, %v1068_v8 }
 0x202   : > { %1070 = vst [vmem:[%s385_s18] sm:$0x3] %v1069_v10 }
 0x203 PF: > { %p16_p9 = scmp.ge.s32.totalorder %s1405_s13, 4   ;;  %s1663_s30 = smov %s1328_s10 }
 0x204   : > { %s1664_s10 = smov %s1414_s16  ;;  %s1665_s11 = smov %s1405_s13 }
 0x205   :  { %18 = sbr.rel (!%p16_p9) target bundleno = 2 (0x2), region = 145 }

// kernel: _lambda_.8
= control target key start
LH: loop header
LB: loop body
LE: loop exit
PB: predicated region body
PF: predicated region fallthrough
CT: control target
= control target key end

     0   :  { %s3232_s0 = inlined_call_operand.vmem [shape: bf16[4,2,3,3,64], index: 0, kind: input, shape index: {}]   ;;  %s3233_s1 = inlined_call_operand.vmem [shape: f32[9,64], index: 1, kind: input, shape index: {}]   ;;  %s3234_s2 = inlined_call_operand.vmem [shape: f32[1,64], index: 2, kind: input, shape index: {}]   ;;  %s3235_s3 = inlined_call_operand.vmem [shape: bf16[64,128], index: 3, kind: input, shape index: {}]   ;;  %s3236_s4 = inlined_call_operand.vmem [shape: f32[1,128], index: 4, kind: input, shape index: {}, may-alias: {4,6,8,10,12,14,16,18,20,22,24}]   ;;  %s3237_s5 = inlined_call_operand.vmem [shape: f32[9,128], index: 5, kind: input, shape index: {}]   ;;  %s3238_s6 = inlined_call_operand.vmem [shape: f32[1,128], index: 6, kind: input, shape index: {}, may-alias: {4,6,8,10,12,14,16,18,20,22,24}]   ;;  %s3239_s7 = inlined_call_operand.vmem [shape: bf16[128,128], index: 7, kind: input, shape index: {}]   ;;  %s3240_s8 = inlined_call_operand.vmem [shape: f32[1,128], index: 8, kind: input, shape index: {}, may-alias: {4,6,8,10,12,14,16,18,20,22,24}]   ;;  %s3241_s9 = inlined_call_operand.vmem [shape: f32[9,128], index: 9, kind: input, shape index: {}]   ;;  %s3242_s10 = inlined_call_operand.vmem [shape: f32[1,128], index: 10, kind: input, shape index: {}, may-alias: {4,6,8,10,12,14,16,18,20,22,24}]   ;;  %s3243_s11 = inlined_call_operand.vmem [shape: bf16[128,128], index: 11, kind: input, shape index: {}]   ;;  %s3244_s12 = inlined_call_operand.vmem [shape: f32[1,128], index: 12, kind: input, shape index: {}, may-alias: {4,6,8,10,12,14,16,18,20,22,24}]   ;;  %s3245_s13 = inlined_call_operand.vmem [shape: f32[9,128], index: 13, kind: input, shape index: {}]   ;;  %s3246_s14 = inlined_call_operand.vmem [shape: f32[1,128], index: 14, kind: input, shape index: {}, may-alias: {4,6,8,10,12,14,16,18,20,22,24}]   ;;  %s3247_s15 = inlined_call_operand.vmem [shape: bf16[128,128], index: 15, kind: input, shape index: {}]   ;;  %s3248_s16 = inlined_call_operand.vmem [shape: f32[1,128], index: 16, kind: input, shape index: {}, may-alias: {4,6,8,10,12,14,16,18,20,22,24}]   ;;  %s3249_s17 = inlined_call_operand.vmem [shape: f32[9,128], index: 17, kind: input, shape index: {}]   ;;  %s3250_s18 = inlined_call_operand.vmem [shape: f32[1,128], index: 18, kind: input, shape index: {}, may-alias: {4,6,8,10,12,14,16,18,20,22,24}]   ;;  %s3251_s19 = inlined_call_operand.vmem [shape: bf16[128,128], index: 19, kind: input, shape index: {}]   ;;  %s3252_s20 = inlined_call_operand.vmem [shape: f32[1,128], index: 20, kind: input, shape index: {}, may-alias: {4,6,8,10,12,14,16,18,20,22,24}]   ;;  %s3253_s21 = inlined_call_operand.vmem [shape: f32[9,128], index: 21, kind: input, shape index: {}]   ;;  %s3254_s22 = inlined_call_operand.vmem [shape: f32[1,128], index: 22, kind: input, shape index: {}, may-alias: {4,6,8,10,12,14,16,18,20,22,24}]   ;;  %s3255_s23 = inlined_call_operand.vmem [shape: bf16[128,128], index: 23, kind: input, shape index: {}]   ;;  %s3256_s24 = inlined_call_operand.vmem [shape: f32[1,128], index: 24, kind: input, shape index: {}, may-alias: {4,6,8,10,12,14,16,18,20,22,24}]   ;;  %s3257_s25 = inlined_call_operand.vmem [shape: bf16[2,4,128], index: 25, kind: output, shape index: {}]  }
   0x1   :  { %3265 = sst [smem:[#allocation4_spill]] %s3232_s0 }
   0x2   :  { %3266 = sst [smem:[#allocation5_spill]] %s3233_s1 }
   0x3   :  { %3267 = sst [smem:[#allocation6_spill]] %s3234_s2 }
   0x4   :  { %3268 = sst [smem:[#allocation7_spill]] %s3235_s3 }
   0x5   :  { %3269 = sst [smem:[#allocation8_spill]] %s3236_s4 }
   0x6   :  { %3270 = sst [smem:[#allocation9_spill]] %s3237_s5 }
   0x7   :  { %3271 = sst [smem:[#allocation10_spill]] %s3238_s6 }
   0x8   :  { %3272 = sst [smem:[#allocation11_spill]] %s3239_s7 }
   0x9   :  { %3273 = sst [smem:[#allocation12_spill]] %s3240_s8 }
   0xa   :  { %3274 = sst [smem:[#allocation13_spill]] %s3241_s9 }
   0xb   :  { %s2801_s29 = smov 0   ;;  %s2803_s2 = smov 0  }
   0xc   :  { %s2805_s6 = smov 0  }
   0xd LB: > { %s2818_s7 = sadd.s32 1, %s2666_s6   ;;  %s42_s26 = sadd.s32 1, %s2662_s2  ;;  %s2666_s6 = sphi %s2805_s6, %s3289_s6   ;;  %s2662_s2 = sphi %s2803_s2, %s3288_s2   ;;  %s2658_s29 = sphi %s2801_s29, %s3287_s29  }
   0xe   : > { %s39_s3 = ssub.s32 %s2666_s6, %s2818_s7  ;;  %p49_p1 = scmp.ne.s32.totalorder %s2662_s2, %s2658_s29 }
   0xf   : > { %p40_p0 = scmp.eq.s32.totalorder %s39_s3, 0  ;;  %p50_p2 = scmp.eq.s32.totalorder %s2666_s6, 0 }
  0x10   : > { %p2319_p4 = scmp.ge.s32.totalorder %s2666_s6, 2 }
  0x11   : > { %s2827_s1 = scalar_select %p40_p0, %s2662_s2, %s42_s26  }
  0x12   : > { %p51_p3 = por %p50_p2, %p49_p1  ;;  %677 = sbr.rel (%p2319_p4) target bundleno = 37 (0x25), region = 112 }
  0x17   : > { %680 = sbr.rel (!%p51_p3) target bundleno = 37 (0x25), region = 116  ;;  %s682_s8 = sand.u32 (%p51_p3), 1, %s2662_s2  }
  0x18   : > { %s2571_s27 = smul.u32 (%p51_p3), 6, %s2666_s6  ;;  %s3275_s5 = sld [smem:[#allocation4_spill]] (%p51_p3) }
  0x19   : > { %s2570_s4 = smul.u32 (%p51_p3), 24, %s682_s8 }
  0x1b   : > { %s684_s3 = scalar_lea.vmem (%p51_p3), [#allocation3], %s2570_s4 }
  0x1e   : > { %s687_s0 = scalar_lea.vmem %s3275_s5, %s2571_s27 }
  0x1f   : > { %v704_v0 = vld [vmem:[%s687_s0] sm:$0xf]   ;;  %v708_v1 = vld [vmem:[%s687_s0 + $0x4] sm:$0x3]  ;;  %v710_v2 = vld [vmem:[%s687_s0 + $0xc] sm:$0xf]  }
  0x20   : > { %705 = vst [vmem:[%s684_s3] sm:$0xf] %v704_v0   ;;  %709 = vst [vmem:[%s684_s3 + $0x4] sm:$0x3] %v708_v1  ;;  %v714_v3 = vld [vmem:[%s687_s0 + $0x10] sm:$0x3] }
  0x21   : > { %v716_v4 = vld [vmem:[%s687_s0 + $0x18] sm:$0xf]   ;;  %711 = vst [vmem:[%s684_s3 + $0x6] sm:$0xf] %v710_v2   ;;  %715 = vst [vmem:[%s684_s3 + $0xa] sm:$0x3] %v714_v3 }
  0x22   : > { %717 = vst [vmem:[%s684_s3 + $0xc] sm:$0xf] %v716_v4   ;;  %v720_v5 = vld [vmem:[%s687_s0 + $0x1c] sm:$0x3]  ;;  %v722_v6 = vld [vmem:[%s687_s0 + $0x24] sm:$0xf]  }
  0x23   : > { %v726_v7 = vld [vmem:[%s687_s0 + $0x28] sm:$0x3]  ;;  %721 = vst [vmem:[%s684_s3 + $0x10] sm:$0x3] %v720_v5  ;;  %723 = vst [vmem:[%s684_s3 + $0x12] sm:$0xf] %v722_v6  }
  0x24   : > { %727 = vst [vmem:[%s684_s3 + $0x16] sm:$0x3] %v726_v7 }
  0x25 PF: > { %p2321_p5 = scmp.ge.s32.totalorder %s2666_s6, 1  ;;  %p774_p6 = scmp.lt.s32.totalorder %s2666_s6, 3 }
  0x27   : > { %p775_p7 = pnand %p2321_p5, %p774_p6 }
  0x28   : > { %s3276_s27 = sld [smem:[#allocation7_spill]] (!%p775_p7)  ;;  %s781_s9 = sand.u32 (!%p775_p7), 1, %s2658_s29  }
  0x29   : > { %778 = sbr.rel (%p775_p7) target bundleno = 1479 (0x5c7), region = 157  ;;  %s3277_s4 = sld [smem:[#allocation5_spill]] (!%p775_p7) }
  0x2a   : > { %s2572_s5 = smul.u32 (!%p775_p7), 24, %s781_s9  ;;  %s3278_s8 = sld [smem:[#allocation6_spill]] (!%p775_p7) }
  0x2b   : > { %s3279_s9 = sld [smem:[#allocation11_spill]] (!%p775_p7)  ;;  %s3285_s29 = sadd.s32 (!%p775_p7), 4294967295, %s2666_s6  }
  0x2c   : > { %s2865_s28 = scalar_lea.vmem (!%p775_p7), [#allocation3], %s2572_s5  ;;  %s3280_s5 = sld [smem:[#allocation8_spill]] (!%p775_p7) }
  0x2d   : > { %s3281_s3 = sld [smem:[#allocation9_spill]] (!%p775_p7)  ;;  %p847_p8 = scmp.lt.s32.totalorder (!%p775_p7), %s3285_s29, 1 }
  0x2e   : > { %v2600_v8 = vld [vmem:[%s3276_s27 + $0x18] sm:$0xff]   ;;  %v862_v9 = vlaneseq  ;;  %v2668_v10 = vmov 0.0   ;;  %v2601_v11 = vld [vmem:[%s3276_s27 + $0x10] sm:$0xff]   ;;  %vm2669_vm0 = vmmov 0   ;;  %v2602_v13 = vld [vmem:[%s3276_s27 + $0x8] sm:$0xff]   ;;  %vm1057_vm1 = vcmask 523264  }
  0x2f   : > { %2458 = vmatprep.subr.bf16.mxu0 %v2668_v10  ;;  %852 = vst [vmem:[#allocation2] sm:$0xf] %v2668_v10  ;;  %853 = vst [vmem:[#allocation2 + $0x4] sm:$0xf] %v2668_v10  ;;  %2470 = vmatprep.subr.bf16.mxu1 %v2668_v10  ;;  %v2863_v14 = vld [vmem:[%s3277_s4] sm:$0xff]  ;;  %s3283_s0 = sld [smem:[#allocation12_spill]] }
  0x30   : > { %854 = vst [vmem:[#allocation2 + $0x8] sm:$0xf] %v2668_v10  ;;  %855 = vst [vmem:[#allocation2 + $0xc] sm:$0xf] %v2668_v10  ;;  %2459 = vmatpush3.bf16.msra.mxu0 %v2600_v8  ;;  %2466 = vmatprep.mubr.msk.bf16.mxu0 %vm2669_vm0, %v2668_v10  ;;  %v2855_v12 = vshrl.u32 %v862_v9, 7  ;;  %v2603_v37 = vld [vmem:[%s3276_s27] sm:$0xff]  }
  0x31   : > { %2460 = vmatprep.subr.bf16.mxu0 %v2668_v10  ;;  %2486 = vmatprep.mubr.msk.bf16.mxu1 %vm2669_vm0, %v2668_v10  ;;  %v858_v15 = vld [vmem:[%s2865_s28] sm:$0x1]  ;;  %v859_v16 = vld [vmem:[%s2865_s28 + $0x2] sm:$0x1]  ;;  %v2323_v21 = vld [vmem:[%s2865_s28 + $0x6] sm:$0x1] }
  0x32   : > { %v2870_v17 = vsub.s32 0, %v2855_v12  ;;  %v2873_v18 = vsub.s32 1, %v2855_v12  ;;  %v860_v19 = vunpack.c.l.bf16 %v858_v15  ;;  %v861_v20 = vunpack.c.l.bf16 %v859_v16  ;;  %v2324_v22 = vld [vmem:[%s2865_s28 + $0x8] sm:$0x1]  ;;  %v881_v23 = vld [vmem:[%s2865_s28] sm:$0x3] }
  0x33   : > { %v871_v25 = vunpack.c.l.bf16 %v2323_v21  ;;  %v872_v26 = vunpack.c.l.bf16 %v2324_v22  ;;  %v882_v28 = vld [vmem:[%s2865_s28 + $0x2] sm:$0x3]  ;;  %v2327_v29 = vld [vmem:[%s2865_s28 + $0xc] sm:$0x1]  ;;  %v2328_v30 = vld [vmem:[%s2865_s28 + $0xe] sm:$0x1]  ;;  %v883_v31 = vunpack.c.l.bf16 %v881_v23 }
  0x34   : > { %2461 = vmatpush3.bf16.msra.mxu0 %v2601_v11  ;;  %v865_v24 = vrot.slane %v2863_v14, %v2870_v17  ;;  %v876_v27 = vrot.slane %v2863_v14, %v2873_v18  ;;  %v884_v32 = vunpack.c.l.bf16 %v882_v28  ;;  %v2887_v33 = vsub.s32 2, %v2855_v12  ;;  %v2329_v35 = vld [vmem:[%s2865_s28 + $0x12] sm:$0x1]  ;;  %v2330_v36 = vld [vmem:[%s2865_s28 + $0x14] sm:$0x1]  ;;  %s3284_s30 = sld [smem:[#allocation13_spill]] }
  0x35   : > { %2462 = vmatprep.subr.bf16.mxu0 %v2668_v10  ;;  %v904_v34 = vunpack.c.l.bf16 %v2327_v29  ;;  %v2331_v42 = vld [vmem:[%s2865_s28 + $0xc] sm:$0x3]  ;;  %v905_v44 = vunpack.c.l.bf16 %v2328_v30  ;;  %v2899_v45 = vsub.s32 3, %v2855_v12  ;;  %v917_v46 = vunpack.c.l.bf16 %v2329_v35  ;;  %v2332_v47 = vld [vmem:[%s2865_s28 + $0xe] sm:$0x3] }
  0x36   : > { %v866_v38 = vmul.f32 %v865_v24, %v860_v19  ;;  %v867_v39 = vmul.f32 %v865_v24, %v861_v20  ;;  %v877_v40 = vmul.f32 %v876_v27, %v871_v25  ;;  %v878_v41 = vmul.f32 %v876_v27, %v872_v26  ;;  %v2335_v48 = vld [vmem:[%s2865_s28 + $0x2] sm:$0x1]  ;;  %v2336_v53 = vld [vmem:[%s2865_s28 + $0x4] sm:$0x1]  ;;  %v2337_v54 = vld [vmem:[%s2865_s28 + $0x8] sm:$0x1] }
  0x37   : > { %v888_v43 = vrot.slane %v2863_v14, %v2887_v33  ;;  %v918_v51 = vunpack.c.l.bf16 %v2330_v36  ;;  %v2904_v52 = vsub.s32 4, %v2855_v12  ;;  %v909_v57 = vrot.slane %v2863_v14, %v2899_v45  ;;  %v2338_v59 = vld [vmem:[%s2865_s28 + $0xa] sm:$0x1]  ;;  %v2339_v0 = vld [vmem:[%s2865_s28 + $0x2] sm:$0x3] }
  0x38   : > { %2463 = vmatpush3.bf16.msra.mxu0 %v2602_v13  ;;  %v879_v49 = vadd.f32 %v877_v40, %v866_v38  ;;  %v880_v50 = vadd.f32 %v878_v41, %v867_v39  ;;  %v929_v58 = vunpack.c.l.bf16 %v2331_v42  ;;  %v930_v61 = vunpack.c.l.bf16 %v2332_v47  ;;  %v2340_v5 = vld [vmem:[%s2865_s28 + $0x4] sm:$0x3]  ;;  %v2341_v11 = vld [vmem:[%s3277_s4 + $0x8] ss:$0 sm:$0xff]  ;;  %s3282_s28 = sld [smem:[#allocation10_spill]]  ;;  %s3286_s4 = smov %s3285_s29 }
  0x39   : > { %2464 = vmatprep.subr.bf16.mxu0 %v2668_v10  ;;  %v889_v55 = vmul.f32 %v888_v43, %v883_v31  ;;  %v890_v56 = vmul.f32 %v888_v43, %v884_v32  ;;  %v922_v60 = vrot.slane %v2863_v14, %v2904_v52  ;;  %v2914_v62 = vsub.s32 5, %v2855_v12  ;;  %s3291_s4 = smov (!%p847_p8, %s3286_s4), 1 }
  0x3a   : > { %v950_v63 = vunpack.c.l.bf16 %v2335_v48  ;;  %v910_v3 = vmul.f32 %v909_v57, %v904_v34  ;;  %v911_v4 = vmul.f32 %v909_v57, %v905_v44  ;;  %v951_v9 = vunpack.c.l.bf16 %v2336_v53  ;;  %v2344_v48 = vld [vmem:[%s3278_s8] ss:$0 sm:$0xff] }
  0x3b   : > { %v2325_v1 = vrot.slane %v889_v55, 9  ;;  %v2326_v2 = vrot.slane %v890_v56, 9  ;;  %v923_v6 = vmul.f32 %v922_v60, %v917_v46  ;;  %v924_v7 = vmul.f32 %v922_v60, %v918_v51 }
  0x3c   : > { %2465 = vmatpush3.bf16.msra.mxu0 %v2603_v37  ;;  %v934_v8 = vrot.slane %v2863_v14, %v2914_v62  ;;  %v2925_v16 = vsub.s32 6, %v2855_v12  ;;  %v963_v19 = vunpack.c.l.bf16 %v2337_v54  ;;  %v964_v22 = vunpack.c.l.bf16 %v2338_v59 }
  0x3d   : > { %2490 = vmatprep.subr.bf16.mxu0 %v2668_v10  ;;  %v899_v13 = vadd.f32 %v2325_v1, %v879_v49  ;;  %v900_v15 = vadd.f32 %v2326_v2, %v880_v50  ;;  %v2928_v23 = vsub.s32 7, %v2855_v12  ;;  %v975_v27 = vunpack.c.l.bf16 %v2339_v0 }
  0x3e   : > { %v935_v20 = vmul.f32 %v934_v8, %v929_v58  ;;  %v936_v21 = vmul.f32 %v934_v8, %v930_v61  ;;  %v955_v26 = vrot.slane %v2863_v14, %v2925_v16  ;;  %v976_v31 = vunpack.c.l.bf16 %v2340_v5  ;;  %v2607_v5 = vld [vmem:[%s3279_s9 + $0x20] sm:$0xff]   ;;  %v2610_v8 = vld [vmem:[%s3279_s9 + $0x8] sm:$0xff]  }
  0x3f   : > { %v912_v24 = vadd.f32 %v910_v3, %v899_v13  ;;  %v913_v25 = vadd.f32 %v911_v4, %v900_v15  ;;  %v968_v30 = vrot.slane %v2863_v14, %v2928_v23  ;;  %v981_v37 = vmul.f32 %v2341_v11, %v975_v27  ;;  %v2604_v3 = vld [vmem:[%s3279_s9 + $0x38] sm:$0xff]   ;;  %v2605_v4 = vld [vmem:[%s3279_s9 + $0x30] sm:$0xff]   ;;  %v1107_v13 = vld [vmem:[%s3281_s3] sm:$0xff] }
  0x40   : > { %v2333_v28 = vrot.slane %v935_v20, 9  ;;  %v2334_v29 = vrot.slane %v936_v21, 9  ;;  %v956_v35 = vmul.f32 %v955_v26, %v950_v63  ;;  %v957_v36 = vmul.f32 %v955_v26, %v951_v9  ;;  %2471 = vmatpush3.bf16.msra.mxu1 %v2604_v3  ;;  %v2611_v9 = vld [vmem:[%s3279_s9] sm:$0xff]  }
  0x41   : > { %v925_v32 = vadd.f32 %v923_v6, %v912_v24  ;;  %v926_v34 = vadd.f32 %v924_v7, %v913_v25  ;;  %v982_v38 = vmul.f32 %v2341_v11, %v976_v31  ;;  %v969_v41 = vmul.f32 %v968_v30, %v963_v19  ;;  %2472 = vmatprep.subr.bf16.mxu1 %v2668_v10  ;;  %v2608_v6 = vld [vmem:[%s3279_s9 + $0x18] sm:$0xff]   ;;  %v2609_v7 = vld [vmem:[%s3279_s9 + $0x10] sm:$0xff]   ;;  %v2345_v11 = vld [vmem:[%s3280_s5] ss:$0 sm:$0xff] }
  0x42   : > { %v970_v42 = vmul.f32 %v968_v30, %v964_v22  ;;  %v2342_v43 = vrot.slane %v981_v37, 9  ;;  %v2670_v50 = vmov 1983009808   ;;  %v1114_v21 = vrot.slane %v1107_v13, %v2870_v17  ;;  %v1109_v25 = vld [vmem:[#allocation2] sm:$0x3] }
  0x43   : > { %v945_v39 = vadd.f32 %v2333_v28, %v925_v32  ;;  %v946_v40 = vadd.f32 %v2334_v29, %v926_v34  ;;  %v2343_v44 = vrot.slane %v982_v38, 9  ;;  %v1010_v51 = vunpack.c.l.s4 %v2670_v50  ;;  %v1117_v26 = vld [vmem:[#allocation2 + $0x1] sm:$0x3] }
  0x44   : > { %2473 = vmatpush3.bf16.msra.mxu1 %v2605_v4  ;;  %v1122_v22 = vrot.slane %v1107_v13, %v2873_v18  ;;  %v1115_v30 = vmul.f32 %v1114_v21, %v1109_v25  ;;  %v1132_v32 = vrot.slane %v1107_v13, %v2887_v33  ;;  %v1127_v34 = vld [vmem:[#allocation2 + $0x2] sm:$0x3]  ;;  %v1142_v37 = vrot.slane %v1107_v13, %v2899_v45 }
  0x45   : > { %v958_v46 = vadd.f32 %v956_v35, %v945_v39  ;;  %v959_v47 = vadd.f32 %v957_v36, %v946_v40  ;;  %v1011_v57 = vunpack.c.0.s8 %v1010_v51  ;;  %2474 = vmatprep.subr.bf16.mxu1 %v2668_v10  ;;  %v1182_v3 = vrot.slane %v1107_v13, %v2928_v23 }
  0x46   : > { %v1123_v31 = vmul.f32 %v1122_v22, %v1117_v26  ;;  %v1133_v36 = vmul.f32 %v1132_v32, %v1127_v34 }
  0x47   : > { %v971_v14 = vadd.f32 %v969_v41, %v958_v46  ;;  %v972_v49 = vadd.f32 %v970_v42, %v959_v47  ;;  %v2938_v63 = vsub.s32 %v1011_v57, %v2855_v12  ;;  %v2606_v12 = vld [vmem:[%s3279_s9 + $0x28] sm:$0xff]   ;;  %v1152_v42 = vrot.slane %v1107_v13, %v2904_v52 }
  0x48   : > { %2475 = vmatpush3.bf16.msra.mxu1 %v2606_v12  ;;  %v1125_v35 = vadd.f32 %v1123_v31, %v1115_v30  ;;  %v1172_v57 = vrot.slane %v1107_v13, %v2925_v16  ;;  %v2352_v30 = vld [vmem:[%s3282_s28] ss:$0 sm:$0xff] }
  0x49   : > { %v991_v53 = vadd.f32 %v2342_v43, %v971_v14  ;;  %v992_v54 = vadd.f32 %v2343_v44, %v972_v49  ;;  %2476 = vmatprep.subr.bf16.mxu1 %v2668_v10  ;;  %v1162_v49 = vrot.slane %v1107_v13, %v2914_v62 }
  0x4a   : > { %v1135_v41 = vadd.f32 %v1133_v36, %v1125_v35 }
  0x4b   : > { %v1000_v55 = vadd.f32 %v2344_v48, %v991_v53  ;;  %v1001_v56 = vadd.f32 %v2344_v48, %v992_v54 }
  0x4c   : > { %2477 = vmatpush3.bf16.msra.mxu1 %v2607_v5 }
  0x4d   : > { %v1002_v58 = vmax.f32 %v1000_v55, 0.0  ;;  %v1003_v59 = vmax.f32 %v1001_v56, 0.0  ;;  %2478 = vmatprep.subr.bf16.mxu1 %v2668_v10 }
  0x4f   : > { %v1004_v60 = vmin.f32 %v1002_v58, 6.0  ;;  %v1005_v61 = vmin.f32 %v1003_v59, 6.0 }
  0x50   : > { %2479 = vmatpush3.bf16.msra.mxu1 %v2608_v6 }
  0x51   : > { %v1008_v0 = vcombine.low %v1004_v60, %v1005_v61  ;;  %2480 = vmatprep.subr.bf16.mxu1 %v2668_v10 }
  0x53   : > { %v1015_v1 = vrot.slane %v1008_v0, %v2938_v63 }
  0x54   : > { %2481 = vmatpush3.bf16.msra.mxu1 %v2609_v7 }
  0x55   : > { %v1017_v2 = vpack.c.bf16 %v1015_v1, %v1015_v1  ;;  %2482 = vmatprep.subr.bf16.mxu1 %v2668_v10 }
  0x57   : > { %2467 = vmatmul.mubr.msk.bf16.vlgmr.msra.gmra.mxu0 %vm1057_vm1, %v1017_v2  ;;  %v1168_v2 = vld [vmem:[#allocation2 + $0xc] sm:$0x3] }
  0x58   : > { %2506 = vmatprep.mubr.msk.bf16.mxu0 %vm2669_vm0, %v2668_v10  ;;  %2483 = vmatpush3.bf16.msra.mxu1 %v2610_v8  ;;  %v1178_v8 = vld [vmem:[#allocation2 + $0xd] sm:$0x3] }
  0x59   : > { %2484 = vmatprep.subr.bf16.mxu1 %v2668_v10  ;;  %v1184_v26 = vmul.f32 %v1182_v3, %v1178_v8 }
  0x5c   : > { %2485 = vmatpush3.bf16.msra.mxu1 %v2611_v9  ;;  %v2351_v9 = vld [vmem:[%s3281_s3 + $0x8] ss:$0 sm:$0xff]  ;;  %s2322_s3 = sshll.u32 %s3291_s4, 1 }
  0x5d   : > { %2510 = vmatprep.subr.bf16.mxu1 %v2668_v10  ;;  %s850_s28 = scalar_lea.vmem %s3257_s25, %s2322_s3 }
 0x117   : > { %v1095_v15 = vpop.f32.mrf.mxu0 }
 0x118   : > { %v1096_v19 = vadd.f32 %v2345_v11, %v1095_v15 }
 0x119   : > { %v2468_v20 = vpop.f32.mrf.mxu0 }
 0x11a   : > { %v1101_v24 = vmax.f32 %v1096_v19, 0.0  ;;  %v1174_v19 = vmul.f32 %v1172_v57, %v1168_v2 }
 0x11b   : > { %v1098_v27 = vpop.f32.mrf.mxu0 }
 0x11c   : > { %v1102_v28 = vmin.f32 %v1101_v24, 6.0  ;;  %v1188_v24 = vld [vmem:[#allocation2 + $0xe] sm:$0x3] }
 0x11d   : > { %v2469_v29 = vpop.f32.mrf.mxu0 }
 0x11e   : > { %1104 = vst [vmem:[#allocation2 + $0x5] sm:$0x3] %v1102_v28  ;;  %1106 = vst [vmem:[#allocation2 + $0x7] sm:$0xc] %v1102_v28  ;;  %v1194_v29 = vmul.f32 %v2351_v9, %v1188_v24 }
 0x125   : > { %v1110_v38 = vld [vmem:[#allocation2 + $0x4] sm:$0x3]  ;;  %v1128_v40 = vld [vmem:[#allocation2 + $0x6] sm:$0x3]  ;;  %v1138_v48 = vld [vmem:[#allocation2 + $0x8] sm:$0x3] }
 0x126   : > { %v1118_v39 = vld [vmem:[#allocation2 + $0x5] sm:$0x3]  ;;  %v1116_v43 = vmul.f32 %v1114_v21, %v1110_v38  ;;  %v1134_v51 = vmul.f32 %v1132_v32, %v1128_v40  ;;  %v1148_v55 = vld [vmem:[#allocation2 + $0x9] sm:$0x3]  ;;  %v1144_v59 = vmul.f32 %v1142_v37, %v1138_v48 }
 0x127   : > { %v1124_v44 = vmul.f32 %v1122_v22, %v1118_v39  ;;  %v1137_v46 = vld [vmem:[#allocation2 + $0x4] sm:$0x3]  ;;  %v1157_v53 = vld [vmem:[#allocation2 + $0x6] sm:$0x3]  ;;  %v1167_v60 = vld [vmem:[#allocation2 + $0x8] sm:$0x3]  ;;  %v1154_v12 = vmul.f32 %v1152_v42, %v1148_v55 }
 0x128   : > { %v1147_v47 = vld [vmem:[#allocation2 + $0x5] sm:$0x3]  ;;  %v1143_v14 = vmul.f32 %v1142_v37, %v1137_v46  ;;  %v1158_v0 = vld [vmem:[#allocation2 + $0xa] sm:$0x3]  ;;  %v1163_v1 = vmul.f32 %v1162_v49, %v1157_v53  ;;  %v1173_v7 = vmul.f32 %v1172_v57, %v1167_v60  ;;  %v2613_v46 = vld [vmem:[%s3243_s11 + $0x30] sm:$0xff]  }
 0x129   : > { %v1126_v50 = vadd.f32 %v1124_v44, %v1116_v43  ;;  %v1153_v56 = vmul.f32 %v1152_v42, %v1147_v47  ;;  %v1177_v5 = vld [vmem:[#allocation2 + $0x9] sm:$0x3]  ;;  %v1164_v15 = vmul.f32 %v1162_v49, %v1158_v0  ;;  %v2612_v44 = vld [vmem:[%s3243_s11 + $0x38] sm:$0xff]   ;;  %v2615_v48 = vld [vmem:[%s3243_s11 + $0x20] sm:$0xff]  }
 0x12a   : > { %v1145_v54 = vadd.f32 %v1143_v14, %v1135_v41  ;;  %v1187_v20 = vld [vmem:[#allocation2 + $0xa] sm:$0x3]  ;;  %v1183_v22 = vmul.f32 %v1182_v3, %v1177_v5  ;;  %2491 = vmatpush3.bf16.msra.mxu0 %v2612_v44  ;;  %v2616_v14 = vld [vmem:[%s3243_s11 + $0x18] sm:$0xff]   ;;  %v2617_v49 = vld [vmem:[%s3243_s11 + $0x10] sm:$0xff]  }
 0x12b   : > { %v1136_v58 = vadd.f32 %v1134_v51, %v1126_v50  ;;  %v1193_v27 = vmul.f32 %v2351_v9, %v1187_v20  ;;  %2492 = vmatprep.subr.bf16.mxu0 %v2668_v10  ;;  %v2614_v47 = vld [vmem:[%s3243_s11 + $0x28] sm:$0xff]   ;;  %v2619_v51 = vld [vmem:[%s3243_s11] sm:$0xff]  }
 0x12c   : > { %v1155_v61 = vadd.f32 %v1153_v56, %v1145_v54  ;;  %v2618_v50 = vld [vmem:[%s3243_s11 + $0x8] sm:$0xff]   ;;  %v2353_v53 = vld [vmem:[%s3283_s0] ss:$0 sm:$0xff]  ;;  %v1347_v0 = vld [vmem:[#allocation2 + $0x1] sm:$0x3] }
 0x12d   : > { %v1146_v4 = vadd.f32 %v1144_v59, %v1136_v58  ;;  %v1337_v54 = vld [vmem:[%s3284_s30] sm:$0xff] }
 0x12e   : > { %v1165_v6 = vadd.f32 %v1163_v1, %v1155_v61  ;;  %2493 = vmatpush3.bf16.msra.mxu0 %v2613_v46  ;;  %v1344_v58 = vrot.slane %v1337_v54, %v2870_v17  ;;  %v1352_v59 = vrot.slane %v1337_v54, %v2873_v18  ;;  %v1339_v61 = vld [vmem:[#allocation2] sm:$0x3]  ;;  %v1362_v5 = vrot.slane %v1337_v54, %v2887_v33 }
 0x12f   : > { %v1156_v11 = vadd.f32 %v1154_v12, %v1146_v4  ;;  %2494 = vmatprep.subr.bf16.mxu0 %v2668_v10  ;;  %v1372_v9 = vrot.slane %v1337_v54, %v2899_v45  ;;  %v1412_v44 = vrot.slane %v1337_v54, %v2928_v23 }
 0x130   : > { %v1175_v21 = vadd.f32 %v1173_v7, %v1165_v6  ;;  %v1345_v4 = vmul.f32 %v1344_v58, %v1339_v61  ;;  %v1353_v12 = vmul.f32 %v1352_v59, %v1347_v0  ;;  %v1357_v6 = vld [vmem:[#allocation2 + $0x2] sm:$0x3] }
 0x131   : > { %v1166_v25 = vadd.f32 %v1164_v15, %v1156_v11  ;;  %v1363_v8 = vmul.f32 %v1362_v5, %v1357_v6 }
 0x132   : > { %v1185_v13 = vadd.f32 %v1183_v22, %v1175_v21  ;;  %2495 = vmatpush3.bf16.msra.mxu0 %v2614_v47  ;;  %v1355_v7 = vadd.f32 %v1353_v12, %v1345_v4  ;;  %v1382_v21 = vrot.slane %v1337_v54, %v2904_v52  ;;  %v2363_v4 = vld [vmem:[%s3242_s10] ss:$0 sm:$0xff] }
 0x133   : > { %v1176_v28 = vadd.f32 %v1174_v19, %v1166_v25  ;;  %2496 = vmatprep.subr.bf16.mxu0 %v2668_v10 }
 0x134   : > { %v1195_v31 = vadd.f32 %v1193_v27, %v1185_v13  ;;  %v1365_v20 = vadd.f32 %v1363_v8, %v1355_v7 }
 0x135   : > { %v1186_v32 = vadd.f32 %v1184_v26, %v1176_v28  ;;  %v1392_v28 = vrot.slane %v1337_v54, %v2914_v62 }
 0x136   : > { %v1204_v34 = vadd.f32 %v2352_v30, %v1195_v31  ;;  %2497 = vmatpush3.bf16.msra.mxu0 %v2615_v48 }
 0x137   : > { %v1196_v35 = vadd.f32 %v1194_v29, %v1186_v32  ;;  %2498 = vmatprep.subr.bf16.mxu0 %v2668_v10 }
 0x138   : > { %v1206_v37 = vmax.f32 %v1204_v34, 0.0 }
 0x139   : > { %v1205_v36 = vadd.f32 %v2352_v30, %v1196_v35 }
 0x13a   : > { %v1208_v39 = vmin.f32 %v1206_v37, 6.0  ;;  %2499 = vmatpush3.bf16.msra.mxu0 %v2616_v14 }
 0x13b   : > { %v1207_v38 = vmax.f32 %v1205_v36, 0.0  ;;  %2500 = vmatprep.subr.bf16.mxu0 %v2668_v10  ;;  %v1402_v36 = vrot.slane %v1337_v54, %v2925_v16 }
 0x13d   : > { %v1209_v40 = vmin.f32 %v1207_v38, 6.0 }
 0x13e   : > { %2501 = vmatpush3.bf16.msra.mxu0 %v2617_v49 }
 0x13f   : > { %v1212_v41 = vcombine.low %v1208_v39, %v1209_v40  ;;  %2502 = vmatprep.subr.bf16.mxu0 %v2668_v10 }
 0x141   : > { %v1219_v42 = vrot.slane %v1212_v41, %v2938_v63 }
 0x142   : > { %2503 = vmatpush3.bf16.msra.mxu0 %v2618_v50  ;;  %v1408_v50 = vld [vmem:[#allocation2 + $0xd] sm:$0x3] }
 0x143   : > { %v1221_v43 = vpack.c.bf16 %v1219_v42, %v1219_v42  ;;  %2504 = vmatprep.subr.bf16.mxu0 %v2668_v10  ;;  %v1414_v0 = vmul.f32 %v1412_v44, %v1408_v50 }
 0x145   : > { %2487 = vmatmul.mubr.bf16.vlgmr.msra.gmra.mxu1 %v1221_v43  ;;  %v1398_v43 = vld [vmem:[#allocation2 + $0xc] sm:$0x3] }
 0x146   : > { %2526 = vmatprep.mubr.msk.bf16.mxu1 %vm2669_vm0, %v2668_v10  ;;  %2505 = vmatpush3.bf16.msra.mxu0 %v2619_v51  ;;  %v2362_v51 = vld [vmem:[%s3284_s30 + $0x8] ss:$0 sm:$0xff] }
 0x147   : > { %2530 = vmatprep.subr.bf16.mxu0 %v2668_v10 }
 0x205   : > { %v1327_v55 = vpop.f32.mrf.mxu1 }
 0x206   : > { %v1328_v56 = vadd.f32 %v2353_v53, %v1327_v55 }
 0x207   : > { %v2488_v57 = vpop.f32.mrf.mxu1 }
 0x208   : > { %v1333_v60 = vmax.f32 %v1328_v56, 0.0  ;;  %v1404_v56 = vmul.f32 %v1402_v36, %v1398_v43 }
 0x209   : > { %v1330_v1 = vpop.f32.mrf.mxu1 }
 0x20a   : > { %v1334_v2 = vmin.f32 %v1333_v60, 6.0  ;;  %v1418_v60 = vld [vmem:[#allocation2 + $0xe] sm:$0x3] }
 0x20b   : > { %v2489_v3 = vpop.f32.mrf.mxu1 }
 0x20c   : > { %1335 = vst [vmem:[#allocation2 + $0x5] sm:$0x3] %v1334_v2  ;;  %1336 = vst [vmem:[#allocation2 + $0x7] sm:$0xc] %v1334_v2  ;;  %v1424_v3 = vmul.f32 %v2362_v51, %v1418_v60 }
 0x213   : > { %v1340_v11 = vld [vmem:[#allocation2 + $0x4] sm:$0x3]  ;;  %v1358_v19 = vld [vmem:[#allocation2 + $0x6] sm:$0x3]  ;;  %v1368_v13 = vld [vmem:[#allocation2 + $0x8] sm:$0x3] }
 0x214   : > { %v1348_v15 = vld [vmem:[#allocation2 + $0x5] sm:$0x3]  ;;  %v1346_v22 = vmul.f32 %v1344_v58, %v1340_v11  ;;  %v1364_v30 = vmul.f32 %v1362_v5, %v1358_v19  ;;  %v1378_v34 = vld [vmem:[#allocation2 + $0x9] sm:$0x3]  ;;  %v1374_v38 = vmul.f32 %v1372_v9, %v1368_v13 }
 0x215   : > { %v1354_v24 = vmul.f32 %v1352_v59, %v1348_v15  ;;  %v1367_v25 = vld [vmem:[#allocation2 + $0x4] sm:$0x3]  ;;  %v1387_v31 = vld [vmem:[#allocation2 + $0x6] sm:$0x3]  ;;  %v1397_v39 = vld [vmem:[#allocation2 + $0x8] sm:$0x3]  ;;  %v1384_v47 = vmul.f32 %v1382_v21, %v1378_v34 }
 0x216   : > { %v1377_v26 = vld [vmem:[#allocation2 + $0x5] sm:$0x3]  ;;  %v1373_v27 = vmul.f32 %v1372_v9, %v1367_v25  ;;  %v1388_v41 = vld [vmem:[#allocation2 + $0xa] sm:$0x3]  ;;  %v1393_v42 = vmul.f32 %v1392_v28, %v1387_v31  ;;  %v1403_v49 = vmul.f32 %v1402_v36, %v1397_v39  ;;  %v2621_v25 = vld [vmem:[%s3247_s15 + $0x30] sm:$0xff]  }
 0x217   : > { %v1356_v29 = vadd.f32 %v1354_v24, %v1346_v22  ;;  %v1383_v35 = vmul.f32 %v1382_v21, %v1377_v26  ;;  %v1407_v48 = vld [vmem:[#allocation2 + $0x9] sm:$0x3]  ;;  %v1394_v55 = vmul.f32 %v1392_v28, %v1388_v41  ;;  %v2620_v24 = vld [vmem:[%s3247_s15 + $0x38] sm:$0xff]   ;;  %v2623_v13 = vld [vmem:[%s3247_s15 + $0x20] sm:$0xff]  }
 0x218   : > { %v1375_v32 = vadd.f32 %v1373_v27, %v1365_v20  ;;  %v1417_v57 = vld [vmem:[#allocation2 + $0xa] sm:$0x3]  ;;  %v1413_v59 = vmul.f32 %v1412_v44, %v1407_v48  ;;  %2511 = vmatpush3.bf16.msra.mxu1 %v2620_v24  ;;  %v2624_v27 = vld [vmem:[%s3247_s15 + $0x18] sm:$0xff]   ;;  %v2625_v28 = vld [vmem:[%s3247_s15 + $0x10] sm:$0xff]  }
 0x219   : > { %v1366_v37 = vadd.f32 %v1364_v30, %v1356_v29  ;;  %v1423_v1 = vmul.f32 %v2362_v51, %v1417_v57  ;;  %2512 = vmatprep.subr.bf16.mxu1 %v2668_v10  ;;  %v2622_v26 = vld [vmem:[%s3247_s15 + $0x28] sm:$0xff]   ;;  %v2627_v30 = vld [vmem:[%s3247_s15] sm:$0xff]  }
 0x21a   : > { %v1385_v40 = vadd.f32 %v1383_v35, %v1375_v32  ;;  %v2626_v29 = vld [vmem:[%s3247_s15 + $0x8] sm:$0xff]   ;;  %v2364_v31 = vld [vmem:[%s3244_s12] ss:$0 sm:$0xff]  ;;  %v1577_v41 = vld [vmem:[#allocation2 + $0x1] sm:$0x3] }
 0x21b   : > { %v1376_v46 = vadd.f32 %v1374_v38, %v1366_v37  ;;  %v1567_v32 = vld [vmem:[%s3245_s13] sm:$0xff] }
 0x21c   : > { %v1395_v14 = vadd.f32 %v1393_v42, %v1385_v40  ;;  %2513 = vmatpush3.bf16.msra.mxu1 %v2621_v25  ;;  %v1574_v37 = vrot.slane %v1567_v32, %v2870_v17  ;;  %v1582_v38 = vrot.slane %v1567_v32, %v2873_v18  ;;  %v1569_v40 = vld [vmem:[#allocation2] sm:$0x3]  ;;  %v1592_v48 = vrot.slane %v1567_v32, %v2887_v33 }
 0x21d   : > { %v1386_v53 = vadd.f32 %v1384_v47, %v1376_v46  ;;  %2514 = vmatprep.subr.bf16.mxu1 %v2668_v10  ;;  %v1602_v51 = vrot.slane %v1567_v32, %v2899_v45  ;;  %v1642_v24 = vrot.slane %v1567_v32, %v2928_v23 }
 0x21e   : > { %v1405_v58 = vadd.f32 %v1403_v49, %v1395_v14  ;;  %v1575_v46 = vmul.f32 %v1574_v37, %v1569_v40  ;;  %v1583_v47 = vmul.f32 %v1582_v38, %v1577_v41  ;;  %v1587_v14 = vld [vmem:[#allocation2 + $0x2] sm:$0x3] }
 0x21f   : > { %v1396_v61 = vadd.f32 %v1394_v55, %v1386_v53  ;;  %v1593_v50 = vmul.f32 %v1592_v48, %v1587_v14 }
 0x220   : > { %v1415_v54 = vadd.f32 %v1413_v59, %v1405_v58  ;;  %2515 = vmatpush3.bf16.msra.mxu1 %v2622_v26  ;;  %v1585_v49 = vadd.f32 %v1583_v47, %v1575_v46  ;;  %v1612_v58 = vrot.slane %v1567_v32, %v2904_v52  ;;  %v2374_v46 = vld [vmem:[%s3246_s14] ss:$0 sm:$0xff] }
 0x221   : > { %v1406_v2 = vadd.f32 %v1404_v56, %v1396_v61  ;;  %2516 = vmatprep.subr.bf16.mxu1 %v2668_v10 }
 0x222   : > { %v1425_v12 = vadd.f32 %v1423_v1, %v1415_v54  ;;  %v1595_v57 = vadd.f32 %v1593_v50, %v1585_v49 }
 0x223   : > { %v1416_v5 = vadd.f32 %v1414_v0, %v1406_v2  ;;  %v1622_v2 = vrot.slane %v1567_v32, %v2914_v62 }
 0x224   : > { %v1434_v6 = vadd.f32 %v2363_v4, %v1425_v12  ;;  %2517 = vmatpush3.bf16.msra.mxu1 %v2623_v13 }
 0x225   : > { %v1426_v7 = vadd.f32 %v1424_v3, %v1416_v5  ;;  %2518 = vmatprep.subr.bf16.mxu1 %v2668_v10 }
 0x226   : > { %v1436_v9 = vmax.f32 %v1434_v6, 0.0 }
 0x227   : > { %v1435_v8 = vadd.f32 %v2363_v4, %v1426_v7 }
 0x228   : > { %v1438_v15 = vmin.f32 %v1436_v9, 6.0  ;;  %2519 = vmatpush3.bf16.msra.mxu1 %v2624_v27 }
 0x229   : > { %v1437_v11 = vmax.f32 %v1435_v8, 0.0  ;;  %2520 = vmatprep.subr.bf16.mxu1 %v2668_v10  ;;  %v1632_v8 = vrot.slane %v1567_v32, %v2925_v16 }
 0x22b   : > { %v1439_v19 = vmin.f32 %v1437_v11, 6.0 }
 0x22c   : > { %2521 = vmatpush3.bf16.msra.mxu1 %v2625_v28 }
 0x22d   : > { %v1442_v20 = vcombine.low %v1438_v15, %v1439_v19  ;;  %2522 = vmatprep.subr.bf16.mxu1 %v2668_v10 }
 0x22f   : > { %v1449_v21 = vrot.slane %v1442_v20, %v2938_v63 }
 0x230   : > { %2523 = vmatpush3.bf16.msra.mxu1 %v2626_v29  ;;  %v1638_v29 = vld [vmem:[#allocation2 + $0xd] sm:$0x3] }
 0x231   : > { %v1451_v22 = vpack.c.bf16 %v1449_v21, %v1449_v21  ;;  %2524 = vmatprep.subr.bf16.mxu1 %v2668_v10  ;;  %v1644_v41 = vmul.f32 %v1642_v24, %v1638_v29 }
 0x233   : > { %2507 = vmatmul.mubr.bf16.vlgmr.msra.gmra.mxu0 %v1451_v22  ;;  %v1628_v22 = vld [vmem:[#allocation2 + $0xc] sm:$0x3] }
 0x234   : > { %2546 = vmatprep.mubr.msk.bf16.mxu0 %vm2669_vm0, %v2668_v10  ;;  %2525 = vmatpush3.bf16.msra.mxu1 %v2627_v30  ;;  %v2373_v30 = vld [vmem:[%s3245_s13 + $0x8] ss:$0 sm:$0xff] }
 0x235   : > { %2550 = vmatprep.subr.bf16.mxu1 %v2668_v10 }
 0x2f3   : > { %v1557_v34 = vpop.f32.mrf.mxu0 }
 0x2f4   : > { %v1558_v35 = vadd.f32 %v2364_v31, %v1557_v34 }
 0x2f5   : > { %v2508_v36 = vpop.f32.mrf.mxu0 }
 0x2f6   : > { %v1563_v39 = vmax.f32 %v1558_v35, 0.0  ;;  %v1634_v35 = vmul.f32 %v1632_v8, %v1628_v22 }
 0x2f7   : > { %v1560_v42 = vpop.f32.mrf.mxu0 }
 0x2f8   : > { %v1564_v43 = vmin.f32 %v1563_v39, 6.0  ;;  %v1648_v39 = vld [vmem:[#allocation2 + $0xe] sm:$0x3] }
 0x2f9   : > { %v2509_v44 = vpop.f32.mrf.mxu0 }
 0x2fa   : > { %1565 = vst [vmem:[#allocation2 + $0x5] sm:$0x3] %v1564_v43  ;;  %1566 = vst [vmem:[#allocation2 + $0x7] sm:$0xc] %v1564_v43  ;;  %v1654_v44 = vmul.f32 %v2373_v30, %v1648_v39 }
 0x301   : > { %v1570_v53 = vld [vmem:[#allocation2 + $0x4] sm:$0x3]  ;;  %v1588_v56 = vld [vmem:[#allocation2 + $0x6] sm:$0x3]  ;;  %v1598_v54 = vld [vmem:[#allocation2 + $0x8] sm:$0x3] }
 0x302   : > { %v1578_v55 = vld [vmem:[#allocation2 + $0x5] sm:$0x3]  ;;  %v1576_v59 = vmul.f32 %v1574_v37, %v1570_v53  ;;  %v1594_v4 = vmul.f32 %v1592_v48, %v1588_v56  ;;  %v1608_v6 = vld [vmem:[#allocation2 + $0x9] sm:$0x3]  ;;  %v1604_v11 = vmul.f32 %v1602_v51, %v1598_v54 }
 0x303   : > { %v1584_v60 = vmul.f32 %v1582_v38, %v1578_v55  ;;  %v1597_v61 = vld [vmem:[#allocation2 + $0x4] sm:$0x3]  ;;  %v1617_v12 = vld [vmem:[#allocation2 + $0x6] sm:$0x3]  ;;  %v1627_v15 = vld [vmem:[#allocation2 + $0x8] sm:$0x3]  ;;  %v1614_v26 = vmul.f32 %v1612_v58, %v1608_v6 }
 0x304   : > { %v1607_v0 = vld [vmem:[#allocation2 + $0x5] sm:$0x3]  ;;  %v1603_v1 = vmul.f32 %v1602_v51, %v1597_v61  ;;  %v1618_v20 = vld [vmem:[#allocation2 + $0xa] sm:$0x3]  ;;  %v1623_v21 = vmul.f32 %v1622_v2, %v1617_v12  ;;  %v1633_v28 = vmul.f32 %v1632_v8, %v1627_v15  ;;  %v2629_v61 = vld [vmem:[%s3251_s19 + $0x30] sm:$0xff]  }
 0x305   : > { %v1586_v3 = vadd.f32 %v1584_v60, %v1576_v59  ;;  %v1613_v7 = vmul.f32 %v1612_v58, %v1607_v0  ;;  %v1637_v13 = vld [vmem:[#allocation2 + $0x9] sm:$0x3]  ;;  %v1624_v34 = vmul.f32 %v1622_v2, %v1618_v20  ;;  %v2628_v60 = vld [vmem:[%s3251_s19 + $0x38] sm:$0xff]   ;;  %v2631_v54 = vld [vmem:[%s3251_s19 + $0x20] sm:$0xff]  }
 0x306   : > { %v1605_v5 = vadd.f32 %v1603_v1, %v1595_v57  ;;  %v1647_v36 = vld [vmem:[#allocation2 + $0xa] sm:$0x3]  ;;  %v1643_v38 = vmul.f32 %v1642_v24, %v1637_v13  ;;  %2531 = vmatpush3.bf16.msra.mxu0 %v2628_v60  ;;  %v2632_v1 = vld [vmem:[%s3251_s19 + $0x18] sm:$0xff]   ;;  %v2633_v2 = vld [vmem:[%s3251_s19 + $0x10] sm:$0xff]  }
 0x307   : > { %v1596_v9 = vadd.f32 %v1594_v4, %v1586_v3  ;;  %v1653_v42 = vmul.f32 %v2373_v30, %v1647_v36  ;;  %2532 = vmatprep.subr.bf16.mxu0 %v2668_v10  ;;  %v2630_v0 = vld [vmem:[%s3251_s19 + $0x28] sm:$0xff]   ;;  %v2635_v4 = vld [vmem:[%s3251_s19] sm:$0xff]  }
 0x308   : > { %v1615_v19 = vadd.f32 %v1613_v7, %v1605_v5  ;;  %v2634_v3 = vld [vmem:[%s3251_s19 + $0x8] sm:$0xff]   ;;  %v2375_v12 = vld [vmem:[%s3248_s16] ss:$0 sm:$0xff]  ;;  %v1807_v20 = vld [vmem:[#allocation2 + $0x1] sm:$0x3] }
 0x309   : > { %v1606_v25 = vadd.f32 %v1604_v11, %v1596_v9  ;;  %v1797_v5 = vld [vmem:[%s3249_s17] sm:$0xff] }
 0x30a   : > { %v1625_v27 = vadd.f32 %v1623_v21, %v1615_v19  ;;  %2533 = vmatpush3.bf16.msra.mxu0 %v2629_v61  ;;  %v1804_v9 = vrot.slane %v1797_v5, %v2870_v17  ;;  %v1812_v11 = vrot.slane %v1797_v5, %v2873_v18  ;;  %v1799_v19 = vld [vmem:[#allocation2] sm:$0x3]  ;;  %v1822_v13 = vrot.slane %v1797_v5, %v2887_v33 }
 0x30b   : > { %v1616_v31 = vadd.f32 %v1614_v26, %v1606_v25  ;;  %2534 = vmatprep.subr.bf16.mxu0 %v2668_v10  ;;  %v1832_v30 = vrot.slane %v1797_v5, %v2899_v45  ;;  %v1872_v60 = vrot.slane %v1797_v5, %v2928_v23 }
 0x30c   : > { %v1635_v37 = vadd.f32 %v1633_v28, %v1625_v27  ;;  %v1805_v25 = vmul.f32 %v1804_v9, %v1799_v19  ;;  %v1813_v26 = vmul.f32 %v1812_v11, %v1807_v20  ;;  %v1817_v27 = vld [vmem:[#allocation2 + $0x2] sm:$0x3] }
 0x30d   : > { %v1626_v40 = vadd.f32 %v1624_v34, %v1616_v31  ;;  %v1823_v29 = vmul.f32 %v1822_v13, %v1817_v27 }
 0x30e   : > { %v1645_v32 = vadd.f32 %v1643_v38, %v1635_v37  ;;  %2535 = vmatpush3.bf16.msra.mxu0 %v2630_v0  ;;  %v1815_v28 = vadd.f32 %v1813_v26, %v1805_v25  ;;  %v1842_v37 = vrot.slane %v1797_v5, %v2904_v52  ;;  %v2385_v25 = vld [vmem:[%s3250_s18] ss:$0 sm:$0xff] }
 0x30f   : > { %v1636_v43 = vadd.f32 %v1634_v35, %v1626_v40  ;;  %2536 = vmatprep.subr.bf16.mxu0 %v2668_v10 }
 0x310   : > { %v1655_v47 = vadd.f32 %v1653_v42, %v1645_v32  ;;  %v1825_v36 = vadd.f32 %v1823_v29, %v1815_v28 }
 0x311   : > { %v1646_v48 = vadd.f32 %v1644_v41, %v1636_v43  ;;  %v1852_v43 = vrot.slane %v1797_v5, %v2914_v62 }
 0x312   : > { %v1664_v14 = vadd.f32 %v2374_v46, %v1655_v47  ;;  %2537 = vmatpush3.bf16.msra.mxu0 %v2631_v54 }
 0x313   : > { %v1656_v49 = vadd.f32 %v1654_v44, %v1646_v48  ;;  %2538 = vmatprep.subr.bf16.mxu0 %v2668_v10 }
 0x314   : > { %v1666_v51 = vmax.f32 %v1664_v14, 0.0 }
 0x315   : > { %v1665_v50 = vadd.f32 %v2374_v46, %v1656_v49 }
 0x316   : > { %v1668_v55 = vmin.f32 %v1666_v51, 6.0  ;;  %2539 = vmatpush3.bf16.msra.mxu0 %v2632_v1 }
 0x317   : > { %v1667_v53 = vmax.f32 %v1665_v50, 0.0  ;;  %2540 = vmatprep.subr.bf16.mxu0 %v2668_v10  ;;  %v1862_v50 = vrot.slane %v1797_v5, %v2925_v16 }
 0x319   : > { %v1669_v56 = vmin.f32 %v1667_v53, 6.0 }
 0x31a   : > { %2541 = vmatpush3.bf16.msra.mxu0 %v2633_v2 }
 0x31b   : > { %v1672_v57 = vcombine.low %v1668_v55, %v1669_v56  ;;  %2542 = vmatprep.subr.bf16.mxu0 %v2668_v10 }
 0x31d   : > { %v1679_v58 = vrot.slane %v1672_v57, %v2938_v63 }
 0x31e   : > { %2543 = vmatpush3.bf16.msra.mxu0 %v2634_v3  ;;  %v1868_v3 = vld [vmem:[#allocation2 + $0xd] sm:$0x3] }
 0x31f   : > { %v1681_v59 = vpack.c.bf16 %v1679_v58, %v1679_v58  ;;  %2544 = vmatprep.subr.bf16.mxu0 %v2668_v10  ;;  %v1874_v20 = vmul.f32 %v1872_v60, %v1868_v3 }
 0x321   : > { %2527 = vmatmul.mubr.bf16.vlgmr.msra.gmra.mxu1 %v1681_v59  ;;  %v1858_v59 = vld [vmem:[#allocation2 + $0xc] sm:$0x3] }
 0x322   : > { %2566 = vmatprep.mubr.msk.bf16.mxu1 %vm2669_vm0, %v2668_v10  ;;  %2545 = vmatpush3.bf16.msra.mxu0 %v2635_v4  ;;  %v2384_v4 = vld [vmem:[%s3249_s17 + $0x8] ss:$0 sm:$0xff] }
 0x3e1   : > { %v1787_v6 = vpop.f32.mrf.mxu1 }
 0x3e2   : > { %v1788_v7 = vadd.f32 %v2375_v12, %v1787_v6 }
 0x3e3   : > { %v2528_v8 = vpop.f32.mrf.mxu1 }
 0x3e4   : > { %v1793_v15 = vmax.f32 %v1788_v7, 0.0  ;;  %v1864_v7 = vmul.f32 %v1862_v50, %v1858_v59 }
 0x3e5   : > { %v1790_v21 = vpop.f32.mrf.mxu1 }
 0x3e6   : > { %v1794_v22 = vmin.f32 %v1793_v15, 6.0  ;;  %v1878_v15 = vld [vmem:[#allocation2 + $0xe] sm:$0x3] }
 0x3e7   : > { %v2529_v24 = vpop.f32.mrf.mxu1 }
 0x3e8   : > { %1795 = vst [vmem:[#allocation2 + $0x5] sm:$0x3] %v1794_v22  ;;  %1796 = vst [vmem:[#allocation2 + $0x7] sm:$0xc] %v1794_v22  ;;  %v1884_v24 = vmul.f32 %v2384_v4, %v1878_v15 }
 0x3ef   : > { %v1800_v31 = vld [vmem:[#allocation2 + $0x4] sm:$0x3]  ;;  %v1818_v35 = vld [vmem:[#allocation2 + $0x6] sm:$0x3]  ;;  %v1828_v32 = vld [vmem:[#allocation2 + $0x8] sm:$0x3] }
 0x3f0   : > { %v1808_v34 = vld [vmem:[#allocation2 + $0x5] sm:$0x3]  ;;  %v1806_v38 = vmul.f32 %v1804_v9, %v1800_v31  ;;  %v1824_v46 = vmul.f32 %v1822_v13, %v1818_v35  ;;  %v1838_v14 = vld [vmem:[#allocation2 + $0x9] sm:$0x3]  ;;  %v1834_v53 = vmul.f32 %v1832_v30, %v1828_v32 }
 0x3f1   : > { %v1814_v39 = vmul.f32 %v1812_v11, %v1808_v34  ;;  %v1827_v40 = vld [vmem:[#allocation2 + $0x4] sm:$0x3]  ;;  %v1847_v47 = vld [vmem:[#allocation2 + $0x6] sm:$0x3]  ;;  %v1857_v55 = vld [vmem:[#allocation2 + $0x8] sm:$0x3]  ;;  %v1844_v0 = vmul.f32 %v1842_v37, %v1838_v14 }
 0x3f2   : > { %v1837_v41 = vld [vmem:[#allocation2 + $0x5] sm:$0x3]  ;;  %v1833_v42 = vmul.f32 %v1832_v30, %v1827_v40  ;;  %v1848_v57 = vld [vmem:[#allocation2 + $0xa] sm:$0x3]  ;;  %v1853_v58 = vmul.f32 %v1852_v43, %v1847_v47  ;;  %v1863_v2 = vmul.f32 %v1862_v50, %v1857_v55  ;;  %v2637_v40 = vld [vmem:[%s3255_s23 + $0x30] sm:$0xff]  }
 0x3f3   : > { %v1816_v44 = vadd.f32 %v1814_v39, %v1806_v38  ;;  %v1843_v49 = vmul.f32 %v1842_v37, %v1837_v41  ;;  %v1867_v54 = vld [vmem:[#allocation2 + $0x9] sm:$0x3]  ;;  %v1854_v6 = vmul.f32 %v1852_v43, %v1848_v57  ;;  %v2636_v39 = vld [vmem:[%s3255_s23 + $0x38] sm:$0xff]   ;;  %v2639_v32 = vld [vmem:[%s3255_s23 + $0x20] sm:$0xff]  }
 0x3f4   : > { %v1835_v48 = vadd.f32 %v1833_v42, %v1825_v36  ;;  %v1877_v8 = vld [vmem:[#allocation2 + $0xa] sm:$0x3]  ;;  %v1873_v11 = vmul.f32 %v1872_v60, %v1867_v54  ;;  %2551 = vmatpush3.bf16.msra.mxu1 %v2636_v39  ;;  %v2640_v42 = vld [vmem:[%s3255_s23 + $0x18] sm:$0xff]   ;;  %v2641_v43 = vld [vmem:[%s3255_s23 + $0x10] sm:$0xff]  }
 0x3f5   : > { %v1826_v51 = vadd.f32 %v1824_v46, %v1816_v44  ;;  %v1883_v21 = vmul.f32 %v2384_v4, %v1877_v8  ;;  %2552 = vmatprep.subr.bf16.mxu1 %v2668_v10  ;;  %v2638_v41 = vld [vmem:[%s3255_s23 + $0x28] sm:$0xff]   ;;  %v2643_v46 = vld [vmem:[%s3255_s23] sm:$0xff]  }
 0x3f6   : > { %v1845_v56 = vadd.f32 %v1843_v49, %v1835_v48  ;;  %v2642_v44 = vld [vmem:[%s3255_s23 + $0x8] sm:$0xff]   ;;  %v2386_v47 = vld [vmem:[%s3252_s20] ss:$0 sm:$0xff]  ;;  %v2037_v57 = vld [vmem:[#allocation2 + $0x1] sm:$0x3] }
 0x3f7   : > { %v1836_v61 = vadd.f32 %v1834_v53, %v1826_v51  ;;  %v2027_v48 = vld [vmem:[%s3253_s21] sm:$0xff]  ;;  %v2395_v39 = vld [vmem:[%s3253_s21 + $0x8] ss:$0 sm:$0xff] }
 0x3f8   : > { %v1855_v1 = vadd.f32 %v1853_v58, %v1845_v56  ;;  %2553 = vmatpush3.bf16.msra.mxu1 %v2637_v40  ;;  %v2034_v51 = vrot.slane %v2027_v48, %v2870_v17  ;;  %v2042_v53 = vrot.slane %v2027_v48, %v2873_v18  ;;  %v2029_v56 = vld [vmem:[#allocation2] sm:$0x3]  ;;  %v2047_v54 = vld [vmem:[#allocation2 + $0x2] sm:$0x3]  ;;  %v2062_v3 = vrot.slane %v2027_v48, %v2899_v45 }
 0x3f9   : > { %v1846_v12 = vadd.f32 %v1844_v0, %v1836_v61  ;;  %2554 = vmatprep.subr.bf16.mxu1 %v2668_v10  ;;  %v2052_v0 = vrot.slane %v2027_v48, %v2887_v33  ;;  %v2082_v33 = vrot.slane %v2027_v48, %v2914_v62 }
 0x3fa   : > { %v1865_v9 = vadd.f32 %v1863_v2, %v1855_v1  ;;  %v2035_v60 = vmul.f32 %v2034_v51, %v2029_v56  ;;  %v2043_v61 = vmul.f32 %v2042_v53, %v2037_v57 }
 0x3fb   : > { %v1856_v19 = vadd.f32 %v1854_v6, %v1846_v12  ;;  %v2053_v2 = vmul.f32 %v2052_v0, %v2047_v54  ;;  %v2072_v6 = vrot.slane %v2027_v48, %v2904_v52 }
 0x3fc   : > { %v1875_v5 = vadd.f32 %v1873_v11, %v1865_v9  ;;  %2555 = vmatpush3.bf16.msra.mxu1 %v2638_v41  ;;  %v2045_v1 = vadd.f32 %v2043_v61, %v2035_v60 }
 0x3fd   : > { %v1866_v22 = vadd.f32 %v1864_v7, %v1856_v19  ;;  %2556 = vmatprep.subr.bf16.mxu1 %v2668_v10 }
 0x3fe   : > { %v1885_v26 = vadd.f32 %v1883_v21, %v1875_v5  ;;  %v2055_v12 = vadd.f32 %v2053_v2, %v2045_v1  ;;  %v2397_v1 = vld [vmem:[%s3256_s24] ss:$0 sm:$0xff] }
 0x3ff   : > { %v1876_v13 = vadd.f32 %v1874_v20, %v1866_v22 }
 0x400   : > { %v1894_v27 = vadd.f32 %v2385_v25, %v1885_v26  ;;  %2557 = vmatpush3.bf16.msra.mxu1 %v2639_v32 }
 0x401   : > { %v1886_v28 = vadd.f32 %v1884_v24, %v1876_v13  ;;  %2558 = vmatprep.subr.bf16.mxu1 %v2668_v10 }
 0x402   : > { %v1896_v30 = vmax.f32 %v1894_v27, 0.0 }
 0x403   : > { %v1895_v29 = vadd.f32 %v2385_v25, %v1886_v28  ;;  %v2092_v25 = vrot.slane %v2027_v48, %v2925_v16 }
 0x404   : > { %v1898_v34 = vmin.f32 %v1896_v30, 6.0  ;;  %2559 = vmatpush3.bf16.msra.mxu1 %v2640_v42  ;;  %v2088_v30 = vld [vmem:[#allocation2 + $0xc] sm:$0x3] }
 0x405   : > { %v1897_v31 = vmax.f32 %v1895_v29, 0.0  ;;  %2560 = vmatprep.subr.bf16.mxu1 %v2668_v10  ;;  %v2094_v41 = vmul.f32 %v2092_v25, %v2088_v30 }
 0x407   : > { %v1899_v35 = vmin.f32 %v1897_v31, 6.0  ;;  %v2102_v31 = vrot.slane %v2027_v48, %v2928_v23 }
 0x408   : > { %2561 = vmatpush3.bf16.msra.mxu1 %v2641_v43 }
 0x409   : > { %v1902_v36 = vcombine.low %v1898_v34, %v1899_v35  ;;  %2562 = vmatprep.subr.bf16.mxu1 %v2668_v10 }
 0x40b   : > { %v1909_v37 = vrot.slane %v1902_v36, %v2938_v63 }
 0x40c   : > { %2563 = vmatpush3.bf16.msra.mxu1 %v2642_v44  ;;  %v2108_v44 = vld [vmem:[#allocation2 + $0xe] sm:$0x3] }
 0x40d   : > { %v1911_v38 = vpack.c.bf16 %v1909_v37, %v1909_v37  ;;  %2564 = vmatprep.subr.bf16.mxu1 %v2668_v10 }
 0x40f   : > { %2547 = vmatmul.mubr.bf16.vlgmr.msra.gmra.mxu0 %v1911_v38  ;;  %v2098_v38 = vld [vmem:[#allocation2 + $0xd] sm:$0x3] }
 0x410   : > { %2565 = vmatpush3.bf16.msra.mxu1 %v2643_v46 }
 0x4cf   : > { %v2017_v14 = vpop.f32.mrf.mxu0 }
 0x4d0   : > { %v2018_v49 = vadd.f32 %v2386_v47, %v2017_v14  ;;  %v2104_v47 = vmul.f32 %v2102_v31, %v2098_v38 }
 0x4d1   : > { %v2548_v50 = vpop.f32.mrf.mxu0 }
 0x4d2   : > { %v2023_v55 = vmax.f32 %v2018_v49, 0.0  ;;  %v2114_v49 = vmul.f32 %v2395_v39, %v2108_v44  ;;  %v2396_v50 = vld [vmem:[%s3254_s22] ss:$0 sm:$0xff] }
 0x4d3   : > { %v2020_v10 = vpop.f32.mrf.mxu0 }
 0x4d4   : > { %v2024_v58 = vmin.f32 %v2023_v55, 6.0 }
 0x4d5   : > { %v2549_v59 = vpop.f32.mrf.mxu0 }
 0x4d6   : > { %2025 = vst [vmem:[#allocation2 + $0x5] sm:$0x3] %v2024_v58  ;;  %2026 = vst [vmem:[#allocation2 + $0x7] sm:$0xc] %v2024_v58 }
 0x4dd   : > { %v2030_v17 = vld [vmem:[#allocation2 + $0x4] sm:$0x3]  ;;  %v2048_v18 = vld [vmem:[#allocation2 + $0x6] sm:$0x3]  ;;  %v2058_v15 = vld [vmem:[#allocation2 + $0x8] sm:$0x3] }
 0x4de   : > { %v2038_v4 = vld [vmem:[#allocation2 + $0x5] sm:$0x3]  ;;  %v2036_v7 = vmul.f32 %v2034_v51, %v2030_v17  ;;  %v2054_v5 = vmul.f32 %v2052_v0, %v2048_v18  ;;  %v2068_v24 = vld [vmem:[#allocation2 + $0x9] sm:$0x3]  ;;  %v2064_v13 = vmul.f32 %v2062_v3, %v2058_v15 }
 0x4df   : > { %v2044_v8 = vmul.f32 %v2042_v53, %v2038_v4  ;;  %v2057_v9 = vld [vmem:[#allocation2 + $0x4] sm:$0x3]  ;;  %v2077_v21 = vld [vmem:[#allocation2 + $0x6] sm:$0x3]  ;;  %v2087_v27 = vld [vmem:[#allocation2 + $0x8] sm:$0x3]  ;;  %v2074_v35 = vmul.f32 %v2072_v6, %v2068_v24 }
 0x4e0   : > { %v2067_v11 = vld [vmem:[#allocation2 + $0x5] sm:$0x3]  ;;  %v2063_v19 = vmul.f32 %v2062_v3, %v2057_v9  ;;  %v2078_v28 = vld [vmem:[#allocation2 + $0xa] sm:$0x3]  ;;  %v2083_v29 = vmul.f32 %v2082_v33, %v2077_v21  ;;  %v2093_v37 = vmul.f32 %v2092_v25, %v2087_v27 }
 0x4e1   : > { %v2046_v20 = vadd.f32 %v2044_v8, %v2036_v7  ;;  %v2073_v45 = vmul.f32 %v2072_v6, %v2067_v11  ;;  %v2097_v62 = vld [vmem:[#allocation2 + $0x9] sm:$0x3]  ;;  %v2084_v40 = vmul.f32 %v2082_v33, %v2078_v28 }
 0x4e2   : > { %v2065_v22 = vadd.f32 %v2063_v19, %v2055_v12  ;;  %v2107_v32 = vld [vmem:[#allocation2 + $0xa] sm:$0x3]  ;;  %v2103_v43 = vmul.f32 %v2102_v31, %v2097_v62 }
 0x4e3   : > { %v2056_v26 = vadd.f32 %v2054_v5, %v2046_v20  ;;  %v2113_v48 = vmul.f32 %v2395_v39, %v2107_v32 }
 0x4e4   : > { %v2075_v52 = vadd.f32 %v2073_v45, %v2065_v22 }
 0x4e5   : > { %v2066_v34 = vadd.f32 %v2064_v13, %v2056_v26 }
 0x4e6   : > { %v2085_v36 = vadd.f32 %v2083_v29, %v2075_v52 }
 0x4e7   : > { %v2076_v16 = vadd.f32 %v2074_v35, %v2066_v34 }
 0x4e8   : > { %v2095_v42 = vadd.f32 %v2093_v37, %v2085_v36 }
 0x4e9   : > { %v2086_v46 = vadd.f32 %v2084_v40, %v2076_v16 }
 0x4ea   : > { %v2105_v23 = vadd.f32 %v2103_v43, %v2095_v42 }
 0x4eb   : > { %v2096_v14 = vadd.f32 %v2094_v41, %v2086_v46 }
 0x4ec   : > { %v2115_v51 = vadd.f32 %v2113_v48, %v2105_v23 }
 0x4ed   : > { %v2106_v53 = vadd.f32 %v2104_v47, %v2096_v14 }
 0x4ee   : > { %v2124_v55 = vadd.f32 %v2396_v50, %v2115_v51 }
 0x4ef   : > { %v2116_v56 = vadd.f32 %v2114_v49, %v2106_v53 }
 0x4f0   : > { %v2126_v10 = vmax.f32 %v2124_v55, 0.0 }
 0x4f1   : > { %v2125_v57 = vadd.f32 %v2396_v50, %v2116_v56 }
 0x4f2   : > { %v2128_v59 = vmin.f32 %v2126_v10, 6.0 }
 0x4f3   : > { %v2127_v58 = vmax.f32 %v2125_v57, 0.0 }
 0x4f5   : > { %v2129_v60 = vmin.f32 %v2127_v58, 6.0 }
 0x4f7   : > { %v2132_v61 = vcombine.low %v2128_v59, %v2129_v60 }
 0x4f9   : > { %v2139_v0 = vrot.slane %v2132_v61, %v2938_v63 }
 0x4fb   : > { %v2141_v54 = vpack.c.bf16 %v2139_v0, %v2139_v0 }
 0x4fd   : > { %2567 = vmatmul.mubr.bf16.vlgmr.msra.gmra.mxu1 %v2141_v54 }
 0x5bd   : > { %v2247_v2 = vpop.f32.mrf.mxu1 }
 0x5be   : > { %v2248_v3 = vadd.f32 %v2397_v1, %v2247_v2 }
 0x5bf   : > { %v2568_v17 = vpop.f32.mrf.mxu1 }
 0x5c0   : > { %v2253_v4 = vmax.f32 %v2248_v3, 0.0 }
 0x5c1   : > { %v2250_v18 = vpop.f32.mrf.mxu1 }
 0x5c2   : > { %v2254_v12 = vmin.f32 %v2253_v4, 6.0 }
 0x5c3   : > { %v2569_v63 = vpop.f32.mrf.mxu1 }
 0x5c4   : > { %v2255_v6 = vpack.c.bf16 %v2254_v12, %v2254_v12 }
 0x5c6   : > { %2256 = vst [vmem:[%s850_s28] sm:$0x3] %v2255_v6 }
 0x5c7 PF: > { %p32_p9 = scmp.ge.s32.totalorder %s2818_s7, 4   ;;  %s3287_s29 = smov %s2662_s2 }
 0x5c8   : > { %s3288_s2 = smov %s2827_s1  ;;  %s3289_s6 = smov %s2818_s7 }
 0x5c9   :  { %34 = sbr.rel (!%p32_p9) target bundleno = 13 (0xd), region = 203 }

</bundles_post_ra>
